<compile_context>
chip_gen: v7x
topology: tpu7x:2x2x1
jax: 0.10.0
libtpu: 0.0.40
codegen_flags: <defaults>
</compile_context>

<pallas_src>
import numpy as np
import jax
import jax.numpy as jnp
from jax.experimental import pallas as pl
from jax.experimental.pallas import tpu as pltpu


def _build_hw_masks(D, H, W):
    """9 border-validity masks indexed by t = kh*3 + kw.

    The D-direction border is handled for free by the zero halo of the padded
    activation row (halo width >= H*W), so masks only encode the H/W borders.
    """
    M = D * H * W
    _, hg, wg = np.meshgrid(np.arange(D), np.arange(H), np.arange(W), indexing="ij")
    masks = []
    for kh in range(3):
        for kw in range(3):
            dh, dw = kh - 1, kw - 1
            valid = ((hg + dh >= 0) & (hg + dh < H) &
                     (wg + dw >= 0) & (wg + dw < W))
            masks.append(valid.reshape(M))
    return np.stack(masks, axis=0).astype(np.float32)          # (9, M)


def _make_rcu_kernel(n_blocks, n_stages, C, D, H, W, pad):
    HW = H * W
    M = D * HW
    CENTER = 4  # t = (kh=1)*3 + (kw=1): all-ones mask, multiply skipped

    def kernel(w_ref, mask_ref, x_ref, o_ref, apad_ref, lhs0_ref, lhs1_ref):
        # w_ref:    (S, 3, C, 9*C) bf16  per-stage, per-kd-plane weight chunks (resident)
        # mask_ref: (9, C, M)      f32   H/W border masks, pre-broadcast over sublanes
        # x_ref:    (1, C, M)      f32   one batch element; channels on sublanes,
        #                                flattened D*H*W spatial on lanes
        # o_ref:    (1, C, M)
        # apad_ref: (C, pad+M+pad) f32   lane-padded activation row (zero halo)
        # lhs0/1:   (9*C, M)       bf16  double-buffered per-kd im2col chunks
        lhs_bufs = (lhs0_ref, lhs1_ref)

        # The halo strips are never written by the stage loop and the scratch
        # persists across grid steps: zero them once, on the first step only.
        @pl.when(pl.program_id(0) == 0)
        def _():
            apad_ref[:, :pad] = jnp.zeros((C, pad), jnp.float32)
            apad_ref[:, pad + M:] = jnp.zeros((C, pad), jnp.float32)

        h = x_ref[0]                                   # (C, M) f32, on-chip all stages
        chunk = 0
        for b in range(n_blocks):
            residual = h
            for s in range(n_stages):
                si = b * n_stages + s
                # ReLU in f32; lane-aligned store into the middle of the padded row.
                apad_ref[:, pad:pad + M] = jnp.maximum(h, 0.0)
                acc = None
                # One K=9C MXU contraction per kd plane, accumulating into h.
                # Chunks alternate im2col buffers so chunk k's matmul can overlap
                # chunk k+1's window loads / masked stores.
                for kd in range(3):
                    lhs = lhs_bufs[chunk & 1]
                    chunk += 1
                    for kh in range(3):
                        for kw in range(3):
                            t = kh * 3 + kw
                            off = (kd - 1) * HW + (kh - 1) * W + (kw - 1)
                            win = apad_ref[:, pad + off:pad + off + M]   # (C, M) f32
                            if t != CENTER:              # D border handled by halo
                                win = win * mask_ref[t]
                            # Cast at the store: bf16 staging halves vst traffic
                            # and VMEM without changing the (bf16-input) MXU math.
                            lhs[t * C:(t + 1) * C, :] = win.astype(jnp.bfloat16)
                    part = jnp.dot(w_ref[si, kd], lhs[...],
                                   preferred_element_type=jnp.float32)   # (C, M) f32
                    acc = part if acc is None else acc + part
                h = acc
            h = h + residual
        o_ref[0] = h.astype(o_ref.dtype)

    return kernel


def rcu_block(x, params):
    """x: (N, C, D, H, W) f32 (NCDHW, PyTorch layout).

    params: n_blocks x n_stages nested list of (C, C, 3, 3, 3) conv weights (OIDHW).
    """
    N, C, D, H, W = x.shape
    HW = H * W
    M = D * HW
    n_blocks = len(params)
    n_stages = len(params[0])
    S = n_blocks * n_stages

    # Halo width: >= max |tap offset| (= H*W + W + 1), rounded up to a lane multiple
    # so every interior store into the padded row is lane-aligned / unmasked.
    pad = ((HW + W + 1 + 127) // 128) * 128

    # (Cout, Cin, kd, kh, kw) -> (kd, Cout, 9*Cin): one dense (C, 9C) MXU operand per
    # kd plane, columns ordered (kh, kw, cin) to match the im2col rows.  bf16 halves
    # the resident footprint; the MXU consumes bf16 natively.
    w_all = jnp.stack(
        [jnp.transpose(w, (2, 0, 3, 4, 1)).reshape(3, C, 9 * C)
         for blk in params for w in blk],
        axis=0).astype(jnp.bfloat16)                    # (S, 3, C, 9*C)

    # 9 H/W border masks, pre-broadcast over the C sublanes so each tap does a plain
    # (C, M) load (no broadcast_in_dim per tap per stage).
    masks = jnp.asarray(
        np.broadcast_to(_build_hw_masks(D, H, W)[:, None, :], (9, C, M)).copy())

    x_flat = x.reshape(N, C, M)                         # spatial flattened onto lanes

    kernel = _make_rcu_kernel(n_blocks, n_stages, C, D, H, W, pad)
    out = pl.pallas_call(
        kernel,
        out_shape=jax.ShapeDtypeStruct((N, C, M), x.dtype),
        grid_spec=pltpu.PrefetchScalarGridSpec(
            num_scalar_prefetch=0,
            grid=(N,),
            in_specs=[
                pl.BlockSpec((S, 3, C, 9 * C), lambda n: (0, 0, 0, 0)),  # weights
                pl.BlockSpec((9, C, M), lambda n: (0, 0, 0)),            # halo masks
                pl.BlockSpec((1, C, M), lambda n: (n, 0, 0)),            # activations
            ],
            out_specs=pl.BlockSpec((1, C, M), lambda n: (n, 0, 0)),
            scratch_shapes=[
                pltpu.VMEM((C, M + 2 * pad), jnp.float32),     # padded activations
                pltpu.VMEM((9 * C, M), jnp.bfloat16),          # im2col chunk buf 0
                pltpu.VMEM((9 * C, M), jnp.bfloat16),          # im2col chunk buf 1
            ],
        ),
        compiler_params=pltpu.CompilerParams(dimension_semantics=("parallel",)),
    )(w_all, masks, x_flat)
    return out.reshape(N, C, D, H, W)


def rcu_block_ref(x, params):
    """Pure-JAX reference (NCDHW conv) for correctness checking."""
    dn = jax.lax.conv_dimension_numbers(
        x.shape, params[0][0].shape, ("NCDHW", "OIDHW", "NCDHW"))
    for blk in params:
        residual = x
        for w in blk:
            x = jnp.maximum(x, 0.0)
            x = jax.lax.conv_general_dilated(
                x, w, window_strides=(1, 1, 1), padding="SAME",
                dimension_numbers=dn)
        x = x + residual
    return x


def init_rcu_params(key, features, n_blocks, n_stages):
    """Deterministic synthetic weights (PyTorch-like uniform fan-in scaling)."""
    # TODO(synk): DDPM convs carry a zero-initialized bias; numerically a no-op here.
    fan_in = features * 27
    bound = 1.0 / (fan_in ** 0.5)
    params = []
    for _ in range(n_blocks):
        ws = []
        for _ in range(n_stages):
            key, sub = jax.random.split(key)
            ws.append(jax.random.uniform(
                sub, (features, features, 3, 3, 3), jnp.float32, -bound, bound))
        params.append(ws)
    return params


if __name__ == "__main__":
    # Small shapes: batch=2, channels=8, 8^3 volume, 2 residual blocks x 2 stages.
    N, C, D, H, W = 2, 8, 8, 8, 8
    n_blocks, n_stages = 2, 2

    key = jax.random.PRNGKey(0)
    kx, kp = jax.random.split(key)
    x = jax.random.normal(kx, (N, C, D, H, W), jnp.float32)
    params = init_rcu_params(kp, C, n_blocks, n_stages)

    out = jax.block_until_ready(jax.jit(rcu_block)(x, params))
    ref = jax.block_until_ready(rcu_block_ref(x, params))

    assert out.shape == (N, C, D, H, W)
    max_err = float(jnp.max(jnp.abs(out - ref)))
    # Tolerance covers bf16-input / f32-accumulate MXU math across 4 stacked convs.
    assert jnp.allclose(out, ref, rtol=2e-2, atol=2e-2), max_err
    print("KERNEL_OK")
</pallas_src>

<mosaic_0001>
module attributes {stable_mosaic.version = 11 : i64} {
  func.func @kernel(%arg0: i32, %arg1: memref<4x3x8x72xbf16, #tpu.memory_space<vmem>>, %arg2: memref<9x8x512xf32, #tpu.memory_space<vmem>>, %arg3: memref<1x8x512xf32, #tpu.memory_space<vmem>>, %arg4: memref<1x8x512xf32, #tpu.memory_space<vmem>>, %arg5: memref<8x768xf32, #tpu.memory_space<vmem>>, %arg6: memref<72x512xbf16, #tpu.memory_space<vmem>>, %arg7: memref<72x512xbf16, #tpu.memory_space<vmem>>) attributes {dimension_semantics = [#tpu.dimension_semantics<parallel>], iteration_bounds = array<i64: 2>, scalar_prefetch = 0 : i64, scratch_operands = 3 : i64, tpu.core_type = #tpu.core_type<tc>, window_params = [{pipeline_mode = #tpu.pipeline_mode<synchronous>, transform_indices = @transform_0, window_bounds = array<i64: 4, 3, 8, 72>}, {pipeline_mode = #tpu.pipeline_mode<synchronous>, transform_indices = @transform_1, window_bounds = array<i64: 9, 8, 512>}, {transform_indices = @transform_2, window_bounds = array<i64: 1, 8, 512>}, {transform_indices = @transform_3, window_bounds = array<i64: 1, 8, 512>}]} {
    %c0_i32 = arith.constant 0 : i32
    %0 = arith.cmpi eq, %arg0, %c0_i32 : i32
    %1 = arith.extui %0 : i1 to i32
    %c0_i32_0 = arith.constant 0 : i32
    %2 = arith.cmpi ne, %1, %c0_i32_0 : i32
    scf.if %2 {
      %cst_782 = arith.constant 0.000000e+00 : f32
      %690 = vector.broadcast %cst_782 : f32 to vector<8x128xf32>
      %c0_783 = arith.constant 0 : index
      %c0_784 = arith.constant 0 : index
      %691 = vector.load %arg5[%c0_783, %c0_784] : memref<8x768xf32, #tpu.memory_space<vmem>>, vector<8x128xf32>
      tpu.vector_store %arg5[%c0_783, %c0_784], %690 {strides = array<i32>} : memref<8x768xf32, #tpu.memory_space<vmem>>, vector<8x128xf32>,
      %cst_785 = arith.constant 0.000000e+00 : f32
      %692 = vector.broadcast %cst_785 : f32 to vector<8x128xf32>
      %c0_786 = arith.constant 0 : index
      %c640 = arith.constant 640 : index
      %693 = vector.load %arg5[%c0_786, %c640] : memref<8x768xf32, #tpu.memory_space<vmem>>, vector<8x128xf32>
      tpu.vector_store %arg5[%c0_786, %c640], %692 {strides = array<i32>} : memref<8x768xf32, #tpu.memory_space<vmem>>, vector<8x128xf32>,
    } else {
    }
    %c0 = arith.constant 0 : index
    %c0_1 = arith.constant 0 : index
    %c0_2 = arith.constant 0 : index
    %3 = vector.load %arg3[%c0, %c0_1, %c0_2] : memref<1x8x512xf32, #tpu.memory_space<vmem>>, vector<1x8x512xf32>
    %4 = vector.shape_cast %3 : vector<1x8x512xf32> to vector<8x512xf32>
    %cst = arith.constant 0.000000e+00 : f32
    %5 = vector.broadcast %cst : f32 to vector<8x512xf32>
    %6 = arith.maximumf %4, %5 : vector<8x512xf32>
    %c0_3 = arith.constant 0 : index
    %c128 = arith.constant 128 : index
    %7 = vector.load %arg5[%c0_3, %c128] : memref<8x768xf32, #tpu.memory_space<vmem>>, vector<8x512xf32>
    tpu.vector_store %arg5[%c0_3, %c128], %6 {strides = array<i32>} : memref<8x768xf32, #tpu.memory_space<vmem>>, vector<8x512xf32>,
    %c0_4 = arith.constant 0 : index
    %c55 = arith.constant 55 : index
    %8 = vector.load %arg5[%c0_4, %c55] : memref<8x768xf32, #tpu.memory_space<vmem>>, vector<8x512xf32>
    %c0_5 = arith.constant 0 : index
    %c0_6 = arith.constant 0 : index
    %c0_7 = arith.constant 0 : index
    %9 = vector.load %arg2[%c0_5, %c0_6, %c0_7] : memref<9x8x512xf32, #tpu.memory_space<vmem>>, vector<1x8x512xf32>
    %10 = vector.shape_cast %9 : vector<1x8x512xf32> to vector<8x512xf32>
    %11 = arith.mulf %8, %10 : vector<8x512xf32>
    %12 = arith.truncf %11 : vector<8x512xf32> to vector<8x512xbf16>
    %c0_8 = arith.constant 0 : index
    %c0_9 = arith.constant 0 : index
    %13 = vector.load %arg6[%c0_8, %c0_9] : memref<72x512xbf16, #tpu.memory_space<vmem>>, vector<8x512xbf16>
    tpu.vector_store %arg6[%c0_8, %c0_9], %12 {strides = array<i32>} : memref<72x512xbf16, #tpu.memory_space<vmem>>, vector<8x512xbf16>,
    %c0_10 = arith.constant 0 : index
    %c56 = arith.constant 56 : index
    %14 = vector.load %arg5[%c0_10, %c56] : memref<8x768xf32, #tpu.memory_space<vmem>>, vector<8x512xf32>
    %c1 = arith.constant 1 : index
    %c0_11 = arith.constant 0 : index
    %c0_12 = arith.constant 0 : index
    %15 = vector.load %arg2[%c1, %c0_11, %c0_12] : memref<9x8x512xf32, #tpu.memory_space<vmem>>, vector<1x8x512xf32>
    %16 = vector.shape_cast %15 : vector<1x8x512xf32> to vector<8x512xf32>
    %17 = arith.mulf %14, %16 : vector<8x512xf32>
    %18 = arith.truncf %17 : vector<8x512xf32> to vector<8x512xbf16>
    %c8 = arith.constant 8 : index
    %c0_13 = arith.constant 0 : index
    %19 = vector.load %arg6[%c8, %c0_13] : memref<72x512xbf16, #tpu.memory_space<vmem>>, vector<8x512xbf16>
    tpu.vector_store %arg6[%c8, %c0_13], %18 {strides = array<i32>} : memref<72x512xbf16, #tpu.memory_space<vmem>>, vector<8x512xbf16>,
    %c0_14 = arith.constant 0 : index
    %c57 = arith.constant 57 : index
    %20 = vector.load %arg5[%c0_14, %c57] : memref<8x768xf32, #tpu.memory_space<vmem>>, vector<8x512xf32>
    %c2 = arith.constant 2 : index
    %c0_15 = arith.constant 0 : index
    %c0_16 = arith.constant 0 : index
    %21 = vector.load %arg2[%c2, %c0_15, %c0_16] : memref<9x8x512xf32, #tpu.memory_space<vmem>>, vector<1x8x512xf32>
    %22 = vector.shape_cast %21 : vector<1x8x512xf32> to vector<8x512xf32>
    %23 = arith.mulf %20, %22 : vector<8x512xf32>
    %24 = arith.truncf %23 : vector<8x512xf32> to vector<8x512xbf16>
    %c16 = arith.constant 16 : index
    %c0_17 = arith.constant 0 : index
    %25 = vector.load %arg6[%c16, %c0_17] : memref<72x512xbf16, #tpu.memory_space<vmem>>, vector<8x512xbf16>
    tpu.vector_store %arg6[%c16, %c0_17], %24 {strides = array<i32>} : memref<72x512xbf16, #tpu.memory_space<vmem>>, vector<8x512xbf16>,
    %c0_18 = arith.constant 0 : index
    %c63 = arith.constant 63 : index
    %26 = vector.load %arg5[%c0_18, %c63] : memref<8x768xf32, #tpu.memory_space<vmem>>, vector<8x512xf32>
    %c3 = arith.constant 3 : index
    %c0_19 = arith.constant 0 : index
    %c0_20 = arith.constant 0 : index
    %27 = vector.load %arg2[%c3, %c0_19, %c0_20] : memref<9x8x512xf32, #tpu.memory_space<vmem>>, vector<1x8x512xf32>
    %28 = vector.shape_cast %27 : vector<1x8x512xf32> to vector<8x512xf32>
    %29 = arith.mulf %26, %28 : vector<8x512xf32>
    %30 = arith.truncf %29 : vector<8x512xf32> to vector<8x512xbf16>
    %c24 = arith.constant 24 : index
    %c0_21 = arith.constant 0 : index
    %31 = vector.load %arg6[%c24, %c0_21] : memref<72x512xbf16, #tpu.memory_space<vmem>>, vector<8x512xbf16>
    tpu.vector_store %arg6[%c24, %c0_21], %30 {strides = array<i32>} : memref<72x512xbf16, #tpu.memory_space<vmem>>, vector<8x512xbf16>,
    %c0_22 = arith.constant 0 : index
    %c64 = arith.constant 64 : index
    %32 = vector.load %arg5[%c0_22, %c64] : memref<8x768xf32, #tpu.memory_space<vmem>>, vector<8x512xf32>
    %33 = arith.truncf %32 : vector<8x512xf32> to vector<8x512xbf16>
    %c32 = arith.constant 32 : index
    %c0_23 = arith.constant 0 : index
    %34 = vector.load %arg6[%c32, %c0_23] : memref<72x512xbf16, #tpu.memory_space<vmem>>, vector<8x512xbf16>
    tpu.vector_store %arg6[%c32, %c0_23], %33 {strides = array<i32>} : memref<72x512xbf16, #tpu.memory_space<vmem>>, vector<8x512xbf16>,
    %c0_24 = arith.constant 0 : index
    %c65 = arith.constant 65 : index
    %35 = vector.load %arg5[%c0_24, %c65] : memref<8x768xf32, #tpu.memory_space<vmem>>, vector<8x512xf32>
    %c5 = arith.constant 5 : index
    %c0_25 = arith.constant 0 : index
    %c0_26 = arith.constant 0 : index
    %36 = vector.load %arg2[%c5, %c0_25, %c0_26] : memref<9x8x512xf32, #tpu.memory_space<vmem>>, vector<1x8x512xf32>
    %37 = vector.shape_cast %36 : vector<1x8x512xf32> to vector<8x512xf32>
    %38 = arith.mulf %35, %37 : vector<8x512xf32>
    %39 = arith.truncf %38 : vector<8x512xf32> to vector<8x512xbf16>
    %c40 = arith.constant 40 : index
    %c0_27 = arith.constant 0 : index
    %40 = vector.load %arg6[%c40, %c0_27] : memref<72x512xbf16, #tpu.memory_space<vmem>>, vector<8x512xbf16>
    tpu.vector_store %arg6[%c40, %c0_27], %39 {strides = array<i32>} : memref<72x512xbf16, #tpu.memory_space<vmem>>, vector<8x512xbf16>,
    %c0_28 = arith.constant 0 : index
    %c71 = arith.constant 71 : index
    %41 = vector.load %arg5[%c0_28, %c71] : memref<8x768xf32, #tpu.memory_space<vmem>>, vector<8x512xf32>
    %c6 = arith.constant 6 : index
    %c0_29 = arith.constant 0 : index
    %c0_30 = arith.constant 0 : index
    %42 = vector.load %arg2[%c6, %c0_29, %c0_30] : memref<9x8x512xf32, #tpu.memory_space<vmem>>, vector<1x8x512xf32>
    %43 = vector.shape_cast %42 : vector<1x8x512xf32> to vector<8x512xf32>
    %44 = arith.mulf %41, %43 : vector<8x512xf32>
    %45 = arith.truncf %44 : vector<8x512xf32> to vector<8x512xbf16>
    %c48 = arith.constant 48 : index
    %c0_31 = arith.constant 0 : index
    %46 = vector.load %arg6[%c48, %c0_31] : memref<72x512xbf16, #tpu.memory_space<vmem>>, vector<8x512xbf16>
    tpu.vector_store %arg6[%c48, %c0_31], %45 {strides = array<i32>} : memref<72x512xbf16, #tpu.memory_space<vmem>>, vector<8x512xbf16>,
    %c0_32 = arith.constant 0 : index
    %c72 = arith.constant 72 : index
    %47 = vector.load %arg5[%c0_32, %c72] : memref<8x768xf32, #tpu.memory_space<vmem>>, vector<8x512xf32>
    %c7 = arith.constant 7 : index
    %c0_33 = arith.constant 0 : index
    %c0_34 = arith.constant 0 : index
    %48 = vector.load %arg2[%c7, %c0_33, %c0_34] : memref<9x8x512xf32, #tpu.memory_space<vmem>>, vector<1x8x512xf32>
    %49 = vector.shape_cast %48 : vector<1x8x512xf32> to vector<8x512xf32>
    %50 = arith.mulf %47, %49 : vector<8x512xf32>
    %51 = arith.truncf %50 : vector<8x512xf32> to vector<8x512xbf16>
    %c56_35 = arith.constant 56 : index
    %c0_36 = arith.constant 0 : index
    %52 = vector.load %arg6[%c56_35, %c0_36] : memref<72x512xbf16, #tpu.memory_space<vmem>>, vector<8x512xbf16>
    tpu.vector_store %arg6[%c56_35, %c0_36], %51 {strides = array<i32>} : memref<72x512xbf16, #tpu.memory_space<vmem>>, vector<8x512xbf16>,
    %c0_37 = arith.constant 0 : index
    %c73 = arith.constant 73 : index
    %53 = vector.load %arg5[%c0_37, %c73] : memref<8x768xf32, #tpu.memory_space<vmem>>, vector<8x512xf32>
    %c8_38 = arith.constant 8 : index
    %c0_39 = arith.constant 0 : index
    %c0_40 = arith.constant 0 : index
    %54 = vector.load %arg2[%c8_38, %c0_39, %c0_40] : memref<9x8x512xf32, #tpu.memory_space<vmem>>, vector<1x8x512xf32>
    %55 = vector.shape_cast %54 : vector<1x8x512xf32> to vector<8x512xf32>
    %56 = arith.mulf %53, %55 : vector<8x512xf32>
    %57 = arith.truncf %56 : vector<8x512xf32> to vector<8x512xbf16>
    %c64_41 = arith.constant 64 : index
    %c0_42 = arith.constant 0 : index
    %58 = vector.load %arg6[%c64_41, %c0_42] : memref<72x512xbf16, #tpu.memory_space<vmem>>, vector<8x512xbf16>
    tpu.vector_store %arg6[%c64_41, %c0_42], %57 {strides = array<i32>} : memref<72x512xbf16, #tpu.memory_space<vmem>>, vector<8x512xbf16>,
    %c0_43 = arith.constant 0 : index
    %c0_44 = arith.constant 0 : index
    %c0_45 = arith.constant 0 : index
    %c0_46 = arith.constant 0 : index
    %59 = vector.load %arg1[%c0_43, %c0_44, %c0_45, %c0_46] : memref<4x3x8x72xbf16, #tpu.memory_space<vmem>>, vector<1x1x8x72xbf16>
    %60 = vector.shape_cast %59 : vector<1x1x8x72xbf16> to vector<8x72xbf16>
    %c0_47 = arith.constant 0 : index
    %c0_48 = arith.constant 0 : index
    %61 = vector.load %arg6[%c0_47, %c0_48] : memref<72x512xbf16, #tpu.memory_space<vmem>>, vector<72x512xbf16>
    %cst_49 = arith.constant dense<0.000000e+00> : vector<8x512xf32>
    %62 = tpu.matmul %60, %61, %cst_49 {dimension_numbers = #tpu.dot_dimension_numbers<[1], [0], [0], [1], [0, 0, 1, 1], [], []>} : vector<8x72xbf16>, vector<72x512xbf16>, vector<8x512xf32> -> vector<8x512xf32>
    %c0_50 = arith.constant 0 : index
    %c119 = arith.constant 119 : index
    %63 = vector.load %arg5[%c0_50, %c119] : memref<8x768xf32, #tpu.memory_space<vmem>>, vector<8x512xf32>
    %c0_51 = arith.constant 0 : index
    %c0_52 = arith.constant 0 : index
    %c0_53 = arith.constant 0 : index
    %64 = vector.load %arg2[%c0_51, %c0_52, %c0_53] : memref<9x8x512xf32, #tpu.memory_space<vmem>>, vector<1x8x512xf32>
    %65 = vector.shape_cast %64 : vector<1x8x512xf32> to vector<8x512xf32>
    %66 = arith.mulf %63, %65 : vector<8x512xf32>
    %67 = arith.truncf %66 : vector<8x512xf32> to vector<8x512xbf16>
    %c0_54 = arith.constant 0 : index
    %c0_55 = arith.constant 0 : index
    %68 = vector.load %arg7[%c0_54, %c0_55] : memref<72x512xbf16, #tpu.memory_space<vmem>>, vector<8x512xbf16>
    tpu.vector_store %arg7[%c0_54, %c0_55], %67 {strides = array<i32>} : memref<72x512xbf16, #tpu.memory_space<vmem>>, vector<8x512xbf16>,
    %c0_56 = arith.constant 0 : index
    %c120 = arith.constant 120 : index
    %69 = vector.load %arg5[%c0_56, %c120] : memref<8x768xf32, #tpu.memory_space<vmem>>, vector<8x512xf32>
    %c1_57 = arith.constant 1 : index
    %c0_58 = arith.constant 0 : index
    %c0_59 = arith.constant 0 : index
    %70 = vector.load %arg2[%c1_57, %c0_58, %c0_59] : memref<9x8x512xf32, #tpu.memory_space<vmem>>, vector<1x8x512xf32>
    %71 = vector.shape_cast %70 : vector<1x8x512xf32> to vector<8x512xf32>
    %72 = arith.mulf %69, %71 : vector<8x512xf32>
    %73 = arith.truncf %72 : vector<8x512xf32> to vector<8x512xbf16>
    %c8_60 = arith.constant 8 : index
    %c0_61 = arith.constant 0 : index
    %74 = vector.load %arg7[%c8_60, %c0_61] : memref<72x512xbf16, #tpu.memory_space<vmem>>, vector<8x512xbf16>
    tpu.vector_store %arg7[%c8_60, %c0_61], %73 {strides = array<i32>} : memref<72x512xbf16, #tpu.memory_space<vmem>>, vector<8x512xbf16>,
    %c0_62 = arith.constant 0 : index
    %c121 = arith.constant 121 : index
    %75 = vector.load %arg5[%c0_62, %c121] : memref<8x768xf32, #tpu.memory_space<vmem>>, vector<8x512xf32>
    %c2_63 = arith.constant 2 : index
    %c0_64 = arith.constant 0 : index
    %c0_65 = arith.constant 0 : index
    %76 = vector.load %arg2[%c2_63, %c0_64, %c0_65] : memref<9x8x512xf32, #tpu.memory_space<vmem>>, vector<1x8x512xf32>
    %77 = vector.shape_cast %76 : vector<1x8x512xf32> to vector<8x512xf32>
    %78 = arith.mulf %75, %77 : vector<8x512xf32>
    %79 = arith.truncf %78 : vector<8x512xf32> to vector<8x512xbf16>
    %c16_66 = arith.constant 16 : index
    %c0_67 = arith.constant 0 : index
    %80 = vector.load %arg7[%c16_66, %c0_67] : memref<72x512xbf16, #tpu.memory_space<vmem>>, vector<8x512xbf16>
    tpu.vector_store %arg7[%c16_66, %c0_67], %79 {strides = array<i32>} : memref<72x512xbf16, #tpu.memory_space<vmem>>, vector<8x512xbf16>,
    %c0_68 = arith.constant 0 : index
    %c127 = arith.constant 127 : index
    %81 = vector.load %arg5[%c0_68, %c127] : memref<8x768xf32, #tpu.memory_space<vmem>>, vector<8x512xf32>
    %c3_69 = arith.constant 3 : index
    %c0_70 = arith.constant 0 : index
    %c0_71 = arith.constant 0 : index
    %82 = vector.load %arg2[%c3_69, %c0_70, %c0_71] : memref<9x8x512xf32, #tpu.memory_space<vmem>>, vector<1x8x512xf32>
    %83 = vector.shape_cast %82 : vector<1x8x512xf32> to vector<8x512xf32>
    %84 = arith.mulf %81, %83 : vector<8x512xf32>
    %85 = arith.truncf %84 : vector<8x512xf32> to vector<8x512xbf16>
    %c24_72 = arith.constant 24 : index
    %c0_73 = arith.constant 0 : index
    %86 = vector.load %arg7[%c24_72, %c0_73] : memref<72x512xbf16, #tpu.memory_space<vmem>>, vector<8x512xbf16>
    tpu.vector_store %arg7[%c24_72, %c0_73], %85 {strides = array<i32>} : memref<72x512xbf16, #tpu.memory_space<vmem>>, vector<8x512xbf16>,
    %c0_74 = arith.constant 0 : index
    %c128_75 = arith.constant 128 : index
    %87 = vector.load %arg5[%c0_74, %c128_75] : memref<8x768xf32, #tpu.memory_space<vmem>>, vector<8x512xf32>
    %88 = arith.truncf %87 : vector<8x512xf32> to vector<8x512xbf16>
    %c32_76 = arith.constant 32 : index
    %c0_77 = arith.constant 0 : index
    %89 = vector.load %arg7[%c32_76, %c0_77] : memref<72x512xbf16, #tpu.memory_space<vmem>>, vector<8x512xbf16>
    tpu.vector_store %arg7[%c32_76, %c0_77], %88 {strides = array<i32>} : memref<72x512xbf16, #tpu.memory_space<vmem>>, vector<8x512xbf16>,
    %c0_78 = arith.constant 0 : index
    %c129 = arith.constant 129 : index
    %90 = vector.load %arg5[%c0_78, %c129] : memref<8x768xf32, #tpu.memory_space<vmem>>, vector<8x512xf32>
    %c5_79 = arith.constant 5 : index
    %c0_80 = arith.constant 0 : index
    %c0_81 = arith.constant 0 : index
    %91 = vector.load %arg2[%c5_79, %c0_80, %c0_81] : memref<9x8x512xf32, #tpu.memory_space<vmem>>, vector<1x8x512xf32>
    %92 = vector.shape_cast %91 : vector<1x8x512xf32> to vector<8x512xf32>
    %93 = arith.mulf %90, %92 : vector<8x512xf32>
    %94 = arith.truncf %93 : vector<8x512xf32> to vector<8x512xbf16>
    %c40_82 = arith.constant 40 : index
    %c0_83 = arith.constant 0 : index
    %95 = vector.load %arg7[%c40_82, %c0_83] : memref<72x512xbf16, #tpu.memory_space<vmem>>, vector<8x512xbf16>
    tpu.vector_store %arg7[%c40_82, %c0_83], %94 {strides = array<i32>} : memref<72x512xbf16, #tpu.memory_space<vmem>>, vector<8x512xbf16>,
    %c0_84 = arith.constant 0 : index
    %c135 = arith.constant 135 : index
    %96 = vector.load %arg5[%c0_84, %c135] : memref<8x768xf32, #tpu.memory_space<vmem>>, vector<8x512xf32>
    %c6_85 = arith.constant 6 : index
    %c0_86 = arith.constant 0 : index
    %c0_87 = arith.constant 0 : index
    %97 = vector.load %arg2[%c6_85, %c0_86, %c0_87] : memref<9x8x512xf32, #tpu.memory_space<vmem>>, vector<1x8x512xf32>
    %98 = vector.shape_cast %97 : vector<1x8x512xf32> to vector<8x512xf32>
    %99 = arith.mulf %96, %98 : vector<8x512xf32>
    %100 = arith.truncf %99 : vector<8x512xf32> to vector<8x512xbf16>
    %c48_88 = arith.constant 48 : index
    %c0_89 = arith.constant 0 : index
    %101 = vector.load %arg7[%c48_88, %c0_89] : memref<72x512xbf16, #tpu.memory_space<vmem>>, vector<8x512xbf16>
    tpu.vector_store %arg7[%c48_88, %c0_89], %100 {strides = array<i32>} : memref<72x512xbf16, #tpu.memory_space<vmem>>, vector<8x512xbf16>,
    %c0_90 = arith.constant 0 : index
    %c136 = arith.constant 136 : index
    %102 = vector.load %arg5[%c0_90, %c136] : memref<8x768xf32, #tpu.memory_space<vmem>>, vector<8x512xf32>
    %c7_91 = arith.constant 7 : index
    %c0_92 = arith.constant 0 : index
    %c0_93 = arith.constant 0 : index
    %103 = vector.load %arg2[%c7_91, %c0_92, %c0_93] : memref<9x8x512xf32, #tpu.memory_space<vmem>>, vector<1x8x512xf32>
    %104 = vector.shape_cast %103 : vector<1x8x512xf32> to vector<8x512xf32>
    %105 = arith.mulf %102, %104 : vector<8x512xf32>
    %106 = arith.truncf %105 : vector<8x512xf32> to vector<8x512xbf16>
    %c56_94 = arith.constant 56 : index
    %c0_95 = arith.constant 0 : index
    %107 = vector.load %arg7[%c56_94, %c0_95] : memref<72x512xbf16, #tpu.memory_space<vmem>>, vector<8x512xbf16>
    tpu.vector_store %arg7[%c56_94, %c0_95], %106 {strides = array<i32>} : memref<72x512xbf16, #tpu.memory_space<vmem>>, vector<8x512xbf16>,
    %c0_96 = arith.constant 0 : index
    %c137 = arith.constant 137 : index
    %108 = vector.load %arg5[%c0_96, %c137] : memref<8x768xf32, #tpu.memory_space<vmem>>, vector<8x512xf32>
    %c8_97 = arith.constant 8 : index
    %c0_98 = arith.constant 0 : index
    %c0_99 = arith.constant 0 : index
    %109 = vector.load %arg2[%c8_97, %c0_98, %c0_99] : memref<9x8x512xf32, #tpu.memory_space<vmem>>, vector<1x8x512xf32>
    %110 = vector.shape_cast %109 : vector<1x8x512xf32> to vector<8x512xf32>
    %111 = arith.mulf %108, %110 : vector<8x512xf32>
    %112 = arith.truncf %111 : vector<8x512xf32> to vector<8x512xbf16>
    %c64_100 = arith.constant 64 : index
    %c0_101 = arith.constant 0 : index
    %113 = vector.load %arg7[%c64_100, %c0_101] : memref<72x512xbf16, #tpu.memory_space<vmem>>, vector<8x512xbf16>
    tpu.vector_store %arg7[%c64_100, %c0_101], %112 {strides = array<i32>} : memref<72x512xbf16, #tpu.memory_space<vmem>>, vector<8x512xbf16>,
    %c0_102 = arith.constant 0 : index
    %c1_103 = arith.constant 1 : index
    %c0_104 = arith.constant 0 : index
    %c0_105 = arith.constant 0 : index
    %114 = vector.load %arg1[%c0_102, %c1_103, %c0_104, %c0_105] : memref<4x3x8x72xbf16, #tpu.memory_space<vmem>>, vector<1x1x8x72xbf16>
    %115 = vector.shape_cast %114 : vector<1x1x8x72xbf16> to vector<8x72xbf16>
    %c0_106 = arith.constant 0 : index
    %c0_107 = arith.constant 0 : index
    %116 = vector.load %arg7[%c0_106, %c0_107] : memref<72x512xbf16, #tpu.memory_space<vmem>>, vector<72x512xbf16>
    %cst_108 = arith.constant dense<0.000000e+00> : vector<8x512xf32>
    %117 = tpu.matmul %115, %116, %cst_108 {dimension_numbers = #tpu.dot_dimension_numbers<[1], [0], [0], [1], [0, 0, 1, 1], [], []>} : vector<8x72xbf16>, vector<72x512xbf16>, vector<8x512xf32> -> vector<8x512xf32>
    %118 = arith.addf %62, %117 : vector<8x512xf32>
    %c0_109 = arith.constant 0 : index
    %c183 = arith.constant 183 : index
    %119 = vector.load %arg5[%c0_109, %c183] : memref<8x768xf32, #tpu.memory_space<vmem>>, vector<8x512xf32>
    %c0_110 = arith.constant 0 : index
    %c0_111 = arith.constant 0 : index
    %c0_112 = arith.constant 0 : index
    %120 = vector.load %arg2[%c0_110, %c0_111, %c0_112] : memref<9x8x512xf32, #tpu.memory_space<vmem>>, vector<1x8x512xf32>
    %121 = vector.shape_cast %120 : vector<1x8x512xf32> to vector<8x512xf32>
    %122 = arith.mulf %119, %121 : vector<8x512xf32>
    %123 = arith.truncf %122 : vector<8x512xf32> to vector<8x512xbf16>
    %c0_113 = arith.constant 0 : index
    %c0_114 = arith.constant 0 : index
    %124 = vector.load %arg6[%c0_113, %c0_114] : memref<72x512xbf16, #tpu.memory_space<vmem>>, vector<8x512xbf16>
    tpu.vector_store %arg6[%c0_113, %c0_114], %123 {strides = array<i32>} : memref<72x512xbf16, #tpu.memory_space<vmem>>, vector<8x512xbf16>,
    %c0_115 = arith.constant 0 : index
    %c184 = arith.constant 184 : index
    %125 = vector.load %arg5[%c0_115, %c184] : memref<8x768xf32, #tpu.memory_space<vmem>>, vector<8x512xf32>
    %c1_116 = arith.constant 1 : index
    %c0_117 = arith.constant 0 : index
    %c0_118 = arith.constant 0 : index
    %126 = vector.load %arg2[%c1_116, %c0_117, %c0_118] : memref<9x8x512xf32, #tpu.memory_space<vmem>>, vector<1x8x512xf32>
    %127 = vector.shape_cast %126 : vector<1x8x512xf32> to vector<8x512xf32>
    %128 = arith.mulf %125, %127 : vector<8x512xf32>
    %129 = arith.truncf %128 : vector<8x512xf32> to vector<8x512xbf16>
    %c8_119 = arith.constant 8 : index
    %c0_120 = arith.constant 0 : index
    %130 = vector.load %arg6[%c8_119, %c0_120] : memref<72x512xbf16, #tpu.memory_space<vmem>>, vector<8x512xbf16>
    tpu.vector_store %arg6[%c8_119, %c0_120], %129 {strides = array<i32>} : memref<72x512xbf16, #tpu.memory_space<vmem>>, vector<8x512xbf16>,
    %c0_121 = arith.constant 0 : index
    %c185 = arith.constant 185 : index
    %131 = vector.load %arg5[%c0_121, %c185] : memref<8x768xf32, #tpu.memory_space<vmem>>, vector<8x512xf32>
    %c2_122 = arith.constant 2 : index
    %c0_123 = arith.constant 0 : index
    %c0_124 = arith.constant 0 : index
    %132 = vector.load %arg2[%c2_122, %c0_123, %c0_124] : memref<9x8x512xf32, #tpu.memory_space<vmem>>, vector<1x8x512xf32>
    %133 = vector.shape_cast %132 : vector<1x8x512xf32> to vector<8x512xf32>
    %134 = arith.mulf %131, %133 : vector<8x512xf32>
    %135 = arith.truncf %134 : vector<8x512xf32> to vector<8x512xbf16>
    %c16_125 = arith.constant 16 : index
    %c0_126 = arith.constant 0 : index
    %136 = vector.load %arg6[%c16_125, %c0_126] : memref<72x512xbf16, #tpu.memory_space<vmem>>, vector<8x512xbf16>
    tpu.vector_store %arg6[%c16_125, %c0_126], %135 {strides = array<i32>} : memref<72x512xbf16, #tpu.memory_space<vmem>>, vector<8x512xbf16>,
    %c0_127 = arith.constant 0 : index
    %c191 = arith.constant 191 : index
    %137 = vector.load %arg5[%c0_127, %c191] : memref<8x768xf32, #tpu.memory_space<vmem>>, vector<8x512xf32>
    %c3_128 = arith.constant 3 : index
    %c0_129 = arith.constant 0 : index
    %c0_130 = arith.constant 0 : index
    %138 = vector.load %arg2[%c3_128, %c0_129, %c0_130] : memref<9x8x512xf32, #tpu.memory_space<vmem>>, vector<1x8x512xf32>
    %139 = vector.shape_cast %138 : vector<1x8x512xf32> to vector<8x512xf32>
    %140 = arith.mulf %137, %139 : vector<8x512xf32>
    %141 = arith.truncf %140 : vector<8x512xf32> to vector<8x512xbf16>
    %c24_131 = arith.constant 24 : index
    %c0_132 = arith.constant 0 : index
    %142 = vector.load %arg6[%c24_131, %c0_132] : memref<72x512xbf16, #tpu.memory_space<vmem>>, vector<8x512xbf16>
    tpu.vector_store %arg6[%c24_131, %c0_132], %141 {strides = array<i32>} : memref<72x512xbf16, #tpu.memory_space<vmem>>, vector<8x512xbf16>,
    %c0_133 = arith.constant 0 : index
    %c192 = arith.constant 192 : index
    %143 = vector.load %arg5[%c0_133, %c192] : memref<8x768xf32, #tpu.memory_space<vmem>>, vector<8x512xf32>
    %144 = arith.truncf %143 : vector<8x512xf32> to vector<8x512xbf16>
    %c32_134 = arith.constant 32 : index
    %c0_135 = arith.constant 0 : index
    %145 = vector.load %arg6[%c32_134, %c0_135] : memref<72x512xbf16, #tpu.memory_space<vmem>>, vector<8x512xbf16>
    tpu.vector_store %arg6[%c32_134, %c0_135], %144 {strides = array<i32>} : memref<72x512xbf16, #tpu.memory_space<vmem>>, vector<8x512xbf16>,
    %c0_136 = arith.constant 0 : index
    %c193 = arith.constant 193 : index
    %146 = vector.load %arg5[%c0_136, %c193] : memref<8x768xf32, #tpu.memory_space<vmem>>, vector<8x512xf32>
    %c5_137 = arith.constant 5 : index
    %c0_138 = arith.constant 0 : index
    %c0_139 = arith.constant 0 : index
    %147 = vector.load %arg2[%c5_137, %c0_138, %c0_139] : memref<9x8x512xf32, #tpu.memory_space<vmem>>, vector<1x8x512xf32>
    %148 = vector.shape_cast %147 : vector<1x8x512xf32> to vector<8x512xf32>
    %149 = arith.mulf %146, %148 : vector<8x512xf32>
    %150 = arith.truncf %149 : vector<8x512xf32> to vector<8x512xbf16>
    %c40_140 = arith.constant 40 : index
    %c0_141 = arith.constant 0 : index
    %151 = vector.load %arg6[%c40_140, %c0_141] : memref<72x512xbf16, #tpu.memory_space<vmem>>, vector<8x512xbf16>
    tpu.vector_store %arg6[%c40_140, %c0_141], %150 {strides = array<i32>} : memref<72x512xbf16, #tpu.memory_space<vmem>>, vector<8x512xbf16>,
    %c0_142 = arith.constant 0 : index
    %c199 = arith.constant 199 : index
    %152 = vector.load %arg5[%c0_142, %c199] : memref<8x768xf32, #tpu.memory_space<vmem>>, vector<8x512xf32>
    %c6_143 = arith.constant 6 : index
    %c0_144 = arith.constant 0 : index
    %c0_145 = arith.constant 0 : index
    %153 = vector.load %arg2[%c6_143, %c0_144, %c0_145] : memref<9x8x512xf32, #tpu.memory_space<vmem>>, vector<1x8x512xf32>
    %154 = vector.shape_cast %153 : vector<1x8x512xf32> to vector<8x512xf32>
    %155 = arith.mulf %152, %154 : vector<8x512xf32>
    %156 = arith.truncf %155 : vector<8x512xf32> to vector<8x512xbf16>
    %c48_146 = arith.constant 48 : index
    %c0_147 = arith.constant 0 : index
    %157 = vector.load %arg6[%c48_146, %c0_147] : memref<72x512xbf16, #tpu.memory_space<vmem>>, vector<8x512xbf16>
    tpu.vector_store %arg6[%c48_146, %c0_147], %156 {strides = array<i32>} : memref<72x512xbf16, #tpu.memory_space<vmem>>, vector<8x512xbf16>,
    %c0_148 = arith.constant 0 : index
    %c200 = arith.constant 200 : index
    %158 = vector.load %arg5[%c0_148, %c200] : memref<8x768xf32, #tpu.memory_space<vmem>>, vector<8x512xf32>
    %c7_149 = arith.constant 7 : index
    %c0_150 = arith.constant 0 : index
    %c0_151 = arith.constant 0 : index
    %159 = vector.load %arg2[%c7_149, %c0_150, %c0_151] : memref<9x8x512xf32, #tpu.memory_space<vmem>>, vector<1x8x512xf32>
    %160 = vector.shape_cast %159 : vector<1x8x512xf32> to vector<8x512xf32>
    %161 = arith.mulf %158, %160 : vector<8x512xf32>
    %162 = arith.truncf %161 : vector<8x512xf32> to vector<8x512xbf16>
    %c56_152 = arith.constant 56 : index
    %c0_153 = arith.constant 0 : index
    %163 = vector.load %arg6[%c56_152, %c0_153] : memref<72x512xbf16, #tpu.memory_space<vmem>>, vector<8x512xbf16>
    tpu.vector_store %arg6[%c56_152, %c0_153], %162 {strides = array<i32>} : memref<72x512xbf16, #tpu.memory_space<vmem>>, vector<8x512xbf16>,
    %c0_154 = arith.constant 0 : index
    %c201 = arith.constant 201 : index
    %164 = vector.load %arg5[%c0_154, %c201] : memref<8x768xf32, #tpu.memory_space<vmem>>, vector<8x512xf32>
    %c8_155 = arith.constant 8 : index
    %c0_156 = arith.constant 0 : index
    %c0_157 = arith.constant 0 : index
    %165 = vector.load %arg2[%c8_155, %c0_156, %c0_157] : memref<9x8x512xf32, #tpu.memory_space<vmem>>, vector<1x8x512xf32>
    %166 = vector.shape_cast %165 : vector<1x8x512xf32> to vector<8x512xf32>
    %167 = arith.mulf %164, %166 : vector<8x512xf32>
    %168 = arith.truncf %167 : vector<8x512xf32> to vector<8x512xbf16>
    %c64_158 = arith.constant 64 : index
    %c0_159 = arith.constant 0 : index
    %169 = vector.load %arg6[%c64_158, %c0_159] : memref<72x512xbf16, #tpu.memory_space<vmem>>, vector<8x512xbf16>
    tpu.vector_store %arg6[%c64_158, %c0_159], %168 {strides = array<i32>} : memref<72x512xbf16, #tpu.memory_space<vmem>>, vector<8x512xbf16>,
    %c0_160 = arith.constant 0 : index
    %c2_161 = arith.constant 2 : index
    %c0_162 = arith.constant 0 : index
    %c0_163 = arith.constant 0 : index
    %170 = vector.load %arg1[%c0_160, %c2_161, %c0_162, %c0_163] : memref<4x3x8x72xbf16, #tpu.memory_space<vmem>>, vector<1x1x8x72xbf16>
    %171 = vector.shape_cast %170 : vector<1x1x8x72xbf16> to vector<8x72xbf16>
    %c0_164 = arith.constant 0 : index
    %c0_165 = arith.constant 0 : index
    %172 = vector.load %arg6[%c0_164, %c0_165] : memref<72x512xbf16, #tpu.memory_space<vmem>>, vector<72x512xbf16>
    %cst_166 = arith.constant dense<0.000000e+00> : vector<8x512xf32>
    %173 = tpu.matmul %171, %172, %cst_166 {dimension_numbers = #tpu.dot_dimension_numbers<[1], [0], [0], [1], [0, 0, 1, 1], [], []>} : vector<8x72xbf16>, vector<72x512xbf16>, vector<8x512xf32> -> vector<8x512xf32>
    %174 = arith.addf %118, %173 : vector<8x512xf32>
    %cst_167 = arith.constant 0.000000e+00 : f32
    %175 = vector.broadcast %cst_167 : f32 to vector<8x512xf32>
    %176 = arith.maximumf %174, %175 : vector<8x512xf32>
    %c0_168 = arith.constant 0 : index
    %c128_169 = arith.constant 128 : index
    %177 = vector.load %arg5[%c0_168, %c128_169] : memref<8x768xf32, #tpu.memory_space<vmem>>, vector<8x512xf32>
    tpu.vector_store %arg5[%c0_168, %c128_169], %176 {strides = array<i32>} : memref<8x768xf32, #tpu.memory_space<vmem>>, vector<8x512xf32>,
    %c0_170 = arith.constant 0 : index
    %c55_171 = arith.constant 55 : index
    %178 = vector.load %arg5[%c0_170, %c55_171] : memref<8x768xf32, #tpu.memory_space<vmem>>, vector<8x512xf32>
    %c0_172 = arith.constant 0 : index
    %c0_173 = arith.constant 0 : index
    %c0_174 = arith.constant 0 : index
    %179 = vector.load %arg2[%c0_172, %c0_173, %c0_174] : memref<9x8x512xf32, #tpu.memory_space<vmem>>, vector<1x8x512xf32>
    %180 = vector.shape_cast %179 : vector<1x8x512xf32> to vector<8x512xf32>
    %181 = arith.mulf %178, %180 : vector<8x512xf32>
    %182 = arith.truncf %181 : vector<8x512xf32> to vector<8x512xbf16>
    %c0_175 = arith.constant 0 : index
    %c0_176 = arith.constant 0 : index
    %183 = vector.load %arg7[%c0_175, %c0_176] : memref<72x512xbf16, #tpu.memory_space<vmem>>, vector<8x512xbf16>
    tpu.vector_store %arg7[%c0_175, %c0_176], %182 {strides = array<i32>} : memref<72x512xbf16, #tpu.memory_space<vmem>>, vector<8x512xbf16>,
    %c0_177 = arith.constant 0 : index
    %c56_178 = arith.constant 56 : index
    %184 = vector.load %arg5[%c0_177, %c56_178] : memref<8x768xf32, #tpu.memory_space<vmem>>, vector<8x512xf32>
    %c1_179 = arith.constant 1 : index
    %c0_180 = arith.constant 0 : index
    %c0_181 = arith.constant 0 : index
    %185 = vector.load %arg2[%c1_179, %c0_180, %c0_181] : memref<9x8x512xf32, #tpu.memory_space<vmem>>, vector<1x8x512xf32>
    %186 = vector.shape_cast %185 : vector<1x8x512xf32> to vector<8x512xf32>
    %187 = arith.mulf %184, %186 : vector<8x512xf32>
    %188 = arith.truncf %187 : vector<8x512xf32> to vector<8x512xbf16>
    %c8_182 = arith.constant 8 : index
    %c0_183 = arith.constant 0 : index
    %189 = vector.load %arg7[%c8_182, %c0_183] : memref<72x512xbf16, #tpu.memory_space<vmem>>, vector<8x512xbf16>
    tpu.vector_store %arg7[%c8_182, %c0_183], %188 {strides = array<i32>} : memref<72x512xbf16, #tpu.memory_space<vmem>>, vector<8x512xbf16>,
    %c0_184 = arith.constant 0 : index
    %c57_185 = arith.constant 57 : index
    %190 = vector.load %arg5[%c0_184, %c57_185] : memref<8x768xf32, #tpu.memory_space<vmem>>, vector<8x512xf32>
    %c2_186 = arith.constant 2 : index
    %c0_187 = arith.constant 0 : index
    %c0_188 = arith.constant 0 : index
    %191 = vector.load %arg2[%c2_186, %c0_187, %c0_188] : memref<9x8x512xf32, #tpu.memory_space<vmem>>, vector<1x8x512xf32>
    %192 = vector.shape_cast %191 : vector<1x8x512xf32> to vector<8x512xf32>
    %193 = arith.mulf %190, %192 : vector<8x512xf32>
    %194 = arith.truncf %193 : vector<8x512xf32> to vector<8x512xbf16>
    %c16_189 = arith.constant 16 : index
    %c0_190 = arith.constant 0 : index
    %195 = vector.load %arg7[%c16_189, %c0_190] : memref<72x512xbf16, #tpu.memory_space<vmem>>, vector<8x512xbf16>
    tpu.vector_store %arg7[%c16_189, %c0_190], %194 {strides = array<i32>} : memref<72x512xbf16, #tpu.memory_space<vmem>>, vector<8x512xbf16>,
    %c0_191 = arith.constant 0 : index
    %c63_192 = arith.constant 63 : index
    %196 = vector.load %arg5[%c0_191, %c63_192] : memref<8x768xf32, #tpu.memory_space<vmem>>, vector<8x512xf32>
    %c3_193 = arith.constant 3 : index
    %c0_194 = arith.constant 0 : index
    %c0_195 = arith.constant 0 : index
    %197 = vector.load %arg2[%c3_193, %c0_194, %c0_195] : memref<9x8x512xf32, #tpu.memory_space<vmem>>, vector<1x8x512xf32>
    %198 = vector.shape_cast %197 : vector<1x8x512xf32> to vector<8x512xf32>
    %199 = arith.mulf %196, %198 : vector<8x512xf32>
    %200 = arith.truncf %199 : vector<8x512xf32> to vector<8x512xbf16>
    %c24_196 = arith.constant 24 : index
    %c0_197 = arith.constant 0 : index
    %201 = vector.load %arg7[%c24_196, %c0_197] : memref<72x512xbf16, #tpu.memory_space<vmem>>, vector<8x512xbf16>
    tpu.vector_store %arg7[%c24_196, %c0_197], %200 {strides = array<i32>} : memref<72x512xbf16, #tpu.memory_space<vmem>>, vector<8x512xbf16>,
    %c0_198 = arith.constant 0 : index
    %c64_199 = arith.constant 64 : index
    %202 = vector.load %arg5[%c0_198, %c64_199] : memref<8x768xf32, #tpu.memory_space<vmem>>, vector<8x512xf32>
    %203 = arith.truncf %202 : vector<8x512xf32> to vector<8x512xbf16>
    %c32_200 = arith.constant 32 : index
    %c0_201 = arith.constant 0 : index
    %204 = vector.load %arg7[%c32_200, %c0_201] : memref<72x512xbf16, #tpu.memory_space<vmem>>, vector<8x512xbf16>
    tpu.vector_store %arg7[%c32_200, %c0_201], %203 {strides = array<i32>} : memref<72x512xbf16, #tpu.memory_space<vmem>>, vector<8x512xbf16>,
    %c0_202 = arith.constant 0 : index
    %c65_203 = arith.constant 65 : index
    %205 = vector.load %arg5[%c0_202, %c65_203] : memref<8x768xf32, #tpu.memory_space<vmem>>, vector<8x512xf32>
    %c5_204 = arith.constant 5 : index
    %c0_205 = arith.constant 0 : index
    %c0_206 = arith.constant 0 : index
    %206 = vector.load %arg2[%c5_204, %c0_205, %c0_206] : memref<9x8x512xf32, #tpu.memory_space<vmem>>, vector<1x8x512xf32>
    %207 = vector.shape_cast %206 : vector<1x8x512xf32> to vector<8x512xf32>
    %208 = arith.mulf %205, %207 : vector<8x512xf32>
    %209 = arith.truncf %208 : vector<8x512xf32> to vector<8x512xbf16>
    %c40_207 = arith.constant 40 : index
    %c0_208 = arith.constant 0 : index
    %210 = vector.load %arg7[%c40_207, %c0_208] : memref<72x512xbf16, #tpu.memory_space<vmem>>, vector<8x512xbf16>
    tpu.vector_store %arg7[%c40_207, %c0_208], %209 {strides = array<i32>} : memref<72x512xbf16, #tpu.memory_space<vmem>>, vector<8x512xbf16>,
    %c0_209 = arith.constant 0 : index
    %c71_210 = arith.constant 71 : index
    %211 = vector.load %arg5[%c0_209, %c71_210] : memref<8x768xf32, #tpu.memory_space<vmem>>, vector<8x512xf32>
    %c6_211 = arith.constant 6 : index
    %c0_212 = arith.constant 0 : index
    %c0_213 = arith.constant 0 : index
    %212 = vector.load %arg2[%c6_211, %c0_212, %c0_213] : memref<9x8x512xf32, #tpu.memory_space<vmem>>, vector<1x8x512xf32>
    %213 = vector.shape_cast %212 : vector<1x8x512xf32> to vector<8x512xf32>
    %214 = arith.mulf %211, %213 : vector<8x512xf32>
    %215 = arith.truncf %214 : vector<8x512xf32> to vector<8x512xbf16>
    %c48_214 = arith.constant 48 : index
    %c0_215 = arith.constant 0 : index
    %216 = vector.load %arg7[%c48_214, %c0_215] : memref<72x512xbf16, #tpu.memory_space<vmem>>, vector<8x512xbf16>
    tpu.vector_store %arg7[%c48_214, %c0_215], %215 {strides = array<i32>} : memref<72x512xbf16, #tpu.memory_space<vmem>>, vector<8x512xbf16>,
    %c0_216 = arith.constant 0 : index
    %c72_217 = arith.constant 72 : index
    %217 = vector.load %arg5[%c0_216, %c72_217] : memref<8x768xf32, #tpu.memory_space<vmem>>, vector<8x512xf32>
    %c7_218 = arith.constant 7 : index
    %c0_219 = arith.constant 0 : index
    %c0_220 = arith.constant 0 : index
    %218 = vector.load %arg2[%c7_218, %c0_219, %c0_220] : memref<9x8x512xf32, #tpu.memory_space<vmem>>, vector<1x8x512xf32>
    %219 = vector.shape_cast %218 : vector<1x8x512xf32> to vector<8x512xf32>
    %220 = arith.mulf %217, %219 : vector<8x512xf32>
    %221 = arith.truncf %220 : vector<8x512xf32> to vector<8x512xbf16>
    %c56_221 = arith.constant 56 : index
    %c0_222 = arith.constant 0 : index
    %222 = vector.load %arg7[%c56_221, %c0_222] : memref<72x512xbf16, #tpu.memory_space<vmem>>, vector<8x512xbf16>
    tpu.vector_store %arg7[%c56_221, %c0_222], %221 {strides = array<i32>} : memref<72x512xbf16, #tpu.memory_space<vmem>>, vector<8x512xbf16>,
    %c0_223 = arith.constant 0 : index
    %c73_224 = arith.constant 73 : index
    %223 = vector.load %arg5[%c0_223, %c73_224] : memref<8x768xf32, #tpu.memory_space<vmem>>, vector<8x512xf32>
    %c8_225 = arith.constant 8 : index
    %c0_226 = arith.constant 0 : index
    %c0_227 = arith.constant 0 : index
    %224 = vector.load %arg2[%c8_225, %c0_226, %c0_227] : memref<9x8x512xf32, #tpu.memory_space<vmem>>, vector<1x8x512xf32>
    %225 = vector.shape_cast %224 : vector<1x8x512xf32> to vector<8x512xf32>
    %226 = arith.mulf %223, %225 : vector<8x512xf32>
    %227 = arith.truncf %226 : vector<8x512xf32> to vector<8x512xbf16>
    %c64_228 = arith.constant 64 : index
    %c0_229 = arith.constant 0 : index
    %228 = vector.load %arg7[%c64_228, %c0_229] : memref<72x512xbf16, #tpu.memory_space<vmem>>, vector<8x512xbf16>
    tpu.vector_store %arg7[%c64_228, %c0_229], %227 {strides = array<i32>} : memref<72x512xbf16, #tpu.memory_space<vmem>>, vector<8x512xbf16>,
    %c1_230 = arith.constant 1 : index
    %c0_231 = arith.constant 0 : index
    %c0_232 = arith.constant 0 : index
    %c0_233 = arith.constant 0 : index
    %229 = vector.load %arg1[%c1_230, %c0_231, %c0_232, %c0_233] : memref<4x3x8x72xbf16, #tpu.memory_space<vmem>>, vector<1x1x8x72xbf16>
    %230 = vector.shape_cast %229 : vector<1x1x8x72xbf16> to vector<8x72xbf16>
    %c0_234 = arith.constant 0 : index
    %c0_235 = arith.constant 0 : index
    %231 = vector.load %arg7[%c0_234, %c0_235] : memref<72x512xbf16, #tpu.memory_space<vmem>>, vector<72x512xbf16>
    %cst_236 = arith.constant dense<0.000000e+00> : vector<8x512xf32>
    %232 = tpu.matmul %230, %231, %cst_236 {dimension_numbers = #tpu.dot_dimension_numbers<[1], [0], [0], [1], [0, 0, 1, 1], [], []>} : vector<8x72xbf16>, vector<72x512xbf16>, vector<8x512xf32> -> vector<8x512xf32>
    %c0_237 = arith.constant 0 : index
    %c119_238 = arith.constant 119 : index
    %233 = vector.load %arg5[%c0_237, %c119_238] : memref<8x768xf32, #tpu.memory_space<vmem>>, vector<8x512xf32>
    %c0_239 = arith.constant 0 : index
    %c0_240 = arith.constant 0 : index
    %c0_241 = arith.constant 0 : index
    %234 = vector.load %arg2[%c0_239, %c0_240, %c0_241] : memref<9x8x512xf32, #tpu.memory_space<vmem>>, vector<1x8x512xf32>
    %235 = vector.shape_cast %234 : vector<1x8x512xf32> to vector<8x512xf32>
    %236 = arith.mulf %233, %235 : vector<8x512xf32>
    %237 = arith.truncf %236 : vector<8x512xf32> to vector<8x512xbf16>
    %c0_242 = arith.constant 0 : index
    %c0_243 = arith.constant 0 : index
    %238 = vector.load %arg6[%c0_242, %c0_243] : memref<72x512xbf16, #tpu.memory_space<vmem>>, vector<8x512xbf16>
    tpu.vector_store %arg6[%c0_242, %c0_243], %237 {strides = array<i32>} : memref<72x512xbf16, #tpu.memory_space<vmem>>, vector<8x512xbf16>,
    %c0_244 = arith.constant 0 : index
    %c120_245 = arith.constant 120 : index
    %239 = vector.load %arg5[%c0_244, %c120_245] : memref<8x768xf32, #tpu.memory_space<vmem>>, vector<8x512xf32>
    %c1_246 = arith.constant 1 : index
    %c0_247 = arith.constant 0 : index
    %c0_248 = arith.constant 0 : index
    %240 = vector.load %arg2[%c1_246, %c0_247, %c0_248] : memref<9x8x512xf32, #tpu.memory_space<vmem>>, vector<1x8x512xf32>
    %241 = vector.shape_cast %240 : vector<1x8x512xf32> to vector<8x512xf32>
    %242 = arith.mulf %239, %241 : vector<8x512xf32>
    %243 = arith.truncf %242 : vector<8x512xf32> to vector<8x512xbf16>
    %c8_249 = arith.constant 8 : index
    %c0_250 = arith.constant 0 : index
    %244 = vector.load %arg6[%c8_249, %c0_250] : memref<72x512xbf16, #tpu.memory_space<vmem>>, vector<8x512xbf16>
    tpu.vector_store %arg6[%c8_249, %c0_250], %243 {strides = array<i32>} : memref<72x512xbf16, #tpu.memory_space<vmem>>, vector<8x512xbf16>,
    %c0_251 = arith.constant 0 : index
    %c121_252 = arith.constant 121 : index
    %245 = vector.load %arg5[%c0_251, %c121_252] : memref<8x768xf32, #tpu.memory_space<vmem>>, vector<8x512xf32>
    %c2_253 = arith.constant 2 : index
    %c0_254 = arith.constant 0 : index
    %c0_255 = arith.constant 0 : index
    %246 = vector.load %arg2[%c2_253, %c0_254, %c0_255] : memref<9x8x512xf32, #tpu.memory_space<vmem>>, vector<1x8x512xf32>
    %247 = vector.shape_cast %246 : vector<1x8x512xf32> to vector<8x512xf32>
    %248 = arith.mulf %245, %247 : vector<8x512xf32>
    %249 = arith.truncf %248 : vector<8x512xf32> to vector<8x512xbf16>
    %c16_256 = arith.constant 16 : index
    %c0_257 = arith.constant 0 : index
    %250 = vector.load %arg6[%c16_256, %c0_257] : memref<72x512xbf16, #tpu.memory_space<vmem>>, vector<8x512xbf16>
    tpu.vector_store %arg6[%c16_256, %c0_257], %249 {strides = array<i32>} : memref<72x512xbf16, #tpu.memory_space<vmem>>, vector<8x512xbf16>,
    %c0_258 = arith.constant 0 : index
    %c127_259 = arith.constant 127 : index
    %251 = vector.load %arg5[%c0_258, %c127_259] : memref<8x768xf32, #tpu.memory_space<vmem>>, vector<8x512xf32>
    %c3_260 = arith.constant 3 : index
    %c0_261 = arith.constant 0 : index
    %c0_262 = arith.constant 0 : index
    %252 = vector.load %arg2[%c3_260, %c0_261, %c0_262] : memref<9x8x512xf32, #tpu.memory_space<vmem>>, vector<1x8x512xf32>
    %253 = vector.shape_cast %252 : vector<1x8x512xf32> to vector<8x512xf32>
    %254 = arith.mulf %251, %253 : vector<8x512xf32>
    %255 = arith.truncf %254 : vector<8x512xf32> to vector<8x512xbf16>
    %c24_263 = arith.constant 24 : index
    %c0_264 = arith.constant 0 : index
    %256 = vector.load %arg6[%c24_263, %c0_264] : memref<72x512xbf16, #tpu.memory_space<vmem>>, vector<8x512xbf16>
    tpu.vector_store %arg6[%c24_263, %c0_264], %255 {strides = array<i32>} : memref<72x512xbf16, #tpu.memory_space<vmem>>, vector<8x512xbf16>,
    %c0_265 = arith.constant 0 : index
    %c128_266 = arith.constant 128 : index
    %257 = vector.load %arg5[%c0_265, %c128_266] : memref<8x768xf32, #tpu.memory_space<vmem>>, vector<8x512xf32>
    %258 = arith.truncf %257 : vector<8x512xf32> to vector<8x512xbf16>
    %c32_267 = arith.constant 32 : index
    %c0_268 = arith.constant 0 : index
    %259 = vector.load %arg6[%c32_267, %c0_268] : memref<72x512xbf16, #tpu.memory_space<vmem>>, vector<8x512xbf16>
    tpu.vector_store %arg6[%c32_267, %c0_268], %258 {strides = array<i32>} : memref<72x512xbf16, #tpu.memory_space<vmem>>, vector<8x512xbf16>,
    %c0_269 = arith.constant 0 : index
    %c129_270 = arith.constant 129 : index
    %260 = vector.load %arg5[%c0_269, %c129_270] : memref<8x768xf32, #tpu.memory_space<vmem>>, vector<8x512xf32>
    %c5_271 = arith.constant 5 : index
    %c0_272 = arith.constant 0 : index
    %c0_273 = arith.constant 0 : index
    %261 = vector.load %arg2[%c5_271, %c0_272, %c0_273] : memref<9x8x512xf32, #tpu.memory_space<vmem>>, vector<1x8x512xf32>
    %262 = vector.shape_cast %261 : vector<1x8x512xf32> to vector<8x512xf32>
    %263 = arith.mulf %260, %262 : vector<8x512xf32>
    %264 = arith.truncf %263 : vector<8x512xf32> to vector<8x512xbf16>
    %c40_274 = arith.constant 40 : index
    %c0_275 = arith.constant 0 : index
    %265 = vector.load %arg6[%c40_274, %c0_275] : memref<72x512xbf16, #tpu.memory_space<vmem>>, vector<8x512xbf16>
    tpu.vector_store %arg6[%c40_274, %c0_275], %264 {strides = array<i32>} : memref<72x512xbf16, #tpu.memory_space<vmem>>, vector<8x512xbf16>,
    %c0_276 = arith.constant 0 : index
    %c135_277 = arith.constant 135 : index
    %266 = vector.load %arg5[%c0_276, %c135_277] : memref<8x768xf32, #tpu.memory_space<vmem>>, vector<8x512xf32>
    %c6_278 = arith.constant 6 : index
    %c0_279 = arith.constant 0 : index
    %c0_280 = arith.constant 0 : index
    %267 = vector.load %arg2[%c6_278, %c0_279, %c0_280] : memref<9x8x512xf32, #tpu.memory_space<vmem>>, vector<1x8x512xf32>
    %268 = vector.shape_cast %267 : vector<1x8x512xf32> to vector<8x512xf32>
    %269 = arith.mulf %266, %268 : vector<8x512xf32>
    %270 = arith.truncf %269 : vector<8x512xf32> to vector<8x512xbf16>
    %c48_281 = arith.constant 48 : index
    %c0_282 = arith.constant 0 : index
    %271 = vector.load %arg6[%c48_281, %c0_282] : memref<72x512xbf16, #tpu.memory_space<vmem>>, vector<8x512xbf16>
    tpu.vector_store %arg6[%c48_281, %c0_282], %270 {strides = array<i32>} : memref<72x512xbf16, #tpu.memory_space<vmem>>, vector<8x512xbf16>,
    %c0_283 = arith.constant 0 : index
    %c136_284 = arith.constant 136 : index
    %272 = vector.load %arg5[%c0_283, %c136_284] : memref<8x768xf32, #tpu.memory_space<vmem>>, vector<8x512xf32>
    %c7_285 = arith.constant 7 : index
    %c0_286 = arith.constant 0 : index
    %c0_287 = arith.constant 0 : index
    %273 = vector.load %arg2[%c7_285, %c0_286, %c0_287] : memref<9x8x512xf32, #tpu.memory_space<vmem>>, vector<1x8x512xf32>
    %274 = vector.shape_cast %273 : vector<1x8x512xf32> to vector<8x512xf32>
    %275 = arith.mulf %272, %274 : vector<8x512xf32>
    %276 = arith.truncf %275 : vector<8x512xf32> to vector<8x512xbf16>
    %c56_288 = arith.constant 56 : index
    %c0_289 = arith.constant 0 : index
    %277 = vector.load %arg6[%c56_288, %c0_289] : memref<72x512xbf16, #tpu.memory_space<vmem>>, vector<8x512xbf16>
    tpu.vector_store %arg6[%c56_288, %c0_289], %276 {strides = array<i32>} : memref<72x512xbf16, #tpu.memory_space<vmem>>, vector<8x512xbf16>,
    %c0_290 = arith.constant 0 : index
    %c137_291 = arith.constant 137 : index
    %278 = vector.load %arg5[%c0_290, %c137_291] : memref<8x768xf32, #tpu.memory_space<vmem>>, vector<8x512xf32>
    %c8_292 = arith.constant 8 : index
    %c0_293 = arith.constant 0 : index
    %c0_294 = arith.constant 0 : index
    %279 = vector.load %arg2[%c8_292, %c0_293, %c0_294] : memref<9x8x512xf32, #tpu.memory_space<vmem>>, vector<1x8x512xf32>
    %280 = vector.shape_cast %279 : vector<1x8x512xf32> to vector<8x512xf32>
    %281 = arith.mulf %278, %280 : vector<8x512xf32>
    %282 = arith.truncf %281 : vector<8x512xf32> to vector<8x512xbf16>
    %c64_295 = arith.constant 64 : index
    %c0_296 = arith.constant 0 : index
    %283 = vector.load %arg6[%c64_295, %c0_296] : memref<72x512xbf16, #tpu.memory_space<vmem>>, vector<8x512xbf16>
    tpu.vector_store %arg6[%c64_295, %c0_296], %282 {strides = array<i32>} : memref<72x512xbf16, #tpu.memory_space<vmem>>, vector<8x512xbf16>,
    %c1_297 = arith.constant 1 : index
    %c1_298 = arith.constant 1 : index
    %c0_299 = arith.constant 0 : index
    %c0_300 = arith.constant 0 : index
    %284 = vector.load %arg1[%c1_297, %c1_298, %c0_299, %c0_300] : memref<4x3x8x72xbf16, #tpu.memory_space<vmem>>, vector<1x1x8x72xbf16>
    %285 = vector.shape_cast %284 : vector<1x1x8x72xbf16> to vector<8x72xbf16>
    %c0_301 = arith.constant 0 : index
    %c0_302 = arith.constant 0 : index
    %286 = vector.load %arg6[%c0_301, %c0_302] : memref<72x512xbf16, #tpu.memory_space<vmem>>, vector<72x512xbf16>
    %cst_303 = arith.constant dense<0.000000e+00> : vector<8x512xf32>
    %287 = tpu.matmul %285, %286, %cst_303 {dimension_numbers = #tpu.dot_dimension_numbers<[1], [0], [0], [1], [0, 0, 1, 1], [], []>} : vector<8x72xbf16>, vector<72x512xbf16>, vector<8x512xf32> -> vector<8x512xf32>
    %288 = arith.addf %232, %287 : vector<8x512xf32>
    %c0_304 = arith.constant 0 : index
    %c183_305 = arith.constant 183 : index
    %289 = vector.load %arg5[%c0_304, %c183_305] : memref<8x768xf32, #tpu.memory_space<vmem>>, vector<8x512xf32>
    %c0_306 = arith.constant 0 : index
    %c0_307 = arith.constant 0 : index
    %c0_308 = arith.constant 0 : index
    %290 = vector.load %arg2[%c0_306, %c0_307, %c0_308] : memref<9x8x512xf32, #tpu.memory_space<vmem>>, vector<1x8x512xf32>
    %291 = vector.shape_cast %290 : vector<1x8x512xf32> to vector<8x512xf32>
    %292 = arith.mulf %289, %291 : vector<8x512xf32>
    %293 = arith.truncf %292 : vector<8x512xf32> to vector<8x512xbf16>
    %c0_309 = arith.constant 0 : index
    %c0_310 = arith.constant 0 : index
    %294 = vector.load %arg7[%c0_309, %c0_310] : memref<72x512xbf16, #tpu.memory_space<vmem>>, vector<8x512xbf16>
    tpu.vector_store %arg7[%c0_309, %c0_310], %293 {strides = array<i32>} : memref<72x512xbf16, #tpu.memory_space<vmem>>, vector<8x512xbf16>,
    %c0_311 = arith.constant 0 : index
    %c184_312 = arith.constant 184 : index
    %295 = vector.load %arg5[%c0_311, %c184_312] : memref<8x768xf32, #tpu.memory_space<vmem>>, vector<8x512xf32>
    %c1_313 = arith.constant 1 : index
    %c0_314 = arith.constant 0 : index
    %c0_315 = arith.constant 0 : index
    %296 = vector.load %arg2[%c1_313, %c0_314, %c0_315] : memref<9x8x512xf32, #tpu.memory_space<vmem>>, vector<1x8x512xf32>
    %297 = vector.shape_cast %296 : vector<1x8x512xf32> to vector<8x512xf32>
    %298 = arith.mulf %295, %297 : vector<8x512xf32>
    %299 = arith.truncf %298 : vector<8x512xf32> to vector<8x512xbf16>
    %c8_316 = arith.constant 8 : index
    %c0_317 = arith.constant 0 : index
    %300 = vector.load %arg7[%c8_316, %c0_317] : memref<72x512xbf16, #tpu.memory_space<vmem>>, vector<8x512xbf16>
    tpu.vector_store %arg7[%c8_316, %c0_317], %299 {strides = array<i32>} : memref<72x512xbf16, #tpu.memory_space<vmem>>, vector<8x512xbf16>,
    %c0_318 = arith.constant 0 : index
    %c185_319 = arith.constant 185 : index
    %301 = vector.load %arg5[%c0_318, %c185_319] : memref<8x768xf32, #tpu.memory_space<vmem>>, vector<8x512xf32>
    %c2_320 = arith.constant 2 : index
    %c0_321 = arith.constant 0 : index
    %c0_322 = arith.constant 0 : index
    %302 = vector.load %arg2[%c2_320, %c0_321, %c0_322] : memref<9x8x512xf32, #tpu.memory_space<vmem>>, vector<1x8x512xf32>
    %303 = vector.shape_cast %302 : vector<1x8x512xf32> to vector<8x512xf32>
    %304 = arith.mulf %301, %303 : vector<8x512xf32>
    %305 = arith.truncf %304 : vector<8x512xf32> to vector<8x512xbf16>
    %c16_323 = arith.constant 16 : index
    %c0_324 = arith.constant 0 : index
    %306 = vector.load %arg7[%c16_323, %c0_324] : memref<72x512xbf16, #tpu.memory_space<vmem>>, vector<8x512xbf16>
    tpu.vector_store %arg7[%c16_323, %c0_324], %305 {strides = array<i32>} : memref<72x512xbf16, #tpu.memory_space<vmem>>, vector<8x512xbf16>,
    %c0_325 = arith.constant 0 : index
    %c191_326 = arith.constant 191 : index
    %307 = vector.load %arg5[%c0_325, %c191_326] : memref<8x768xf32, #tpu.memory_space<vmem>>, vector<8x512xf32>
    %c3_327 = arith.constant 3 : index
    %c0_328 = arith.constant 0 : index
    %c0_329 = arith.constant 0 : index
    %308 = vector.load %arg2[%c3_327, %c0_328, %c0_329] : memref<9x8x512xf32, #tpu.memory_space<vmem>>, vector<1x8x512xf32>
    %309 = vector.shape_cast %308 : vector<1x8x512xf32> to vector<8x512xf32>
    %310 = arith.mulf %307, %309 : vector<8x512xf32>
    %311 = arith.truncf %310 : vector<8x512xf32> to vector<8x512xbf16>
    %c24_330 = arith.constant 24 : index
    %c0_331 = arith.constant 0 : index
    %312 = vector.load %arg7[%c24_330, %c0_331] : memref<72x512xbf16, #tpu.memory_space<vmem>>, vector<8x512xbf16>
    tpu.vector_store %arg7[%c24_330, %c0_331], %311 {strides = array<i32>} : memref<72x512xbf16, #tpu.memory_space<vmem>>, vector<8x512xbf16>,
    %c0_332 = arith.constant 0 : index
    %c192_333 = arith.constant 192 : index
    %313 = vector.load %arg5[%c0_332, %c192_333] : memref<8x768xf32, #tpu.memory_space<vmem>>, vector<8x512xf32>
    %314 = arith.truncf %313 : vector<8x512xf32> to vector<8x512xbf16>
    %c32_334 = arith.constant 32 : index
    %c0_335 = arith.constant 0 : index
    %315 = vector.load %arg7[%c32_334, %c0_335] : memref<72x512xbf16, #tpu.memory_space<vmem>>, vector<8x512xbf16>
    tpu.vector_store %arg7[%c32_334, %c0_335], %314 {strides = array<i32>} : memref<72x512xbf16, #tpu.memory_space<vmem>>, vector<8x512xbf16>,
    %c0_336 = arith.constant 0 : index
    %c193_337 = arith.constant 193 : index
    %316 = vector.load %arg5[%c0_336, %c193_337] : memref<8x768xf32, #tpu.memory_space<vmem>>, vector<8x512xf32>
    %c5_338 = arith.constant 5 : index
    %c0_339 = arith.constant 0 : index
    %c0_340 = arith.constant 0 : index
    %317 = vector.load %arg2[%c5_338, %c0_339, %c0_340] : memref<9x8x512xf32, #tpu.memory_space<vmem>>, vector<1x8x512xf32>
    %318 = vector.shape_cast %317 : vector<1x8x512xf32> to vector<8x512xf32>
    %319 = arith.mulf %316, %318 : vector<8x512xf32>
    %320 = arith.truncf %319 : vector<8x512xf32> to vector<8x512xbf16>
    %c40_341 = arith.constant 40 : index
    %c0_342 = arith.constant 0 : index
    %321 = vector.load %arg7[%c40_341, %c0_342] : memref<72x512xbf16, #tpu.memory_space<vmem>>, vector<8x512xbf16>
    tpu.vector_store %arg7[%c40_341, %c0_342], %320 {strides = array<i32>} : memref<72x512xbf16, #tpu.memory_space<vmem>>, vector<8x512xbf16>,
    %c0_343 = arith.constant 0 : index
    %c199_344 = arith.constant 199 : index
    %322 = vector.load %arg5[%c0_343, %c199_344] : memref<8x768xf32, #tpu.memory_space<vmem>>, vector<8x512xf32>
    %c6_345 = arith.constant 6 : index
    %c0_346 = arith.constant 0 : index
    %c0_347 = arith.constant 0 : index
    %323 = vector.load %arg2[%c6_345, %c0_346, %c0_347] : memref<9x8x512xf32, #tpu.memory_space<vmem>>, vector<1x8x512xf32>
    %324 = vector.shape_cast %323 : vector<1x8x512xf32> to vector<8x512xf32>
    %325 = arith.mulf %322, %324 : vector<8x512xf32>
    %326 = arith.truncf %325 : vector<8x512xf32> to vector<8x512xbf16>
    %c48_348 = arith.constant 48 : index
    %c0_349 = arith.constant 0 : index
    %327 = vector.load %arg7[%c48_348, %c0_349] : memref<72x512xbf16, #tpu.memory_space<vmem>>, vector<8x512xbf16>
    tpu.vector_store %arg7[%c48_348, %c0_349], %326 {strides = array<i32>} : memref<72x512xbf16, #tpu.memory_space<vmem>>, vector<8x512xbf16>,
    %c0_350 = arith.constant 0 : index
    %c200_351 = arith.constant 200 : index
    %328 = vector.load %arg5[%c0_350, %c200_351] : memref<8x768xf32, #tpu.memory_space<vmem>>, vector<8x512xf32>
    %c7_352 = arith.constant 7 : index
    %c0_353 = arith.constant 0 : index
    %c0_354 = arith.constant 0 : index
    %329 = vector.load %arg2[%c7_352, %c0_353, %c0_354] : memref<9x8x512xf32, #tpu.memory_space<vmem>>, vector<1x8x512xf32>
    %330 = vector.shape_cast %329 : vector<1x8x512xf32> to vector<8x512xf32>
    %331 = arith.mulf %328, %330 : vector<8x512xf32>
    %332 = arith.truncf %331 : vector<8x512xf32> to vector<8x512xbf16>
    %c56_355 = arith.constant 56 : index
    %c0_356 = arith.constant 0 : index
    %333 = vector.load %arg7[%c56_355, %c0_356] : memref<72x512xbf16, #tpu.memory_space<vmem>>, vector<8x512xbf16>
    tpu.vector_store %arg7[%c56_355, %c0_356], %332 {strides = array<i32>} : memref<72x512xbf16, #tpu.memory_space<vmem>>, vector<8x512xbf16>,
    %c0_357 = arith.constant 0 : index
    %c201_358 = arith.constant 201 : index
    %334 = vector.load %arg5[%c0_357, %c201_358] : memref<8x768xf32, #tpu.memory_space<vmem>>, vector<8x512xf32>
    %c8_359 = arith.constant 8 : index
    %c0_360 = arith.constant 0 : index
    %c0_361 = arith.constant 0 : index
    %335 = vector.load %arg2[%c8_359, %c0_360, %c0_361] : memref<9x8x512xf32, #tpu.memory_space<vmem>>, vector<1x8x512xf32>
    %336 = vector.shape_cast %335 : vector<1x8x512xf32> to vector<8x512xf32>
    %337 = arith.mulf %334, %336 : vector<8x512xf32>
    %338 = arith.truncf %337 : vector<8x512xf32> to vector<8x512xbf16>
    %c64_362 = arith.constant 64 : index
    %c0_363 = arith.constant 0 : index
    %339 = vector.load %arg7[%c64_362, %c0_363] : memref<72x512xbf16, #tpu.memory_space<vmem>>, vector<8x512xbf16>
    tpu.vector_store %arg7[%c64_362, %c0_363], %338 {strides = array<i32>} : memref<72x512xbf16, #tpu.memory_space<vmem>>, vector<8x512xbf16>,
    %c1_364 = arith.constant 1 : index
    %c2_365 = arith.constant 2 : index
    %c0_366 = arith.constant 0 : index
    %c0_367 = arith.constant 0 : index
    %340 = vector.load %arg1[%c1_364, %c2_365, %c0_366, %c0_367] : memref<4x3x8x72xbf16, #tpu.memory_space<vmem>>, vector<1x1x8x72xbf16>
    %341 = vector.shape_cast %340 : vector<1x1x8x72xbf16> to vector<8x72xbf16>
    %c0_368 = arith.constant 0 : index
    %c0_369 = arith.constant 0 : index
    %342 = vector.load %arg7[%c0_368, %c0_369] : memref<72x512xbf16, #tpu.memory_space<vmem>>, vector<72x512xbf16>
    %cst_370 = arith.constant dense<0.000000e+00> : vector<8x512xf32>
    %343 = tpu.matmul %341, %342, %cst_370 {dimension_numbers = #tpu.dot_dimension_numbers<[1], [0], [0], [1], [0, 0, 1, 1], [], []>} : vector<8x72xbf16>, vector<72x512xbf16>, vector<8x512xf32> -> vector<8x512xf32>
    %344 = arith.addf %288, %343 : vector<8x512xf32>
    %345 = arith.addf %344, %4 : vector<8x512xf32>
    %cst_371 = arith.constant 0.000000e+00 : f32
    %346 = vector.broadcast %cst_371 : f32 to vector<8x512xf32>
    %347 = arith.maximumf %345, %346 : vector<8x512xf32>
    %c0_372 = arith.constant 0 : index
    %c128_373 = arith.constant 128 : index
    %348 = vector.load %arg5[%c0_372, %c128_373] : memref<8x768xf32, #tpu.memory_space<vmem>>, vector<8x512xf32>
    tpu.vector_store %arg5[%c0_372, %c128_373], %347 {strides = array<i32>} : memref<8x768xf32, #tpu.memory_space<vmem>>, vector<8x512xf32>,
    %c0_374 = arith.constant 0 : index
    %c55_375 = arith.constant 55 : index
    %349 = vector.load %arg5[%c0_374, %c55_375] : memref<8x768xf32, #tpu.memory_space<vmem>>, vector<8x512xf32>
    %c0_376 = arith.constant 0 : index
    %c0_377 = arith.constant 0 : index
    %c0_378 = arith.constant 0 : index
    %350 = vector.load %arg2[%c0_376, %c0_377, %c0_378] : memref<9x8x512xf32, #tpu.memory_space<vmem>>, vector<1x8x512xf32>
    %351 = vector.shape_cast %350 : vector<1x8x512xf32> to vector<8x512xf32>
    %352 = arith.mulf %349, %351 : vector<8x512xf32>
    %353 = arith.truncf %352 : vector<8x512xf32> to vector<8x512xbf16>
    %c0_379 = arith.constant 0 : index
    %c0_380 = arith.constant 0 : index
    %354 = vector.load %arg6[%c0_379, %c0_380] : memref<72x512xbf16, #tpu.memory_space<vmem>>, vector<8x512xbf16>
    tpu.vector_store %arg6[%c0_379, %c0_380], %353 {strides = array<i32>} : memref<72x512xbf16, #tpu.memory_space<vmem>>, vector<8x512xbf16>,
    %c0_381 = arith.constant 0 : index
    %c56_382 = arith.constant 56 : index
    %355 = vector.load %arg5[%c0_381, %c56_382] : memref<8x768xf32, #tpu.memory_space<vmem>>, vector<8x512xf32>
    %c1_383 = arith.constant 1 : index
    %c0_384 = arith.constant 0 : index
    %c0_385 = arith.constant 0 : index
    %356 = vector.load %arg2[%c1_383, %c0_384, %c0_385] : memref<9x8x512xf32, #tpu.memory_space<vmem>>, vector<1x8x512xf32>
    %357 = vector.shape_cast %356 : vector<1x8x512xf32> to vector<8x512xf32>
    %358 = arith.mulf %355, %357 : vector<8x512xf32>
    %359 = arith.truncf %358 : vector<8x512xf32> to vector<8x512xbf16>
    %c8_386 = arith.constant 8 : index
    %c0_387 = arith.constant 0 : index
    %360 = vector.load %arg6[%c8_386, %c0_387] : memref<72x512xbf16, #tpu.memory_space<vmem>>, vector<8x512xbf16>
    tpu.vector_store %arg6[%c8_386, %c0_387], %359 {strides = array<i32>} : memref<72x512xbf16, #tpu.memory_space<vmem>>, vector<8x512xbf16>,
    %c0_388 = arith.constant 0 : index
    %c57_389 = arith.constant 57 : index
    %361 = vector.load %arg5[%c0_388, %c57_389] : memref<8x768xf32, #tpu.memory_space<vmem>>, vector<8x512xf32>
    %c2_390 = arith.constant 2 : index
    %c0_391 = arith.constant 0 : index
    %c0_392 = arith.constant 0 : index
    %362 = vector.load %arg2[%c2_390, %c0_391, %c0_392] : memref<9x8x512xf32, #tpu.memory_space<vmem>>, vector<1x8x512xf32>
    %363 = vector.shape_cast %362 : vector<1x8x512xf32> to vector<8x512xf32>
    %364 = arith.mulf %361, %363 : vector<8x512xf32>
    %365 = arith.truncf %364 : vector<8x512xf32> to vector<8x512xbf16>
    %c16_393 = arith.constant 16 : index
    %c0_394 = arith.constant 0 : index
    %366 = vector.load %arg6[%c16_393, %c0_394] : memref<72x512xbf16, #tpu.memory_space<vmem>>, vector<8x512xbf16>
    tpu.vector_store %arg6[%c16_393, %c0_394], %365 {strides = array<i32>} : memref<72x512xbf16, #tpu.memory_space<vmem>>, vector<8x512xbf16>,
    %c0_395 = arith.constant 0 : index
    %c63_396 = arith.constant 63 : index
    %367 = vector.load %arg5[%c0_395, %c63_396] : memref<8x768xf32, #tpu.memory_space<vmem>>, vector<8x512xf32>
    %c3_397 = arith.constant 3 : index
    %c0_398 = arith.constant 0 : index
    %c0_399 = arith.constant 0 : index
    %368 = vector.load %arg2[%c3_397, %c0_398, %c0_399] : memref<9x8x512xf32, #tpu.memory_space<vmem>>, vector<1x8x512xf32>
    %369 = vector.shape_cast %368 : vector<1x8x512xf32> to vector<8x512xf32>
    %370 = arith.mulf %367, %369 : vector<8x512xf32>
    %371 = arith.truncf %370 : vector<8x512xf32> to vector<8x512xbf16>
    %c24_400 = arith.constant 24 : index
    %c0_401 = arith.constant 0 : index
    %372 = vector.load %arg6[%c24_400, %c0_401] : memref<72x512xbf16, #tpu.memory_space<vmem>>, vector<8x512xbf16>
    tpu.vector_store %arg6[%c24_400, %c0_401], %371 {strides = array<i32>} : memref<72x512xbf16, #tpu.memory_space<vmem>>, vector<8x512xbf16>,
    %c0_402 = arith.constant 0 : index
    %c64_403 = arith.constant 64 : index
    %373 = vector.load %arg5[%c0_402, %c64_403] : memref<8x768xf32, #tpu.memory_space<vmem>>, vector<8x512xf32>
    %374 = arith.truncf %373 : vector<8x512xf32> to vector<8x512xbf16>
    %c32_404 = arith.constant 32 : index
    %c0_405 = arith.constant 0 : index
    %375 = vector.load %arg6[%c32_404, %c0_405] : memref<72x512xbf16, #tpu.memory_space<vmem>>, vector<8x512xbf16>
    tpu.vector_store %arg6[%c32_404, %c0_405], %374 {strides = array<i32>} : memref<72x512xbf16, #tpu.memory_space<vmem>>, vector<8x512xbf16>,
    %c0_406 = arith.constant 0 : index
    %c65_407 = arith.constant 65 : index
    %376 = vector.load %arg5[%c0_406, %c65_407] : memref<8x768xf32, #tpu.memory_space<vmem>>, vector<8x512xf32>
    %c5_408 = arith.constant 5 : index
    %c0_409 = arith.constant 0 : index
    %c0_410 = arith.constant 0 : index
    %377 = vector.load %arg2[%c5_408, %c0_409, %c0_410] : memref<9x8x512xf32, #tpu.memory_space<vmem>>, vector<1x8x512xf32>
    %378 = vector.shape_cast %377 : vector<1x8x512xf32> to vector<8x512xf32>
    %379 = arith.mulf %376, %378 : vector<8x512xf32>
    %380 = arith.truncf %379 : vector<8x512xf32> to vector<8x512xbf16>
    %c40_411 = arith.constant 40 : index
    %c0_412 = arith.constant 0 : index
    %381 = vector.load %arg6[%c40_411, %c0_412] : memref<72x512xbf16, #tpu.memory_space<vmem>>, vector<8x512xbf16>
    tpu.vector_store %arg6[%c40_411, %c0_412], %380 {strides = array<i32>} : memref<72x512xbf16, #tpu.memory_space<vmem>>, vector<8x512xbf16>,
    %c0_413 = arith.constant 0 : index
    %c71_414 = arith.constant 71 : index
    %382 = vector.load %arg5[%c0_413, %c71_414] : memref<8x768xf32, #tpu.memory_space<vmem>>, vector<8x512xf32>
    %c6_415 = arith.constant 6 : index
    %c0_416 = arith.constant 0 : index
    %c0_417 = arith.constant 0 : index
    %383 = vector.load %arg2[%c6_415, %c0_416, %c0_417] : memref<9x8x512xf32, #tpu.memory_space<vmem>>, vector<1x8x512xf32>
    %384 = vector.shape_cast %383 : vector<1x8x512xf32> to vector<8x512xf32>
    %385 = arith.mulf %382, %384 : vector<8x512xf32>
    %386 = arith.truncf %385 : vector<8x512xf32> to vector<8x512xbf16>
    %c48_418 = arith.constant 48 : index
    %c0_419 = arith.constant 0 : index
    %387 = vector.load %arg6[%c48_418, %c0_419] : memref<72x512xbf16, #tpu.memory_space<vmem>>, vector<8x512xbf16>
    tpu.vector_store %arg6[%c48_418, %c0_419], %386 {strides = array<i32>} : memref<72x512xbf16, #tpu.memory_space<vmem>>, vector<8x512xbf16>,
    %c0_420 = arith.constant 0 : index
    %c72_421 = arith.constant 72 : index
    %388 = vector.load %arg5[%c0_420, %c72_421] : memref<8x768xf32, #tpu.memory_space<vmem>>, vector<8x512xf32>
    %c7_422 = arith.constant 7 : index
    %c0_423 = arith.constant 0 : index
    %c0_424 = arith.constant 0 : index
    %389 = vector.load %arg2[%c7_422, %c0_423, %c0_424] : memref<9x8x512xf32, #tpu.memory_space<vmem>>, vector<1x8x512xf32>
    %390 = vector.shape_cast %389 : vector<1x8x512xf32> to vector<8x512xf32>
    %391 = arith.mulf %388, %390 : vector<8x512xf32>
    %392 = arith.truncf %391 : vector<8x512xf32> to vector<8x512xbf16>
    %c56_425 = arith.constant 56 : index
    %c0_426 = arith.constant 0 : index
    %393 = vector.load %arg6[%c56_425, %c0_426] : memref<72x512xbf16, #tpu.memory_space<vmem>>, vector<8x512xbf16>
    tpu.vector_store %arg6[%c56_425, %c0_426], %392 {strides = array<i32>} : memref<72x512xbf16, #tpu.memory_space<vmem>>, vector<8x512xbf16>,
    %c0_427 = arith.constant 0 : index
    %c73_428 = arith.constant 73 : index
    %394 = vector.load %arg5[%c0_427, %c73_428] : memref<8x768xf32, #tpu.memory_space<vmem>>, vector<8x512xf32>
    %c8_429 = arith.constant 8 : index
    %c0_430 = arith.constant 0 : index
    %c0_431 = arith.constant 0 : index
    %395 = vector.load %arg2[%c8_429, %c0_430, %c0_431] : memref<9x8x512xf32, #tpu.memory_space<vmem>>, vector<1x8x512xf32>
    %396 = vector.shape_cast %395 : vector<1x8x512xf32> to vector<8x512xf32>
    %397 = arith.mulf %394, %396 : vector<8x512xf32>
    %398 = arith.truncf %397 : vector<8x512xf32> to vector<8x512xbf16>
    %c64_432 = arith.constant 64 : index
    %c0_433 = arith.constant 0 : index
    %399 = vector.load %arg6[%c64_432, %c0_433] : memref<72x512xbf16, #tpu.memory_space<vmem>>, vector<8x512xbf16>
    tpu.vector_store %arg6[%c64_432, %c0_433], %398 {strides = array<i32>} : memref<72x512xbf16, #tpu.memory_space<vmem>>, vector<8x512xbf16>,
    %c2_434 = arith.constant 2 : index
    %c0_435 = arith.constant 0 : index
    %c0_436 = arith.constant 0 : index
    %c0_437 = arith.constant 0 : index
    %400 = vector.load %arg1[%c2_434, %c0_435, %c0_436, %c0_437] : memref<4x3x8x72xbf16, #tpu.memory_space<vmem>>, vector<1x1x8x72xbf16>
    %401 = vector.shape_cast %400 : vector<1x1x8x72xbf16> to vector<8x72xbf16>
    %c0_438 = arith.constant 0 : index
    %c0_439 = arith.constant 0 : index
    %402 = vector.load %arg6[%c0_438, %c0_439] : memref<72x512xbf16, #tpu.memory_space<vmem>>, vector<72x512xbf16>
    %cst_440 = arith.constant dense<0.000000e+00> : vector<8x512xf32>
    %403 = tpu.matmul %401, %402, %cst_440 {dimension_numbers = #tpu.dot_dimension_numbers<[1], [0], [0], [1], [0, 0, 1, 1], [], []>} : vector<8x72xbf16>, vector<72x512xbf16>, vector<8x512xf32> -> vector<8x512xf32>
    %c0_441 = arith.constant 0 : index
    %c119_442 = arith.constant 119 : index
    %404 = vector.load %arg5[%c0_441, %c119_442] : memref<8x768xf32, #tpu.memory_space<vmem>>, vector<8x512xf32>
    %c0_443 = arith.constant 0 : index
    %c0_444 = arith.constant 0 : index
    %c0_445 = arith.constant 0 : index
    %405 = vector.load %arg2[%c0_443, %c0_444, %c0_445] : memref<9x8x512xf32, #tpu.memory_space<vmem>>, vector<1x8x512xf32>
    %406 = vector.shape_cast %405 : vector<1x8x512xf32> to vector<8x512xf32>
    %407 = arith.mulf %404, %406 : vector<8x512xf32>
    %408 = arith.truncf %407 : vector<8x512xf32> to vector<8x512xbf16>
    %c0_446 = arith.constant 0 : index
    %c0_447 = arith.constant 0 : index
    %409 = vector.load %arg7[%c0_446, %c0_447] : memref<72x512xbf16, #tpu.memory_space<vmem>>, vector<8x512xbf16>
    tpu.vector_store %arg7[%c0_446, %c0_447], %408 {strides = array<i32>} : memref<72x512xbf16, #tpu.memory_space<vmem>>, vector<8x512xbf16>,
    %c0_448 = arith.constant 0 : index
    %c120_449 = arith.constant 120 : index
    %410 = vector.load %arg5[%c0_448, %c120_449] : memref<8x768xf32, #tpu.memory_space<vmem>>, vector<8x512xf32>
    %c1_450 = arith.constant 1 : index
    %c0_451 = arith.constant 0 : index
    %c0_452 = arith.constant 0 : index
    %411 = vector.load %arg2[%c1_450, %c0_451, %c0_452] : memref<9x8x512xf32, #tpu.memory_space<vmem>>, vector<1x8x512xf32>
    %412 = vector.shape_cast %411 : vector<1x8x512xf32> to vector<8x512xf32>
    %413 = arith.mulf %410, %412 : vector<8x512xf32>
    %414 = arith.truncf %413 : vector<8x512xf32> to vector<8x512xbf16>
    %c8_453 = arith.constant 8 : index
    %c0_454 = arith.constant 0 : index
    %415 = vector.load %arg7[%c8_453, %c0_454] : memref<72x512xbf16, #tpu.memory_space<vmem>>, vector<8x512xbf16>
    tpu.vector_store %arg7[%c8_453, %c0_454], %414 {strides = array<i32>} : memref<72x512xbf16, #tpu.memory_space<vmem>>, vector<8x512xbf16>,
    %c0_455 = arith.constant 0 : index
    %c121_456 = arith.constant 121 : index
    %416 = vector.load %arg5[%c0_455, %c121_456] : memref<8x768xf32, #tpu.memory_space<vmem>>, vector<8x512xf32>
    %c2_457 = arith.constant 2 : index
    %c0_458 = arith.constant 0 : index
    %c0_459 = arith.constant 0 : index
    %417 = vector.load %arg2[%c2_457, %c0_458, %c0_459] : memref<9x8x512xf32, #tpu.memory_space<vmem>>, vector<1x8x512xf32>
    %418 = vector.shape_cast %417 : vector<1x8x512xf32> to vector<8x512xf32>
    %419 = arith.mulf %416, %418 : vector<8x512xf32>
    %420 = arith.truncf %419 : vector<8x512xf32> to vector<8x512xbf16>
    %c16_460 = arith.constant 16 : index
    %c0_461 = arith.constant 0 : index
    %421 = vector.load %arg7[%c16_460, %c0_461] : memref<72x512xbf16, #tpu.memory_space<vmem>>, vector<8x512xbf16>
    tpu.vector_store %arg7[%c16_460, %c0_461], %420 {strides = array<i32>} : memref<72x512xbf16, #tpu.memory_space<vmem>>, vector<8x512xbf16>,
    %c0_462 = arith.constant 0 : index
    %c127_463 = arith.constant 127 : index
    %422 = vector.load %arg5[%c0_462, %c127_463] : memref<8x768xf32, #tpu.memory_space<vmem>>, vector<8x512xf32>
    %c3_464 = arith.constant 3 : index
    %c0_465 = arith.constant 0 : index
    %c0_466 = arith.constant 0 : index
    %423 = vector.load %arg2[%c3_464, %c0_465, %c0_466] : memref<9x8x512xf32, #tpu.memory_space<vmem>>, vector<1x8x512xf32>
    %424 = vector.shape_cast %423 : vector<1x8x512xf32> to vector<8x512xf32>
    %425 = arith.mulf %422, %424 : vector<8x512xf32>
    %426 = arith.truncf %425 : vector<8x512xf32> to vector<8x512xbf16>
    %c24_467 = arith.constant 24 : index
    %c0_468 = arith.constant 0 : index
    %427 = vector.load %arg7[%c24_467, %c0_468] : memref<72x512xbf16, #tpu.memory_space<vmem>>, vector<8x512xbf16>
    tpu.vector_store %arg7[%c24_467, %c0_468], %426 {strides = array<i32>} : memref<72x512xbf16, #tpu.memory_space<vmem>>, vector<8x512xbf16>,
    %c0_469 = arith.constant 0 : index
    %c128_470 = arith.constant 128 : index
    %428 = vector.load %arg5[%c0_469, %c128_470] : memref<8x768xf32, #tpu.memory_space<vmem>>, vector<8x512xf32>
    %429 = arith.truncf %428 : vector<8x512xf32> to vector<8x512xbf16>
    %c32_471 = arith.constant 32 : index
    %c0_472 = arith.constant 0 : index
    %430 = vector.load %arg7[%c32_471, %c0_472] : memref<72x512xbf16, #tpu.memory_space<vmem>>, vector<8x512xbf16>
    tpu.vector_store %arg7[%c32_471, %c0_472], %429 {strides = array<i32>} : memref<72x512xbf16, #tpu.memory_space<vmem>>, vector<8x512xbf16>,
    %c0_473 = arith.constant 0 : index
    %c129_474 = arith.constant 129 : index
    %431 = vector.load %arg5[%c0_473, %c129_474] : memref<8x768xf32, #tpu.memory_space<vmem>>, vector<8x512xf32>
    %c5_475 = arith.constant 5 : index
    %c0_476 = arith.constant 0 : index
    %c0_477 = arith.constant 0 : index
    %432 = vector.load %arg2[%c5_475, %c0_476, %c0_477] : memref<9x8x512xf32, #tpu.memory_space<vmem>>, vector<1x8x512xf32>
    %433 = vector.shape_cast %432 : vector<1x8x512xf32> to vector<8x512xf32>
    %434 = arith.mulf %431, %433 : vector<8x512xf32>
    %435 = arith.truncf %434 : vector<8x512xf32> to vector<8x512xbf16>
    %c40_478 = arith.constant 40 : index
    %c0_479 = arith.constant 0 : index
    %436 = vector.load %arg7[%c40_478, %c0_479] : memref<72x512xbf16, #tpu.memory_space<vmem>>, vector<8x512xbf16>
    tpu.vector_store %arg7[%c40_478, %c0_479], %435 {strides = array<i32>} : memref<72x512xbf16, #tpu.memory_space<vmem>>, vector<8x512xbf16>,
    %c0_480 = arith.constant 0 : index
    %c135_481 = arith.constant 135 : index
    %437 = vector.load %arg5[%c0_480, %c135_481] : memref<8x768xf32, #tpu.memory_space<vmem>>, vector<8x512xf32>
    %c6_482 = arith.constant 6 : index
    %c0_483 = arith.constant 0 : index
    %c0_484 = arith.constant 0 : index
    %438 = vector.load %arg2[%c6_482, %c0_483, %c0_484] : memref<9x8x512xf32, #tpu.memory_space<vmem>>, vector<1x8x512xf32>
    %439 = vector.shape_cast %438 : vector<1x8x512xf32> to vector<8x512xf32>
    %440 = arith.mulf %437, %439 : vector<8x512xf32>
    %441 = arith.truncf %440 : vector<8x512xf32> to vector<8x512xbf16>
    %c48_485 = arith.constant 48 : index
    %c0_486 = arith.constant 0 : index
    %442 = vector.load %arg7[%c48_485, %c0_486] : memref<72x512xbf16, #tpu.memory_space<vmem>>, vector<8x512xbf16>
    tpu.vector_store %arg7[%c48_485, %c0_486], %441 {strides = array<i32>} : memref<72x512xbf16, #tpu.memory_space<vmem>>, vector<8x512xbf16>,
    %c0_487 = arith.constant 0 : index
    %c136_488 = arith.constant 136 : index
    %443 = vector.load %arg5[%c0_487, %c136_488] : memref<8x768xf32, #tpu.memory_space<vmem>>, vector<8x512xf32>
    %c7_489 = arith.constant 7 : index
    %c0_490 = arith.constant 0 : index
    %c0_491 = arith.constant 0 : index
    %444 = vector.load %arg2[%c7_489, %c0_490, %c0_491] : memref<9x8x512xf32, #tpu.memory_space<vmem>>, vector<1x8x512xf32>
    %445 = vector.shape_cast %444 : vector<1x8x512xf32> to vector<8x512xf32>
    %446 = arith.mulf %443, %445 : vector<8x512xf32>
    %447 = arith.truncf %446 : vector<8x512xf32> to vector<8x512xbf16>
    %c56_492 = arith.constant 56 : index
    %c0_493 = arith.constant 0 : index
    %448 = vector.load %arg7[%c56_492, %c0_493] : memref<72x512xbf16, #tpu.memory_space<vmem>>, vector<8x512xbf16>
    tpu.vector_store %arg7[%c56_492, %c0_493], %447 {strides = array<i32>} : memref<72x512xbf16, #tpu.memory_space<vmem>>, vector<8x512xbf16>,
    %c0_494 = arith.constant 0 : index
    %c137_495 = arith.constant 137 : index
    %449 = vector.load %arg5[%c0_494, %c137_495] : memref<8x768xf32, #tpu.memory_space<vmem>>, vector<8x512xf32>
    %c8_496 = arith.constant 8 : index
    %c0_497 = arith.constant 0 : index
    %c0_498 = arith.constant 0 : index
    %450 = vector.load %arg2[%c8_496, %c0_497, %c0_498] : memref<9x8x512xf32, #tpu.memory_space<vmem>>, vector<1x8x512xf32>
    %451 = vector.shape_cast %450 : vector<1x8x512xf32> to vector<8x512xf32>
    %452 = arith.mulf %449, %451 : vector<8x512xf32>
    %453 = arith.truncf %452 : vector<8x512xf32> to vector<8x512xbf16>
    %c64_499 = arith.constant 64 : index
    %c0_500 = arith.constant 0 : index
    %454 = vector.load %arg7[%c64_499, %c0_500] : memref<72x512xbf16, #tpu.memory_space<vmem>>, vector<8x512xbf16>
    tpu.vector_store %arg7[%c64_499, %c0_500], %453 {strides = array<i32>} : memref<72x512xbf16, #tpu.memory_space<vmem>>, vector<8x512xbf16>,
    %c2_501 = arith.constant 2 : index
    %c1_502 = arith.constant 1 : index
    %c0_503 = arith.constant 0 : index
    %c0_504 = arith.constant 0 : index
    %455 = vector.load %arg1[%c2_501, %c1_502, %c0_503, %c0_504] : memref<4x3x8x72xbf16, #tpu.memory_space<vmem>>, vector<1x1x8x72xbf16>
    %456 = vector.shape_cast %455 : vector<1x1x8x72xbf16> to vector<8x72xbf16>
    %c0_505 = arith.constant 0 : index
    %c0_506 = arith.constant 0 : index
    %457 = vector.load %arg7[%c0_505, %c0_506] : memref<72x512xbf16, #tpu.memory_space<vmem>>, vector<72x512xbf16>
    %cst_507 = arith.constant dense<0.000000e+00> : vector<8x512xf32>
    %458 = tpu.matmul %456, %457, %cst_507 {dimension_numbers = #tpu.dot_dimension_numbers<[1], [0], [0], [1], [0, 0, 1, 1], [], []>} : vector<8x72xbf16>, vector<72x512xbf16>, vector<8x512xf32> -> vector<8x512xf32>
    %459 = arith.addf %403, %458 : vector<8x512xf32>
    %c0_508 = arith.constant 0 : index
    %c183_509 = arith.constant 183 : index
    %460 = vector.load %arg5[%c0_508, %c183_509] : memref<8x768xf32, #tpu.memory_space<vmem>>, vector<8x512xf32>
    %c0_510 = arith.constant 0 : index
    %c0_511 = arith.constant 0 : index
    %c0_512 = arith.constant 0 : index
    %461 = vector.load %arg2[%c0_510, %c0_511, %c0_512] : memref<9x8x512xf32, #tpu.memory_space<vmem>>, vector<1x8x512xf32>
    %462 = vector.shape_cast %461 : vector<1x8x512xf32> to vector<8x512xf32>
    %463 = arith.mulf %460, %462 : vector<8x512xf32>
    %464 = arith.truncf %463 : vector<8x512xf32> to vector<8x512xbf16>
    %c0_513 = arith.constant 0 : index
    %c0_514 = arith.constant 0 : index
    %465 = vector.load %arg6[%c0_513, %c0_514] : memref<72x512xbf16, #tpu.memory_space<vmem>>, vector<8x512xbf16>
    tpu.vector_store %arg6[%c0_513, %c0_514], %464 {strides = array<i32>} : memref<72x512xbf16, #tpu.memory_space<vmem>>, vector<8x512xbf16>,
    %c0_515 = arith.constant 0 : index
    %c184_516 = arith.constant 184 : index
    %466 = vector.load %arg5[%c0_515, %c184_516] : memref<8x768xf32, #tpu.memory_space<vmem>>, vector<8x512xf32>
    %c1_517 = arith.constant 1 : index
    %c0_518 = arith.constant 0 : index
    %c0_519 = arith.constant 0 : index
    %467 = vector.load %arg2[%c1_517, %c0_518, %c0_519] : memref<9x8x512xf32, #tpu.memory_space<vmem>>, vector<1x8x512xf32>
    %468 = vector.shape_cast %467 : vector<1x8x512xf32> to vector<8x512xf32>
    %469 = arith.mulf %466, %468 : vector<8x512xf32>
    %470 = arith.truncf %469 : vector<8x512xf32> to vector<8x512xbf16>
    %c8_520 = arith.constant 8 : index
    %c0_521 = arith.constant 0 : index
    %471 = vector.load %arg6[%c8_520, %c0_521] : memref<72x512xbf16, #tpu.memory_space<vmem>>, vector<8x512xbf16>
    tpu.vector_store %arg6[%c8_520, %c0_521], %470 {strides = array<i32>} : memref<72x512xbf16, #tpu.memory_space<vmem>>, vector<8x512xbf16>,
    %c0_522 = arith.constant 0 : index
    %c185_523 = arith.constant 185 : index
    %472 = vector.load %arg5[%c0_522, %c185_523] : memref<8x768xf32, #tpu.memory_space<vmem>>, vector<8x512xf32>
    %c2_524 = arith.constant 2 : index
    %c0_525 = arith.constant 0 : index
    %c0_526 = arith.constant 0 : index
    %473 = vector.load %arg2[%c2_524, %c0_525, %c0_526] : memref<9x8x512xf32, #tpu.memory_space<vmem>>, vector<1x8x512xf32>
    %474 = vector.shape_cast %473 : vector<1x8x512xf32> to vector<8x512xf32>
    %475 = arith.mulf %472, %474 : vector<8x512xf32>
    %476 = arith.truncf %475 : vector<8x512xf32> to vector<8x512xbf16>
    %c16_527 = arith.constant 16 : index
    %c0_528 = arith.constant 0 : index
    %477 = vector.load %arg6[%c16_527, %c0_528] : memref<72x512xbf16, #tpu.memory_space<vmem>>, vector<8x512xbf16>
    tpu.vector_store %arg6[%c16_527, %c0_528], %476 {strides = array<i32>} : memref<72x512xbf16, #tpu.memory_space<vmem>>, vector<8x512xbf16>,
    %c0_529 = arith.constant 0 : index
    %c191_530 = arith.constant 191 : index
    %478 = vector.load %arg5[%c0_529, %c191_530] : memref<8x768xf32, #tpu.memory_space<vmem>>, vector<8x512xf32>
    %c3_531 = arith.constant 3 : index
    %c0_532 = arith.constant 0 : index
    %c0_533 = arith.constant 0 : index
    %479 = vector.load %arg2[%c3_531, %c0_532, %c0_533] : memref<9x8x512xf32, #tpu.memory_space<vmem>>, vector<1x8x512xf32>
    %480 = vector.shape_cast %479 : vector<1x8x512xf32> to vector<8x512xf32>
    %481 = arith.mulf %478, %480 : vector<8x512xf32>
    %482 = arith.truncf %481 : vector<8x512xf32> to vector<8x512xbf16>
    %c24_534 = arith.constant 24 : index
    %c0_535 = arith.constant 0 : index
    %483 = vector.load %arg6[%c24_534, %c0_535] : memref<72x512xbf16, #tpu.memory_space<vmem>>, vector<8x512xbf16>
    tpu.vector_store %arg6[%c24_534, %c0_535], %482 {strides = array<i32>} : memref<72x512xbf16, #tpu.memory_space<vmem>>, vector<8x512xbf16>,
    %c0_536 = arith.constant 0 : index
    %c192_537 = arith.constant 192 : index
    %484 = vector.load %arg5[%c0_536, %c192_537] : memref<8x768xf32, #tpu.memory_space<vmem>>, vector<8x512xf32>
    %485 = arith.truncf %484 : vector<8x512xf32> to vector<8x512xbf16>
    %c32_538 = arith.constant 32 : index
    %c0_539 = arith.constant 0 : index
    %486 = vector.load %arg6[%c32_538, %c0_539] : memref<72x512xbf16, #tpu.memory_space<vmem>>, vector<8x512xbf16>
    tpu.vector_store %arg6[%c32_538, %c0_539], %485 {strides = array<i32>} : memref<72x512xbf16, #tpu.memory_space<vmem>>, vector<8x512xbf16>,
    %c0_540 = arith.constant 0 : index
    %c193_541 = arith.constant 193 : index
    %487 = vector.load %arg5[%c0_540, %c193_541] : memref<8x768xf32, #tpu.memory_space<vmem>>, vector<8x512xf32>
    %c5_542 = arith.constant 5 : index
    %c0_543 = arith.constant 0 : index
    %c0_544 = arith.constant 0 : index
    %488 = vector.load %arg2[%c5_542, %c0_543, %c0_544] : memref<9x8x512xf32, #tpu.memory_space<vmem>>, vector<1x8x512xf32>
    %489 = vector.shape_cast %488 : vector<1x8x512xf32> to vector<8x512xf32>
    %490 = arith.mulf %487, %489 : vector<8x512xf32>
    %491 = arith.truncf %490 : vector<8x512xf32> to vector<8x512xbf16>
    %c40_545 = arith.constant 40 : index
    %c0_546 = arith.constant 0 : index
    %492 = vector.load %arg6[%c40_545, %c0_546] : memref<72x512xbf16, #tpu.memory_space<vmem>>, vector<8x512xbf16>
    tpu.vector_store %arg6[%c40_545, %c0_546], %491 {strides = array<i32>} : memref<72x512xbf16, #tpu.memory_space<vmem>>, vector<8x512xbf16>,
    %c0_547 = arith.constant 0 : index
    %c199_548 = arith.constant 199 : index
    %493 = vector.load %arg5[%c0_547, %c199_548] : memref<8x768xf32, #tpu.memory_space<vmem>>, vector<8x512xf32>
    %c6_549 = arith.constant 6 : index
    %c0_550 = arith.constant 0 : index
    %c0_551 = arith.constant 0 : index
    %494 = vector.load %arg2[%c6_549, %c0_550, %c0_551] : memref<9x8x512xf32, #tpu.memory_space<vmem>>, vector<1x8x512xf32>
    %495 = vector.shape_cast %494 : vector<1x8x512xf32> to vector<8x512xf32>
    %496 = arith.mulf %493, %495 : vector<8x512xf32>
    %497 = arith.truncf %496 : vector<8x512xf32> to vector<8x512xbf16>
    %c48_552 = arith.constant 48 : index
    %c0_553 = arith.constant 0 : index
    %498 = vector.load %arg6[%c48_552, %c0_553] : memref<72x512xbf16, #tpu.memory_space<vmem>>, vector<8x512xbf16>
    tpu.vector_store %arg6[%c48_552, %c0_553], %497 {strides = array<i32>} : memref<72x512xbf16, #tpu.memory_space<vmem>>, vector<8x512xbf16>,
    %c0_554 = arith.constant 0 : index
    %c200_555 = arith.constant 200 : index
    %499 = vector.load %arg5[%c0_554, %c200_555] : memref<8x768xf32, #tpu.memory_space<vmem>>, vector<8x512xf32>
    %c7_556 = arith.constant 7 : index
    %c0_557 = arith.constant 0 : index
    %c0_558 = arith.constant 0 : index
    %500 = vector.load %arg2[%c7_556, %c0_557, %c0_558] : memref<9x8x512xf32, #tpu.memory_space<vmem>>, vector<1x8x512xf32>
    %501 = vector.shape_cast %500 : vector<1x8x512xf32> to vector<8x512xf32>
    %502 = arith.mulf %499, %501 : vector<8x512xf32>
    %503 = arith.truncf %502 : vector<8x512xf32> to vector<8x512xbf16>
    %c56_559 = arith.constant 56 : index
    %c0_560 = arith.constant 0 : index
    %504 = vector.load %arg6[%c56_559, %c0_560] : memref<72x512xbf16, #tpu.memory_space<vmem>>, vector<8x512xbf16>
    tpu.vector_store %arg6[%c56_559, %c0_560], %503 {strides = array<i32>} : memref<72x512xbf16, #tpu.memory_space<vmem>>, vector<8x512xbf16>,
    %c0_561 = arith.constant 0 : index
    %c201_562 = arith.constant 201 : index
    %505 = vector.load %arg5[%c0_561, %c201_562] : memref<8x768xf32, #tpu.memory_space<vmem>>, vector<8x512xf32>
    %c8_563 = arith.constant 8 : index
    %c0_564 = arith.constant 0 : index
    %c0_565 = arith.constant 0 : index
    %506 = vector.load %arg2[%c8_563, %c0_564, %c0_565] : memref<9x8x512xf32, #tpu.memory_space<vmem>>, vector<1x8x512xf32>
    %507 = vector.shape_cast %506 : vector<1x8x512xf32> to vector<8x512xf32>
    %508 = arith.mulf %505, %507 : vector<8x512xf32>
    %509 = arith.truncf %508 : vector<8x512xf32> to vector<8x512xbf16>
    %c64_566 = arith.constant 64 : index
    %c0_567 = arith.constant 0 : index
    %510 = vector.load %arg6[%c64_566, %c0_567] : memref<72x512xbf16, #tpu.memory_space<vmem>>, vector<8x512xbf16>
    tpu.vector_store %arg6[%c64_566, %c0_567], %509 {strides = array<i32>} : memref<72x512xbf16, #tpu.memory_space<vmem>>, vector<8x512xbf16>,
    %c2_568 = arith.constant 2 : index
    %c2_569 = arith.constant 2 : index
    %c0_570 = arith.constant 0 : index
    %c0_571 = arith.constant 0 : index
    %511 = vector.load %arg1[%c2_568, %c2_569, %c0_570, %c0_571] : memref<4x3x8x72xbf16, #tpu.memory_space<vmem>>, vector<1x1x8x72xbf16>
    %512 = vector.shape_cast %511 : vector<1x1x8x72xbf16> to vector<8x72xbf16>
    %c0_572 = arith.constant 0 : index
    %c0_573 = arith.constant 0 : index
    %513 = vector.load %arg6[%c0_572, %c0_573] : memref<72x512xbf16, #tpu.memory_space<vmem>>, vector<72x512xbf16>
    %cst_574 = arith.constant dense<0.000000e+00> : vector<8x512xf32>
    %514 = tpu.matmul %512, %513, %cst_574 {dimension_numbers = #tpu.dot_dimension_numbers<[1], [0], [0], [1], [0, 0, 1, 1], [], []>} : vector<8x72xbf16>, vector<72x512xbf16>, vector<8x512xf32> -> vector<8x512xf32>
    %515 = arith.addf %459, %514 : vector<8x512xf32>
    %cst_575 = arith.constant 0.000000e+00 : f32
    %516 = vector.broadcast %cst_575 : f32 to vector<8x512xf32>
    %517 = arith.maximumf %515, %516 : vector<8x512xf32>
    %c0_576 = arith.constant 0 : index
    %c128_577 = arith.constant 128 : index
    %518 = vector.load %arg5[%c0_576, %c128_577] : memref<8x768xf32, #tpu.memory_space<vmem>>, vector<8x512xf32>
    tpu.vector_store %arg5[%c0_576, %c128_577], %517 {strides = array<i32>} : memref<8x768xf32, #tpu.memory_space<vmem>>, vector<8x512xf32>,
    %c0_578 = arith.constant 0 : index
    %c55_579 = arith.constant 55 : index
    %519 = vector.load %arg5[%c0_578, %c55_579] : memref<8x768xf32, #tpu.memory_space<vmem>>, vector<8x512xf32>
    %c0_580 = arith.constant 0 : index
    %c0_581 = arith.constant 0 : index
    %c0_582 = arith.constant 0 : index
    %520 = vector.load %arg2[%c0_580, %c0_581, %c0_582] : memref<9x8x512xf32, #tpu.memory_space<vmem>>, vector<1x8x512xf32>
    %521 = vector.shape_cast %520 : vector<1x8x512xf32> to vector<8x512xf32>
    %522 = arith.mulf %519, %521 : vector<8x512xf32>
    %523 = arith.truncf %522 : vector<8x512xf32> to vector<8x512xbf16>
    %c0_583 = arith.constant 0 : index
    %c0_584 = arith.constant 0 : index
    %524 = vector.load %arg7[%c0_583, %c0_584] : memref<72x512xbf16, #tpu.memory_space<vmem>>, vector<8x512xbf16>
    tpu.vector_store %arg7[%c0_583, %c0_584], %523 {strides = array<i32>} : memref<72x512xbf16, #tpu.memory_space<vmem>>, vector<8x512xbf16>,
    %c0_585 = arith.constant 0 : index
    %c56_586 = arith.constant 56 : index
    %525 = vector.load %arg5[%c0_585, %c56_586] : memref<8x768xf32, #tpu.memory_space<vmem>>, vector<8x512xf32>
    %c1_587 = arith.constant 1 : index
    %c0_588 = arith.constant 0 : index
    %c0_589 = arith.constant 0 : index
    %526 = vector.load %arg2[%c1_587, %c0_588, %c0_589] : memref<9x8x512xf32, #tpu.memory_space<vmem>>, vector<1x8x512xf32>
    %527 = vector.shape_cast %526 : vector<1x8x512xf32> to vector<8x512xf32>
    %528 = arith.mulf %525, %527 : vector<8x512xf32>
    %529 = arith.truncf %528 : vector<8x512xf32> to vector<8x512xbf16>
    %c8_590 = arith.constant 8 : index
    %c0_591 = arith.constant 0 : index
    %530 = vector.load %arg7[%c8_590, %c0_591] : memref<72x512xbf16, #tpu.memory_space<vmem>>, vector<8x512xbf16>
    tpu.vector_store %arg7[%c8_590, %c0_591], %529 {strides = array<i32>} : memref<72x512xbf16, #tpu.memory_space<vmem>>, vector<8x512xbf16>,
    %c0_592 = arith.constant 0 : index
    %c57_593 = arith.constant 57 : index
    %531 = vector.load %arg5[%c0_592, %c57_593] : memref<8x768xf32, #tpu.memory_space<vmem>>, vector<8x512xf32>
    %c2_594 = arith.constant 2 : index
    %c0_595 = arith.constant 0 : index
    %c0_596 = arith.constant 0 : index
    %532 = vector.load %arg2[%c2_594, %c0_595, %c0_596] : memref<9x8x512xf32, #tpu.memory_space<vmem>>, vector<1x8x512xf32>
    %533 = vector.shape_cast %532 : vector<1x8x512xf32> to vector<8x512xf32>
    %534 = arith.mulf %531, %533 : vector<8x512xf32>
    %535 = arith.truncf %534 : vector<8x512xf32> to vector<8x512xbf16>
    %c16_597 = arith.constant 16 : index
    %c0_598 = arith.constant 0 : index
    %536 = vector.load %arg7[%c16_597, %c0_598] : memref<72x512xbf16, #tpu.memory_space<vmem>>, vector<8x512xbf16>
    tpu.vector_store %arg7[%c16_597, %c0_598], %535 {strides = array<i32>} : memref<72x512xbf16, #tpu.memory_space<vmem>>, vector<8x512xbf16>,
    %c0_599 = arith.constant 0 : index
    %c63_600 = arith.constant 63 : index
    %537 = vector.load %arg5[%c0_599, %c63_600] : memref<8x768xf32, #tpu.memory_space<vmem>>, vector<8x512xf32>
    %c3_601 = arith.constant 3 : index
    %c0_602 = arith.constant 0 : index
    %c0_603 = arith.constant 0 : index
    %538 = vector.load %arg2[%c3_601, %c0_602, %c0_603] : memref<9x8x512xf32, #tpu.memory_space<vmem>>, vector<1x8x512xf32>
    %539 = vector.shape_cast %538 : vector<1x8x512xf32> to vector<8x512xf32>
    %540 = arith.mulf %537, %539 : vector<8x512xf32>
    %541 = arith.truncf %540 : vector<8x512xf32> to vector<8x512xbf16>
    %c24_604 = arith.constant 24 : index
    %c0_605 = arith.constant 0 : index
    %542 = vector.load %arg7[%c24_604, %c0_605] : memref<72x512xbf16, #tpu.memory_space<vmem>>, vector<8x512xbf16>
    tpu.vector_store %arg7[%c24_604, %c0_605], %541 {strides = array<i32>} : memref<72x512xbf16, #tpu.memory_space<vmem>>, vector<8x512xbf16>,
    %c0_606 = arith.constant 0 : index
    %c64_607 = arith.constant 64 : index
    %543 = vector.load %arg5[%c0_606, %c64_607] : memref<8x768xf32, #tpu.memory_space<vmem>>, vector<8x512xf32>
    %544 = arith.truncf %543 : vector<8x512xf32> to vector<8x512xbf16>
    %c32_608 = arith.constant 32 : index
    %c0_609 = arith.constant 0 : index
    %545 = vector.load %arg7[%c32_608, %c0_609] : memref<72x512xbf16, #tpu.memory_space<vmem>>, vector<8x512xbf16>
    tpu.vector_store %arg7[%c32_608, %c0_609], %544 {strides = array<i32>} : memref<72x512xbf16, #tpu.memory_space<vmem>>, vector<8x512xbf16>,
    %c0_610 = arith.constant 0 : index
    %c65_611 = arith.constant 65 : index
    %546 = vector.load %arg5[%c0_610, %c65_611] : memref<8x768xf32, #tpu.memory_space<vmem>>, vector<8x512xf32>
    %c5_612 = arith.constant 5 : index
    %c0_613 = arith.constant 0 : index
    %c0_614 = arith.constant 0 : index
    %547 = vector.load %arg2[%c5_612, %c0_613, %c0_614] : memref<9x8x512xf32, #tpu.memory_space<vmem>>, vector<1x8x512xf32>
    %548 = vector.shape_cast %547 : vector<1x8x512xf32> to vector<8x512xf32>
    %549 = arith.mulf %546, %548 : vector<8x512xf32>
    %550 = arith.truncf %549 : vector<8x512xf32> to vector<8x512xbf16>
    %c40_615 = arith.constant 40 : index
    %c0_616 = arith.constant 0 : index
    %551 = vector.load %arg7[%c40_615, %c0_616] : memref<72x512xbf16, #tpu.memory_space<vmem>>, vector<8x512xbf16>
    tpu.vector_store %arg7[%c40_615, %c0_616], %550 {strides = array<i32>} : memref<72x512xbf16, #tpu.memory_space<vmem>>, vector<8x512xbf16>,
    %c0_617 = arith.constant 0 : index
    %c71_618 = arith.constant 71 : index
    %552 = vector.load %arg5[%c0_617, %c71_618] : memref<8x768xf32, #tpu.memory_space<vmem>>, vector<8x512xf32>
    %c6_619 = arith.constant 6 : index
    %c0_620 = arith.constant 0 : index
    %c0_621 = arith.constant 0 : index
    %553 = vector.load %arg2[%c6_619, %c0_620, %c0_621] : memref<9x8x512xf32, #tpu.memory_space<vmem>>, vector<1x8x512xf32>
    %554 = vector.shape_cast %553 : vector<1x8x512xf32> to vector<8x512xf32>
    %555 = arith.mulf %552, %554 : vector<8x512xf32>
    %556 = arith.truncf %555 : vector<8x512xf32> to vector<8x512xbf16>
    %c48_622 = arith.constant 48 : index
    %c0_623 = arith.constant 0 : index
    %557 = vector.load %arg7[%c48_622, %c0_623] : memref<72x512xbf16, #tpu.memory_space<vmem>>, vector<8x512xbf16>
    tpu.vector_store %arg7[%c48_622, %c0_623], %556 {strides = array<i32>} : memref<72x512xbf16, #tpu.memory_space<vmem>>, vector<8x512xbf16>,
    %c0_624 = arith.constant 0 : index
    %c72_625 = arith.constant 72 : index
    %558 = vector.load %arg5[%c0_624, %c72_625] : memref<8x768xf32, #tpu.memory_space<vmem>>, vector<8x512xf32>
    %c7_626 = arith.constant 7 : index
    %c0_627 = arith.constant 0 : index
    %c0_628 = arith.constant 0 : index
    %559 = vector.load %arg2[%c7_626, %c0_627, %c0_628] : memref<9x8x512xf32, #tpu.memory_space<vmem>>, vector<1x8x512xf32>
    %560 = vector.shape_cast %559 : vector<1x8x512xf32> to vector<8x512xf32>
    %561 = arith.mulf %558, %560 : vector<8x512xf32>
    %562 = arith.truncf %561 : vector<8x512xf32> to vector<8x512xbf16>
    %c56_629 = arith.constant 56 : index
    %c0_630 = arith.constant 0 : index
    %563 = vector.load %arg7[%c56_629, %c0_630] : memref<72x512xbf16, #tpu.memory_space<vmem>>, vector<8x512xbf16>
    tpu.vector_store %arg7[%c56_629, %c0_630], %562 {strides = array<i32>} : memref<72x512xbf16, #tpu.memory_space<vmem>>, vector<8x512xbf16>,
    %c0_631 = arith.constant 0 : index
    %c73_632 = arith.constant 73 : index
    %564 = vector.load %arg5[%c0_631, %c73_632] : memref<8x768xf32, #tpu.memory_space<vmem>>, vector<8x512xf32>
    %c8_633 = arith.constant 8 : index
    %c0_634 = arith.constant 0 : index
    %c0_635 = arith.constant 0 : index
    %565 = vector.load %arg2[%c8_633, %c0_634, %c0_635] : memref<9x8x512xf32, #tpu.memory_space<vmem>>, vector<1x8x512xf32>
    %566 = vector.shape_cast %565 : vector<1x8x512xf32> to vector<8x512xf32>
    %567 = arith.mulf %564, %566 : vector<8x512xf32>
    %568 = arith.truncf %567 : vector<8x512xf32> to vector<8x512xbf16>
    %c64_636 = arith.constant 64 : index
    %c0_637 = arith.constant 0 : index
    %569 = vector.load %arg7[%c64_636, %c0_637] : memref<72x512xbf16, #tpu.memory_space<vmem>>, vector<8x512xbf16>
    tpu.vector_store %arg7[%c64_636, %c0_637], %568 {strides = array<i32>} : memref<72x512xbf16, #tpu.memory_space<vmem>>, vector<8x512xbf16>,
    %c3_638 = arith.constant 3 : index
    %c0_639 = arith.constant 0 : index
    %c0_640 = arith.constant 0 : index
    %c0_641 = arith.constant 0 : index
    %570 = vector.load %arg1[%c3_638, %c0_639, %c0_640, %c0_641] : memref<4x3x8x72xbf16, #tpu.memory_space<vmem>>, vector<1x1x8x72xbf16>
    %571 = vector.shape_cast %570 : vector<1x1x8x72xbf16> to vector<8x72xbf16>
    %c0_642 = arith.constant 0 : index
    %c0_643 = arith.constant 0 : index
    %572 = vector.load %arg7[%c0_642, %c0_643] : memref<72x512xbf16, #tpu.memory_space<vmem>>, vector<72x512xbf16>
    %cst_644 = arith.constant dense<0.000000e+00> : vector<8x512xf32>
    %573 = tpu.matmul %571, %572, %cst_644 {dimension_numbers = #tpu.dot_dimension_numbers<[1], [0], [0], [1], [0, 0, 1, 1], [], []>} : vector<8x72xbf16>, vector<72x512xbf16>, vector<8x512xf32> -> vector<8x512xf32>
    %c0_645 = arith.constant 0 : index
    %c119_646 = arith.constant 119 : index
    %574 = vector.load %arg5[%c0_645, %c119_646] : memref<8x768xf32, #tpu.memory_space<vmem>>, vector<8x512xf32>
    %c0_647 = arith.constant 0 : index
    %c0_648 = arith.constant 0 : index
    %c0_649 = arith.constant 0 : index
    %575 = vector.load %arg2[%c0_647, %c0_648, %c0_649] : memref<9x8x512xf32, #tpu.memory_space<vmem>>, vector<1x8x512xf32>
    %576 = vector.shape_cast %575 : vector<1x8x512xf32> to vector<8x512xf32>
    %577 = arith.mulf %574, %576 : vector<8x512xf32>
    %578 = arith.truncf %577 : vector<8x512xf32> to vector<8x512xbf16>
    %c0_650 = arith.constant 0 : index
    %c0_651 = arith.constant 0 : index
    %579 = vector.load %arg6[%c0_650, %c0_651] : memref<72x512xbf16, #tpu.memory_space<vmem>>, vector<8x512xbf16>
    tpu.vector_store %arg6[%c0_650, %c0_651], %578 {strides = array<i32>} : memref<72x512xbf16, #tpu.memory_space<vmem>>, vector<8x512xbf16>,
    %c0_652 = arith.constant 0 : index
    %c120_653 = arith.constant 120 : index
    %580 = vector.load %arg5[%c0_652, %c120_653] : memref<8x768xf32, #tpu.memory_space<vmem>>, vector<8x512xf32>
    %c1_654 = arith.constant 1 : index
    %c0_655 = arith.constant 0 : index
    %c0_656 = arith.constant 0 : index
    %581 = vector.load %arg2[%c1_654, %c0_655, %c0_656] : memref<9x8x512xf32, #tpu.memory_space<vmem>>, vector<1x8x512xf32>
    %582 = vector.shape_cast %581 : vector<1x8x512xf32> to vector<8x512xf32>
    %583 = arith.mulf %580, %582 : vector<8x512xf32>
    %584 = arith.truncf %583 : vector<8x512xf32> to vector<8x512xbf16>
    %c8_657 = arith.constant 8 : index
    %c0_658 = arith.constant 0 : index
    %585 = vector.load %arg6[%c8_657, %c0_658] : memref<72x512xbf16, #tpu.memory_space<vmem>>, vector<8x512xbf16>
    tpu.vector_store %arg6[%c8_657, %c0_658], %584 {strides = array<i32>} : memref<72x512xbf16, #tpu.memory_space<vmem>>, vector<8x512xbf16>,
    %c0_659 = arith.constant 0 : index
    %c121_660 = arith.constant 121 : index
    %586 = vector.load %arg5[%c0_659, %c121_660] : memref<8x768xf32, #tpu.memory_space<vmem>>, vector<8x512xf32>
    %c2_661 = arith.constant 2 : index
    %c0_662 = arith.constant 0 : index
    %c0_663 = arith.constant 0 : index
    %587 = vector.load %arg2[%c2_661, %c0_662, %c0_663] : memref<9x8x512xf32, #tpu.memory_space<vmem>>, vector<1x8x512xf32>
    %588 = vector.shape_cast %587 : vector<1x8x512xf32> to vector<8x512xf32>
    %589 = arith.mulf %586, %588 : vector<8x512xf32>
    %590 = arith.truncf %589 : vector<8x512xf32> to vector<8x512xbf16>
    %c16_664 = arith.constant 16 : index
    %c0_665 = arith.constant 0 : index
    %591 = vector.load %arg6[%c16_664, %c0_665] : memref<72x512xbf16, #tpu.memory_space<vmem>>, vector<8x512xbf16>
    tpu.vector_store %arg6[%c16_664, %c0_665], %590 {strides = array<i32>} : memref<72x512xbf16, #tpu.memory_space<vmem>>, vector<8x512xbf16>,
    %c0_666 = arith.constant 0 : index
    %c127_667 = arith.constant 127 : index
    %592 = vector.load %arg5[%c0_666, %c127_667] : memref<8x768xf32, #tpu.memory_space<vmem>>, vector<8x512xf32>
    %c3_668 = arith.constant 3 : index
    %c0_669 = arith.constant 0 : index
    %c0_670 = arith.constant 0 : index
    %593 = vector.load %arg2[%c3_668, %c0_669, %c0_670] : memref<9x8x512xf32, #tpu.memory_space<vmem>>, vector<1x8x512xf32>
    %594 = vector.shape_cast %593 : vector<1x8x512xf32> to vector<8x512xf32>
    %595 = arith.mulf %592, %594 : vector<8x512xf32>
    %596 = arith.truncf %595 : vector<8x512xf32> to vector<8x512xbf16>
    %c24_671 = arith.constant 24 : index
    %c0_672 = arith.constant 0 : index
    %597 = vector.load %arg6[%c24_671, %c0_672] : memref<72x512xbf16, #tpu.memory_space<vmem>>, vector<8x512xbf16>
    tpu.vector_store %arg6[%c24_671, %c0_672], %596 {strides = array<i32>} : memref<72x512xbf16, #tpu.memory_space<vmem>>, vector<8x512xbf16>,
    %c0_673 = arith.constant 0 : index
    %c128_674 = arith.constant 128 : index
    %598 = vector.load %arg5[%c0_673, %c128_674] : memref<8x768xf32, #tpu.memory_space<vmem>>, vector<8x512xf32>
    %599 = arith.truncf %598 : vector<8x512xf32> to vector<8x512xbf16>
    %c32_675 = arith.constant 32 : index
    %c0_676 = arith.constant 0 : index
    %600 = vector.load %arg6[%c32_675, %c0_676] : memref<72x512xbf16, #tpu.memory_space<vmem>>, vector<8x512xbf16>
    tpu.vector_store %arg6[%c32_675, %c0_676], %599 {strides = array<i32>} : memref<72x512xbf16, #tpu.memory_space<vmem>>, vector<8x512xbf16>,
    %c0_677 = arith.constant 0 : index
    %c129_678 = arith.constant 129 : index
    %601 = vector.load %arg5[%c0_677, %c129_678] : memref<8x768xf32, #tpu.memory_space<vmem>>, vector<8x512xf32>
    %c5_679 = arith.constant 5 : index
    %c0_680 = arith.constant 0 : index
    %c0_681 = arith.constant 0 : index
    %602 = vector.load %arg2[%c5_679, %c0_680, %c0_681] : memref<9x8x512xf32, #tpu.memory_space<vmem>>, vector<1x8x512xf32>
    %603 = vector.shape_cast %602 : vector<1x8x512xf32> to vector<8x512xf32>
    %604 = arith.mulf %601, %603 : vector<8x512xf32>
    %605 = arith.truncf %604 : vector<8x512xf32> to vector<8x512xbf16>
    %c40_682 = arith.constant 40 : index
    %c0_683 = arith.constant 0 : index
    %606 = vector.load %arg6[%c40_682, %c0_683] : memref<72x512xbf16, #tpu.memory_space<vmem>>, vector<8x512xbf16>
    tpu.vector_store %arg6[%c40_682, %c0_683], %605 {strides = array<i32>} : memref<72x512xbf16, #tpu.memory_space<vmem>>, vector<8x512xbf16>,
    %c0_684 = arith.constant 0 : index
    %c135_685 = arith.constant 135 : index
    %607 = vector.load %arg5[%c0_684, %c135_685] : memref<8x768xf32, #tpu.memory_space<vmem>>, vector<8x512xf32>
    %c6_686 = arith.constant 6 : index
    %c0_687 = arith.constant 0 : index
    %c0_688 = arith.constant 0 : index
    %608 = vector.load %arg2[%c6_686, %c0_687, %c0_688] : memref<9x8x512xf32, #tpu.memory_space<vmem>>, vector<1x8x512xf32>
    %609 = vector.shape_cast %608 : vector<1x8x512xf32> to vector<8x512xf32>
    %610 = arith.mulf %607, %609 : vector<8x512xf32>
    %611 = arith.truncf %610 : vector<8x512xf32> to vector<8x512xbf16>
    %c48_689 = arith.constant 48 : index
    %c0_690 = arith.constant 0 : index
    %612 = vector.load %arg6[%c48_689, %c0_690] : memref<72x512xbf16, #tpu.memory_space<vmem>>, vector<8x512xbf16>
    tpu.vector_store %arg6[%c48_689, %c0_690], %611 {strides = array<i32>} : memref<72x512xbf16, #tpu.memory_space<vmem>>, vector<8x512xbf16>,
    %c0_691 = arith.constant 0 : index
    %c136_692 = arith.constant 136 : index
    %613 = vector.load %arg5[%c0_691, %c136_692] : memref<8x768xf32, #tpu.memory_space<vmem>>, vector<8x512xf32>
    %c7_693 = arith.constant 7 : index
    %c0_694 = arith.constant 0 : index
    %c0_695 = arith.constant 0 : index
    %614 = vector.load %arg2[%c7_693, %c0_694, %c0_695] : memref<9x8x512xf32, #tpu.memory_space<vmem>>, vector<1x8x512xf32>
    %615 = vector.shape_cast %614 : vector<1x8x512xf32> to vector<8x512xf32>
    %616 = arith.mulf %613, %615 : vector<8x512xf32>
    %617 = arith.truncf %616 : vector<8x512xf32> to vector<8x512xbf16>
    %c56_696 = arith.constant 56 : index
    %c0_697 = arith.constant 0 : index
    %618 = vector.load %arg6[%c56_696, %c0_697] : memref<72x512xbf16, #tpu.memory_space<vmem>>, vector<8x512xbf16>
    tpu.vector_store %arg6[%c56_696, %c0_697], %617 {strides = array<i32>} : memref<72x512xbf16, #tpu.memory_space<vmem>>, vector<8x512xbf16>,
    %c0_698 = arith.constant 0 : index
    %c137_699 = arith.constant 137 : index
    %619 = vector.load %arg5[%c0_698, %c137_699] : memref<8x768xf32, #tpu.memory_space<vmem>>, vector<8x512xf32>
    %c8_700 = arith.constant 8 : index
    %c0_701 = arith.constant 0 : index
    %c0_702 = arith.constant 0 : index
    %620 = vector.load %arg2[%c8_700, %c0_701, %c0_702] : memref<9x8x512xf32, #tpu.memory_space<vmem>>, vector<1x8x512xf32>
    %621 = vector.shape_cast %620 : vector<1x8x512xf32> to vector<8x512xf32>
    %622 = arith.mulf %619, %621 : vector<8x512xf32>
    %623 = arith.truncf %622 : vector<8x512xf32> to vector<8x512xbf16>
    %c64_703 = arith.constant 64 : index
    %c0_704 = arith.constant 0 : index
    %624 = vector.load %arg6[%c64_703, %c0_704] : memref<72x512xbf16, #tpu.memory_space<vmem>>, vector<8x512xbf16>
    tpu.vector_store %arg6[%c64_703, %c0_704], %623 {strides = array<i32>} : memref<72x512xbf16, #tpu.memory_space<vmem>>, vector<8x512xbf16>,
    %c3_705 = arith.constant 3 : index
    %c1_706 = arith.constant 1 : index
    %c0_707 = arith.constant 0 : index
    %c0_708 = arith.constant 0 : index
    %625 = vector.load %arg1[%c3_705, %c1_706, %c0_707, %c0_708] : memref<4x3x8x72xbf16, #tpu.memory_space<vmem>>, vector<1x1x8x72xbf16>
    %626 = vector.shape_cast %625 : vector<1x1x8x72xbf16> to vector<8x72xbf16>
    %c0_709 = arith.constant 0 : index
    %c0_710 = arith.constant 0 : index
    %627 = vector.load %arg6[%c0_709, %c0_710] : memref<72x512xbf16, #tpu.memory_space<vmem>>, vector<72x512xbf16>
    %cst_711 = arith.constant dense<0.000000e+00> : vector<8x512xf32>
    %628 = tpu.matmul %626, %627, %cst_711 {dimension_numbers = #tpu.dot_dimension_numbers<[1], [0], [0], [1], [0, 0, 1, 1], [], []>} : vector<8x72xbf16>, vector<72x512xbf16>, vector<8x512xf32> -> vector<8x512xf32>
    %629 = arith.addf %573, %628 : vector<8x512xf32>
    %c0_712 = arith.constant 0 : index
    %c183_713 = arith.constant 183 : index
    %630 = vector.load %arg5[%c0_712, %c183_713] : memref<8x768xf32, #tpu.memory_space<vmem>>, vector<8x512xf32>
    %c0_714 = arith.constant 0 : index
    %c0_715 = arith.constant 0 : index
    %c0_716 = arith.constant 0 : index
    %631 = vector.load %arg2[%c0_714, %c0_715, %c0_716] : memref<9x8x512xf32, #tpu.memory_space<vmem>>, vector<1x8x512xf32>
    %632 = vector.shape_cast %631 : vector<1x8x512xf32> to vector<8x512xf32>
    %633 = arith.mulf %630, %632 : vector<8x512xf32>
    %634 = arith.truncf %633 : vector<8x512xf32> to vector<8x512xbf16>
    %c0_717 = arith.constant 0 : index
    %c0_718 = arith.constant 0 : index
    %635 = vector.load %arg7[%c0_717, %c0_718] : memref<72x512xbf16, #tpu.memory_space<vmem>>, vector<8x512xbf16>
    tpu.vector_store %arg7[%c0_717, %c0_718], %634 {strides = array<i32>} : memref<72x512xbf16, #tpu.memory_space<vmem>>, vector<8x512xbf16>,
    %c0_719 = arith.constant 0 : index
    %c184_720 = arith.constant 184 : index
    %636 = vector.load %arg5[%c0_719, %c184_720] : memref<8x768xf32, #tpu.memory_space<vmem>>, vector<8x512xf32>
    %c1_721 = arith.constant 1 : index
    %c0_722 = arith.constant 0 : index
    %c0_723 = arith.constant 0 : index
    %637 = vector.load %arg2[%c1_721, %c0_722, %c0_723] : memref<9x8x512xf32, #tpu.memory_space<vmem>>, vector<1x8x512xf32>
    %638 = vector.shape_cast %637 : vector<1x8x512xf32> to vector<8x512xf32>
    %639 = arith.mulf %636, %638 : vector<8x512xf32>
    %640 = arith.truncf %639 : vector<8x512xf32> to vector<8x512xbf16>
    %c8_724 = arith.constant 8 : index
    %c0_725 = arith.constant 0 : index
    %641 = vector.load %arg7[%c8_724, %c0_725] : memref<72x512xbf16, #tpu.memory_space<vmem>>, vector<8x512xbf16>
    tpu.vector_store %arg7[%c8_724, %c0_725], %640 {strides = array<i32>} : memref<72x512xbf16, #tpu.memory_space<vmem>>, vector<8x512xbf16>,
    %c0_726 = arith.constant 0 : index
    %c185_727 = arith.constant 185 : index
    %642 = vector.load %arg5[%c0_726, %c185_727] : memref<8x768xf32, #tpu.memory_space<vmem>>, vector<8x512xf32>
    %c2_728 = arith.constant 2 : index
    %c0_729 = arith.constant 0 : index
    %c0_730 = arith.constant 0 : index
    %643 = vector.load %arg2[%c2_728, %c0_729, %c0_730] : memref<9x8x512xf32, #tpu.memory_space<vmem>>, vector<1x8x512xf32>
    %644 = vector.shape_cast %643 : vector<1x8x512xf32> to vector<8x512xf32>
    %645 = arith.mulf %642, %644 : vector<8x512xf32>
    %646 = arith.truncf %645 : vector<8x512xf32> to vector<8x512xbf16>
    %c16_731 = arith.constant 16 : index
    %c0_732 = arith.constant 0 : index
    %647 = vector.load %arg7[%c16_731, %c0_732] : memref<72x512xbf16, #tpu.memory_space<vmem>>, vector<8x512xbf16>
    tpu.vector_store %arg7[%c16_731, %c0_732], %646 {strides = array<i32>} : memref<72x512xbf16, #tpu.memory_space<vmem>>, vector<8x512xbf16>,
    %c0_733 = arith.constant 0 : index
    %c191_734 = arith.constant 191 : index
    %648 = vector.load %arg5[%c0_733, %c191_734] : memref<8x768xf32, #tpu.memory_space<vmem>>, vector<8x512xf32>
    %c3_735 = arith.constant 3 : index
    %c0_736 = arith.constant 0 : index
    %c0_737 = arith.constant 0 : index
    %649 = vector.load %arg2[%c3_735, %c0_736, %c0_737] : memref<9x8x512xf32, #tpu.memory_space<vmem>>, vector<1x8x512xf32>
    %650 = vector.shape_cast %649 : vector<1x8x512xf32> to vector<8x512xf32>
    %651 = arith.mulf %648, %650 : vector<8x512xf32>
    %652 = arith.truncf %651 : vector<8x512xf32> to vector<8x512xbf16>
    %c24_738 = arith.constant 24 : index
    %c0_739 = arith.constant 0 : index
    %653 = vector.load %arg7[%c24_738, %c0_739] : memref<72x512xbf16, #tpu.memory_space<vmem>>, vector<8x512xbf16>
    tpu.vector_store %arg7[%c24_738, %c0_739], %652 {strides = array<i32>} : memref<72x512xbf16, #tpu.memory_space<vmem>>, vector<8x512xbf16>,
    %c0_740 = arith.constant 0 : index
    %c192_741 = arith.constant 192 : index
    %654 = vector.load %arg5[%c0_740, %c192_741] : memref<8x768xf32, #tpu.memory_space<vmem>>, vector<8x512xf32>
    %655 = arith.truncf %654 : vector<8x512xf32> to vector<8x512xbf16>
    %c32_742 = arith.constant 32 : index
    %c0_743 = arith.constant 0 : index
    %656 = vector.load %arg7[%c32_742, %c0_743] : memref<72x512xbf16, #tpu.memory_space<vmem>>, vector<8x512xbf16>
    tpu.vector_store %arg7[%c32_742, %c0_743], %655 {strides = array<i32>} : memref<72x512xbf16, #tpu.memory_space<vmem>>, vector<8x512xbf16>,
    %c0_744 = arith.constant 0 : index
    %c193_745 = arith.constant 193 : index
    %657 = vector.load %arg5[%c0_744, %c193_745] : memref<8x768xf32, #tpu.memory_space<vmem>>, vector<8x512xf32>
    %c5_746 = arith.constant 5 : index
    %c0_747 = arith.constant 0 : index
    %c0_748 = arith.constant 0 : index
    %658 = vector.load %arg2[%c5_746, %c0_747, %c0_748] : memref<9x8x512xf32, #tpu.memory_space<vmem>>, vector<1x8x512xf32>
    %659 = vector.shape_cast %658 : vector<1x8x512xf32> to vector<8x512xf32>
    %660 = arith.mulf %657, %659 : vector<8x512xf32>
    %661 = arith.truncf %660 : vector<8x512xf32> to vector<8x512xbf16>
    %c40_749 = arith.constant 40 : index
    %c0_750 = arith.constant 0 : index
    %662 = vector.load %arg7[%c40_749, %c0_750] : memref<72x512xbf16, #tpu.memory_space<vmem>>, vector<8x512xbf16>
    tpu.vector_store %arg7[%c40_749, %c0_750], %661 {strides = array<i32>} : memref<72x512xbf16, #tpu.memory_space<vmem>>, vector<8x512xbf16>,
    %c0_751 = arith.constant 0 : index
    %c199_752 = arith.constant 199 : index
    %663 = vector.load %arg5[%c0_751, %c199_752] : memref<8x768xf32, #tpu.memory_space<vmem>>, vector<8x512xf32>
    %c6_753 = arith.constant 6 : index
    %c0_754 = arith.constant 0 : index
    %c0_755 = arith.constant 0 : index
    %664 = vector.load %arg2[%c6_753, %c0_754, %c0_755] : memref<9x8x512xf32, #tpu.memory_space<vmem>>, vector<1x8x512xf32>
    %665 = vector.shape_cast %664 : vector<1x8x512xf32> to vector<8x512xf32>
    %666 = arith.mulf %663, %665 : vector<8x512xf32>
    %667 = arith.truncf %666 : vector<8x512xf32> to vector<8x512xbf16>
    %c48_756 = arith.constant 48 : index
    %c0_757 = arith.constant 0 : index
    %668 = vector.load %arg7[%c48_756, %c0_757] : memref<72x512xbf16, #tpu.memory_space<vmem>>, vector<8x512xbf16>
    tpu.vector_store %arg7[%c48_756, %c0_757], %667 {strides = array<i32>} : memref<72x512xbf16, #tpu.memory_space<vmem>>, vector<8x512xbf16>,
    %c0_758 = arith.constant 0 : index
    %c200_759 = arith.constant 200 : index
    %669 = vector.load %arg5[%c0_758, %c200_759] : memref<8x768xf32, #tpu.memory_space<vmem>>, vector<8x512xf32>
    %c7_760 = arith.constant 7 : index
    %c0_761 = arith.constant 0 : index
    %c0_762 = arith.constant 0 : index
    %670 = vector.load %arg2[%c7_760, %c0_761, %c0_762] : memref<9x8x512xf32, #tpu.memory_space<vmem>>, vector<1x8x512xf32>
    %671 = vector.shape_cast %670 : vector<1x8x512xf32> to vector<8x512xf32>
    %672 = arith.mulf %669, %671 : vector<8x512xf32>
    %673 = arith.truncf %672 : vector<8x512xf32> to vector<8x512xbf16>
    %c56_763 = arith.constant 56 : index
    %c0_764 = arith.constant 0 : index
    %674 = vector.load %arg7[%c56_763, %c0_764] : memref<72x512xbf16, #tpu.memory_space<vmem>>, vector<8x512xbf16>
    tpu.vector_store %arg7[%c56_763, %c0_764], %673 {strides = array<i32>} : memref<72x512xbf16, #tpu.memory_space<vmem>>, vector<8x512xbf16>,
    %c0_765 = arith.constant 0 : index
    %c201_766 = arith.constant 201 : index
    %675 = vector.load %arg5[%c0_765, %c201_766] : memref<8x768xf32, #tpu.memory_space<vmem>>, vector<8x512xf32>
    %c8_767 = arith.constant 8 : index
    %c0_768 = arith.constant 0 : index
    %c0_769 = arith.constant 0 : index
    %676 = vector.load %arg2[%c8_767, %c0_768, %c0_769] : memref<9x8x512xf32, #tpu.memory_space<vmem>>, vector<1x8x512xf32>
    %677 = vector.shape_cast %676 : vector<1x8x512xf32> to vector<8x512xf32>
    %678 = arith.mulf %675, %677 : vector<8x512xf32>
    %679 = arith.truncf %678 : vector<8x512xf32> to vector<8x512xbf16>
    %c64_770 = arith.constant 64 : index
    %c0_771 = arith.constant 0 : index
    %680 = vector.load %arg7[%c64_770, %c0_771] : memref<72x512xbf16, #tpu.memory_space<vmem>>, vector<8x512xbf16>
    tpu.vector_store %arg7[%c64_770, %c0_771], %679 {strides = array<i32>} : memref<72x512xbf16, #tpu.memory_space<vmem>>, vector<8x512xbf16>,
    %c3_772 = arith.constant 3 : index
    %c2_773 = arith.constant 2 : index
    %c0_774 = arith.constant 0 : index
    %c0_775 = arith.constant 0 : index
    %681 = vector.load %arg1[%c3_772, %c2_773, %c0_774, %c0_775] : memref<4x3x8x72xbf16, #tpu.memory_space<vmem>>, vector<1x1x8x72xbf16>
    %682 = vector.shape_cast %681 : vector<1x1x8x72xbf16> to vector<8x72xbf16>
    %c0_776 = arith.constant 0 : index
    %c0_777 = arith.constant 0 : index
    %683 = vector.load %arg7[%c0_776, %c0_777] : memref<72x512xbf16, #tpu.memory_space<vmem>>, vector<72x512xbf16>
    %cst_778 = arith.constant dense<0.000000e+00> : vector<8x512xf32>
    %684 = tpu.matmul %682, %683, %cst_778 {dimension_numbers = #tpu.dot_dimension_numbers<[1], [0], [0], [1], [0, 0, 1, 1], [], []>} : vector<8x72xbf16>, vector<72x512xbf16>, vector<8x512xf32> -> vector<8x512xf32>
    %685 = arith.addf %629, %684 : vector<8x512xf32>
    %686 = arith.addf %685, %345 : vector<8x512xf32>
    %c0_779 = arith.constant 0 : index
    %c0_780 = arith.constant 0 : index
    %c0_781 = arith.constant 0 : index
    %687 = vector.load %arg4[%c0_779, %c0_780, %c0_781] : memref<1x8x512xf32, #tpu.memory_space<vmem>>, vector<1x8x512xf32>
    %688 = vector.shape_cast %687 : vector<1x8x512xf32> to vector<8x512xf32>
    %689 = vector.shape_cast %686 : vector<8x512xf32> to vector<1x8x512xf32>
    tpu.vector_store %arg4[%c0_779, %c0_780, %c0_781], %689 {strides = array<i32>} : memref<1x8x512xf32, #tpu.memory_space<vmem>>, vector<1x8x512xf32>,
    return
  }
  func.func @transform_0(%arg0: i32) -> (i32, i32, i32, i32) {
    %c0_i32 = arith.constant 0 : i32
    %c0_i32_0 = arith.constant 0 : i32
    %c0_i32_1 = arith.constant 0 : i32
    %c0_i32_2 = arith.constant 0 : i32
    %c0_i32_3 = arith.constant 0 : i32
    return %c0_i32, %c0_i32_0, %c0_i32_1, %c0_i32_2 : i32, i32, i32, i32
  }
  func.func @transform_1(%arg0: i32) -> (i32, i32, i32) {
    %c0_i32 = arith.constant 0 : i32
    %c0_i32_0 = arith.constant 0 : i32
    %c0_i32_1 = arith.constant 0 : i32
    %c0_i32_2 = arith.constant 0 : i32
    return %c0_i32, %c0_i32_0, %c0_i32_1 : i32, i32, i32
  }
  func.func @transform_2(%arg0: i32) -> (i32, i32, i32) {
    %c0_i32 = arith.constant 0 : i32
    %c0_i32_0 = arith.constant 0 : i32
    %c0_i32_1 = arith.constant 0 : i32
    return %arg0, %c0_i32, %c0_i32_0 : i32, i32, i32
  }
  func.func @transform_3(%arg0: i32) -> (i32, i32, i32) {
    %c0_i32 = arith.constant 0 : i32
    %c0_i32_0 = arith.constant 0 : i32
    %c0_i32_1 = arith.constant 0 : i32
    return %arg0, %c0_i32, %c0_i32_0 : i32, i32, i32
  }
}

</mosaic_0001>

<bundles_post_ra>
// kernel: rcu_block.1
= control target key start
LH: loop header
LB: loop body
LE: loop exit
PB: predicated region body
PF: predicated region fallthrough
CT: control target
= control target key end

     0   :  { %s11255_s12 = smov 0   ;;  %s17246_s0 = inlined_call_operand.vmem [shape: bf16[4,3,8,72], index: 0, kind: input, shape index: {}]   ;;  %s17247_s1 = inlined_call_operand.vmem [shape: f32[9,8,512], index: 1, kind: input, shape index: {}]   ;;  %s17248_s2 = inlined_call_operand.vmem [shape: f32[2,8,512], index: 2, kind: input, shape index: {}]   ;;  %s17249_s3 = inlined_call_operand.vmem [shape: f32[2,8,512], index: 3, kind: output, shape index: {}]  }
   0x1 LB: > { %s9854_s13 = sadd.s32 4294967295, %s11214_s12   ;;  %p9858_p0 = scmp.ge.s32.totalorder %s11214_s12, 1  ;;  %s11214_s12 = sphi %s11255_s12, %s13_s12  }
   0x2   : > { %p137_p1 = scmp.lt.s32.totalorder %s11214_s12, 3 }
   0x4   : > { %p138_p2 = pnand %p9858_p0, %p137_p1 }
   0x6   : > { %141 = sbr.rel (%p138_p2) target bundleno = 2181 (0x885), region = 32 }
   0xd   : > { %p161_p3 = scmp.lt.s32.totalorder %s9854_s13, 1  ;;  %p9863_p4 = scmp.ne.s32.totalorder %s9854_s13, 0 }
   0xe   : > { %v11216_v0 = vmov (!%p9863_p4), 0.0  }
   0xf   : > { %s162_s14 = scalar_select %p161_p3, %s9854_s13, 1 }
  0x10   : > { %175 = sbr.rel (%p9863_p4) target bundleno = 23 (0x17), region = 36  ;;  %176 = vst [vmem:[#allocation2] sm:$0xff] (!%p9863_p4), %v11216_v0  ;;  %177 = vst [vmem:[#allocation2 + $0x28] sm:$0xff] (!%p9863_p4), %v11216_v0 }
  0x11   : > { %s10821_s15 = sshll.u32 %s162_s14, 5 }
  0x12   : > { %s11266_s18 = scalar_lea.vmem %s17248_s2, %s10821_s15  ;;  %s11271_s21 = scalar_lea.vmem %s17249_s3, %s10821_s15 }
  0x17 PF: > { %v11276_v1 = vld [vmem:[%s17247_s1 + $0x10] sm:$0xff]  ;;  %v11281_v2 = vld [vmem:[%s17247_s1] sm:$0xff]  ;;  %s11217_s26 = smov 119   ;;  %v11290_v3 = vld [vmem:[%s17247_s1 + $0x18] sm:$0xff]  ;;  %s11218_s8 = smov 120   ;;  %vm17301_vm0 = vcmask 973824  }
  0x18   : > { %843 = vrot.lane.b32.xlu1 %v11276_v1, %s11217_s26  ;;  %839 = vrot.lane.b32.xlu0 %v11281_v2, %s11217_s26  ;;  %v11295_v4 = vld [vmem:[%s17247_s1 + $0x8] sm:$0xff]  ;;  %v11309_v6 = vld [vmem:[%s17247_s1 + $0x20] sm:$0xff]  ;;  %s11219_s19 = smov 121   ;;  %s11220_s30 = smov 127   ;;  %vm17302_vm1 = vcmask 982016   ;;  %vm17449_vm2 = vcmask 990208  }
  0x19   : > { %v11304_v5 = vld [vmem:[%s17247_s1 + $0x28] sm:$0xff]  ;;  %v11318_v7 = vld [vmem:[%s17247_s1 + $0x38] sm:$0xff]  ;;  %v11323_v8 = vld [vmem:[%s17247_s1 + $0x30] sm:$0xff]  ;;  %s11221_s14 = smov 1   ;;  %s11222_s27 = smov 7   ;;  %vm1060_vm3 = vcmask 1039360  }
  0x1a   : > { %v180_v9 = vld [vmem:[%s11266_s18 + $0x10] sm:$0xff]  ;;  %v181_v10 = vld [vmem:[%s11266_s18 + $0x18] sm:$0xff]  ;;  %v178_v12 = vld [vmem:[%s11266_s18] sm:$0xff]  ;;  %s11223_s11 = smov 8   ;;  %s11224_s25 = smov 9   ;;  %vm1102_vm4 = vcmask 7168  }
  0x1b   : > { %v11327_v11 = vmax.f32 %v180_v9, 0.0  ;;  %v179_v13 = vld [vmem:[%s11266_s18 + $0x8] sm:$0xff]  ;;  %v11335_v14 = vmax.f32 %v181_v10, 0.0  ;;  %v11337_v15 = vmax.f32 %v178_v12, 0.0  ;;  %v11349_v18 = vld [vmem:[%s17247_s1 + $0x40] sm:$0xff]  ;;  %v11362_v19 = vld [vmem:[%s17247_s1 + $0x58] sm:$0xff] }
  0x1c   : > { %845 = vrot.lane.b32.xlu1 %v11290_v3, %s11217_s26  ;;  %841 = vrot.lane.b32.xlu0 %v11295_v4, %s11217_s26  ;;  %v11339_v16 = vmax.f32 %v179_v13, 0.0  ;;  %v11344_v17 = vld [vmem:[%s17247_s1 + $0x48] sm:$0xff]  ;;  %v11367_v20 = vld [vmem:[%s17247_s1 + $0x50] sm:$0xff]  ;;  %s11225_s6 = smov 55   ;;  %s11226_s7 = smov 56   ;;  %vm1031_vm5 = vcmask 56320  }
  0x1d   : > { %188 = vst [vmem:[#allocation2 + $0x18] sm:$0xff] %v11327_v11  ;;  %189 = vst [vmem:[#allocation2 + $0x20] sm:$0xff] %v11335_v14  ;;  %v11376_v21 = vld [vmem:[%s17247_s1 + $0x68] sm:$0xff]  ;;  %v11381_v22 = vld [vmem:[%s17247_s1 + $0x60] sm:$0xff]  ;;  %s11227_s9 = smov 57   ;;  %s11228_s10 = smov 63  }
  0x1e   : > { %186 = vst [vmem:[#allocation2 + $0x8] sm:$0xff] %v11337_v15  ;;  %187 = vst [vmem:[#allocation2 + $0x10] sm:$0xff] %v11339_v16  ;;  %v11390_v23 = vld [vmem:[%s17247_s1 + $0x78] sm:$0xff]  ;;  %v11395_v24 = vld [vmem:[%s17247_s1 + $0x70] sm:$0xff]  ;;  %s11229_s13 = smov 65   ;;  %s11230_s15 = smov 71  }
  0x1f   : > { %v11404_v25 = vld [vmem:[%s17247_s1 + $0xa8] sm:$0xff]  ;;  %v11409_v26 = vld [vmem:[%s17247_s1 + $0xa0] sm:$0xff]  ;;  %v11418_v27 = vld [vmem:[%s17247_s1 + $0xb8] sm:$0xff]  ;;  %s11231_s16 = smov 72   ;;  %s11232_s17 = smov 73   ;;  %vm17252_vm6 = vcmask 64512  }
  0x20   : > { %912 = vrot.lane.b32.xlu1 %v11304_v5, %s11218_s8  ;;  %910 = vrot.lane.b32.xlu0 %v11309_v6, %s11218_s8  ;;  %v11423_v28 = vld [vmem:[%s17247_s1 + $0xb0] sm:$0xff]  ;;  %v11432_v29 = vld [vmem:[%s17247_s1 + $0xc8] sm:$0xff]  ;;  %vm17251_vm7 = vcmask 72704   ;;  %vm17250_vm8 = vcmask 449536   ;;  %vm284_vm9 = vcmask 457728   ;;  %vm356_vm10 = vcmask 465920  }
  0x21   : > { %v11437_v30 = vld [vmem:[%s17247_s1 + $0xc0] sm:$0xff]  ;;  %v11446_v31 = vld [vmem:[%s17247_s1 + $0xd8] sm:$0xff]  ;;  %v11451_v32 = vld [vmem:[%s17247_s1 + $0xd0] sm:$0xff]  ;;  %vm428_vm11 = vcmask 515072   ;;  %vm470_vm12 = vcmask 531456   ;;  %vm398_vm13 = vcmask 580608  }
  0x22   : > { %v11460_v33 = vld [vmem:[%s17247_s1 + $0xe8] sm:$0xff]  ;;  %v11465_v34 = vld [vmem:[%s17247_s1 + $0xe0] sm:$0xff]  ;;  %v11474_v35 = vld [vmem:[%s17247_s1 + $0xf8] sm:$0xff]  ;;  %s11234_s20 = smov 64   ;;  %vm326_vm14 = vcmask 588800   ;;  %vm254_vm15 = vcmask 596992  }
  0x23   : > { %v11479_v36 = vld [vmem:[%s17247_s1 + $0xf0] sm:$0xff]  ;;  %v11488_v37 = vld [vmem:[%s17247_s1 + $0x108] sm:$0xff]  ;;  %v11493_v38 = vld [vmem:[%s17247_s1 + $0x100] sm:$0xff] }
  0x24   : > { %916 = vrot.lane.b32.xlu1 %v11318_v7, %s11218_s8  ;;  %914 = vrot.lane.b32.xlu0 %v11323_v8, %s11218_s8  ;;  %v11502_v39 = vld [vmem:[%s17247_s1 + $0x118] sm:$0xff]  ;;  %v11507_v40 = vld [vmem:[%s17247_s1 + $0x110] sm:$0xff] }
  0x28   : > { %983 = vrot.lane.b32.xlu1 %v11344_v17, %s11219_s19  ;;  %981 = vrot.lane.b32.xlu0 %v11349_v18, %s11219_s19 }
  0x2c   : > { %987 = vrot.lane.b32.xlu1 %v11362_v19, %s11219_s19  ;;  %985 = vrot.lane.b32.xlu0 %v11367_v20, %s11219_s19 }
  0x30   : > { %1054 = vrot.lane.b32.xlu1 %v11376_v21, %s11220_s30  ;;  %1052 = vrot.lane.b32.xlu0 %v11381_v22, %s11220_s30 }
  0x34   : > { %1058 = vrot.lane.b32.xlu1 %v11390_v23, %s11220_s30  ;;  %1056 = vrot.lane.b32.xlu0 %v11395_v24, %s11220_s30 }
  0x38   : > { %1147 = vrot.lane.b32.xlu1 %v11404_v25, %s11221_s14  ;;  %1145 = vrot.lane.b32.xlu0 %v11409_v26, %s11221_s14 }
  0x3c   : > { %1151 = vrot.lane.b32.xlu1 %v11418_v27, %s11221_s14  ;;  %1149 = vrot.lane.b32.xlu0 %v11423_v28, %s11221_s14 }
  0x40   : > { %1218 = vrot.lane.b32.xlu1 %v11432_v29, %s11222_s27  ;;  %1216 = vrot.lane.b32.xlu0 %v11437_v30, %s11222_s27 }
  0x44   : > { %1222 = vrot.lane.b32.xlu1 %v11446_v31, %s11222_s27  ;;  %1220 = vrot.lane.b32.xlu0 %v11451_v32, %s11222_s27 }
  0x48   : > { %1289 = vrot.lane.b32.xlu1 %v11460_v33, %s11223_s11  ;;  %1287 = vrot.lane.b32.xlu0 %v11465_v34, %s11223_s11 }
  0x4c   : > { %1293 = vrot.lane.b32.xlu1 %v11474_v35, %s11223_s11  ;;  %1291 = vrot.lane.b32.xlu0 %v11479_v36, %s11223_s11 }
  0x50   : > { %1360 = vrot.lane.b32.xlu1 %v11488_v37, %s11224_s25  ;;  %1358 = vrot.lane.b32.xlu0 %v11493_v38, %s11224_s25 }
  0x54   : > { %1364 = vrot.lane.b32.xlu1 %v11502_v39, %s11224_s25  ;;  %1362 = vrot.lane.b32.xlu0 %v11507_v40, %s11224_s25 }
  0x58   : > { %205 = vrot.lane.b32.xlu1 %v11295_v4, %s11225_s6  ;;  %203 = vrot.lane.b32.xlu0 %v11281_v2, %s11225_s6 }
  0x5c   : > { %209 = vrot.lane.b32.xlu1 %v11290_v3, %s11225_s6  ;;  %207 = vrot.lane.b32.xlu0 %v11276_v1, %s11225_s6 }
  0x60   : > { %278 = vrot.lane.b32.xlu1 %v11304_v5, %s11226_s7  ;;  %276 = vrot.lane.b32.xlu0 %v11309_v6, %s11226_s7 }
  0x64   : > { %282 = vrot.lane.b32.xlu1 %v11318_v7, %s11226_s7  ;;  %280 = vrot.lane.b32.xlu0 %v11323_v8, %s11226_s7 }
  0x68   : > { %350 = vrot.lane.b32.xlu1 %v11344_v17, %s11227_s9  ;;  %348 = vrot.lane.b32.xlu0 %v11349_v18, %s11227_s9 }
  0x6c   : > { %354 = vrot.lane.b32.xlu1 %v11362_v19, %s11227_s9  ;;  %352 = vrot.lane.b32.xlu0 %v11367_v20, %s11227_s9 }
  0x70   : > { %422 = vrot.lane.b32.xlu1 %v11376_v21, %s11228_s10  ;;  %420 = vrot.lane.b32.xlu0 %v11381_v22, %s11228_s10 }
  0x74   : > { %426 = vrot.lane.b32.xlu1 %v11390_v23, %s11228_s10  ;;  %424 = vrot.lane.b32.xlu0 %v11395_v24, %s11228_s10 }
  0x78   : > { %535 = vrot.lane.b32.xlu1 %v11404_v25, %s11229_s13  ;;  %533 = vrot.lane.b32.xlu0 %v11409_v26, %s11229_s13 }
  0x7c   : > { %539 = vrot.lane.b32.xlu1 %v11418_v27, %s11229_s13  ;;  %537 = vrot.lane.b32.xlu0 %v11423_v28, %s11229_s13 }
  0x80   : > { %607 = vrot.lane.b32.xlu1 %v11432_v29, %s11230_s15  ;;  %605 = vrot.lane.b32.xlu0 %v11437_v30, %s11230_s15 }
  0x84   : > { %611 = vrot.lane.b32.xlu1 %v11446_v31, %s11230_s15  ;;  %609 = vrot.lane.b32.xlu0 %v11451_v32, %s11230_s15 }
  0x88   : > { %679 = vrot.lane.b32.xlu1 %v11460_v33, %s11231_s16  ;;  %677 = vrot.lane.b32.xlu0 %v11465_v34, %s11231_s16 }
  0x8a   : > { %v11565_v41 = vpop.permute.xlu1 %843  ;;  %v11567_v42 = vpop.permute.xlu0 %839 }
  0x8c   : > { %683 = vrot.lane.b32.xlu1 %v11474_v35, %s11231_s16  ;;  %681 = vrot.lane.b32.xlu0 %v11479_v36, %s11231_s16 }
  0x8e   : > { %v11573_v43 = vpop.permute.xlu1 %845  ;;  %v11575_v44 = vpop.permute.xlu0 %841 }
  0x8f   : > { %v850_v12 = vsel %vm17301_vm0, %v11565_v41, %v11573_v43  ;;  %v848_v13 = vsel %vm17301_vm0, %v11567_v42, %v11575_v44 }
  0x90   : > { %751 = vrot.lane.b32.xlu1 %v11488_v37, %s11232_s17  ;;  %749 = vrot.lane.b32.xlu0 %v11493_v38, %s11232_s17 }
  0x92   : > { %v11581_v45 = vpop.permute.xlu1 %912  ;;  %v11583_v46 = vpop.permute.xlu0 %910 }
  0x94   : > { %755 = vrot.lane.b32.xlu1 %v11502_v39, %s11232_s17  ;;  %753 = vrot.lane.b32.xlu0 %v11507_v40, %s11232_s17 }
  0x96   : > { %v11589_v47 = vpop.permute.xlu1 %916  ;;  %v11591_v48 = vpop.permute.xlu0 %914 }
  0x98   : > { %1826 = vrot.lane.b32.xlu1 %v11295_v4, %s11225_s6  ;;  %1824 = vrot.lane.b32.xlu0 %v11281_v2, %s11225_s6 }
  0x9a   : > { %v11597_v49 = vpop.permute.xlu1 %983  ;;  %v11599_v50 = vpop.permute.xlu0 %981 }
  0x9c   : > { %1830 = vrot.lane.b32.xlu1 %v11290_v3, %s11225_s6  ;;  %1828 = vrot.lane.b32.xlu0 %v11276_v1, %s11225_s6 }
  0x9e   : > { %v11605_v51 = vpop.permute.xlu1 %987  ;;  %v11607_v52 = vpop.permute.xlu0 %985 }
  0xa0   : > { %1895 = vrot.lane.b32.xlu1 %v11304_v5, %s11226_s7  ;;  %1893 = vrot.lane.b32.xlu0 %v11309_v6, %s11226_s7 }
  0xa2   : > { %v11613_v53 = vpop.permute.xlu1 %1054  ;;  %v11615_v54 = vpop.permute.xlu0 %1052 }
  0xa4   : > { %1899 = vrot.lane.b32.xlu1 %v11318_v7, %s11226_s7  ;;  %1897 = vrot.lane.b32.xlu0 %v11323_v8, %s11226_s7 }
  0xa6   : > { %v11621_v55 = vpop.permute.xlu1 %1058  ;;  %v11623_v56 = vpop.permute.xlu0 %1056 }
  0xa8   : > { %1964 = vrot.lane.b32.xlu1 %v11344_v17, %s11227_s9  ;;  %1962 = vrot.lane.b32.xlu0 %v11349_v18, %s11227_s9  ;;  %v849_v17 = vsel %vm17301_vm0, %v11575_v44, %v11565_v41  ;;  %v990_v44 = vsel %vm17449_vm2, %v11599_v50, %v11597_v49 }
  0xaa   : > { %v11629_v57 = vpop.permute.xlu1 %1147  ;;  %v11631_v58 = vpop.permute.xlu0 %1145 }
  0xac   : > { %1968 = vrot.lane.b32.xlu1 %v11362_v19, %s11227_s9  ;;  %1966 = vrot.lane.b32.xlu0 %v11367_v20, %s11227_s9  ;;  %v11714_v20 = vld [vmem:[#allocation2] sm:$0xff] }
  0xae   : > { %v11637_v59 = vpop.permute.xlu1 %1151  ;;  %v11639_v60 = vpop.permute.xlu0 %1149 }
  0xb0   : > { %2033 = vrot.lane.b32.xlu1 %v11376_v21, %s11228_s10  ;;  %2031 = vrot.lane.b32.xlu0 %v11381_v22, %s11228_s10  ;;  %v859_v21 = vmul.f32 %v850_v12, %v11327_v11  ;;  %v857_v22 = vmul.f32 %v848_v13, %v11337_v15  ;;  %v998_v12 = vmul.f32 %v11599_v50, %v11714_v20 }
  0xb1   : > { %v999_v13 = vmul.f32 %v990_v44, %v11337_v15  ;;  %v1002_v50 = vmul.f32 %v11605_v51, %v11335_v14 }
  0xb2   : > { %v11645_v61 = vpop.permute.xlu1 %1218  ;;  %v11647_v62 = vpop.permute.xlu0 %1216 }
  0xb4   : > { %2037 = vrot.lane.b32.xlu1 %v11390_v23, %s11228_s10  ;;  %2035 = vrot.lane.b32.xlu0 %v11395_v24, %s11228_s10  ;;  %v858_v23 = vmul.f32 %v849_v17, %v11339_v16 }
  0xb6   : > { %v11653_v63 = vpop.permute.xlu1 %1222  ;;  %v11655_v0 = vpop.permute.xlu0 %1220 }
  0xb8   : > { %2142 = vrot.lane.b32.xlu1 %v11404_v25, %s11229_s13  ;;  %2140 = vrot.lane.b32.xlu0 %v11409_v26, %s11229_s13  ;;  %v856_v26 = vmul.f32 %v11567_v42, %v11714_v20 }
  0xba   : > { %v11661_v1 = vpop.permute.xlu1 %1289  ;;  %v11663_v2 = vpop.permute.xlu0 %1287 }
  0xbc   : > { %2146 = vrot.lane.b32.xlu1 %v11418_v27, %s11229_s13  ;;  %2144 = vrot.lane.b32.xlu0 %v11423_v28, %s11229_s13  ;;  %v919_v27 = vsel %vm17302_vm1, %v11583_v46, %v11581_v45  ;;  %v860_v28 = vmul.f32 %v11573_v43, %v11335_v14 }
  0xbe   : > { %v11669_v3 = vpop.permute.xlu1 %1293  ;;  %v11671_v4 = vpop.permute.xlu0 %1291 }
  0xc0   : > { %2211 = vrot.lane.b32.xlu1 %v11432_v29, %s11230_s15  ;;  %2209 = vrot.lane.b32.xlu0 %v11437_v30, %s11230_s15  ;;  %v10851_v29 = vpack.c.bf16 %v859_v21, %v858_v23  ;;  %v10850_v30 = vpack.c.bf16 %v857_v22, %v856_v26  ;;  %v1069_v23 = vmul.f32 %v11615_v54, %v11714_v20 }
  0xc2   : > { %v11677_v5 = vpop.permute.xlu1 %1360  ;;  %v11679_v6 = vpop.permute.xlu0 %1358 }
  0xc4   : > { %2215 = vrot.lane.b32.xlu1 %v11446_v31, %s11230_s15  ;;  %2213 = vrot.lane.b32.xlu0 %v11451_v32, %s11230_s15  ;;  %v927_v31 = vmul.f32 %v11583_v46, %v11714_v20  ;;  %v928_v32 = vmul.f32 %v919_v27, %v11337_v15  ;;  %v992_v46 = vsel %vm17449_vm2, %v11607_v52, %v11605_v51 }
  0xc5   : > { %v10856_v27 = vpack.c.bf16 %v999_v13, %v998_v12  ;;  %v10858_v51 = vpack.c.bf16 %v1002_v50, %v1002_v50  ;;  %v1225_v12 = vsel %vm1031_vm5, %v11647_v62, %v11645_v61  ;;  %v1226_v50 = vsel %vm1031_vm5, %v11645_v61, %v11655_v0 }
  0xc6   : > { %v11685_v7 = vpop.permute.xlu1 %1364  ;;  %v11687_v8 = vpop.permute.xlu0 %1362  ;;  %v10853_v41 = vpack.c.bf16 %v928_v32, %v927_v31  ;;  %v1063_v32 = vsel %vm1060_vm3, %v11623_v56, %v11621_v55 }
  0xc8   : > { %2280 = vrot.lane.b32.xlu1 %v11460_v33, %s11231_s16  ;;  %2278 = vrot.lane.b32.xlu0 %v11465_v34, %s11231_s16  ;;  %v920_v33 = vsel %vm17302_vm1, %v11581_v45, %v11591_v48  ;;  %v921_v34 = vsel %vm17302_vm1, %v11591_v48, %v11589_v47  ;;  %v991_v45 = vsel %vm17449_vm2, %v11597_v49, %v11607_v52 }
  0xc9   : > { %v1000_v17 = vmul.f32 %v991_v45, %v11339_v16  ;;  %v1001_v49 = vmul.f32 %v992_v46, %v11327_v11  ;;  %v1061_v52 = vsel %vm1060_vm3, %v11615_v54, %v11613_v53  ;;  %v11827_v46 = vld [vmem:[#allocation2 + $0x28] sm:$0xff] }
  0xca   : > { %v11693_v9 = vpop.permute.xlu1 %205  ;;  %v11695_v10 = vpop.permute.xlu0 %203  ;;  %v1070_v26 = vmul.f32 %v1061_v52, %v11337_v15  ;;  %v1166_v13 = vmul.f32 %v11637_v59, %v11827_v46  ;;  %v1234_v52 = vmul.f32 %v1225_v12, %v11339_v16 }
  0xcc   : > { %2284 = vrot.lane.b32.xlu1 %v11474_v35, %s11231_s16  ;;  %2282 = vrot.lane.b32.xlu0 %v11479_v36, %s11231_s16  ;;  %v10859_v54 = vpack.c.bf16 %v1070_v26, %v1069_v23  ;;  %v1227_v23 = vsel %vm1031_vm5, %v11655_v0, %v11653_v63 }
  0xcd   : > { %v1236_v61 = vmul.f32 %v1227_v23, %v11335_v14 }
  0xce   : > { %v11710_v18 = vpop.permute.xlu1 %209  ;;  %v11712_v19 = vpop.permute.xlu0 %207 }
  0xd0   : > { %2349 = vrot.lane.b32.xlu1 %v11488_v37, %s11232_s17  ;;  %2347 = vrot.lane.b32.xlu0 %v11493_v38, %s11232_s17  ;;  %v931_v37 = vmul.f32 %v11589_v47, %v11335_v14  ;;  %v929_v38 = vmul.f32 %v920_v33, %v11339_v16  ;;  %v1073_v33 = vmul.f32 %v11621_v55, %v11335_v14 }
  0xd1   : > { %v1162_v55 = vmul.f32 %v11631_v58, %v11337_v15 }
  0xd2   : > { %v11723_v24 = vpop.permute.xlu1 %278  ;;  %v11725_v25 = vpop.permute.xlu0 %276  ;;  %v10855_v47 = vpack.c.bf16 %v931_v37, %v931_v37  ;;  %v1154_v37 = vsel %vm1102_vm4, %v11631_v58, %v11629_v57  ;;  %v10861_v45 = vpack.c.bf16 %v1073_v33, %v1073_v33 }
  0xd4   : > { %2353 = vrot.lane.b32.xlu1 %v11502_v39, %s11232_s17  ;;  %2351 = vrot.lane.b32.xlu0 %v11507_v40, %s11232_s17  ;;  %v930_v39 = vmul.f32 %v921_v34, %v11327_v11  ;;  %v10852_v40 = vpack.c.bf16 %v860_v28, %v860_v28  ;;  %v10857_v28 = vpack.c.bf16 %v1001_v49, %v1000_v17 }
  0xd5   : > { %v1072_v34 = vmul.f32 %v1063_v32, %v11327_v11  ;;  %v1233_v49 = vmul.f32 %v11647_v62, %v11337_v15  ;;  %v1235_v62 = vmul.f32 %v1226_v50, %v11327_v11  ;;  %v214_v50 = vsel %vm17250_vm8, %v11712_v19, %v11710_v18 }
  0xd6   : > { %v11747_v35 = vpop.permute.xlu1 %282  ;;  %v11749_v36 = vpop.permute.xlu0 %280  ;;  %v10854_v48 = vpack.c.bf16 %v930_v39, %v929_v38  ;;  %v1156_v38 = vsel %vm1102_vm4, %v11639_v60, %v11637_v59  ;;  %v1237_v59 = vmul.f32 %v11653_v63, %v11827_v46  ;;  %v1298_v63 = vsel %vm17252_vm6, %v11671_v4, %v11669_v3 }
  0xd7   : > { %v1165_v44 = vmul.f32 %v1156_v38, %v11335_v14 }
  0xd8   : > { %881 = vrot.lane.b32.xlu1 %v10851_v29, %s11224_s25  ;;  %879 = vrot.lane.b32.xlu0 %v10850_v30, %s11224_s25  ;;  %v1062_v29 = vsel %vm1060_vm3, %v11613_v53, %v11623_v56  ;;  %v1155_v56 = vsel %vm1102_vm4, %v11629_v57, %v11639_v60  ;;  %v10869_v33 = vpack.c.bf16 %v1237_v59, %v1237_v59 }
  0xd9   : > { %v1071_v53 = vmul.f32 %v1062_v29, %v11339_v16  ;;  %v1164_v57 = vmul.f32 %v1155_v56, %v11327_v11  ;;  %v10867_v29 = vpack.c.bf16 %v1234_v52, %v1233_v49  ;;  %v212_v52 = vsel %vm17250_vm8, %v11695_v10, %v11693_v9 }
  0xda   : > { %v11757_v42 = vpop.permute.xlu1 %350  ;;  %v11759_v43 = vpop.permute.xlu0 %348 }
  0xdb   : > { %v10860_v60 = vpack.c.bf16 %v1072_v34, %v1071_v53  ;;  %v10865_v17 = vpack.c.bf16 %v1165_v44, %v1164_v57  ;;  %v10868_v53 = vpack.c.bf16 %v1236_v61, %v1235_v62  ;;  %v1304_v34 = vmul.f32 %v11663_v2, %v11337_v15 }
  0xdc   : > { %950 = vrot.lane.b32.xlu1 %v10853_v41, %s11223_s11  ;;  %883 = vrot.lane.b32.xlu0 %v10852_v40, %s11224_s25  ;;  %v1163_v41 = vmul.f32 %v1154_v37, %v11339_v16  ;;  %v221_v62 = vmul.f32 %v212_v52, %v11337_v15  ;;  %v223_v61 = vmul.f32 %v214_v50, %v11327_v11 }
  0xde   : > { %v11780_v21 = vpop.permute.xlu1 %354  ;;  %v11782_v22 = vpop.permute.xlu0 %352  ;;  %v10864_v58 = vpack.c.bf16 %v1163_v41, %v1162_v55  ;;  %v1375_v41 = vmul.f32 %v11679_v6, %v11337_v15 }
  0xe0   : > { %954 = vrot.lane.b32.xlu1 %v10855_v47, %s11223_s11  ;;  %952 = vrot.lane.b32.xlu0 %v10854_v48, %s11223_s11 }
  0xe2   : > { %v11794_v30 = vpop.permute.xlu1 %422  ;;  %v11796_v31 = vpop.permute.xlu0 %420 }
  0xe4   : > { %1023 = vrot.lane.b32.xlu1 %v10857_v28, %s11222_s27  ;;  %1021 = vrot.lane.b32.xlu0 %v10856_v27, %s11222_s27  ;;  %v10866_v28 = vpack.c.bf16 %v1166_v13, %v1166_v13  ;;  %v1369_v13 = vsel %vm17251_vm7, %v11687_v8, %v11685_v7 }
  0xe5   : > { %v1378_v49 = vmul.f32 %v1369_v13, %v11335_v14 }
  0xe6   : > { %v11816_v39 = vpop.permute.xlu1 %426  ;;  %v11818_v40 = vpop.permute.xlu0 %424 }
  0xe8   : > { %1092 = vrot.lane.b32.xlu1 %v10859_v54, %s11221_s14  ;;  %1025 = vrot.lane.b32.xlu0 %v10858_v51, %s11222_s27  ;;  %v1296_v51 = vsel %vm17252_vm6, %v11663_v2, %v11661_v1  ;;  %v1297_v54 = vsel %vm17252_vm6, %v11661_v1, %v11671_v4  ;;  %v1307_v1 = vmul.f32 %v1298_v63, %v11335_v14 }
  0xe9   : > { %v1305_v37 = vmul.f32 %v1296_v51, %v11339_v16  ;;  %v1306_v56 = vmul.f32 %v1297_v54, %v11327_v11  ;;  %v1367_v4 = vsel %vm17251_vm7, %v11679_v6, %v11677_v5  ;;  %v1308_v2 = vmul.f32 %v11669_v3, %v11827_v46 }
  0xea   : > { %v11829_v47 = vpop.permute.xlu1 %535  ;;  %v11831_v48 = vpop.permute.xlu0 %533  ;;  %v1376_v57 = vmul.f32 %v1367_v4, %v11339_v16  ;;  %v285_v54 = vsel %vm284_vm9, %v11725_v25, %v11723_v24  ;;  %v224_v63 = vmul.f32 %v11710_v18, %v11335_v14  ;;  %v297_v18 = vmul.f32 %v11747_v35, %v11335_v14 }
  0xeb   : > { %v10870_v44 = vpack.c.bf16 %v1305_v37, %v1304_v34  ;;  %v10872_v3 = vpack.c.bf16 %v1308_v2, %v1308_v2  ;;  %v294_v34 = vmul.f32 %v285_v54, %v11337_v15  ;;  %v286_v37 = vsel %vm284_vm9, %v11723_v24, %v11749_v36 }
  0xec   : > { %1096 = vrot.lane.b32.xlu1 %v10861_v45, %s11221_s14  ;;  %1094 = vrot.lane.b32.xlu0 %v10860_v60, %s11221_s14  ;;  %v10871_v45 = vpack.c.bf16 %v1307_v1, %v1306_v56  ;;  %v1368_v60 = vsel %vm17251_vm7, %v11677_v5, %v11687_v8  ;;  %v10873_v6 = vpack.c.bf16 %v1376_v57, %v1375_v41 }
  0xed   : > { %v1377_v5 = vmul.f32 %v1368_v60, %v11327_v11  ;;  %v213_v8 = vsel %vm17250_vm8, %v11693_v9, %v11712_v19  ;;  %v287_v56 = vsel %vm284_vm9, %v11749_v36, %v11747_v35  ;;  %v10825_v2 = vpack.c.bf16 %v224_v63, %v224_v63 }
  0xee   : > { %v11849_v26 = vpop.permute.xlu1 %539  ;;  %v11851_v27 = vpop.permute.xlu0 %537  ;;  %v222_v9 = vmul.f32 %v213_v8, %v11339_v16  ;;  %v296_v24 = vmul.f32 %v287_v56, %v11327_v11  ;;  %v358_v35 = vsel %vm356_vm10, %v11757_v42, %v11782_v22  ;;  %v359_v60 = vsel %vm356_vm10, %v11782_v22, %v11780_v21 }
  0xef   : > { %v10874_v19 = vpack.c.bf16 %v1378_v49, %v1377_v5  ;;  %v10828_v13 = vpack.c.bf16 %v297_v18, %v297_v18  ;;  %v367_v5 = vmul.f32 %v358_v35, %v11339_v16  ;;  %v429_v22 = vsel %vm428_vm11, %v11796_v31, %v11794_v30 }
  0xf0   : > { %1187 = vrot.lane.b32.xlu1 %v10865_v17, %s11220_s30  ;;  %1185 = vrot.lane.b32.xlu0 %v10864_v58, %s11220_s30  ;;  %v1379_v17 = vmul.f32 %v11685_v7, %v11827_v46  ;;  %v220_v7 = vmul.f32 %v11714_v20, %v11695_v10  ;;  %v441_v54 = vmul.f32 %v11816_v39, %v11335_v14 }
  0xf1   : > { %v10836_v18 = vpack.c.bf16 %v11327_v11, %v11339_v16  ;;  %v544_v35 = vsel %vm470_vm12, %v11851_v27, %v11849_v26 }
  0xf2   : > { %v11859_v32 = vpop.permute.xlu1 %607  ;;  %v11861_v0 = vpop.permute.xlu0 %605  ;;  %v10823_v10 = vpack.c.bf16 %v221_v62, %v220_v7  ;;  %v437_v7 = vmul.f32 %v11714_v20, %v11796_v31  ;;  %v438_v62 = vmul.f32 %v429_v22, %v11337_v15 }
  0xf4   : > { %1256 = vrot.lane.b32.xlu1 %v10867_v29, %s11219_s19  ;;  %1189 = vrot.lane.b32.xlu0 %v10866_v28, %s11220_s30  ;;  %v10875_v28 = vpack.c.bf16 %v1379_v17, %v1379_v17  ;;  %v10832_v31 = vpack.c.bf16 %v438_v62, %v437_v7 }
  0xf6   : > { %v11882_v38 = vpop.permute.xlu1 %611  ;;  %v11884_v55 = vpop.permute.xlu0 %609 }
  0xf7   : > { %v615_v22 = vsel %vm398_vm13, %v11859_v32, %v11884_v55 }
  0xf8   : > { %1260 = vrot.lane.b32.xlu1 %v10869_v33, %s11219_s19  ;;  %1258 = vrot.lane.b32.xlu0 %v10868_v53, %s11219_s19  ;;  %v10824_v33 = vpack.c.bf16 %v223_v61, %v222_v9  ;;  %v293_v53 = vmul.f32 %v11714_v20, %v11725_v25  ;;  %v295_v25 = vmul.f32 %v286_v37, %v11339_v16 }
  0xf9   : > { %v624_v62 = vmul.f32 %v615_v22, %v11339_v16 }
  0xfa   : > { %v11896_v12 = vpop.permute.xlu1 %679  ;;  %v11898_v58 = vpop.permute.xlu0 %677  ;;  %v10826_v41 = vpack.c.bf16 %v294_v34, %v293_v53  ;;  %v10834_v53 = vpack.c.bf16 %v441_v54, %v441_v54 }
  0xfc   : > { %1329 = vrot.lane.b32.xlu1 %v10871_v45, %s11218_s8  ;;  %1327 = vrot.lane.b32.xlu0 %v10870_v44, %s11218_s8  ;;  %v17254_v44 = vmov 0   ;;  %v357_v45 = vsel %vm356_vm10, %v11759_v43, %v11757_v42  ;;  %v368_v42 = vmul.f32 %v359_v60, %v11327_v11 }
  0xfd   : > { %1574 = vmatprep.mubr.bf16.mxu0 %v17254_v44  ;;  %1615 = vmatprep.mubr.bf16.mxu1 %v17254_v44  ;;  %v366_v17 = vmul.f32 %v357_v45, %v11337_v15  ;;  %v543_v45 = vsel %vm470_vm12, %v11829_v47, %v11851_v27  ;;  %v553_v27 = vmul.f32 %v544_v35, %v11327_v11 }
  0xfe   : > { %v11918_v23 = vpop.permute.xlu1 %683  ;;  %v11920_v59 = vpop.permute.xlu0 %681  ;;  %v10830_v50 = vpack.c.bf16 %v368_v42, %v367_v5  ;;  %v614_v42 = vsel %vm398_vm13, %v11861_v0, %v11859_v32 }
  0xff   : > { %v623_v7 = vmul.f32 %v614_v42, %v11337_v15 }
 0x100   : > { %1398 = vrot.lane.b32.xlu1 %v10873_v6, %s11217_s26  ;;  %1331 = vrot.lane.b32.xlu0 %v10872_v3, %s11218_s8  ;;  %v10827_v3 = vpack.c.bf16 %v296_v24, %v295_v25  ;;  %v365_v6 = vmul.f32 %v11714_v20, %v11759_v43  ;;  %v369_v43 = vmul.f32 %v11780_v21, %v11335_v14  ;;  %v12029_v24 = vld [vmem:[#allocation2 + $0x20] sm:$0xff] }
 0x102   : > { %v11929_v29 = vpop.permute.xlu1 %751  ;;  %v11931_v51 = vpop.permute.xlu0 %749  ;;  %v10829_v8 = vpack.c.bf16 %v366_v17, %v365_v6  ;;  %v10831_v21 = vpack.c.bf16 %v369_v43, %v369_v43 }
 0x104   : > { %1402 = vrot.lane.b32.xlu1 %v10875_v28, %s11217_s26  ;;  %1400 = vrot.lane.b32.xlu0 %v10874_v19, %s11217_s26  ;;  %v430_v28 = vsel %vm428_vm11, %v11794_v30, %v11818_v40  ;;  %v431_v19 = vsel %vm428_vm11, %v11818_v40, %v11816_v39  ;;  %v478_v40 = vld [vmem:[#allocation2] sm:$0xff]  ;;  %v542_v39 = vsel %vm470_vm12, %v11831_v48, %v11829_v47 }
 0x105   : > { %v440_v63 = vmul.f32 %v431_v19, %v11327_v11  ;;  %v10835_v25 = vpack.c.bf16 %v11337_v15, %v478_v40  ;;  %v554_v47 = vmul.f32 %v11849_v26, %v11335_v14  ;;  %v616_v26 = vsel %vm398_vm13, %v11884_v55, %v11882_v38 }
 0x106   : > { %v11949_v1 = vpop.permute.xlu1 %755  ;;  %v11951_v4 = vpop.permute.xlu0 %753  ;;  %v625_v32 = vmul.f32 %v616_v26, %v11327_v11  ;;  %v686_v55 = vsel %vm326_vm14, %v11898_v58, %v11896_v12 }
 0x107   : > { %v10840_v43 = vpack.c.bf16 %v554_v47, %v554_v47 }
 0x108   : > { %245 = vrot.lane.b32.xlu1 %v10824_v33, %s11232_s17  ;;  %243 = vrot.lane.b32.xlu0 %v10823_v10, %s11232_s17  ;;  %v439_v10 = vmul.f32 %v430_v28, %v11339_v16 }
 0x10a   : > { %v11959_v57 = vpop.permute.xlu1 %1826  ;;  %v11961_v36 = vpop.permute.xlu0 %1824  ;;  %v10833_v34 = vpack.c.bf16 %v440_v63, %v439_v10  ;;  %v10842_v10 = vpack.c.bf16 %v625_v32, %v624_v62  ;;  %v687_v63 = vsel %vm326_vm14, %v11896_v12, %v11920_v59 }
 0x10b   : > { %v696_v12 = vmul.f32 %v687_v63, %v11339_v16  ;;  %v1840_v22 = vmul.f32 %v11961_v36, %v11337_v15 }
 0x10c   : > { %316 = vrot.lane.b32.xlu1 %v10826_v41, %s11231_s16  ;;  %247 = vrot.lane.b32.xlu0 %v10825_v2, %s11232_s17  ;;  %v550_v2 = vmul.f32 %v11714_v20, %v11831_v48  ;;  %v551_v41 = vmul.f32 %v542_v39, %v11337_v15  ;;  %v10837_v48 = vpack.c.bf16 %v12029_v24, %v12029_v24 }
 0x10d   : > { %v698_v39 = vmul.f32 %v11918_v23, %v11335_v14 }
 0x10e   : > { %v11981_v49 = vpop.permute.xlu1 %1830  ;;  %v11983_v52 = vpop.permute.xlu0 %1828  ;;  %v10838_v6 = vpack.c.bf16 %v551_v41, %v550_v2  ;;  %v760_v2 = vsel %vm254_vm15, %v11951_v4, %v11949_v1 }
 0x10f   : > { %v10846_v47 = vpack.c.bf16 %v698_v39, %v698_v39 }
 0x110   : > { %320 = vrot.lane.b32.xlu1 %v10828_v13, %s11231_s16  ;;  %318 = vrot.lane.b32.xlu0 %v10827_v3, %s11231_s16  ;;  %v552_v3 = vmul.f32 %v543_v45, %v11339_v16 }
 0x112   : > { %v11995_v9 = vpop.permute.xlu1 %1895  ;;  %v11997_v61 = vpop.permute.xlu0 %1893 }
 0x114   : > { %390 = vrot.lane.b32.xlu1 %v10830_v50, %s11230_s15  ;;  %388 = vrot.lane.b32.xlu0 %v10829_v8, %s11230_s15  ;;  %v10839_v8 = vpack.c.bf16 %v553_v27, %v552_v3  ;;  %v622_v50 = vmul.f32 %v11714_v20, %v11861_v0  ;;  %v626_v0 = vmul.f32 %v11882_v38, %v11335_v14 }
 0x116   : > { %v12011_v33 = vpop.permute.xlu1 %1899  ;;  %v12013_v30 = vpop.permute.xlu0 %1897  ;;  %v10841_v54 = vpack.c.bf16 %v623_v7, %v622_v50  ;;  %v10843_v38 = vpack.c.bf16 %v626_v0, %v626_v0  ;;  %v1901_v0 = vsel %vm284_vm9, %v11997_v61, %v11995_v9 }
 0x117   : > { %v1910_v63 = vmul.f32 %v1901_v0, %v11339_v16 }
 0x118   : > { %460 = vrot.lane.b32.xlu1 %v10832_v31, %s11229_s13  ;;  %392 = vrot.lane.b32.xlu0 %v10831_v21, %s11230_s15  ;;  %v694_v21 = vmul.f32 %v11714_v20, %v11898_v58  ;;  %v695_v31 = vmul.f32 %v686_v55, %v11337_v15 }
 0x11a   : > { %v12017_v37 = vpop.permute.xlu1 %1964  ;;  %v12019_v56 = vpop.permute.xlu0 %1962  ;;  %v10844_v58 = vpack.c.bf16 %v695_v31, %v694_v21  ;;  %v1902_v21 = vsel %vm284_vm9, %v11995_v9, %v12013_v30 }
 0x11b   : > { %v1970_v9 = vsel %vm356_vm10, %v12019_v56, %v12017_v37  ;;  %v1978_v39 = vmul.f32 %v12019_v56, %v11337_v15 }
 0x11c   : > { %464 = vrot.lane.b32.xlu1 %v10834_v53, %s11229_s13  ;;  %462 = vrot.lane.b32.xlu0 %v10833_v34, %s11229_s13  ;;  %v688_v34 = vsel %vm326_vm14, %v11920_v59, %v11918_v23  ;;  %v759_v59 = vsel %vm254_vm15, %v11929_v29, %v11951_v4  ;;  %v766_v23 = vmul.f32 %v11714_v20, %v11931_v51 }
 0x11e   : > { %v12040_v60 = vpop.permute.xlu1 %1968  ;;  %v12042_v13 = vpop.permute.xlu0 %1966 }
 0x120   : > { %503 = vrot.lane.b32.xlu1 %v10836_v18, %s11234_s20  ;;  %501 = vrot.lane.b32.xlu0 %v10835_v25, %s11234_s20  ;;  %v697_v18 = vmul.f32 %v688_v34, %v11327_v11  ;;  %v758_v25 = vsel %vm254_vm15, %v11931_v51, %v11929_v29  ;;  %v769_v29 = vmul.f32 %v760_v2, %v11327_v11 }
 0x121   : > { %v767_v35 = vmul.f32 %v758_v25, %v11337_v15  ;;  %v770_v51 = vmul.f32 %v11949_v1, %v11335_v14  ;;  %v1844_v1 = vmul.f32 %v11981_v49, %v11827_v46  ;;  %v1911_v34 = vmul.f32 %v1902_v21, %v11327_v11 }
 0x122   : > { %v12052_v17 = vpop.permute.xlu1 %2033  ;;  %v12054_v5 = vpop.permute.xlu0 %2031  ;;  %v10845_v3 = vpack.c.bf16 %v697_v18, %v696_v12  ;;  %v1979_v12 = vmul.f32 %v1970_v9, %v11339_v16 }
 0x123   : > { %v10847_v20 = vpack.c.bf16 %v767_v35, %v766_v23  ;;  %v10878_v31 = vpack.c.bf16 %v1844_v1, %v1844_v1  ;;  %v1971_v23 = vsel %vm356_vm10, %v12017_v37, %v12042_v13  ;;  %v1972_v35 = vsel %vm356_vm10, %v12042_v13, %v12040_v60 }
 0x124   : > { %573 = vrot.lane.b32.xlu1 %v10838_v6, %s11228_s10  ;;  %505 = vrot.lane.b32.xlu0 %v10837_v48, %s11234_s20  ;;  %v768_v48 = vmul.f32 %v759_v59, %v11339_v16  ;;  %v1832_v6 = vsel %vm17250_vm8, %v11961_v36, %v11959_v57  ;;  %v1980_v56 = vmul.f32 %v1971_v23, %v11327_v11 }
 0x125   : > { %v1841_v26 = vmul.f32 %v1832_v6, %v11339_v16  ;;  %v10882_v16 = vpack.c.bf16 %v1979_v12, %v1978_v39  ;;  %v2039_v37 = vsel %vm428_vm11, %v12054_v5, %v12052_v17  ;;  %v11203_v6 = vld [vmem:[#allocation2 + $0x10] sm:$0xff] }
 0x126   : > { %v12075_v28 = vpop.permute.xlu1 %2037  ;;  %v12077_v19 = vpop.permute.xlu0 %2035  ;;  %v10848_v42 = vpack.c.bf16 %v769_v29, %v768_v48  ;;  %v1981_v48 = vmul.f32 %v1972_v35, %v11335_v14 }
 0x127   : > { %v10876_v32 = vpack.c.bf16 %v1841_v26, %v1840_v22 }
 0x128   : > { %577 = vrot.lane.b32.xlu1 %v10840_v43, %s11228_s10  ;;  %575 = vrot.lane.b32.xlu0 %v10839_v8, %s11228_s10  ;;  %v1833_v43 = vsel %vm17250_vm8, %v11959_v57, %v11983_v52  ;;  %v1834_v8 = vsel %vm17250_vm8, %v11983_v52, %v11981_v49  ;;  %v10849_v57 = vpack.c.bf16 %v770_v51, %v770_v51  ;;  %vm252_vm8 = vcmask 1043456  }
 0x129   : > { %v1842_v36 = vmul.f32 %v1833_v43, %v11327_v11  ;;  %v1843_v62 = vmul.f32 %v1834_v8, %v11335_v14  ;;  %v1903_v49 = vsel %vm284_vm9, %v12013_v30, %v12011_v33  ;;  %v2041_v11 = vsel %vm428_vm11, %v12077_v19, %v12075_v28 }
 0x12a   : > { %v12089_v40 = vpop.permute.xlu1 %2142  ;;  %v12091_v53 = vpop.permute.xlu0 %2140  ;;  %v2050_v26 = vmul.f32 %v2041_v11, %v12029_v24  ;;  %v2051_v8 = vmul.f32 %v12075_v28, %v11827_v46 }
 0x12c   : > { %647 = vrot.lane.b32.xlu1 %v10842_v10, %s11227_s9  ;;  %645 = vrot.lane.b32.xlu0 %v10841_v54, %s11227_s9  ;;  %v10877_v54 = vpack.c.bf16 %v1843_v62, %v1842_v36  ;;  %v1909_v10 = vmul.f32 %v11997_v61, %v11337_v15  ;;  %v1913_v61 = vmul.f32 %v12011_v33, %v11827_v46  ;;  %v12228_v36 = vld [vmem:[#allocation2 + $0x10] sm:$0xff] }
 0x12d   : > { %v1982_v33 = vmul.f32 %v12040_v60, %v11827_v46  ;;  %v2148_v62 = vsel %vm470_vm12, %v12091_v53, %v12089_v40 }
 0x12e   : > { %v12111_v41 = vpop.permute.xlu1 %2146  ;;  %v12113_v45 = vpop.permute.xlu0 %2144  ;;  %v10879_v18 = vpack.c.bf16 %v1910_v63, %v1909_v10  ;;  %v10881_v15 = vpack.c.bf16 %v1913_v61, %v1913_v61  ;;  %v2157_v63 = vmul.f32 %v2148_v62, %v12228_v36 }
 0x12f   : > { %v10884_v51 = vpack.c.bf16 %v1982_v33, %v1982_v33  ;;  %v2150_v28 = vsel %vm470_vm12, %v12113_v45, %v12111_v41 }
 0x130   : > { %717 = vrot.lane.b32.xlu1 %v10844_v58, %s11226_s7  ;;  %649 = vrot.lane.b32.xlu0 %v10843_v38, %s11227_s9  ;;  %v1912_v38 = vmul.f32 %v1903_v49, %v11335_v14  ;;  %v11202_v14 = vld [vmem:[#allocation2 + $0x8] sm:$0xff]  ;;  %v2149_v49 = vsel %vm470_vm12, %v12089_v40, %v12113_v45  ;;  %v2159_v45 = vmul.f32 %v2150_v28, %v12029_v24 }
 0x131   : > { %v2047_v60 = vmul.f32 %v11202_v14, %v12054_v5  ;;  %v12226_v5 = vld [vmem:[#allocation2 + $0x8] sm:$0xff] }
 0x132   : > { %v12122_v4 = vpop.permute.xlu1 %2211  ;;  %v12124_v27 = vpop.permute.xlu0 %2209  ;;  %v10880_v25 = vpack.c.bf16 %v1912_v38, %v1911_v34  ;;  %v2156_v10 = vmul.f32 %v12091_v53, %v12226_v5  ;;  %v2091_v40 = vld [vmem:[#allocation2 + $0x28] sm:$0xff]  ;;  %v10887_v34 = vpack.c.bf16 %v2051_v8, %v2051_v8 }
 0x133   : > { %v10890_v53 = vpack.c.bf16 %v2091_v40, %v2091_v40 }
 0x134   : > { %721 = vrot.lane.b32.xlu1 %v10846_v47, %s11226_s7  ;;  %719 = vrot.lane.b32.xlu0 %v10845_v3, %s11226_s7  ;;  %v12209_v47 = vld [vmem:[#allocation2 + $0x18] sm:$0xff]  ;;  %v2040_v3 = vsel %vm428_vm11, %v12052_v17, %v12077_v19 }
 0x135   : > { %v2049_v22 = vmul.f32 %v2040_v3, %v12209_v47  ;;  %v2158_v38 = vmul.f32 %v2149_v49, %v12209_v47  ;;  %v12257_v35 = vpack.c.bf16 %v12029_v24, %v12209_v47 }
 0x136   : > { %v12142_v50 = vpop.permute.xlu1 %2215  ;;  %v12144_v7 = vpop.permute.xlu0 %2213 }
 0x137   : > { %v10886_v1 = vpack.c.bf16 %v2050_v26, %v2049_v22  ;;  %v2229_v8 = vmul.f32 %v12142_v50, %v11827_v46 }
 0x138   : > { %791 = vrot.lane.b32.xlu1 %v10848_v42, %s11225_s6  ;;  %789 = vrot.lane.b32.xlu0 %v10847_v20, %s11225_s6  ;;  %v2048_v20 = vmul.f32 %v11203_v6, %v2039_v37  ;;  %v10883_v42 = vpack.c.bf16 %v1981_v48, %v1980_v56  ;;  %v10892_v6 = vpack.c.bf16 %v2159_v45, %v2158_v38 }
 0x13a   : > { %v12152_v55 = vpop.permute.xlu1 %2280  ;;  %v12154_v52 = vpop.permute.xlu0 %2278  ;;  %v10885_v19 = vpack.c.bf16 %v2048_v20, %v2047_v60  ;;  %v2217_v20 = vsel %vm398_vm13, %v12124_v27, %v12122_v4 }
 0x13c   : > { %1863 = vrot.lane.b32.xlu1 %v10876_v32, %s11232_s17  ;;  %793 = vrot.lane.b32.xlu0 %v10849_v57, %s11225_s6 }
 0x13e   : > { %v12175_v30 = vpop.permute.xlu1 %2284  ;;  %v12177_v58 = vpop.permute.xlu0 %2282 }
 0x13f   : > { %v2287_v28 = vsel %vm326_vm14, %v12152_v55, %v12177_v58 }
 0x140   : > { %1867 = vrot.lane.b32.xlu1 %v10878_v31, %s11232_s17  ;;  %1865 = vrot.lane.b32.xlu0 %v10877_v54, %s11232_s17  ;;  %v12243_v54 = vpack.c.bf16 %v12228_v36, %v12226_v5 }
 0x142   : > { %v12186_v59 = vpop.permute.xlu1 %2349  ;;  %v12188_v2 = vpop.permute.xlu0 %2347 }
 0x144   : > { %1934 = vrot.lane.b32.xlu1 %v10880_v25, %s11231_s16  ;;  %1932 = vrot.lane.b32.xlu0 %v10879_v18, %s11231_s16 }
 0x146   : > { %v12205_v29 = vpop.permute.xlu1 %2353  ;;  %v12207_v13 = vpop.permute.xlu0 %2351 }
 0x148   : > { %2001 = vrot.lane.b32.xlu1 %v10882_v16, %s11230_s15  ;;  %1936 = vrot.lane.b32.xlu0 %v10881_v15, %s11231_s16  ;;  %v10891_v15 = vpack.c.bf16 %v2157_v63, %v2156_v10  ;;  %v2160_v16 = vmul.f32 %v12111_v41, %v11827_v46  ;;  %v10896_v10 = vpack.c.bf16 %v2229_v8, %v2229_v8 }
 0x149   : > { %v2288_v63 = vsel %vm326_vm14, %v12177_v58, %v12175_v30  ;;  %v2355_v58 = vsel %vm254_vm15, %v12188_v2, %v12186_v59 }
 0x14a   : > { %v882_v17 = vpop.permute.xlu1 %881  ;;  %v880_v43 = vpop.permute.xlu0 %879 }
 0x14b   : > { %v886_v57 = vrot.slane %v882_v17, 4  ;;  %v885_v32 = vrot.slane %v880_v43, 4 }
 0x14c   : > { %2005 = vrot.lane.b32.xlu1 %v10884_v51, %s11230_s15  ;;  %2003 = vrot.lane.b32.xlu0 %v10883_v42, %s11230_s15  ;;  %v2218_v42 = vsel %vm398_vm13, %v12122_v4, %v12144_v7  ;;  %v2226_v4 = vmul.f32 %v2217_v20, %v12228_v36  ;;  %v2298_v20 = vmul.f32 %v12175_v30, %v11827_v46 }
 0x14d   : > { %v888_v39 = vsel %vm252_vm8, %v885_v32, %v886_v57  ;;  %v2227_v32 = vmul.f32 %v2218_v42, %v12209_v47  ;;  %v2364_v42 = vmul.f32 %v2355_v58, %v12228_v36  ;;  %v2356_v30 = vsel %vm254_vm15, %v12186_v59, %v12207_v13 }
 0x14e   : > { %v951_v0 = vpop.permute.xlu1 %950  ;;  %v884_v21 = vpop.permute.xlu0 %883  ;;  %v890_v3 = vsel %vm17251_vm7, %v880_v43, %v888_v39  ;;  %v2219_v43 = vsel %vm398_vm13, %v12144_v7, %v12142_v50  ;;  %v10893_v50 = vpack.c.bf16 %v2160_v16, %v2160_v16  ;;  %v10899_v59 = vpack.c.bf16 %v2298_v20, %v2298_v20 }
 0x14f   : > { %v887_v31 = vrot.slane %v884_v21, 4  ;;  %v956_v12 = vrot.slane %v951_v0, 4  ;;  %v2294_v21 = vmul.f32 %v12154_v52, %v12226_v5 }
 0x150   : > { %2072 = vrot.lane.b32.xlu1 %v10886_v1, %s11229_s13  ;;  %2070 = vrot.lane.b32.xlu0 %v10885_v19, %s11229_s13  ;;  %v2286_v19 = vsel %vm326_vm14, %v12154_v52, %v12152_v55  ;;  %v2297_v55 = vmul.f32 %v2288_v63, %v12029_v24  ;;  %v12356_v63 = vld [vmem:[%s17247_s1 + $0x8] sm:$0xff] }
 0x151   : > { %v891_v23 = vsel %vm252_vm8, %v886_v57, %v887_v31  ;;  %v2295_v49 = vmul.f32 %v2286_v19, %v12228_v36 }
 0x152   : > { %v955_v9 = vpop.permute.xlu1 %954  ;;  %v953_v61 = vpop.permute.xlu0 %952  ;;  %v892_v14 = vsel %vm17251_vm7, %v882_v17, %v891_v23  ;;  %v2225_v17 = vmul.f32 %v12124_v27, %v12226_v5  ;;  %vm17253_vm7 = vcmask 523264  }
 0x153   : > { %v958_v18 = vrot.slane %v955_v9, 4  ;;  %v957_v25 = vrot.slane %v953_v61, 4 }
 0x154   : > { %2110 = vrot.lane.b32.xlu1 %v12243_v54, %s11234_s20  ;;  %2074 = vrot.lane.b32.xlu0 %v10887_v34, %s11229_s13  ;;  %v10894_v31 = vpack.c.bf16 %v2226_v4, %v2225_v17 }
 0x155   : > { %v959_v33 = vsel %vm252_vm8, %v956_v12, %v957_v25  ;;  %v962_v56 = vsel %vm252_vm8, %v957_v25, %v958_v18  ;;  %v10897_v12 = vpack.c.bf16 %v2295_v49, %v2294_v21  ;;  %v2296_v18 = vmul.f32 %v2287_v28, %v12209_v47 }
 0x156   : > { %v1024_v48 = vpop.permute.xlu1 %1023  ;;  %v1022_v37 = vpop.permute.xlu0 %1021  ;;  %v961_v11 = vsel %vm17252_vm6, %v951_v0, %v959_v33  ;;  %v963_v60 = vsel %vm17252_vm6, %v953_v61, %v962_v56  ;;  %v2228_v0 = vmul.f32 %v2219_v43, %v12029_v24  ;;  %vm17481_vm6 = vcmask 449536  }
 0x157   : > { %v9975_v41 = vcombine.high %v890_v3, %v961_v11  ;;  %v9977_v51 = vcombine.high %v892_v14, %v963_v60  ;;  %v9974_v22 = vcombine.low %v890_v3, %v961_v11  ;;  %v9976_v26 = vcombine.low %v892_v14, %v963_v60 }
 0x158   : > { %2114 = vrot.lane.b32.xlu1 %v10890_v53, %s11234_s20  ;;  %2112 = vrot.lane.b32.xlu0 %v12257_v35, %s11234_s20  ;;  %v1028_v1 = vrot.slane %v1024_v48, 4  ;;  %v1027_v62 = vrot.slane %v1022_v37, 4  ;;  %v10895_v39 = vpack.c.bf16 %v2228_v0, %v2227_v32 }
 0x159   : > { %1542 = vmatprep.subr.bf16.mxu0 %v9975_v41  ;;  %1583 = vmatprep.subr.bf16.mxu1 %v9977_v51  ;;  %v2363_v51 = vmul.f32 %v12188_v2, %v12226_v5  ;;  %v2357_v2 = vsel %vm254_vm15, %v12207_v13, %v12205_v29 }
 0x15a   : > { %v1093_v57 = vpop.permute.xlu1 %1092  ;;  %1543 = vmatpush1.bf16.msra.mxu0 %v9974_v22  ;;  %1584 = vmatpush1.bf16.msra.mxu1 %v9976_v26  ;;  %v1026_v27 = vpop.permute.xlu0 %1025  ;;  %v1030_v40 = vsel %vm252_vm8, %v1027_v62, %v1028_v1  ;;  %v10898_v22 = vpack.c.bf16 %v2297_v55, %v2296_v18  ;;  %v2365_v62 = vmul.f32 %v2356_v30, %v12209_v47  ;;  %v12369_v18 = vld [vmem:[%s17247_s1 + $0x10] sm:$0xff]  ;;  %v12374_v55 = vld [vmem:[%s17247_s1 + $0x18] sm:$0xff] }
 0x15b   : > { %v1029_v7 = vrot.slane %v1026_v27, 4  ;;  %v1098_v38 = vrot.slane %v1093_v57, 4  ;;  %v1032_v53 = vsel %vm1031_vm5, %v1022_v37, %v1030_v40  ;;  %v10900_v4 = vpack.c.bf16 %v2364_v42, %v2363_v51 }
 0x15c   : > { %2181 = vrot.lane.b32.xlu1 %v10892_v6, %s11228_s10  ;;  %2179 = vrot.lane.b32.xlu0 %v10891_v15, %s11228_s10  ;;  %v2366_v13 = vmul.f32 %v2357_v2, %v12029_v24 }
 0x15d   : > { %v1033_v45 = vsel %vm252_vm8, %v1028_v1, %v1029_v7  ;;  %v2367_v1 = vmul.f32 %v12205_v29, %v11827_v46 }
 0x15e   : > { %v1097_v52 = vpop.permute.xlu1 %1096  ;;  %v1095_v34 = vpop.permute.xlu0 %1094  ;;  %v1034_v3 = vsel %vm1031_vm5, %v1024_v48, %v1033_v45  ;;  %v10901_v29 = vpack.c.bf16 %v2366_v13, %v2365_v62  ;;  %v12429_v62 = vld [vmem:[%s17247_s1 + $0x48] sm:$0xff] }
 0x15f   : > { %v1100_v9 = vrot.slane %v1097_v52, 4  ;;  %v1099_v61 = vrot.slane %v1095_v34, 4  ;;  %v10902_v46 = vpack.c.bf16 %v2367_v1, %v2367_v1  ;;  %v12424_v1 = vld [vmem:[%s17247_s1 + $0x40] sm:$0xff] }
 0x160   : > { %2248 = vrot.lane.b32.xlu1 %v10894_v31, %s11227_s9  ;;  %2183 = vrot.lane.b32.xlu0 %v10893_v50, %s11228_s10 }
 0x161   : > { %v1104_v25 = vsel %vm252_vm8, %v1099_v61, %v1100_v9  ;;  %v1101_v23 = vsel %vm252_vm8, %v1098_v38, %v1099_v61 }
 0x162   : > { %v1105_v15 = vsel %vm1102_vm4, %v1095_v34, %v1104_v25  ;;  %v1188_v16 = vpop.permute.xlu1 %1187  ;;  %v1186_v33 = vpop.permute.xlu0 %1185  ;;  %v1103_v56 = vsel %vm1102_vm4, %v1093_v57, %v1101_v23 }
 0x163   : > { %v1192_v11 = vrot.slane %v1188_v16, 4  ;;  %v1191_v14 = vrot.slane %v1186_v33, 4  ;;  %v9979_v60 = vcombine.high %v1032_v53, %v1103_v56  ;;  %v9981_v6 = vcombine.high %v1034_v3, %v1105_v15 }
 0x164   : > { %2252 = vrot.lane.b32.xlu1 %v10896_v10, %s11227_s9  ;;  %2250 = vrot.lane.b32.xlu0 %v10895_v39, %s11227_s9  ;;  %v9978_v37 = vcombine.low %v1032_v53, %v1103_v56  ;;  %v9980_v41 = vcombine.low %v1034_v3, %v1105_v15  ;;  %v12351_v10 = vld [vmem:[%s17247_s1] sm:$0xff] }
 0x165   : > { %v1194_v48 = vsel %vm252_vm8, %v1191_v14, %v1192_v11  ;;  %1544 = vmatprep.subr.bf16.mxu0 %v9979_v60  ;;  %1585 = vmatprep.subr.bf16.mxu1 %v9981_v6  ;;  %v12387_v60 = vld [vmem:[%s17247_s1 + $0x20] sm:$0xff]  ;;  %v12392_v6 = vld [vmem:[%s17247_s1 + $0x28] sm:$0xff] }
 0x166   : > { %v1196_v26 = vsel %vm1060_vm3, %v1186_v33, %v1194_v48  ;;  %v1257_v17 = vpop.permute.xlu1 %1256  ;;  %1545 = vmatpush1.bf16.msra.mxu0 %v9978_v37  ;;  %1586 = vmatpush1.bf16.msra.mxu1 %v9980_v41  ;;  %v1190_v43 = vpop.permute.xlu0 %1189 }
 0x167   : > { %v1193_v5 = vrot.slane %v1190_v43, 4  ;;  %v9983_v36 = vcombine.high %v12243_v54, %v1196_v26  ;;  %v9982_v19 = vcombine.low %v12243_v54, %v1196_v26  ;;  %v1262_v21 = vrot.slane %v1257_v17, 4  ;;  %v12405_v26 = vld [vmem:[%s17247_s1 + $0x30] sm:$0xff] }
 0x168   : > { %2319 = vrot.lane.b32.xlu1 %v10898_v22, %s11226_s7  ;;  %2317 = vrot.lane.b32.xlu0 %v10897_v12, %s11226_s7 }
 0x169   : > { %v1197_v8 = vsel %vm252_vm8, %v1192_v11, %v1193_v5  ;;  %1546 = vmatprep.subr.bf16.mxu0 %v9983_v36 }
 0x16a   : > { %v1261_v57 = vpop.permute.xlu1 %1260  ;;  %1547 = vmatpush1.bf16.msra.mxu0 %v9982_v19  ;;  %v1259_v27 = vpop.permute.xlu0 %1258  ;;  %v1198_v54 = vsel %vm1060_vm3, %v1188_v16, %v1197_v8  ;;  %v9973_v8 = vld [vmem:[%s17246_s0 + $0x4] sm:$0xf] }
 0x16b   : > { %v1263_v32 = vrot.slane %v1259_v27, 4  ;;  %v9985_v7 = vcombine.high %v12257_v35, %v1198_v54  ;;  %v9984_v0 = vcombine.low %v12257_v35, %v1198_v54  ;;  %v1264_v49 = vrot.slane %v1261_v57, 4 }
 0x16c   : > { %2386 = vrot.lane.b32.xlu1 %v10900_v4, %s11225_s6  ;;  %2321 = vrot.lane.b32.xlu0 %v10899_v59, %s11226_s7 }
 0x16d   : > { %1587 = vmatprep.subr.bf16.mxu1 %v9985_v7  ;;  %v1265_v31 = vsel %vm252_vm8, %v1262_v21, %v1263_v32  ;;  %v1268_v45 = vsel %vm252_vm8, %v1263_v32, %v1264_v49 }
 0x16e   : > { %v1330_v47 = vpop.permute.xlu1 %1329  ;;  %1588 = vmatpush1.bf16.msra.mxu1 %v9984_v0  ;;  %v1328_v24 = vpop.permute.xlu0 %1327  ;;  %v1267_v38 = vsel %vm17449_vm2, %v1257_v17, %v1265_v31  ;;  %v1269_v58 = vsel %vm17449_vm2, %v1259_v27, %v1268_v45  ;;  %v12410_v17 = vld [vmem:[%s17247_s1 + $0x38] sm:$0xff]  ;;  %v12464_v45 = vld [vmem:[%s17247_s1 + $0x60] sm:$0xff] }
 0x16f   : > { %v1334_v50 = vrot.slane %v1330_v47, 4  ;;  %v1333_v28 = vrot.slane %v1328_v24, 4 }
 0x170   : > { %2390 = vrot.lane.b32.xlu1 %v10902_v46, %s11225_s6  ;;  %2388 = vrot.lane.b32.xlu0 %v10901_v29, %s11225_s6  ;;  %v12446_v29 = vld [vmem:[%s17247_s1 + $0x50] sm:$0xff] }
 0x171   : > { %v1336_v35 = vsel %vm252_vm8, %v1333_v28, %v1334_v50 }
 0x172   : > { %v1338_v40 = vsel %vm17302_vm1, %v1328_v24, %v1336_v35  ;;  %v1399_v52 = vpop.permute.xlu1 %1398  ;;  %v1332_v34 = vpop.permute.xlu0 %1331 }
 0x173   : > { %v1335_v9 = vrot.slane %v1332_v34, 4  ;;  %v9987_v61 = vcombine.high %v1267_v38, %v1338_v40  ;;  %v9986_v39 = vcombine.low %v1267_v38, %v1338_v40  ;;  %v1404_v25 = vrot.slane %v1399_v52, 4 }
 0x174   : > { %3247 = vrot.lane.b32.xlu0 %v12351_v10, %s11217_s26  ;;  %3249 = vrot.lane.b32.xlu1 %v12356_v63, %s11217_s26 }
 0x175   : > { %v1339_v12 = vsel %vm252_vm8, %v1334_v50, %v1335_v9  ;;  %1548 = vmatprep.subr.bf16.mxu0 %v9987_v61  ;;  %v12469_v9 = vld [vmem:[%s17247_s1 + $0x68] sm:$0xff] }
 0x176   : > { %v1403_v23 = vpop.permute.xlu1 %1402  ;;  %1549 = vmatpush1.bf16.msra.mxu0 %v9986_v39  ;;  %v1401_v53 = vpop.permute.xlu0 %1400  ;;  %v1340_v15 = vsel %vm17302_vm1, %v1330_v47, %v1339_v12  ;;  %v12451_v47 = vld [vmem:[%s17247_s1 + $0x58] sm:$0xff] }
 0x177   : > { %v1406_v16 = vrot.slane %v1403_v23, 4  ;;  %v1405_v33 = vrot.slane %v1401_v53, 4  ;;  %v9989_v56 = vcombine.high %v1269_v58, %v1340_v15  ;;  %v9988_v3 = vcombine.low %v1269_v58, %v1340_v15  ;;  %v12478_v23 = vld [vmem:[%s17247_s1 + $0x70] sm:$0xff] }
 0x178   : > { %3251 = vrot.lane.b32.xlu0 %v12369_v18, %s11217_s26  ;;  %3253 = vrot.lane.b32.xlu1 %v12374_v55, %s11217_s26 }
 0x179   : > { %v1407_v11 = vsel %vm252_vm8, %v1404_v25, %v1405_v33  ;;  %v1410_v14 = vsel %vm252_vm8, %v1405_v33, %v1406_v16  ;;  %1589 = vmatprep.subr.bf16.mxu1 %v9989_v56 }
 0x17a   : > { %v1411_v20 = vsel %vm17301_vm0, %v1401_v53, %v1410_v14  ;;  %v246_v37 = vpop.permute.xlu1 %245  ;;  %1590 = vmatpush1.bf16.msra.mxu1 %v9988_v3  ;;  %v244_v41 = vpop.permute.xlu0 %243  ;;  %v1409_v51 = vsel %vm17301_vm0, %v1399_v52, %v1407_v11  ;;  %v12483_v53 = vld [vmem:[%s17247_s1 + $0x78] sm:$0xff] }
 0x17b   : > { %v9993_v42 = vcombine.high %v1411_v20, %v1411_v20  ;;  %v9991_v48 = vcombine.high %v1409_v51, %v1409_v51  ;;  %v9990_v22 = vcombine.low %v1409_v51, %v1409_v51  ;;  %v9992_v30 = vcombine.low %v1411_v20, %v1411_v20  ;;  %v12501_v51 = vld [vmem:[%s17247_s1 + $0xa8] sm:$0xff] }
 0x17c   : > { %3316 = vrot.lane.b32.xlu0 %v12387_v60, %s11218_s8  ;;  %3318 = vrot.lane.b32.xlu1 %v12392_v6, %s11218_s8  ;;  %v250_v43 = vrot.slane %v246_v37, 4  ;;  %v249_v2 = vrot.slane %v244_v41, 4 }
 0x17d   : > { %9994 = vmatprep.subr.msk.bf16.mxu0 %vm252_vm8, %v9991_v48  ;;  %9996 = vmatprep.subr.msk.bf16.mxu1 %vm252_vm8, %v9993_v42  ;;  %v1531_v5 = vsel %vm252_vm8, %v9990_v22, 0  ;;  %v1537_v36 = vsel %vm252_vm8, %v9992_v30, 0 }
 0x17e   : > { %v317_v19 = vpop.permute.xlu1 %316  ;;  %v248_v59 = vpop.permute.xlu0 %247  ;;  %1551 = vmatpush1.bf16.msra.mxu0 %v1531_v5  ;;  %1592 = vmatpush1.bf16.msra.mxu1 %v1537_v36  ;;  %v253_v13 = vsel %vm252_vm8, %v249_v2, %v250_v43 }
 0x17f   : > { %v251_v4 = vrot.slane %v248_v59, 4  ;;  %v322_v54 = vrot.slane %v317_v19, 4  ;;  %v255_v24 = vsel %vm254_vm15, %v244_v41, %v253_v13  ;;  %v12496_v41 = vld [vmem:[%s17247_s1 + $0xa0] sm:$0xff] }
 0x180   : > { %3320 = vrot.lane.b32.xlu0 %v12405_v26, %s11218_s8  ;;  %3322 = vrot.lane.b32.xlu1 %v12410_v17, %s11218_s8 }
 0x181   : > { %9995 = vmatmul.mubr.msk.bf16.vlgmr.msra.gmra.mrb[0].mxu0 %vm326_vm14, %v9973_v8  ;;  %9997 = vmatmul.mubr.msk.bf16.vlgmr.msra.gmra.mrb[0].mxu1 %vm326_vm14, %v9973_v8  ;;  %v256_v32 = vsel %vm252_vm8, %v250_v43, %v251_v4  ;;  %v12514_v4 = vld [vmem:[%s17247_s1 + $0xb0] sm:$0xff]  ;;  %v12519_v8 = vld [vmem:[%s17247_s1 + $0xb8] sm:$0xff] }
 0x182   : > { %v321_v57 = vpop.permute.xlu1 %320  ;;  %v319_v27 = vpop.permute.xlu0 %318  ;;  %1761 = vmatprep.mubr.bf16.mxu0 %v17254_v44  ;;  %1802 = vmatprep.mubr.bf16.mxu1 %v17254_v44  ;;  %v257_v49 = vsel %vm254_vm15, %v246_v37, %v256_v32 }
 0x183   : > { %v324_v7 = vrot.slane %v321_v57, 4  ;;  %v323_v0 = vrot.slane %v319_v27, 4 }
 0x184   : > { %3385 = vrot.lane.b32.xlu0 %v12424_v1, %s11219_s19  ;;  %3387 = vrot.lane.b32.xlu1 %v12429_v62, %s11219_s19 }
 0x185   : > { %v328_v21 = vsel %vm252_vm8, %v323_v0, %v324_v7  ;;  %v325_v46 = vsel %vm252_vm8, %v322_v54, %v323_v0  ;;  %v12528_v7 = vld [vmem:[%s17247_s1 + $0xc0] sm:$0xff]  ;;  %v12533_v0 = vld [vmem:[%s17247_s1 + $0xc8] sm:$0xff] }
 0x186   : > { %v329_v50 = vsel %vm326_vm14, %v319_v27, %v328_v21  ;;  %v391_v28 = vpop.permute.xlu1 %390  ;;  %v389_v31 = vpop.permute.xlu0 %388  ;;  %v327_v35 = vsel %vm326_vm14, %v317_v19, %v325_v46 }
 0x187   : > { %v10000_v40 = vcombine.low %v257_v49, %v329_v50  ;;  %v9998_v52 = vcombine.low %v255_v24, %v327_v35  ;;  %v9999_v34 = vcombine.high %v255_v24, %v327_v35  ;;  %v10001_v38 = vcombine.high %v257_v49, %v329_v50 }
 0x188   : > { %3389 = vrot.lane.b32.xlu0 %v12446_v29, %s11219_s19  ;;  %3391 = vrot.lane.b32.xlu1 %v12451_v47, %s11219_s19  ;;  %v395_v61 = vrot.slane %v391_v28, 4  ;;  %v394_v39 = vrot.slane %v389_v31, 4 }
 0x189   : > { %1729 = vmatprep.subr.bf16.mxu0 %v9999_v34  ;;  %1770 = vmatprep.subr.bf16.mxu1 %v10001_v38  ;;  %v12551_v34 = vld [vmem:[%s17247_s1 + $0xd8] sm:$0xff] }
 0x18a   : > { %v461_v12 = vpop.permute.xlu1 %460  ;;  %v393_v58 = vpop.permute.xlu0 %392  ;;  %1730 = vmatpush1.bf16.msra.mxu0 %v9998_v52  ;;  %1771 = vmatpush1.bf16.msra.mxu1 %v10000_v40  ;;  %v397_v15 = vsel %vm252_vm8, %v394_v39, %v395_v61  ;;  %v12546_v52 = vld [vmem:[%s17247_s1 + $0xd0] sm:$0xff] }
 0x18b   : > { %v396_v25 = vrot.slane %v393_v58, 4  ;;  %v466_v56 = vrot.slane %v461_v12, 4  ;;  %v399_v42 = vsel %vm398_vm13, %v389_v31, %v397_v15 }
 0x18c   : > { %3454 = vrot.lane.b32.xlu0 %v12464_v45, %s11220_s30  ;;  %3456 = vrot.lane.b32.xlu1 %v12469_v9, %s11220_s30 }
 0x18d   : > { %v400_v3 = vsel %vm252_vm8, %v395_v61, %v396_v25 }
 0x18e   : > { %v465_v16 = vpop.permute.xlu1 %464  ;;  %v463_v33 = vpop.permute.xlu0 %462  ;;  %v401_v48 = vsel %vm398_vm13, %v391_v28, %v400_v3  ;;  %v12564_v3 = vld [vmem:[%s17247_s1 + $0xe0] sm:$0xff] }
 0x18f   : > { %v468_v11 = vrot.slane %v465_v16, 4  ;;  %v467_v14 = vrot.slane %v463_v33, 4 }
 0x190   : > { %3458 = vrot.lane.b32.xlu0 %v12478_v23, %s11220_s30  ;;  %3460 = vrot.lane.b32.xlu1 %v12483_v53, %s11220_s30 }
 0x191   : > { %v472_v20 = vsel %vm252_vm8, %v467_v14, %v468_v11  ;;  %v469_v37 = vsel %vm252_vm8, %v466_v56, %v467_v14  ;;  %v12569_v11 = vld [vmem:[%s17247_s1 + $0xe8] sm:$0xff] }
 0x192   : > { %v473_v22 = vsel %vm470_vm12, %v463_v33, %v472_v20  ;;  %v504_v30 = vpop.permute.xlu1 %503  ;;  %v502_v43 = vpop.permute.xlu0 %501  ;;  %v471_v2 = vsel %vm470_vm12, %v461_v12, %v469_v37 }
 0x193   : > { %v10004_v5 = vcombine.low %v401_v48, %v473_v22  ;;  %v10002_v36 = vcombine.low %v399_v42, %v471_v2  ;;  %v10003_v19 = vcombine.high %v399_v42, %v471_v2  ;;  %v10005_v59 = vcombine.high %v401_v48, %v473_v22  ;;  %v12578_v22 = vld [vmem:[%s17247_s1 + $0xf0] sm:$0xff] }
 0x194   : > { %3545 = vrot.lane.b32.xlu0 %v12496_v41, %s11221_s14  ;;  %3547 = vrot.lane.b32.xlu1 %v12501_v51, %s11221_s14  ;;  %v508_v13 = vrot.slane %v504_v30, 4  ;;  %v507_v57 = vrot.slane %v502_v43, 4 }
 0x195   : > { %1731 = vmatprep.subr.bf16.mxu0 %v10003_v19  ;;  %1772 = vmatprep.subr.bf16.mxu1 %v10005_v59 }
 0x196   : > { %v574_v27 = vpop.permute.xlu1 %573  ;;  %v506_v54 = vpop.permute.xlu0 %505  ;;  %1732 = vmatpush1.bf16.msra.mxu0 %v10002_v36  ;;  %1773 = vmatpush1.bf16.msra.mxu1 %v10004_v5  ;;  %v510_v21 = vsel %vm252_vm8, %v507_v57, %v508_v13 }
 0x197   : > { %v509_v32 = vrot.slane %v506_v54, 4  ;;  %v579_v49 = vrot.slane %v574_v27, 4  ;;  %v512_v38 = vsel %vm17253_vm7, %v502_v43, %v510_v21  ;;  %v12596_v54 = vld [vmem:[%s17247_s1 + $0x100] sm:$0xff] }
 0x198   : > { %3549 = vrot.lane.b32.xlu0 %v12514_v4, %s11221_s14  ;;  %3551 = vrot.lane.b32.xlu1 %v12519_v8, %s11221_s14 }
 0x199   : > { %v513_v50 = vsel %vm252_vm8, %v508_v13, %v509_v32  ;;  %v12601_v32 = vld [vmem:[%s17247_s1 + $0x108] sm:$0xff] }
 0x19a   : > { %v578_v46 = vpop.permute.xlu1 %577  ;;  %v576_v24 = vpop.permute.xlu0 %575  ;;  %v514_v61 = vsel %vm17253_vm7, %v504_v30, %v513_v50  ;;  %v12583_v30 = vld [vmem:[%s17247_s1 + $0xf8] sm:$0xff] }
 0x19b   : > { %v581_v28 = vrot.slane %v578_v46, 4  ;;  %v580_v31 = vrot.slane %v576_v24, 4 }
 0x19c   : > { %3614 = vrot.lane.b32.xlu0 %v12528_v7, %s11222_s27  ;;  %3616 = vrot.lane.b32.xlu1 %v12533_v0, %s11222_s27 }
 0x19d   : > { %v585_v35 = vsel %vm252_vm8, %v580_v31, %v581_v28  ;;  %v582_v40 = vsel %vm252_vm8, %v579_v49, %v580_v31 }
 0x19e   : > { %v586_v39 = vsel %vm428_vm11, %v576_v24, %v585_v35  ;;  %v648_v12 = vpop.permute.xlu1 %647  ;;  %v646_v58 = vpop.permute.xlu0 %645  ;;  %v584_v25 = vsel %vm428_vm11, %v574_v27, %v582_v40 }
 0x19f   : > { %v10008_v15 = vcombine.low %v514_v61, %v586_v39  ;;  %v10006_v16 = vcombine.low %v512_v38, %v584_v25  ;;  %v10007_v33 = vcombine.high %v512_v38, %v584_v25  ;;  %v10009_v56 = vcombine.high %v514_v61, %v586_v39  ;;  %v12620_v25 = vld [vmem:[%s17247_s1 + $0x118] sm:$0xff] }
 0x1a0   : > { %3618 = vrot.lane.b32.xlu0 %v12546_v52, %s11222_s27  ;;  %3620 = vrot.lane.b32.xlu1 %v12551_v34, %s11222_s27  ;;  %v652_v14 = vrot.slane %v648_v12, 4  ;;  %v651_v20 = vrot.slane %v646_v58, 4 }
 0x1a1   : > { %1733 = vmatprep.subr.bf16.mxu0 %v10007_v33  ;;  %1774 = vmatprep.subr.bf16.mxu1 %v10009_v56 }
 0x1a2   : > { %v718_v37 = vpop.permute.xlu1 %717  ;;  %v650_v42 = vpop.permute.xlu0 %649  ;;  %1734 = vmatpush1.bf16.msra.mxu0 %v10006_v16  ;;  %1775 = vmatpush1.bf16.msra.mxu1 %v10008_v15  ;;  %v654_v43 = vsel %vm252_vm8, %v651_v20, %v652_v14 }
 0x1a3   : > { %v653_v48 = vrot.slane %v650_v42, 4  ;;  %v723_v36 = vrot.slane %v718_v37, 4  ;;  %v656_v21 = vsel %vm356_vm10, %v646_v58, %v654_v43  ;;  %v12615_v58 = vld [vmem:[%s17247_s1 + $0x110] sm:$0xff] }
 0x1a4   : > { %3683 = vrot.lane.b32.xlu0 %v12564_v3, %s11223_s11  ;;  %3685 = vrot.lane.b32.xlu1 %v12569_v11, %s11223_s11 }
 0x1a5   : > { %v657_v19 = vsel %vm252_vm8, %v652_v14, %v653_v48 }
 0x1a6   : > { %v722_v2 = vpop.permute.xlu1 %721  ;;  %v720_v5 = vpop.permute.xlu0 %719  ;;  %v658_v46 = vsel %vm356_vm10, %v648_v12, %v657_v19 }
 0x1a7   : > { %v725_v59 = vrot.slane %v722_v2, 4  ;;  %v724_v13 = vrot.slane %v720_v5, 4 }
 0x1a8   : > { %3687 = vrot.lane.b32.xlu0 %v12578_v22, %s11223_s11  ;;  %3689 = vrot.lane.b32.xlu1 %v12583_v30, %s11223_s11 }
 0x1a9   : > { %v729_v57 = vsel %vm252_vm8, %v724_v13, %v725_v59  ;;  %v726_v27 = vsel %vm252_vm8, %v723_v36, %v724_v13  ;;  %v807_v59 = vld [vmem:[%s17246_s0] sm:$0xf] }
 0x1aa   : > { %v730_v24 = vsel %vm284_vm9, %v720_v5, %v729_v57  ;;  %v792_v49 = vpop.permute.xlu1 %791  ;;  %v790_v50 = vpop.permute.xlu0 %789  ;;  %v728_v28 = vsel %vm284_vm9, %v718_v37, %v726_v27 }
 0x1ab   : > { %v10012_v31 = vcombine.low %v658_v46, %v730_v24  ;;  %v796_v35 = vrot.slane %v792_v49, 4  ;;  %v795_v40 = vrot.slane %v790_v50, 4  ;;  %v10010_v38 = vcombine.low %v656_v21, %v728_v28 }
 0x1ac   : > { %v10011_v61 = vcombine.high %v656_v21, %v728_v28  ;;  %v10013_v39 = vcombine.high %v658_v46, %v730_v24  ;;  %3752 = vrot.lane.b32.xlu0 %v12596_v54, %s11224_s25  ;;  %3754 = vrot.lane.b32.xlu1 %v12601_v32, %s11224_s25 }
 0x1ad   : > { %v798_v12 = vsel %vm252_vm8, %v795_v40, %v796_v35 }
 0x1ae   : > { %v800_v15 = vsel %vm17481_vm6, %v790_v50, %v798_v12  ;;  %1735 = vmatprep.subr.bf16.mxu0 %v10011_v61  ;;  %1776 = vmatprep.subr.bf16.mxu1 %v10013_v39  ;;  %v1864_v16 = vpop.permute.xlu1 %1863  ;;  %v794_v33 = vpop.permute.xlu0 %793 }
 0x1af   : > { %v10014_v56 = vcombine.low %v800_v15, %v800_v15  ;;  %v10015_v14 = vcombine.high %v800_v15, %v800_v15  ;;  %1736 = vmatpush1.bf16.msra.mxu0 %v10010_v38  ;;  %1777 = vmatpush1.bf16.msra.mxu1 %v10012_v31  ;;  %v797_v20 = vrot.slane %v794_v33, 4  ;;  %v1869_v13 = vrot.slane %v1864_v16, 4 }
 0x1b0   : > { %3756 = vrot.lane.b32.xlu0 %v12615_v58, %s11224_s25  ;;  %3758 = vrot.lane.b32.xlu1 %v12620_v25, %s11224_s25 }
 0x1b1   : > { %v801_v37 = vsel %vm252_vm8, %v796_v35, %v797_v20  ;;  %10018 = vmatprep.subr.msk.bf16.mxu0 %vm252_vm8, %v10015_v14  ;;  %v1718_v42 = vsel %vm252_vm8, %v10014_v56, 0 }
 0x1b2   : > { %v1868_v48 = vpop.permute.xlu1 %1867  ;;  %v1866_v43 = vpop.permute.xlu0 %1865  ;;  %v802_v2 = vsel %vm17481_vm6, %v792_v49, %v801_v37 }
 0x1b3   : > { %1738 = vmatpush1.bf16.msra.mxu0 %v1718_v42  ;;  %v1870_v5 = vrot.slane %v1866_v43, 4  ;;  %v10017_v36 = vcombine.high %v802_v2, %v802_v2  ;;  %v10016_v19 = vcombine.low %v802_v2, %v802_v2  ;;  %v1871_v46 = vrot.slane %v1868_v48, 4 }
 0x1b4   : > { %2635 = vrot.lane.b32.xlu0 %v12351_v10, %s11225_s6  ;;  %2637 = vrot.lane.b32.xlu1 %v12356_v63, %s11225_s6 }
 0x1b5   : > { %10020 = vmatprep.subr.msk.bf16.mxu1 %vm252_vm8, %v10017_v36  ;;  %v1724_v57 = vsel %vm252_vm8, %v10016_v19, 0  ;;  %v1872_v49 = vsel %vm252_vm8, %v1869_v13, %v1870_v5  ;;  %v1874_v61 = vsel %vm252_vm8, %v1870_v5, %v1871_v46 }
 0x1b6   : > { %v1935_v27 = vpop.permute.xlu1 %1934  ;;  %1779 = vmatpush1.bf16.msra.mxu1 %v1724_v57  ;;  %v1933_v21 = vpop.permute.xlu0 %1932  ;;  %10019 = vmatmul.mubr.msk.bf16.vlgmr.msra.gmra.mrb[0].mxu0 %vm326_vm14, %v807_v59  ;;  %v1873_v31 = vsel %vm254_vm15, %v1864_v16, %v1872_v49  ;;  %v1875_v16 = vsel %vm254_vm15, %v1866_v43, %v1874_v61 }
 0x1b7   : > { %v1939_v24 = vrot.slane %v1935_v27, 4  ;;  %v1938_v50 = vrot.slane %v1933_v21, 4  ;;  %2560 = vmatprep.mubr.bf16.mxu0 %v17254_v44 }
 0x1b8   : > { %2639 = vrot.lane.b32.xlu0 %v12369_v18, %s11225_s6  ;;  %2641 = vrot.lane.b32.xlu1 %v12374_v55, %s11225_s6 }
 0x1b9   : > { %v1941_v28 = vsel %vm252_vm8, %v1938_v50, %v1939_v24  ;;  %10021 = vmatmul.mubr.msk.bf16.vlgmr.msra.gmra.mrb[0].mxu1 %vm326_vm14, %v807_v59 }
 0x1ba   : > { %v1942_v35 = vsel %vm326_vm14, %v1933_v21, %v1941_v28  ;;  %v2002_v40 = vpop.permute.xlu1 %2001  ;;  %v1937_v38 = vpop.permute.xlu0 %1936  ;;  %2601 = vmatprep.mubr.bf16.mxu1 %v17254_v44 }
 0x1bb   : > { %v10078_v39 = vcombine.low %v1873_v31, %v1942_v35  ;;  %v1940_v12 = vrot.slane %v1937_v38, 4  ;;  %v10079_v15 = vcombine.high %v1873_v31, %v1942_v35  ;;  %v2007_v2 = vrot.slane %v2002_v40, 4 }
 0x1bc   : > { %2704 = vrot.lane.b32.xlu0 %v12387_v60, %s11226_s7  ;;  %2706 = vrot.lane.b32.xlu1 %v12392_v6, %s11226_s7 }
 0x1bd   : > { %v1943_v33 = vsel %vm252_vm8, %v1939_v24, %v1940_v12  ;;  %2528 = vmatprep.subr.bf16.mxu0 %v10079_v15 }
 0x1be   : > { %v2006_v56 = vpop.permute.xlu1 %2005  ;;  %2529 = vmatpush1.bf16.msra.mxu0 %v10078_v39  ;;  %v2004_v14 = vpop.permute.xlu0 %2003  ;;  %v1944_v20 = vsel %vm326_vm14, %v1935_v27, %v1943_v33 }
 0x1bf   : > { %v2008_v37 = vrot.slane %v2004_v14, 4  ;;  %v10080_v42 = vcombine.low %v1875_v16, %v1944_v20  ;;  %v10081_v48 = vcombine.high %v1875_v16, %v1944_v20  ;;  %v2009_v43 = vrot.slane %v2006_v56, 4 }
 0x1c0   : > { %2708 = vrot.lane.b32.xlu0 %v12405_v26, %s11226_s7  ;;  %2710 = vrot.lane.b32.xlu1 %v12410_v17, %s11226_s7 }
 0x1c1   : > { %2569 = vmatprep.subr.bf16.mxu1 %v10081_v48  ;;  %v2010_v59 = vsel %vm252_vm8, %v2007_v2, %v2008_v37  ;;  %v2012_v49 = vsel %vm252_vm8, %v2008_v37, %v2009_v43 }
 0x1c2   : > { %v2073_v5 = vpop.permute.xlu1 %2072  ;;  %2570 = vmatpush1.bf16.msra.mxu1 %v10080_v42  ;;  %v2071_v36 = vpop.permute.xlu0 %2070  ;;  %v2011_v27 = vsel %vm398_vm13, %v2002_v40, %v2010_v59  ;;  %v2013_v40 = vsel %vm398_vm13, %v2004_v14, %v2012_v49 }
 0x1c3   : > { %v2077_v19 = vrot.slane %v2073_v5, 4  ;;  %v2076_v13 = vrot.slane %v2071_v36, 4 }
 0x1c4   : > { %2773 = vrot.lane.b32.xlu0 %v12424_v1, %s11227_s9  ;;  %2775 = vrot.lane.b32.xlu1 %v12429_v62, %s11227_s9 }
 0x1c5   : > { %v2079_v57 = vsel %vm252_vm8, %v2076_v13, %v2077_v19 }
 0x1c6   : > { %v2080_v21 = vsel %vm470_vm12, %v2071_v36, %v2079_v57  ;;  %v2111_v46 = vpop.permute.xlu1 %2110  ;;  %v2075_v24 = vpop.permute.xlu0 %2074 }
 0x1c7   : > { %v10082_v50 = vcombine.low %v2011_v27, %v2080_v21  ;;  %v2078_v28 = vrot.slane %v2075_v24, 4  ;;  %v10083_v31 = vcombine.high %v2011_v27, %v2080_v21  ;;  %v2116_v12 = vrot.slane %v2111_v46, 4 }
 0x1c8   : > { %2777 = vrot.lane.b32.xlu0 %v12446_v29, %s11227_s9  ;;  %2779 = vrot.lane.b32.xlu1 %v12451_v47, %s11227_s9 }
 0x1c9   : > { %v2081_v35 = vsel %vm252_vm8, %v2077_v19, %v2078_v28  ;;  %2530 = vmatprep.subr.bf16.mxu0 %v10083_v31 }
 0x1ca   : > { %v2115_v38 = vpop.permute.xlu1 %2114  ;;  %2531 = vmatpush1.bf16.msra.mxu0 %v10082_v50  ;;  %v2113_v61 = vpop.permute.xlu0 %2112  ;;  %v2082_v39 = vsel %vm470_vm12, %v2073_v5, %v2081_v35 }
 0x1cb   : > { %v2117_v15 = vrot.slane %v2113_v61, 4  ;;  %v10084_v33 = vcombine.low %v2013_v40, %v2082_v39  ;;  %v10085_v16 = vcombine.high %v2013_v40, %v2082_v39  ;;  %v2118_v14 = vrot.slane %v2115_v38, 4 }
 0x1cc   : > { %2842 = vrot.lane.b32.xlu0 %v12464_v45, %s11228_s10  ;;  %2844 = vrot.lane.b32.xlu1 %v12469_v9, %s11228_s10 }
 0x1cd   : > { %2571 = vmatprep.subr.bf16.mxu1 %v10085_v16  ;;  %v2119_v42 = vsel %vm252_vm8, %v2116_v12, %v2117_v15  ;;  %v2121_v59 = vsel %vm252_vm8, %v2117_v15, %v2118_v14 }
 0x1ce   : > { %v2182_v56 = vpop.permute.xlu1 %2181  ;;  %2572 = vmatpush1.bf16.msra.mxu1 %v10084_v33  ;;  %v2180_v20 = vpop.permute.xlu0 %2179  ;;  %v2120_v5 = vsel %vm17253_vm7, %v2111_v46, %v2119_v42  ;;  %v2122_v46 = vsel %vm17253_vm7, %v2113_v61, %v2121_v59  ;;  %vm17482_vm7 = vmmov %vm17481_vm6 }
 0x1cf   : > { %v2186_v37 = vrot.slane %v2182_v56, 4  ;;  %v2185_v48 = vrot.slane %v2180_v20, 4 }
 0x1d0   : > { %2846 = vrot.lane.b32.xlu0 %v12478_v23, %s11228_s10  ;;  %2848 = vrot.lane.b32.xlu1 %v12483_v53, %s11228_s10 }
 0x1d1   : > { %v2188_v2 = vsel %vm252_vm8, %v2185_v48, %v2186_v37 }
 0x1d2   : > { %v2189_v36 = vsel %vm428_vm11, %v2180_v20, %v2188_v2  ;;  %v2249_v43 = vpop.permute.xlu1 %2248  ;;  %v2184_v19 = vpop.permute.xlu0 %2183 }
 0x1d3   : > { %v10086_v13 = vcombine.low %v2120_v5, %v2189_v36  ;;  %v2187_v57 = vrot.slane %v2184_v19, 4  ;;  %v10087_v27 = vcombine.high %v2120_v5, %v2189_v36  ;;  %v2254_v40 = vrot.slane %v2249_v43, 4 }
 0x1d4   : > { %2951 = vrot.lane.b32.xlu0 %v12496_v41, %s11229_s13  ;;  %2953 = vrot.lane.b32.xlu1 %v12501_v51, %s11229_s13 }
 0x1d5   : > { %v2190_v21 = vsel %vm252_vm8, %v2186_v37, %v2187_v57  ;;  %2532 = vmatprep.subr.bf16.mxu0 %v10087_v27 }
 0x1d6   : > { %v2253_v24 = vpop.permute.xlu1 %2252  ;;  %2533 = vmatpush1.bf16.msra.mxu0 %v10086_v13  ;;  %v2251_v49 = vpop.permute.xlu0 %2250  ;;  %v2191_v50 = vsel %vm428_vm11, %v2182_v56, %v2190_v21 }
 0x1d7   : > { %v2255_v28 = vrot.slane %v2251_v49, 4  ;;  %v10088_v31 = vcombine.low %v2122_v46, %v2191_v50  ;;  %v10089_v35 = vcombine.high %v2122_v46, %v2191_v50  ;;  %v2256_v61 = vrot.slane %v2253_v24, 4 }
 0x1d8   : > { %2955 = vrot.lane.b32.xlu0 %v12514_v4, %s11229_s13  ;;  %2957 = vrot.lane.b32.xlu1 %v12519_v8, %s11229_s13 }
 0x1d9   : > { %2573 = vmatprep.subr.bf16.mxu1 %v10089_v35  ;;  %v2257_v15 = vsel %vm252_vm8, %v2254_v40, %v2255_v28  ;;  %v2259_v42 = vsel %vm252_vm8, %v2255_v28, %v2256_v61 }
 0x1da   : > { %v2320_v38 = vpop.permute.xlu1 %2319  ;;  %2574 = vmatpush1.bf16.msra.mxu1 %v10088_v31  ;;  %v2318_v39 = vpop.permute.xlu0 %2317  ;;  %v2258_v56 = vsel %vm356_vm10, %v2249_v43, %v2257_v15  ;;  %v2260_v43 = vsel %vm356_vm10, %v2251_v49, %v2259_v42 }
 0x1db   : > { %v2324_v12 = vrot.slane %v2320_v38, 4  ;;  %v2323_v33 = vrot.slane %v2318_v39, 4 }
 0x1dc   : > { %3020 = vrot.lane.b32.xlu0 %v12528_v7, %s11230_s15  ;;  %3022 = vrot.lane.b32.xlu1 %v12533_v0, %s11230_s15 }
 0x1dd   : > { %v2326_v16 = vsel %vm252_vm8, %v2323_v33, %v2324_v12 }
 0x1de   : > { %v2327_v20 = vsel %vm284_vm9, %v2318_v39, %v2326_v16  ;;  %v2387_v14 = vpop.permute.xlu1 %2386  ;;  %v2322_v37 = vpop.permute.xlu0 %2321  ;;  %v10077_v16 = vld [vmem:[%s17246_s0 + $0x8] sm:$0xf] }
 0x1df   : > { %v10090_v48 = vcombine.low %v2258_v56, %v2327_v20  ;;  %v2325_v2 = vrot.slane %v2322_v37, 4  ;;  %v10091_v5 = vcombine.high %v2258_v56, %v2327_v20  ;;  %v2392_v19 = vrot.slane %v2387_v14, 4 }
 0x1e0   : > { %3024 = vrot.lane.b32.xlu0 %v12546_v52, %s11230_s15  ;;  %3026 = vrot.lane.b32.xlu1 %v12551_v34, %s11230_s15 }
 0x1e1   : > { %v2328_v36 = vsel %vm252_vm8, %v2324_v12, %v2325_v2  ;;  %2534 = vmatprep.subr.bf16.mxu0 %v10091_v5 }
 0x1e2   : > { %v2391_v59 = vpop.permute.xlu1 %2390  ;;  %2535 = vmatpush1.bf16.msra.mxu0 %v10090_v48  ;;  %v2389_v13 = vpop.permute.xlu0 %2388  ;;  %v2329_v57 = vsel %vm284_vm9, %v2320_v38, %v2328_v36 }
 0x1e3   : > { %v2394_v27 = vrot.slane %v2391_v59, 4  ;;  %v2393_v21 = vrot.slane %v2389_v13, 4  ;;  %v10092_v46 = vcombine.low %v2260_v43, %v2329_v57  ;;  %v10093_v24 = vcombine.high %v2260_v43, %v2329_v57 }
 0x1e4   : > { %3089 = vrot.lane.b32.xlu0 %v12564_v3, %s11231_s16  ;;  %3091 = vrot.lane.b32.xlu1 %v12569_v11, %s11231_s16 }
 0x1e5   : > { %v2395_v50 = vsel %vm252_vm8, %v2392_v19, %v2393_v21  ;;  %v2397_v49 = vsel %vm252_vm8, %v2393_v21, %v2394_v27  ;;  %2575 = vmatprep.subr.bf16.mxu1 %v10093_v24 }
 0x1e6   : > { %v2398_v28 = vsel %vm17481_vm6, %v2389_v13, %v2397_v49  ;;  %2576 = vmatpush1.bf16.msra.mxu1 %v10092_v46  ;;  %v2396_v31 = vsel %vm17482_vm7, %v2387_v14, %v2395_v50  ;;  %v12728_v35 = vpop.permute.xlu0 %3247  ;;  %v12730_v40 = vpop.permute.xlu1 %3249  ;;  %vm17541_vm7 = vcmask 64512  }
 0x1e7   : > { %v10096_v38 = vcombine.low %v2398_v28, %v2398_v28  ;;  %v10097_v39 = vcombine.high %v2398_v28, %v2398_v28  ;;  %v10095_v61 = vcombine.high %v2396_v31, %v2396_v31  ;;  %v10094_v12 = vcombine.low %v2396_v31, %v2396_v31  ;;  %vm17542_vm6 = vmmov %vm17541_vm7 }
 0x1e8   : > { %3093 = vrot.lane.b32.xlu0 %v12578_v22, %s11231_s16  ;;  %3095 = vrot.lane.b32.xlu1 %v12583_v30, %s11231_s16 }
 0x1e9   : > { %10098 = vmatprep.subr.msk.bf16.mxu0 %vm252_vm8, %v10095_v61  ;;  %10100 = vmatprep.subr.msk.bf16.mxu1 %vm252_vm8, %v10097_v39  ;;  %v2517_v15 = vsel %vm252_vm8, %v10094_v12, 0  ;;  %v2523_v33 = vsel %vm252_vm8, %v10096_v38, 0 }
 0x1ea   : > { %2537 = vmatpush1.bf16.msra.mxu0 %v2517_v15  ;;  %2578 = vmatpush1.bf16.msra.mxu1 %v2523_v33  ;;  %v12743_v56 = vpop.permute.xlu0 %3251  ;;  %v12745_v20 = vpop.permute.xlu1 %3253 }
 0x1ec   : > { %3158 = vrot.lane.b32.xlu0 %v12596_v54, %s11232_s17  ;;  %3160 = vrot.lane.b32.xlu1 %v12601_v32, %s11232_s17 }
 0x1ed   : > { %10099 = vmatmul.mubr.msk.bf16.vlgmr.msra.gmra.mrb[0].mxu0 %vm326_vm14, %v10077_v16  ;;  %10101 = vmatmul.mubr.msk.bf16.vlgmr.msra.gmra.mrb[0].mxu1 %vm326_vm14, %v10077_v16 }
 0x1ee   : > { %v12753_v14 = vpop.permute.xlu0 %3316  ;;  %v12755_v37 = vpop.permute.xlu1 %3318  ;;  %3965 = vmatprep.mubr.bf16.mxu0 %v17254_v44  ;;  %4006 = vmatprep.mubr.bf16.mxu1 %v17254_v44 }
 0x1f0   : > { %3162 = vrot.lane.b32.xlu0 %v12615_v58, %s11232_s17  ;;  %3164 = vrot.lane.b32.xlu1 %v12620_v25, %s11232_s17 }
 0x1f2   : > { %v12763_v42 = vpop.permute.xlu0 %3320  ;;  %v12765_v48 = vpop.permute.xlu1 %3322 }
 0x1f4   : > { %4215 = vrot.lane.b32.xlu0 %v12351_v10, %s11225_s6  ;;  %4217 = vrot.lane.b32.xlu1 %v12356_v63, %s11225_s6 }
 0x1f6   : > { %v12771_v2 = vpop.permute.xlu0 %3385  ;;  %v12773_v5 = vpop.permute.xlu1 %3387 }
 0x1f8   : > { %4219 = vrot.lane.b32.xlu0 %v12369_v18, %s11225_s6  ;;  %4221 = vrot.lane.b32.xlu1 %v12374_v55, %s11225_s6 }
 0x1fa   : > { %v12779_v36 = vpop.permute.xlu0 %3389  ;;  %v12781_v43 = vpop.permute.xlu1 %3391 }
 0x1fc   : > { %4284 = vrot.lane.b32.xlu0 %v12387_v60, %s11226_s7  ;;  %4286 = vrot.lane.b32.xlu1 %v12392_v6, %s11226_s7 }
 0x1fe   : > { %v12787_v10 = vpop.permute.xlu0 %3454  ;;  %v12789_v63 = vpop.permute.xlu1 %3456 }
 0x200   : > { %4288 = vrot.lane.b32.xlu0 %v12405_v26, %s11226_s7  ;;  %4290 = vrot.lane.b32.xlu1 %v12410_v17, %s11226_s7 }
 0x202   : > { %v12795_v18 = vpop.permute.xlu0 %3458  ;;  %v12797_v55 = vpop.permute.xlu1 %3460 }
 0x203   : > { %17483 = vst [vmem:[#allocation5_spill] sm:$0xff] %v12797_v55 }
 0x204   : > { %4353 = vrot.lane.b32.xlu0 %v12424_v1, %s11227_s9  ;;  %4355 = vrot.lane.b32.xlu1 %v12429_v62, %s11227_s9 }
 0x206   : > { %v12803_v60 = vpop.permute.xlu0 %3545  ;;  %v12805_v6 = vpop.permute.xlu1 %3547 }
 0x208   : > { %4357 = vrot.lane.b32.xlu0 %v12446_v29, %s11227_s9  ;;  %4359 = vrot.lane.b32.xlu1 %v12451_v47, %s11227_s9 }
 0x20a   : > { %v12811_v26 = vpop.permute.xlu0 %3549  ;;  %v12813_v17 = vpop.permute.xlu1 %3551 }
 0x20c   : > { %4422 = vrot.lane.b32.xlu0 %v12464_v45, %s11228_s10  ;;  %4424 = vrot.lane.b32.xlu1 %v12469_v9, %s11228_s10 }
 0x20e   : > { %v12819_v1 = vpop.permute.xlu0 %3614  ;;  %v12821_v62 = vpop.permute.xlu1 %3616 }
 0x210   : > { %4426 = vrot.lane.b32.xlu0 %v12478_v23, %s11228_s10  ;;  %4428 = vrot.lane.b32.xlu1 %v12483_v53, %s11228_s10 }
 0x212   : > { %v12827_v29 = vpop.permute.xlu0 %3618  ;;  %v12829_v47 = vpop.permute.xlu1 %3620 }
 0x214   : > { %4531 = vrot.lane.b32.xlu0 %v12496_v41, %s11229_s13  ;;  %4533 = vrot.lane.b32.xlu1 %v12501_v51, %s11229_s13 }
 0x216   : > { %v12835_v45 = vpop.permute.xlu0 %3683  ;;  %v12837_v9 = vpop.permute.xlu1 %3685 }
 0x218   : > { %4535 = vrot.lane.b32.xlu0 %v12514_v4, %s11229_s13  ;;  %4537 = vrot.lane.b32.xlu1 %v12519_v8, %s11229_s13 }
 0x21a   : > { %v12843_v23 = vpop.permute.xlu0 %3687  ;;  %v12845_v53 = vpop.permute.xlu1 %3689 }
 0x21c   : > { %4600 = vrot.lane.b32.xlu0 %v12528_v7, %s11230_s15  ;;  %4602 = vrot.lane.b32.xlu1 %v12533_v0, %s11230_s15 }
 0x21e   : > { %v12851_v41 = vpop.permute.xlu0 %3752  ;;  %v12853_v51 = vpop.permute.xlu1 %3754 }
 0x220   : > { %4604 = vrot.lane.b32.xlu0 %v12546_v52, %s11230_s15  ;;  %4606 = vrot.lane.b32.xlu1 %v12551_v34, %s11230_s15 }
 0x222   : > { %v12859_v4 = vpop.permute.xlu0 %3756  ;;  %v12861_v8 = vpop.permute.xlu1 %3758 }
 0x224   : > { %4669 = vrot.lane.b32.xlu0 %v12564_v3, %s11231_s16  ;;  %4671 = vrot.lane.b32.xlu1 %v12569_v11, %s11231_s16 }
 0x226   : > { %v12867_v7 = vpop.permute.xlu0 %2635  ;;  %v12869_v0 = vpop.permute.xlu1 %2637 }
 0x227   : > { %17484 = vst [vmem:[#allocation6_spill] sm:$0xff] %v12867_v7 }
 0x228   : > { %4673 = vrot.lane.b32.xlu0 %v12578_v22, %s11231_s16  ;;  %4675 = vrot.lane.b32.xlu1 %v12583_v30, %s11231_s16 }
 0x22a   : > { %v12875_v52 = vpop.permute.xlu0 %2639  ;;  %v12877_v34 = vpop.permute.xlu1 %2641 }
 0x22c   : > { %4738 = vrot.lane.b32.xlu0 %v12596_v54, %s11232_s17  ;;  %4740 = vrot.lane.b32.xlu1 %v12601_v32, %s11232_s17 }
 0x22e   : > { %v12883_v3 = vpop.permute.xlu0 %2704  ;;  %v12885_v11 = vpop.permute.xlu1 %2706 }
 0x22f   : > { %17485 = vst [vmem:[#allocation7_spill] sm:$0xff] %v12883_v3 }
 0x230   : > { %4742 = vrot.lane.b32.xlu0 %v12615_v58, %s11232_s17  ;;  %4744 = vrot.lane.b32.xlu1 %v12620_v25, %s11232_s17 }
 0x232   : > { %v12891_v22 = vpop.permute.xlu0 %2708  ;;  %v12893_v30 = vpop.permute.xlu1 %2710 }
 0x236   : > { %v12895_v19 = vpop.permute.xlu0 %2773  ;;  %v12897_v54 = vpop.permute.xlu1 %2775 }
 0x237   : > { %17486 = vst [vmem:[#allocation8_spill] sm:$0xff] %v12895_v19 }
 0x23a   : > { %v12899_v59 = vpop.permute.xlu0 %2777  ;;  %v12901_v32 = vpop.permute.xlu1 %2779 }
 0x23b   : > { %17487 = vst [vmem:[#allocation9_spill] sm:$0xff] %v12901_v32 }
 0x23e   : > { %v12903_v13 = vpop.permute.xlu0 %2842  ;;  %v12905_v57 = vpop.permute.xlu1 %2844 }
 0x23f   : > { %17488 = vst [vmem:[#allocation10_spill] sm:$0xff] %v12903_v13  ;;  %17489 = vst [vmem:[#allocation11_spill] sm:$0xff] %v12905_v57 }
 0x242   : > { %v12907_v58 = vpop.permute.xlu0 %2846  ;;  %v12909_v27 = vpop.permute.xlu1 %2848 }
 0x243   : > { %17490 = vst [vmem:[#allocation12_spill] sm:$0xff] %v12907_v58  ;;  %17491 = vst [vmem:[#allocation13_spill] sm:$0xff] %v12909_v27 }
 0x246   : > { %v12911_v25 = vpop.permute.xlu0 %2951  ;;  %v12913_v21 = vpop.permute.xlu1 %2953 }
 0x247   : > { %17492 = vst [vmem:[#allocation14_spill] sm:$0xff] %v12911_v25  ;;  %17493 = vst [vmem:[#allocation15_spill] sm:$0xff] %v12913_v21 }
 0x24a   : > { %v12915_v46 = vpop.permute.xlu0 %2955  ;;  %v12917_v24 = vpop.permute.xlu1 %2957 }
 0x24b   : > { %17494 = vst [vmem:[#allocation16_spill] sm:$0xff] %v12915_v46  ;;  %17495 = vst [vmem:[#allocation17_spill] sm:$0xff] %v12917_v24 }
 0x24e   : > { %v12919_v50 = vpop.permute.xlu0 %3020  ;;  %v12921_v49 = vpop.permute.xlu1 %3022 }
 0x24f   : > { %17496 = vst [vmem:[#allocation18_spill] sm:$0xff] %v12919_v50  ;;  %17497 = vst [vmem:[#allocation19_spill] sm:$0xff] %v12921_v49 }
 0x252   : > { %v12923_v28 = vpop.permute.xlu0 %3024  ;;  %v12925_v31 = vpop.permute.xlu1 %3026 }
 0x253   : > { %17498 = vst [vmem:[#allocation20_spill] sm:$0xff] %v12923_v28  ;;  %17499 = vst [vmem:[#allocation21_spill] sm:$0xff] %v12925_v31  ;;  %v13065_v28 = vsel %vm1060_vm3, %v12787_v10, %v12789_v63 }
 0x256   : > { %v12927_v38 = vpop.permute.xlu0 %3089  ;;  %v12929_v39 = vpop.permute.xlu1 %3091 }
 0x257   : > { %17500 = vst [vmem:[#allocation22_spill] sm:$0xff] %v12927_v38  ;;  %17501 = vst [vmem:[#allocation23_spill] sm:$0xff] %v12929_v39 }
 0x25a   : > { %v12931_v61 = vpop.permute.xlu0 %3093  ;;  %v12933_v12 = vpop.permute.xlu1 %3095 }
 0x25b   : > { %17502 = vst [vmem:[#allocation24_spill] sm:$0xff] %v12931_v61  ;;  %17503 = vst [vmem:[#allocation25_spill] sm:$0xff] %v12933_v12 }
 0x25e   : > { %v12935_v15 = vpop.permute.xlu0 %3158  ;;  %v12937_v33 = vpop.permute.xlu1 %3160 }
 0x25f   : > { %17504 = vst [vmem:[#allocation26_spill] sm:$0xff] %v12935_v15  ;;  %17505 = vst [vmem:[#allocation27_spill] sm:$0xff] %v12937_v33 }
 0x262   : > { %v12939_v16 = vpop.permute.xlu0 %3162  ;;  %v12941_v44 = vpop.permute.xlu1 %3164 }
 0x263   : > { %17506 = vst [vmem:[#allocation28_spill] sm:$0xff] %v12939_v16  ;;  %17507 = vst [vmem:[#allocation29_spill] sm:$0xff] %v12941_v44 }
 0x266   : > { %v12943_v50 = vpop.permute.xlu0 %4215  ;;  %v12945_v25 = vpop.permute.xlu1 %4217 }
 0x267   : > { %17508 = vst [vmem:[#allocation30_spill] sm:$0xff] %v12943_v50  ;;  %17509 = vst [vmem:[#allocation31_spill] sm:$0xff] %v12945_v25 }
 0x26a   : > { %v12947_v13 = vpop.permute.xlu0 %4219  ;;  %v12949_v38 = vpop.permute.xlu1 %4221 }
 0x26b   : > { %17510 = vst [vmem:[#allocation32_spill] sm:$0xff] %v12947_v13  ;;  %17511 = vst [vmem:[#allocation33_spill] sm:$0xff] %v12949_v38 }
 0x26e   : > { %v12951_v19 = vpop.permute.xlu0 %4284  ;;  %v12953_v3 = vpop.permute.xlu1 %4286 }
 0x26f   : > { %17512 = vst [vmem:[#allocation34_spill] sm:$0xff] %v12951_v19  ;;  %17513 = vst [vmem:[#allocation35_spill] sm:$0xff] %v12953_v3 }
 0x272   : > { %v12955_v7 = vpop.permute.xlu0 %4288  ;;  %v12957_v15 = vpop.permute.xlu1 %4290 }
 0x273   : > { %17514 = vst [vmem:[#allocation36_spill] sm:$0xff] %v12955_v7  ;;  %17515 = vst [vmem:[#allocation37_spill] sm:$0xff] %v12957_v15 }
 0x276   : > { %v12959_v33 = vpop.permute.xlu0 %4353  ;;  %v12961_v16 = vpop.permute.xlu1 %4355 }
 0x277   : > { %17516 = vst [vmem:[#allocation38_spill] sm:$0xff] %v12959_v33  ;;  %17517 = vst [vmem:[#allocation39_spill] sm:$0xff] %v12961_v16 }
 0x27a   : > { %v12963_v44 = vpop.permute.xlu0 %4357  ;;  %v12965_v50 = vpop.permute.xlu1 %4359 }
 0x27b   : > { %17518 = vst [vmem:[#allocation40_spill] sm:$0xff] %v12963_v44  ;;  %17519 = vst [vmem:[#allocation41_spill] sm:$0xff] %v12965_v50 }
 0x27e   : > { %v12967_v25 = vpop.permute.xlu0 %4422  ;;  %v12969_v13 = vpop.permute.xlu1 %4424 }
 0x27f   : > { %17520 = vst [vmem:[#allocation42_spill] sm:$0xff] %v12967_v25  ;;  %17521 = vst [vmem:[#allocation43_spill] sm:$0xff] %v12969_v13 }
 0x282   : > { %v12971_v38 = vpop.permute.xlu0 %4426  ;;  %v12973_v19 = vpop.permute.xlu1 %4428 }
 0x283   : > { %17522 = vst [vmem:[#allocation44_spill] sm:$0xff] %v12971_v38  ;;  %17523 = vst [vmem:[#allocation45_spill] sm:$0xff] %v12973_v19 }
 0x286   : > { %v12975_v3 = vpop.permute.xlu0 %4531  ;;  %v12977_v7 = vpop.permute.xlu1 %4533 }
 0x287   : > { %17524 = vst [vmem:[#allocation46_spill] sm:$0xff] %v12975_v3  ;;  %17525 = vst [vmem:[#allocation47_spill] sm:$0xff] %v12977_v7  ;;  %v12997_v7 = vld [vmem:[#allocation2] sm:$0xff] }
 0x288   : > { %17535 = vst [vmem:[#allocation57_spill] sm:$0xff] %v12997_v7  ;;  %v13016_v12 = vmul.f32 %v12753_v14, %v12997_v7  ;;  %v13041_v31 = vmul.f32 %v12771_v2, %v12997_v7  ;;  %v13060_v49 = vmul.f32 %v12787_v10, %v12997_v7  ;;  %v13085_v10 = vsel %vm1102_vm4, %v12805_v6, %v12811_v26 }
 0x28a   : > { %v12979_v15 = vpop.permute.xlu0 %4535  ;;  %v12981_v33 = vpop.permute.xlu1 %4537  ;;  %17539 = vst [vmem:[#allocation61_spill] sm:$0xff] %v13060_v49  ;;  %v13102_v49 = vsel %vm1031_vm5, %v12821_v62, %v12827_v29 }
 0x28b   : > { %17526 = vst [vmem:[#allocation48_spill] sm:$0xff] %v12979_v15  ;;  %17527 = vst [vmem:[#allocation49_spill] sm:$0xff] %v12981_v33  ;;  %v12999_v15 = vld [vmem:[#allocation2 + $0x28] sm:$0xff] }
 0x28c   : > { %17536 = vst [vmem:[#allocation58_spill] sm:$0xff] %v12999_v15  ;;  %v13020_v39 = vmul.f32 %v12813_v17, %v12999_v15  ;;  %v13037_v61 = vmul.f32 %v12829_v47, %v12999_v15 }
 0x28e   : > { %v12983_v16 = vpop.permute.xlu0 %4600  ;;  %v12985_v44 = vpop.permute.xlu1 %4602  ;;  %17537 = vst [vmem:[#allocation59_spill] sm:$0xff] %v13020_v39  ;;  %17538 = vst [vmem:[#allocation60_spill] sm:$0xff] %v13037_v61 }
 0x28f   : > { %17528 = vst [vmem:[#allocation50_spill] sm:$0xff] %v12983_v16  ;;  %17529 = vst [vmem:[#allocation51_spill] sm:$0xff] %v12985_v44  ;;  %v13003_v16 = vmul.f32 %v12728_v35, %v12997_v7  ;;  %v3257_v44 = vsel %vm17301_vm0, %v12743_v56, %v12745_v20  ;;  %v13116_v7 = vsel %vm17541_vm7, %v12835_v45, %v12837_v9  ;;  %vm17554_vm7 = vcmask 449536  }
 0x292   : > { %v12987_v50 = vpop.permute.xlu0 %4604  ;;  %v12989_v25 = vpop.permute.xlu1 %4606 }
 0x293   : > { %17530 = vst [vmem:[#allocation52_spill] sm:$0xff] %v12987_v50  ;;  %17531 = vst [vmem:[#allocation53_spill] sm:$0xff] %v12989_v25  ;;  %v3255_v25 = vsel %vm17301_vm0, %v12728_v35, %v12730_v40  ;;  %v13025_v35 = vsel %vm17302_vm1, %v12753_v14, %v12755_v37  ;;  %v13046_v14 = vsel %vm17449_vm2, %v12771_v2, %v12773_v5 }
 0x294   : > { %v13070_v2 = vsel %vm1060_vm3, %v12789_v63, %v12795_v18  ;;  %v13090_v63 = vsel %vm1102_vm4, %v12811_v26, %v12813_v17 }
 0x296   : > { %v12991_v13 = vpop.permute.xlu0 %4669  ;;  %v12993_v38 = vpop.permute.xlu1 %4671 }
 0x297   : > { %17532 = vst [vmem:[#allocation54_spill] sm:$0xff] %v12991_v13  ;;  %17533 = vst [vmem:[#allocation55_spill] sm:$0xff] %v12993_v38  ;;  %v3256_v13 = vsel %vm17301_vm0, %v12730_v40, %v12743_v56  ;;  %v3325_v40 = vsel %vm17302_vm1, %v12755_v37, %v12763_v42  ;;  %v13033_v56 = vsel %vm17302_vm1, %v12763_v42, %v12765_v48  ;;  %vm17545_vm1 = vcmask 72704  }
 0x298   : > { %v13051_v37 = vsel %vm17449_vm2, %v12773_v5, %v12779_v36  ;;  %v13056_v42 = vsel %vm17449_vm2, %v12779_v36, %v12781_v43  ;;  %v13075_v5 = vsel %vm1060_vm3, %v12795_v18, %v12797_v55  ;;  %v13080_v36 = vsel %vm1102_vm4, %v12803_v60, %v12805_v6  ;;  %vm17543_vm0 = vmmov %vm17542_vm6 }
 0x299   : > { %v13097_v55 = vsel %vm1031_vm5, %v12819_v1, %v12821_v62  ;;  %v13107_v6 = vsel %vm1031_vm5, %v12827_v29, %v12829_v47  ;;  %v13121_v62 = vsel %vm17542_vm6, %v12837_v9, %v12843_v23  ;;  %v13126_v29 = vsel %vm17543_vm0, %v12843_v23, %v12845_v53  ;;  %vm17546_vm0 = vmmov %vm17545_vm1 }
 0x29a   : > { %v4674_v19 = vpop.permute.xlu0 %4673  ;;  %v12995_v3 = vpop.permute.xlu1 %4675  ;;  %v13130_v47 = vmul.f32 %v12845_v53, %v12999_v15  ;;  %v13135_v26 = vsel %vm17545_vm1, %v12851_v41, %v12853_v51  ;;  %vm17547_vm1 = vmmov %vm17546_vm0 }
 0x29b   : > { %17534 = vst [vmem:[#allocation56_spill] sm:$0xff] %v12995_v3  ;;  %v4678_v9 = vsel %vm326_vm14, %v12993_v38, %v4674_v19  ;;  %v4679_v24 = vsel %vm326_vm14, %v4674_v19, %v12995_v3  ;;  %v13152_v38 = vsel %vm17546_vm0, %v12853_v51, %v12859_v4  ;;  %v13157_v19 = vsel %vm17547_vm1, %v12859_v4, %v12861_v8  ;;  %vm17555_vm6 = vmmov %vm17554_vm7 }
 0x29c   : > { %17544 = vst [vmem:[#allocation63_spill] sm:$0xff] %v13130_v47  ;;  %vm17579_vm0 = vmmov %vm17555_vm6 }
 0x29d   : > { %vm17581_vm1 = vmmov %vm17579_vm0 }
 0x29e   : > { %v4739_v33 = vpop.permute.xlu0 %4738  ;;  %v4741_v50 = vpop.permute.xlu1 %4740 }
 0x29f   : > { %v4746_v47 = vsel %vm254_vm15, %v4739_v33, %v4741_v50 }
 0x2a2   : > { %v4743_v18 = vpop.permute.xlu0 %4742  ;;  %v13111_v17 = vpop.permute.xlu1 %4744 }
 0x2a3   : > { %17540 = vst [vmem:[#allocation62_spill] sm:$0xff] %v13111_v17  ;;  %v4747_v23 = vsel %vm254_vm15, %v4741_v50, %v4743_v18  ;;  %v4748_v27 = vsel %vm254_vm15, %v4743_v18, %v13111_v17 }
 0x2c0   : > { %v2562_v61 = vpop.f32.mrb[0].mxu0  ;;  %v2603_v39 = vpop.f32.mrb[0].mxu1 }
 0x2c1   : > { %v13142_v21 = vmax.f32 %v2562_v61, 0.0  ;;  %v13144_v46 = vmax.f32 %v2603_v39, 0.0  ;;  %v2564_v53 = vpop.f32.mrb[1].mxu0  ;;  %v2605_v15 = vpop.f32.mrb[1].mxu1 }
 0x2c2   : > { %v13159_v61 = vmax.f32 %v2564_v53, 0.0  ;;  %v13161_v39 = vmax.f32 %v2605_v15, 0.0  ;;  %v2566_v3 = vpop.f32.mrb[2].mxu0  ;;  %v2607_v57 = vpop.f32.mrb[2].mxu1 }
 0x2c3   : > { %v13164_v50 = vmul.f32 %v4678_v9, %v13144_v46  ;;  %v2567_v18 = vpop.f32.mrb[3].mxu0  ;;  %v2608_v17 = vpop.f32.mrb[3].mxu1  ;;  %v13167_v58 = vmul.f32 %v4739_v33, %v13142_v21  ;;  %v13170_v51 = vmul.f32 %v4747_v23, %v13144_v46  ;;  %v3264_v4 = vmul.f32 %v3255_v25, %v13142_v21 }
 0x2c4   : > { %v13174_v53 = vmul.f32 %v4679_v24, %v13161_v39  ;;  %v13177_v15 = vmul.f32 %v4746_v47, %v13159_v61  ;;  %v13180_v3 = vmul.f32 %v4748_v27, %v13161_v39  ;;  %v3265_v57 = vmul.f32 %v3256_v13, %v13159_v61  ;;  %v17560_v27 = vld [vmem:[#allocation15_spill] sm:$0xff]  ;;  %v17561_v24 = vld [vmem:[#allocation17_spill] sm:$0xff] }
 0x2c5   : > { %17548 = vst [vmem:[#allocation64_spill] sm:$0xff] %v13164_v50  ;;  %17549 = vst [vmem:[#allocation65_spill] sm:$0xff] %v13167_v58  ;;  %v2644_v33 = vsel %vm17554_vm7, %v12869_v0, %v12875_v52  ;;  %v10930_v17 = vpack.c.bf16 %v3264_v4, %v13003_v16  ;;  %v3266_v9 = vmul.f32 %v3257_v44, %v13144_v46  ;;  %v17573_v58 = vld [vmem:[#allocation25_spill] sm:$0xff]  ;;  %v17577_v50 = vld [vmem:[#allocation31_spill] sm:$0xff] }
 0x2c6   : > { %17550 = vst [vmem:[#allocation66_spill] sm:$0xff] %v13170_v51  ;;  %17551 = vst [vmem:[#allocation67_spill] sm:$0xff] %v13174_v53  ;;  %v3267_v25 = vmul.f32 %v12745_v20, %v13161_v39  ;;  %v3334_v47 = vmul.f32 %v3325_v40, %v13159_v61  ;;  %v2645_v16 = vsel %vm17555_vm6, %v12875_v52, %v12877_v34  ;;  %v17580_v53 = vld [vmem:[#allocation32_spill] sm:$0xff] }
 0x2c7   : > { %17552 = vst [vmem:[#allocation68_spill] sm:$0xff] %v13177_v15  ;;  %17553 = vst [vmem:[#allocation69_spill] sm:$0xff] %v13180_v3  ;;  %3286 = vrot.lane.b32.xlu0 %v10930_v17, %s11224_s25  ;;  %v10931_v44 = vpack.c.bf16 %v3266_v9, %v3265_v57  ;;  %v3333_v20 = vmul.f32 %v13025_v35, %v13142_v21  ;;  %v3335_v23 = vmul.f32 %v13033_v56, %v13144_v46  ;;  %v17576_v15 = vld [vmem:[#allocation29_spill] sm:$0xff] }
 0x2c8   : > { %v2713_v18 = vsel %vm284_vm9, %v12885_v11, %v12891_v22  ;;  %v2714_v40 = vsel %vm284_vm9, %v12891_v22, %v12893_v30  ;;  %v3403_v52 = vmul.f32 %v13051_v37, %v13159_v61  ;;  %v3404_v4 = vmul.f32 %v13056_v42, %v13144_v46  ;;  %vm17583_vm7 = vmmov %vm17579_vm0 }
 0x2c9   : > { %3288 = vrot.lane.b32.xlu1 %v10931_v44, %s11224_s25  ;;  %v10932_v35 = vpack.c.bf16 %v3267_v25, %v3267_v25  ;;  %v10934_v57 = vpack.c.bf16 %v3335_v23, %v3334_v47  ;;  %v3336_v56 = vmul.f32 %v12765_v48, %v13161_v39  ;;  %v13220_v17 = vmul.f32 %v13070_v2, %v13159_v61  ;;  %vm17624_vm6 = vmmov %vm17579_vm0 }
 0x2ca   : > { %v2782_v22 = vsel %vm356_vm10, %v12897_v54, %v12899_v59  ;;  %v2783_v37 = vsel %vm356_vm10, %v12899_v59, %v12901_v32  ;;  %v10937_v42 = vpack.c.bf16 %v3404_v4, %v3403_v52  ;;  %v13230_v9 = vmul.f32 %v13075_v5, %v13144_v46  ;;  %v17569_v59 = vld [vmem:[#allocation61_spill] sm:$0xff] }
 0x2cb   : > { %3290 = vrot.lane.b32.xlu0 %v10932_v35, %s11224_s25  ;;  %v10933_v48 = vpack.c.bf16 %v3333_v20, %v13016_v12  ;;  %v3402_v2 = vmul.f32 %v13046_v14, %v13142_v21  ;;  %v3405_v25 = vmul.f32 %v12781_v43, %v13161_v39  ;;  %v13240_v47 = vmul.f32 %v12803_v60, %v13142_v21 }
 0x2cc   : > { %v13246_v5 = vmul.f32 %v13080_v36, %v13159_v61  ;;  %v13250_v12 = vmul.f32 %v13085_v10, %v13144_v46  ;;  %v13254_v14 = vmul.f32 %v13090_v63, %v13161_v39  ;;  %v10935_v43 = vpack.c.bf16 %v3336_v56, %v3336_v56  ;;  %v17556_v56 = vld [vmem:[#allocation12_spill] sm:$0xff] }
 0x2cd   : > { %3355 = vrot.lane.b32.xlu1 %v10933_v48, %s11223_s11  ;;  %v13259_v60 = vmul.f32 %v12819_v1, %v13142_v21  ;;  %v13263_v44 = vmul.f32 %v13097_v55, %v13159_v61  ;;  %v13267_v36 = vmul.f32 %v13102_v49, %v13144_v46  ;;  %v13275_v20 = vmul.f32 %v13107_v6, %v13161_v39  ;;  %v17557_v48 = vld [vmem:[#allocation11_spill] sm:$0xff]  ;;  %v17567_v63 = vld [vmem:[#allocation24_spill] sm:$0xff] }
 0x2ce   : > { %v13279_v1 = vmul.f32 %v12835_v45, %v13142_v21  ;;  %v13286_v49 = vmul.f32 %v13116_v7, %v13159_v61  ;;  %v13290_v23 = vmul.f32 %v13121_v62, %v13144_v46  ;;  %v13294_v6 = vmul.f32 %v13126_v29, %v13161_v39  ;;  %v17563_v29 = vld [vmem:[#allocation19_spill] sm:$0xff] }
 0x2cf   : > { %3357 = vrot.lane.b32.xlu0 %v10934_v57, %s11223_s11  ;;  %v13300_v52 = vmul.f32 %v12851_v41, %v13142_v21  ;;  %v13304_v4 = vmul.f32 %v13135_v26, %v13159_v61  ;;  %v13308_v7 = vmul.f32 %v13152_v38, %v13144_v46  ;;  %v10936_v62 = vpack.c.bf16 %v3402_v2, %v13041_v31 }
 0x2d0   : > { %v13318_v41 = vmul.f32 %v13157_v19, %v13161_v39  ;;  %v3471_v26 = vmul.f32 %v13065_v28, %v13142_v21  ;;  %v13325_v57 = vmul.f32 %v2644_v33, %v13159_v61  ;;  %v13328_v31 = vmul.f32 %v2645_v16, %v13144_v46  ;;  %v17559_v33 = vld [vmem:[#allocation16_spill] sm:$0xff] }
 0x2d1   : > { %3359 = vrot.lane.b32.xlu1 %v10935_v43, %s11223_s11  ;;  %v2851_v2 = vsel %vm428_vm11, %v17557_v48, %v17556_v56  ;;  %v17558_v43 = vld [vmem:[#allocation13_spill] sm:$0xff]  ;;  %v13340_v13 = vmul.f32 %v2713_v18, %v13159_v61  ;;  %v2960_v16 = vsel %vm470_vm12, %v17560_v27, %v17559_v33  ;;  %v2961_v38 = vsel %vm470_vm12, %v17559_v33, %v17561_v24  ;;  %v17586_v24 = vld [vmem:[#allocation36_spill] sm:$0xff] }
 0x2d2   : > { %v2852_v19 = vsel %vm428_vm11, %v17556_v56, %v17558_v43  ;;  %v13351_v56 = vmul.f32 %v2714_v40, %v13144_v46  ;;  %v10938_v18 = vpack.c.bf16 %v3405_v25, %v3405_v25  ;;  %v13358_v45 = vmul.f32 %v2782_v22, %v13159_v61  ;;  %v17566_v33 = vld [vmem:[#allocation21_spill] sm:$0xff]  ;;  %v17568_v40 = vld [vmem:[#allocation23_spill] sm:$0xff]  ;;  %v17608_v48 = vld [vmem:[#allocation52_spill] sm:$0xff] }
 0x2d3   : > { %3424 = vrot.lane.b32.xlu0 %v10936_v62, %s11222_s27  ;;  %v17562_v62 = vld [vmem:[#allocation20_spill] sm:$0xff]  ;;  %v13361_v55 = vmul.f32 %v2783_v37, %v13144_v46  ;;  %v3098_v10 = vsel %vm326_vm14, %v17568_v40, %v17567_v63  ;;  %v10939_v51 = vpack.c.bf16 %v3471_v26, %v17569_v59  ;;  %v17570_v22 = vld [vmem:[#allocation5_spill] sm:$0xff]  ;;  %v13378_v3 = vmul.f32 %v2851_v2, %v13159_v61  ;;  %v17578_v37 = vld [vmem:[#allocation30_spill] sm:$0xff] }
 0x2d4   : > { %v3029_v28 = vsel %vm398_vm13, %v17563_v29, %v17562_v62  ;;  %17564 = vst [vmem:[#allocation12_spill] sm:$0xff] %v13358_v45  ;;  %v3030_v35 = vsel %vm398_vm13, %v17562_v62, %v17566_v33  ;;  %v3474_v25 = vmul.f32 %v17570_v22, %v13161_v39  ;;  %v13381_v62 = vmul.f32 %v2852_v19, %v13144_v46  ;;  %v17574_v26 = vld [vmem:[#allocation28_spill] sm:$0xff]  ;;  %v17582_v33 = vld [vmem:[#allocation33_spill] sm:$0xff] }
 0x2d5   : > { %3426 = vrot.lane.b32.xlu1 %v10937_v42, %s11222_s27  ;;  %17565 = vst [vmem:[#allocation16_spill] sm:$0xff] %v13361_v55  ;;  %17571 = vst [vmem:[#allocation20_spill] sm:$0xff] %v13378_v3  ;;  %v3099_v59 = vsel %vm326_vm14, %v17567_v63, %v17573_v58  ;;  %v17575_v42 = vld [vmem:[#allocation27_spill] sm:$0xff]  ;;  %v3168_v22 = vsel %vm254_vm15, %v17574_v26, %v17576_v15  ;;  %v4223_v2 = vsel %vm17579_vm0, %v17578_v37, %v17577_v50  ;;  %v17594_v3 = vld [vmem:[#allocation38_spill] sm:$0xff]  ;;  %vm17674_vm0 = vcmask 72704  }
 0x2d6   : > { %17572 = vst [vmem:[#allocation24_spill] sm:$0xff] %v13381_v62  ;;  %v4224_v19 = vsel %vm17581_vm1, %v17577_v50, %v17580_v53  ;;  %v4225_v63 = vsel %vm17583_vm7, %v17580_v53, %v17582_v33  ;;  %v17584_v15 = vld [vmem:[#allocation35_spill] sm:$0xff]  ;;  %v13413_v29 = vmul.f32 %v2960_v16, %v13159_v61  ;;  %v13416_v53 = vmul.f32 %v2961_v38, %v13144_v46  ;;  %v17595_v62 = vld [vmem:[#allocation40_spill] sm:$0xff]  ;;  %vm17676_vm7 = vmmov %vm17674_vm0 }
 0x2d7   : > { %3428 = vrot.lane.b32.xlu0 %v10938_v18, %s11222_s27  ;;  %v3167_v18 = vsel %vm254_vm15, %v17575_v42, %v17574_v26  ;;  %v17585_v42 = vld [vmem:[#allocation34_spill] sm:$0xff]  ;;  %v4293_v50 = vsel %vm284_vm9, %v17584_v15, %v17586_v24  ;;  %v17590_v26 = vpack.c.bf16 %v13230_v9, %v13220_v17  ;;  %v10941_v33 = vpack.c.bf16 %v3474_v25, %v3474_v25  ;;  %v17593_v16 = vld [vmem:[#allocation39_spill] sm:$0xff]  ;;  %v17599_v45 = vld [vmem:[#allocation44_spill] sm:$0xff] }
 0x2d8   : > { %v4292_v40 = vsel %vm284_vm9, %v17585_v42, %v17584_v15  ;;  %17587 = vst [vmem:[#allocation61_spill] sm:$0xff] %v13413_v29  ;;  %17588 = vst [vmem:[#allocation5_spill] sm:$0xff] %v13416_v53  ;;  %v13426_v27 = vmul.f32 %v3029_v28, %v13159_v61  ;;  %v13429_v15 = vmul.f32 %v3030_v35, %v13144_v46  ;;  %v17597_v28 = vld [vmem:[#allocation43_spill] sm:$0xff]  ;;  %v17598_v25 = vld [vmem:[#allocation42_spill] sm:$0xff]  ;;  %vm17675_vm1 = vcmask 64512  }
 0x2d9   : > { %3493 = vrot.lane.b32.xlu1 %v10939_v51, %s11221_s14  ;;  %v17589_v51 = vld [vmem:[#allocation37_spill] sm:$0xff]  ;;  %v4361_v38 = vsel %vm356_vm10, %v17594_v3, %v17593_v16  ;;  %v4430_v35 = vsel %vm428_vm11, %v17598_v25, %v17597_v28  ;;  %v13449_v43 = vmul.f32 %v3098_v10, %v13159_v61  ;;  %v17601_v29 = vld [vmem:[#allocation47_spill] sm:$0xff]  ;;  %v17602_v53 = vld [vmem:[#allocation46_spill] sm:$0xff] }
 0x2da   : > { %v4294_v58 = vsel %vm284_vm9, %v17586_v24, %v17589_v51  ;;  %17591 = vst [vmem:[#allocation28_spill] sm:$0xff] %v13426_v27  ;;  %17592 = vst [vmem:[#allocation31_spill] sm:$0xff] %v13429_v15  ;;  %v4362_v24 = vsel %vm356_vm10, %v17593_v16, %v17595_v62  ;;  %v17596_v51 = vld [vmem:[#allocation41_spill] sm:$0xff]  ;;  %v13452_v16 = vmul.f32 %v3099_v59, %v13144_v46  ;;  %v17603_v55 = vld [vmem:[#allocation48_spill] sm:$0xff] }
 0x2db   : > { %3495 = vrot.lane.b32.xlu0 %v17590_v26, %s11221_s14  ;;  %v4363_v17 = vsel %vm356_vm10, %v17595_v62, %v17596_v51  ;;  %v4431_v62 = vsel %vm428_vm11, %v17597_v28, %v17599_v45  ;;  %v17600_v9 = vld [vmem:[#allocation45_spill] sm:$0xff]  ;;  %v4540_v10 = vsel %vm470_vm12, %v17601_v29, %v17603_v55  ;;  %v17605_v28 = vpack.c.bf16 %v13246_v5, %v13240_v47  ;;  %v17606_v15 = vld [vmem:[#allocation51_spill] sm:$0xff] }
 0x2dc   : > { %v4432_v51 = vsel %vm428_vm11, %v17599_v45, %v17600_v9  ;;  %v17604_v26 = vld [vmem:[#allocation49_spill] sm:$0xff]  ;;  %v13476_v9 = vmul.f32 %v3167_v18, %v13159_v61  ;;  %v13479_v27 = vmul.f32 %v3168_v22, %v13144_v46  ;;  %v13489_v47 = vmul.f32 %v17578_v37, %v13142_v21 }
 0x2dd   : > { %3497 = vrot.lane.b32.xlu1 %v10941_v33, %s11221_s14  ;;  %v4539_v33 = vsel %vm470_vm12, %v17602_v53, %v17601_v29  ;;  %v4541_v59 = vsel %vm470_vm12, %v17603_v55, %v17604_v26  ;;  %v17607_v29 = vld [vmem:[#allocation50_spill] sm:$0xff]  ;;  %v4609_v55 = vsel %vm398_vm13, %v17606_v15, %v17608_v48  ;;  %v13492_v5 = vmul.f32 %v4223_v2, %v13159_v61  ;;  %v17609_v18 = vld [vmem:[#allocation53_spill] sm:$0xff] }
 0x2de   : > { %v4608_v32 = vsel %vm398_vm13, %v17607_v29, %v17606_v15  ;;  %v4610_v22 = vsel %vm398_vm13, %v17608_v48, %v17609_v18  ;;  %v13504_v15 = vmul.f32 %v4224_v19, %v13144_v46  ;;  %v13507_v37 = vmul.f32 %v4225_v63, %v13161_v39 }
 0x2df   : > { %3584 = vrot.lane.b32.xlu0 %v17605_v28, %s11220_s30  ;;  %v17610_v28 = vpack.c.bf16 %v13254_v14, %v13250_v12  ;;  %v13513_v48 = vmul.f32 %v17585_v42, %v13142_v21  ;;  %v13516_v18 = vmul.f32 %v4292_v40, %v13159_v61  ;;  %v13519_v12 = vmul.f32 %v4293_v50, %v13144_v46  ;;  %v17611_v14 = vld [vmem:[#allocation59_spill] sm:$0xff] }
 0x2e0   : > { %v17612_v19 = vpack.c.bf16 %v17611_v14, %v17611_v14  ;;  %v13532_v42 = vmul.f32 %v17594_v3, %v13142_v21  ;;  %v13535_v40 = vmul.f32 %v4361_v38, %v13159_v61  ;;  %v13540_v2 = vmul.f32 %v4362_v24, %v13144_v46 }
 0x2e1   : > { %3586 = vrot.lane.b32.xlu1 %v17610_v28, %s11220_s30  ;;  %v13528_v28 = vmul.f32 %v4294_v58, %v13161_v39  ;;  %v13543_v14 = vmul.f32 %v4363_v17, %v13161_v39  ;;  %v13547_v58 = vmul.f32 %v17598_v25, %v13142_v21  ;;  %v17613_v3 = vpack.c.bf16 %v13263_v44, %v13259_v60 }
 0x2e2   : > { %v13558_v24 = vmul.f32 %v4430_v35, %v13159_v61  ;;  %v13561_v17 = vmul.f32 %v4431_v62, %v13144_v46  ;;  %v13566_v50 = vmul.f32 %v4432_v51, %v13161_v39  ;;  %v13570_v60 = vpack.c.bf16 %v13159_v61, %v13142_v21  ;;  %v17615_v35 = vld [vmem:[#allocation54_spill] sm:$0xff] }
 0x2e3   : > { %3588 = vrot.lane.b32.xlu0 %v17612_v19, %s11220_s30  ;;  %v13574_v44 = vpack.c.bf16 %v13161_v39, %v13144_v46  ;;  %v17616_v62 = vpack.c.bf16 %v13275_v20, %v13267_v36  ;;  %v13587_v25 = vmul.f32 %v17602_v53, %v13142_v21  ;;  %v13590_v38 = vmul.f32 %v4539_v33, %v13159_v61  ;;  %v17617_v20 = vld [vmem:[#allocation60_spill] sm:$0xff]  ;;  %v17622_v33 = vld [vmem:[#allocation58_spill] sm:$0xff] }
 0x2e4   : > { %v10965_v51 = vpack.c.bf16 %v13558_v24, %v13547_v58  ;;  %v13598_v45 = vmul.f32 %v4541_v59, %v13161_v39  ;;  %v13602_v36 = vmul.f32 %v17607_v29, %v13142_v21  ;;  %v17618_v53 = vpack.c.bf16 %v17617_v20, %v17617_v20  ;;  %v17620_v29 = vld [vmem:[#allocation63_spill] sm:$0xff] }
 0x2e5   : > { %3653 = vrot.lane.b32.xlu1 %v17613_v3, %s11219_s19  ;;  %v17614_v3 = vld [vmem:[#allocation55_spill] sm:$0xff]  ;;  %v13617_v59 = vmul.f32 %v4610_v22, %v13161_v39  ;;  %v13623_v63 = vmul.f32 %v17615_v35, %v13142_v21 }
 0x2e6   : > { %v4677_v19 = vsel %vm326_vm14, %v17615_v35, %v17614_v3  ;;  %v13595_v3 = vmul.f32 %v4540_v10, %v13144_v46  ;;  %v13614_v10 = vmul.f32 %v4609_v55, %v13144_v46  ;;  %v10952_v35 = vpack.c.bf16 %v17620_v29, %v17620_v29 }
 0x2e7   : > { %3655 = vrot.lane.b32.xlu0 %v17616_v62, %s11219_s19  ;;  %v13611_v62 = vmul.f32 %v4608_v32, %v13159_v61  ;;  %v13626_v20 = vmul.f32 %v4677_v19, %v13159_v61  ;;  %v17619_v32 = vpack.c.bf16 %v13286_v49, %v13279_v1  ;;  %v17621_v19 = vpack.c.bf16 %v13294_v6, %v13290_v23  ;;  %v17623_v49 = vld [vmem:[#allocation6_spill] sm:$0xff]  ;;  %v17626_v23 = vld [vmem:[#allocation57_spill] sm:$0xff] }
 0x2e8   : > { %v3772_v1 = vmul.f32 %v12861_v8, %v17622_v33  ;;  %v2651_v6 = vmul.f32 %v17626_v23, %v17623_v49  ;;  %v17627_v8 = vpack.c.bf16 %v13318_v41, %v13308_v7  ;;  %v17629_v7 = vpack.c.bf16 %v13328_v31, %v13325_v57 }
 0x2e9   : > { %3657 = vrot.lane.b32.xlu1 %v17618_v53, %s11219_s19  ;;  %v10974_v55 = vpack.c.bf16 %v13611_v62, %v13602_v36  ;;  %v17625_v53 = vpack.c.bf16 %v13304_v4, %v13300_v52  ;;  %v2655_v52 = vmul.f32 %v12877_v34, %v13161_v39  ;;  %v17631_v57 = vpack.c.bf16 %v13351_v56, %v13340_v13  ;;  %v17635_v13 = vld [vmem:[#allocation16_spill] sm:$0xff] }
 0x2ea   : > { %v10955_v22 = vpack.c.bf16 %v3772_v1, %v3772_v1  ;;  %v2724_v1 = vmul.f32 %v12893_v30, %v13161_v39  ;;  %v17636_v56 = vld [vmem:[#allocation12_spill] sm:$0xff] }
 0x2eb   : > { %3722 = vrot.lane.b32.xlu0 %v17619_v32, %s11218_s8  ;;  %v2643_v32 = vsel %vm17624_vm6, %v17623_v49, %v12869_v0  ;;  %v10905_v41 = vpack.c.bf16 %v2655_v52, %v2655_v52  ;;  %v17637_v52 = vpack.c.bf16 %v17635_v13, %v17636_v56  ;;  %v17647_v13 = vld [vmem:[#allocation17_spill] sm:$0xff]  ;;  %vm17677_vm6 = vmmov %vm17675_vm1 }
 0x2ec   : > { %v2652_v29 = vmul.f32 %v2643_v32, %v13142_v21  ;;  %v10908_v31 = vpack.c.bf16 %v2724_v1, %v2724_v1  ;;  %v2971_v56 = vmul.f32 %v17647_v13, %v13161_v39 }
 0x2ed   : > { %3724 = vrot.lane.b32.xlu1 %v17621_v19, %s11218_s8 }
 0x2ee   : > { %v10903_v19 = vpack.c.bf16 %v2652_v29, %v2651_v6  ;;  %v17633_v29 = vld [vmem:[#allocation10_spill] sm:$0xff] }
 0x2ef   : > { %3726 = vrot.lane.b32.xlu0 %v10952_v35, %s11218_s8  ;;  %v17628_v35 = vld [vmem:[#allocation7_spill] sm:$0xff] }
 0x2f0   : > { %v2712_v0 = vsel %vm284_vm9, %v17628_v35, %v12885_v11  ;;  %v2720_v4 = vmul.f32 %v17626_v23, %v17628_v35  ;;  %v17630_v11 = vld [vmem:[#allocation8_spill] sm:$0xff] }
 0x2f1   : > { %3791 = vrot.lane.b32.xlu1 %v17625_v53, %s11217_s26  ;;  %v2721_v53 = vmul.f32 %v2712_v0, %v13142_v21  ;;  %v2789_v49 = vmul.f32 %v17626_v23, %v17630_v11  ;;  %v2858_v0 = vmul.f32 %v17626_v23, %v17633_v29 }
 0x2f3   : > { %3793 = vrot.lane.b32.xlu0 %v17627_v8, %s11217_s26  ;;  %v10906_v34 = vpack.c.bf16 %v2721_v53, %v2720_v4  ;;  %v17634_v8 = vld [vmem:[#allocation9_spill] sm:$0xff] }
 0x2f4   : > { %v2793_v35 = vmul.f32 %v17634_v8, %v13161_v39  ;;  %v17645_v8 = vld [vmem:[#allocation19_spill] sm:$0xff] }
 0x2f5   : > { %3795 = vrot.lane.b32.xlu1 %v10955_v22, %s11217_s26  ;;  %v2781_v22 = vsel %vm356_vm10, %v17630_v11, %v12897_v54  ;;  %v17632_v54 = vld [vmem:[#allocation11_spill] sm:$0xff]  ;;  %v17639_v11 = vld [vmem:[#allocation24_spill] sm:$0xff] }
 0x2f6   : > { %v2790_v32 = vmul.f32 %v2781_v22, %v13142_v21  ;;  %v2850_v6 = vsel %vm428_vm11, %v17633_v29, %v17632_v54  ;;  %v10911_v4 = vpack.c.bf16 %v2793_v35, %v2793_v35  ;;  %v17640_v22 = vld [vmem:[#allocation20_spill] sm:$0xff]  ;;  %v17646_v35 = vld [vmem:[#allocation18_spill] sm:$0xff] }
 0x2f7   : > { %2674 = vrot.lane.b32.xlu0 %v10903_v19, %s11232_s17  ;;  %v2859_v19 = vmul.f32 %v2850_v6, %v13142_v21  ;;  %v17644_v6 = vpack.c.bf16 %v13144_v46, %v13159_v61  ;;  %v17648_v61 = vld [vmem:[#allocation5_spill] sm:$0xff] }
 0x2f8   : > { %v10909_v30 = vpack.c.bf16 %v2790_v32, %v2789_v49  ;;  %v17642_v49 = vld [vmem:[#allocation15_spill] sm:$0xff]  ;;  %v17643_v32 = vld [vmem:[#allocation14_spill] sm:$0xff] }
 0x2f9   : > { %2676 = vrot.lane.b32.xlu1 %v17629_v7, %s11232_s17  ;;  %v10912_v53 = vpack.c.bf16 %v2859_v19, %v2858_v0  ;;  %v17638_v7 = vld [vmem:[#allocation13_spill] sm:$0xff]  ;;  %v2967_v54 = vmul.f32 %v17626_v23, %v17643_v32  ;;  %v3028_v0 = vsel %vm398_vm13, %v17646_v35, %v17645_v8  ;;  %v17658_v8 = vld [vmem:[#allocation26_spill] sm:$0xff] }
 0x2fa   : > { %v3037_v46 = vmul.f32 %v3028_v0, %v13142_v21 }
 0x2fb   : > { %2678 = vrot.lane.b32.xlu0 %v10905_v41, %s11232_s17  ;;  %v2862_v41 = vmul.f32 %v17638_v7, %v13161_v39  ;;  %v10920_v7 = vpack.c.bf16 %v2971_v56, %v2971_v56  ;;  %v3174_v56 = vmul.f32 %v17626_v23, %v17658_v8 }
 0x2fd   : > { %2743 = vrot.lane.b32.xlu1 %v10906_v34, %s11231_s16  ;;  %v17641_v34 = vpack.c.bf16 %v17639_v11, %v17640_v22  ;;  %v10914_v1 = vpack.c.bf16 %v2862_v41, %v2862_v41  ;;  %v17651_v41 = vld [vmem:[#allocation23_spill] sm:$0xff]  ;;  %v17652_v11 = vld [vmem:[#allocation22_spill] sm:$0xff] }
 0x2fe   : > { %v3097_v22 = vsel %vm326_vm14, %v17652_v11, %v17651_v41  ;;  %v17663_v41 = vld [vmem:[#allocation33_spill] sm:$0xff] }
 0x2ff   : > { %2745 = vrot.lane.b32.xlu0 %v17631_v57, %s11231_s16  ;;  %v2959_v57 = vsel %vm470_vm12, %v17643_v32, %v17642_v49  ;;  %v3105_v32 = vmul.f32 %v17626_v23, %v17652_v11  ;;  %v4235_v11 = vmul.f32 %v17663_v41, %v17622_v33 }
 0x300   : > { %v2968_v29 = vmul.f32 %v2959_v57, %v13142_v21  ;;  %v3106_v57 = vmul.f32 %v3097_v22, %v13142_v21  ;;  %v17667_v22 = vpack.c.bf16 %v13516_v18, %v13513_v48  ;;  %v17671_v48 = vpack.c.bf16 %v13543_v14, %v13540_v2 }
 0x301   : > { %2747 = vrot.lane.b32.xlu1 %v10908_v31, %s11231_s16  ;;  %v10915_v31 = vpack.c.bf16 %v13142_v21, %v17626_v23  ;;  %v17673_v2 = vpack.c.bf16 %v13566_v50, %v13561_v17 }
 0x302   : > { %v10918_v19 = vpack.c.bf16 %v2968_v29, %v2967_v54  ;;  %v17655_v54 = vld [vmem:[#allocation28_spill] sm:$0xff]  ;;  %v10924_v0 = vpack.c.bf16 %v3106_v57, %v3105_v32 }
 0x303   : > { %2812 = vrot.lane.b32.xlu0 %v10909_v30, %s11230_s15  ;;  %v10917_v30 = vpack.c.bf16 %v13161_v39, %v13161_v39 }
 0x305   : > { %2814 = vrot.lane.b32.xlu1 %v17637_v52, %s11230_s15  ;;  %v3036_v52 = vmul.f32 %v17626_v23, %v17646_v35  ;;  %v17662_v23 = vpack.c.bf16 %v13479_v27, %v13476_v9  ;;  %v17666_v27 = vld [vmem:[#allocation37_spill] sm:$0xff] }
 0x306   : > { %v4304_v9 = vmul.f32 %v17666_v27, %v17622_v33 }
 0x307   : > { %2816 = vrot.lane.b32.xlu0 %v10911_v4, %s11230_s15  ;;  %v17649_v4 = vld [vmem:[#allocation61_spill] sm:$0xff] }
 0x309   : > { %2881 = vrot.lane.b32.xlu1 %v10912_v53, %s11229_s13  ;;  %v17650_v53 = vpack.c.bf16 %v17648_v61, %v17649_v4 }
 0x30b   : > { %2883 = vrot.lane.b32.xlu0 %v17641_v34, %s11229_s13  ;;  %v10921_v34 = vpack.c.bf16 %v3037_v46, %v3036_v52  ;;  %v17660_v46 = vpack.c.bf16 %v13452_v16, %v13449_v43  ;;  %v17664_v43 = vpack.c.bf16 %v13492_v5, %v13489_v47  ;;  %v10958_v16 = vpack.c.bf16 %v4235_v11, %v4235_v11  ;;  %v17669_v5 = vld [vmem:[#allocation41_spill] sm:$0xff] }
 0x30c   : > { %v17668_v47 = vpack.c.bf16 %v13528_v28, %v13519_v12  ;;  %v17672_v12 = vld [vmem:[#allocation45_spill] sm:$0xff] }
 0x30d   : > { %2885 = vrot.lane.b32.xlu1 %v10914_v1, %s11229_s13  ;;  %v17653_v1 = vld [vmem:[#allocation21_spill] sm:$0xff]  ;;  %v4442_v28 = vmul.f32 %v17672_v12, %v17622_v33 }
 0x30e   : > { %v3040_v49 = vmul.f32 %v17653_v1, %v13161_v39 }
 0x30f   : > { %2921 = vrot.lane.b32.xlu0 %v10915_v31, %s11234_s20  ;;  %v17654_v31 = vld [vmem:[#allocation31_spill] sm:$0xff] }
 0x310   : > { %v17656_v29 = vpack.c.bf16 %v17654_v31, %v17655_v54 }
 0x311   : > { %2923 = vrot.lane.b32.xlu1 %v17644_v6, %s11234_s20  ;;  %v10923_v6 = vpack.c.bf16 %v3040_v49, %v3040_v49 }
 0x313   : > { %2925 = vrot.lane.b32.xlu0 %v10917_v30, %s11234_s20  ;;  %v17657_v30 = vld [vmem:[#allocation27_spill] sm:$0xff] }
 0x314   : > { %v3166_v35 = vsel %vm254_vm15, %v17658_v8, %v17657_v30  ;;  %v4482_v30 = vld [vmem:[#allocation2 + $0x28] sm:$0xff] }
 0x315   : > { %2990 = vrot.lane.b32.xlu1 %v10918_v19, %s11228_s10  ;;  %v17659_v19 = vld [vmem:[#allocation25_spill] sm:$0xff]  ;;  %v3175_v52 = vmul.f32 %v3166_v35, %v13142_v21  ;;  %v10970_v50 = vpack.c.bf16 %v4482_v30, %v4482_v30 }
 0x316   : > { %v3109_v13 = vmul.f32 %v17659_v19, %v13161_v39 }
 0x317   : > { %2992 = vrot.lane.b32.xlu0 %v17650_v53, %s11228_s10  ;;  %v10927_v4 = vpack.c.bf16 %v3175_v52, %v3174_v56  ;;  %v17661_v53 = vld [vmem:[#allocation29_spill] sm:$0xff] }
 0x318   : > { %v10926_v61 = vpack.c.bf16 %v3109_v13, %v3109_v13 }
 0x319   : > { %2994 = vrot.lane.b32.xlu1 %v10920_v7, %s11228_s10  ;;  %v3178_v7 = vmul.f32 %v17661_v53, %v13161_v39  ;;  %v17665_v39 = vpack.c.bf16 %v13507_v37, %v13504_v15  ;;  %v4373_v15 = vmul.f32 %v17669_v5, %v17622_v33  ;;  %v17670_v37 = vpack.c.bf16 %v13535_v40, %v13532_v42  ;;  %v17680_v5 = vld [vmem:[#allocation53_spill] sm:$0xff] }
 0x31a   : > { %v10967_v40 = vpack.c.bf16 %v4442_v28, %v4442_v28 }
 0x31b   : > { %3059 = vrot.lane.b32.xlu0 %v10921_v34, %s11227_s9  ;;  %v10929_v21 = vpack.c.bf16 %v3178_v7, %v3178_v7  ;;  %v10961_v34 = vpack.c.bf16 %v4304_v9, %v4304_v9  ;;  %v10964_v49 = vpack.c.bf16 %v4373_v15, %v4373_v15  ;;  %v4620_v15 = vmul.f32 %v17680_v5, %v17622_v33 }
 0x31d   : > { %3061 = vrot.lane.b32.xlu1 %v17656_v29, %s11227_s9 }
 0x31f   : > { %3063 = vrot.lane.b32.xlu0 %v10923_v6, %s11227_s9 }
 0x321   : > { %3128 = vrot.lane.b32.xlu1 %v10924_v0, %s11226_s7 }
 0x323   : > { %3130 = vrot.lane.b32.xlu0 %v17660_v46, %s11226_s7 }
 0x325   : > { %3132 = vrot.lane.b32.xlu1 %v10926_v61, %s11226_s7 }
 0x327   : > { %3197 = vrot.lane.b32.xlu0 %v10927_v4, %s11225_s6 }
 0x329   : > { %3199 = vrot.lane.b32.xlu1 %v17662_v23, %s11225_s6  ;;  %v4551_v23 = vmul.f32 %v17604_v26, %v17622_v33  ;;  %v17679_v26 = vpack.c.bf16 %v13598_v45, %v13595_v3 }
 0x32b   : > { %3201 = vrot.lane.b32.xlu0 %v10929_v21, %s11225_s6  ;;  %v10973_v27 = vpack.c.bf16 %v4551_v23, %v4551_v23 }
 0x32d   : > { %4254 = vrot.lane.b32.xlu1 %v17664_v43, %s11232_s17 }
 0x32f   : > { %4256 = vrot.lane.b32.xlu0 %v17665_v39, %s11232_s17 }
 0x331   : > { %4258 = vrot.lane.b32.xlu1 %v10958_v16, %s11232_s17  ;;  %v17678_v16 = vpack.c.bf16 %v13590_v38, %v13587_v25 }
 0x333   : > { %4323 = vrot.lane.b32.xlu0 %v17667_v22, %s11231_s16 }
 0x335   : > { %4325 = vrot.lane.b32.xlu1 %v17668_v47, %s11231_s16 }
 0x337   : > { %4327 = vrot.lane.b32.xlu0 %v10961_v34, %s11231_s16 }
 0x339   : > { %4392 = vrot.lane.b32.xlu1 %v17670_v37, %s11230_s15  ;;  %v3287_v1 = vpop.permute.xlu0 %3286 }
 0x33a   : > { %v3292_v57 = vrot.slane %v3287_v1, 4 }
 0x33b   : > { %v3289_v18 = vpop.permute.xlu1 %3288  ;;  %4394 = vrot.lane.b32.xlu0 %v17671_v48, %s11230_s15 }
 0x33c   : > { %v3293_v31 = vrot.slane %v3289_v18, 4 }
 0x33d   : > { %4396 = vrot.lane.b32.xlu1 %v10964_v49, %s11230_s15  ;;  %v3291_v32 = vpop.permute.xlu0 %3290 }
 0x33e   : > { %v3294_v42 = vrot.slane %v3291_v32, 4  ;;  %v3295_v8 = vsel %vm252_vm8, %v3292_v57, %v3293_v31  ;;  %v10976_v32 = vpack.c.bf16 %v4620_v15, %v4620_v15 }
 0x33f   : > { %v3356_v54 = vpop.permute.xlu1 %3355  ;;  %4461 = vrot.lane.b32.xlu0 %v10965_v51, %s11229_s13  ;;  %v3296_v17 = vsel %vm17674_vm0, %v3287_v1, %v3295_v8  ;;  %vm17694_vm0 = vcmask 982016  }
 0x340   : > { %v3361_v29 = vrot.slane %v3356_v54, 4  ;;  %v3297_v0 = vsel %vm252_vm8, %v3293_v31, %v3294_v42  ;;  %v17681_v31 = vpack.c.bf16 %v13617_v59, %v13614_v10 }
 0x341   : > { %4463 = vrot.lane.b32.xlu1 %v17673_v2, %s11229_s13  ;;  %v3358_v14 = vpop.permute.xlu0 %3357  ;;  %v3298_v61 = vsel %vm17676_vm7, %v3289_v18, %v3297_v0  ;;  %vm17696_vm7 = vcmask 973824  }
 0x342   : > { %v3362_v6 = vrot.slane %v3358_v14, 4 }
 0x343   : > { %v3360_v35 = vpop.permute.xlu1 %3359  ;;  %4465 = vrot.lane.b32.xlu0 %v10967_v40, %s11229_s13  ;;  %v17682_v40 = vld [vmem:[#allocation56_spill] sm:$0xff] }
 0x344   : > { %v3363_v58 = vrot.slane %v3360_v35, 4  ;;  %v3364_v24 = vsel %vm252_vm8, %v3361_v29, %v3362_v6  ;;  %v4689_v2 = vmul.f32 %v17682_v40, %v17622_v33 }
 0x345   : > { %4501 = vrot.lane.b32.xlu1 %v13570_v60, %s11234_s20  ;;  %v3425_v51 = vpop.permute.xlu0 %3424  ;;  %v3365_v19 = vsel %vm17675_vm1, %v3356_v54, %v3364_v24  ;;  %v17684_v24 = vld [vmem:[#allocation67_spill] sm:$0xff]  ;;  %vm17695_vm1 = vmmov %vm17694_vm0 }
 0x346   : > { %v3366_v13 = vsel %vm252_vm8, %v3362_v6, %v3363_v58  ;;  %v10213_v56 = vcombine.low %v3296_v17, %v3365_v19  ;;  %v10214_v52 = vcombine.high %v3296_v17, %v3365_v19  ;;  %v3430_v41 = vrot.slane %v3425_v51, 4 }
 0x347   : > { %v3427_v46 = vpop.permute.xlu1 %3426  ;;  %4503 = vrot.lane.b32.xlu0 %v13574_v44, %s11234_s20  ;;  %v3367_v4 = vsel %vm17677_vm6, %v3358_v14, %v3366_v13  ;;  %v17683_v6 = vpack.c.bf16 %v13626_v20, %v13623_v63  ;;  %v10979_v58 = vpack.c.bf16 %v4689_v2, %v4689_v2  ;;  %v17687_v13 = vld [vmem:[#allocation62_spill] sm:$0xff]  ;;  %vm17697_vm6 = vmmov %vm17696_vm7 }
 0x348   : > { %3933 = vmatprep.subr.bf16.mxu0 %v10214_v52  ;;  %v10215_v53 = vcombine.low %v3298_v61, %v3367_v4  ;;  %v10216_v7 = vcombine.high %v3298_v61, %v3367_v4  ;;  %v3431_v11 = vrot.slane %v3427_v46, 4  ;;  %v17689_v61 = vld [vmem:[#allocation65_spill] sm:$0xff] }
 0x349   : > { %4505 = vrot.lane.b32.xlu1 %v10970_v50, %s11234_s20  ;;  %3934 = vmatpush1.bf16.msra.mxu0 %v10213_v56  ;;  %v3429_v21 = vpop.permute.xlu0 %3428  ;;  %v4758_v56 = vmul.f32 %v17687_v13, %v17622_v33  ;;  %v17691_v33 = vld [vmem:[#allocation69_spill] sm:$0xff] }
 0x34a   : > { %3974 = vmatprep.subr.bf16.mxu1 %v10216_v7  ;;  %v3432_v39 = vrot.slane %v3429_v21, 4  ;;  %v3433_v47 = vsel %vm252_vm8, %v3430_v41, %v3431_v11 }
 0x34b   : > { %v3494_v43 = vpop.permute.xlu1 %3493  ;;  %3975 = vmatpush1.bf16.msra.mxu1 %v10215_v53  ;;  %4570 = vrot.lane.b32.xlu0 %v17678_v16, %s11228_s10  ;;  %v3434_v3 = vsel %vm1031_vm5, %v3425_v51, %v3433_v47  ;;  %v17685_v51 = vld [vmem:[#allocation64_spill] sm:$0xff] }
 0x34c   : > { %v3499_v22 = vrot.slane %v3494_v43, 4  ;;  %v3435_v38 = vsel %vm252_vm8, %v3431_v11, %v3432_v39  ;;  %v17686_v50 = vpack.c.bf16 %v17684_v24, %v17685_v51  ;;  %v17692_v11 = vld [vmem:[#allocation66_spill] sm:$0xff]  ;;  %v13906_v47 = vld [vmem:[%s17247_s1 + $0x8] sm:$0xff] }
 0x34d   : > { %4572 = vrot.lane.b32.xlu1 %v17679_v26, %s11228_s10  ;;  %v3496_v9 = vpop.permute.xlu0 %3495  ;;  %v3436_v36 = vsel %vm1031_vm5, %v3427_v46, %v3435_v38  ;;  %v17688_v46 = vld [vmem:[#allocation68_spill] sm:$0xff] }
 0x34e   : > { %v3500_v34 = vrot.slane %v3496_v9, 4  ;;  %v17690_v4 = vpack.c.bf16 %v17688_v46, %v17689_v61  ;;  %v13982_v61 = vld [vmem:[%s17247_s1 + $0x48] sm:$0xff] }
 0x34f   : > { %v3498_v37 = vpop.permute.xlu1 %3497  ;;  %4574 = vrot.lane.b32.xlu0 %v10973_v27, %s11228_s10  ;;  %v13898_v27 = vld [vmem:[%s17247_s1] sm:$0xff] }
 0x350   : > { %v3501_v25 = vrot.slane %v3498_v37, 4  ;;  %v3502_v1 = vsel %vm252_vm8, %v3499_v22, %v3500_v34 }
 0x351   : > { %4639 = vrot.lane.b32.xlu1 %v10974_v55, %s11227_s9  ;;  %v3585_v45 = vpop.permute.xlu0 %3584  ;;  %v3503_v49 = vsel %vm1102_vm4, %v3494_v43, %v3502_v1  ;;  %v17693_v43 = vpack.c.bf16 %v17691_v33, %v17692_v11 }
 0x352   : > { %v3504_v18 = vsel %vm252_vm8, %v3500_v34, %v3501_v25  ;;  %v3590_v48 = vrot.slane %v3585_v45, 4  ;;  %v10217_v12 = vcombine.low %v3434_v3, %v3503_v49  ;;  %v10218_v28 = vcombine.high %v3434_v3, %v3503_v49 }
 0x353   : > { %v3587_v57 = vpop.permute.xlu1 %3586  ;;  %4641 = vrot.lane.b32.xlu0 %v17681_v31, %s11227_s9  ;;  %v3505_v62 = vsel %vm1102_vm4, %v3496_v9, %v3504_v18 }
 0x354   : > { %v3591_v55 = vrot.slane %v3587_v57, 4  ;;  %3935 = vmatprep.subr.bf16.mxu0 %v10218_v28  ;;  %v10219_v54 = vcombine.low %v3436_v36, %v3505_v62  ;;  %v10220_v42 = vcombine.high %v3436_v36, %v3505_v62 }
 0x355   : > { %4643 = vrot.lane.b32.xlu1 %v10976_v32, %s11227_s9  ;;  %3936 = vmatpush1.bf16.msra.mxu0 %v10217_v12  ;;  %v3589_v14 = vpop.permute.xlu0 %3588 }
 0x356   : > { %3976 = vmatprep.subr.bf16.mxu1 %v10220_v42  ;;  %v3592_v29 = vrot.slane %v3589_v14, 4  ;;  %v3593_v10 = vsel %vm252_vm8, %v3590_v48, %v3591_v55 }
 0x357   : > { %v3654_v59 = vpop.permute.xlu1 %3653  ;;  %3977 = vmatpush1.bf16.msra.mxu1 %v10219_v54  ;;  %4708 = vrot.lane.b32.xlu0 %v17683_v6, %s11226_s7  ;;  %v3594_v30 = vsel %vm1060_vm3, %v3585_v45, %v3593_v10  ;;  %v13916_v45 = vld [vmem:[%s17247_s1 + $0x10] sm:$0xff] }
 0x358   : > { %v3595_v8 = vsel %vm252_vm8, %v3591_v55, %v3592_v29  ;;  %v10221_v35 = vcombine.low %v13570_v60, %v3594_v30  ;;  %v10222_v0 = vcombine.high %v13570_v60, %v3594_v30  ;;  %v3659_v7 = vrot.slane %v3654_v59, 4  ;;  %v13933_v55 = vld [vmem:[%s17247_s1 + $0x20] sm:$0xff]  ;;  %v13942_v29 = vld [vmem:[%s17247_s1 + $0x28] sm:$0xff] }
 0x359   : > { %4710 = vrot.lane.b32.xlu1 %v17686_v50, %s11226_s7  ;;  %v3656_v17 = vpop.permute.xlu0 %3655  ;;  %v3596_v19 = vsel %vm1060_vm3, %v3587_v57, %v3595_v8  ;;  %v13925_v57 = vld [vmem:[%s17247_s1 + $0x18] sm:$0xff] }
 0x35a   : > { %3937 = vmatprep.subr.bf16.mxu0 %v10222_v0  ;;  %v10223_v63 = vcombine.low %v13574_v44, %v3596_v19  ;;  %v10224_v20 = vcombine.high %v13574_v44, %v3596_v19  ;;  %v3660_v60 = vrot.slane %v3656_v17, 4  ;;  %v10982_v44 = vpack.c.bf16 %v4758_v56, %v4758_v56 }
 0x35b   : > { %v3658_v52 = vpop.permute.xlu1 %3657  ;;  %3938 = vmatpush1.bf16.msra.mxu0 %v10221_v35  ;;  %4712 = vrot.lane.b32.xlu0 %v10979_v58, %s11226_s7  ;;  %v13952_v35 = vld [vmem:[%s17247_s1 + $0x30] sm:$0xff]  ;;  %v17698_v56 = vmov 0  }
 0x35c   : > { %3978 = vmatprep.subr.bf16.mxu1 %v10224_v20  ;;  %v3661_v23 = vrot.slane %v3658_v52, 4  ;;  %v3662_v39 = vsel %vm252_vm8, %v3659_v7, %v3660_v60  ;;  %v10212_v58 = vld [vmem:[%s17246_s0 + $0x10] sm:$0xf]  ;;  %v13972_v20 = vld [vmem:[%s17247_s1 + $0x40] sm:$0xff] }
 0x35d   : > { %4777 = vrot.lane.b32.xlu1 %v17690_v4, %s11225_s6  ;;  %3979 = vmatpush1.bf16.msra.mxu1 %v10223_v63  ;;  %v3723_v53 = vpop.permute.xlu0 %3722  ;;  %v3663_v15 = vsel %vm17449_vm2, %v3654_v59, %v3662_v39  ;;  %v14002_v39 = vld [vmem:[%s17247_s1 + $0x58] sm:$0xff] }
 0x35e   : > { %v3728_v21 = vrot.slane %v3723_v53, 4  ;;  %v3664_v9 = vsel %vm252_vm8, %v3660_v60, %v3661_v23 }
 0x35f   : > { %v3725_v41 = vpop.permute.xlu1 %3724  ;;  %4779 = vrot.lane.b32.xlu0 %v17693_v43, %s11225_s6  ;;  %v3665_v49 = vsel %vm17449_vm2, %v3656_v17, %v3664_v9  ;;  %v13964_v17 = vld [vmem:[%s17247_s1 + $0x38] sm:$0xff] }
 0x360   : > { %v3729_v16 = vrot.slane %v3725_v41, 4 }
 0x361   : > { %4781 = vrot.lane.b32.xlu1 %v10982_v44, %s11225_s6  ;;  %v3727_v26 = vpop.permute.xlu0 %3726 }
 0x362   : > { %v3730_v22 = vrot.slane %v3727_v26, 4  ;;  %v3731_v34 = vsel %vm252_vm8, %v3728_v21, %v3729_v16  ;;  %v13992_v21 = vld [vmem:[%s17247_s1 + $0x50] sm:$0xff] }
 0x363   : > { %v3792_v5 = vpop.permute.xlu1 %3791  ;;  %v3732_v37 = vsel %vm17694_vm0, %v3723_v53, %v3731_v34  ;;  %5642 = vrot.lane.b32.xlu0 %v13898_v27, %s11217_s26  ;;  %vm17699_vm0 = vcmask 523264  }
 0x364   : > { %v3733_v38 = vsel %vm252_vm8, %v3729_v16, %v3730_v22  ;;  %v10225_v25 = vcombine.low %v3663_v15, %v3732_v37  ;;  %v10226_v1 = vcombine.high %v3663_v15, %v3732_v37  ;;  %v3797_v48 = vrot.slane %v3792_v5, 4  ;;  %v14011_v15 = vld [vmem:[%s17247_s1 + $0x60] sm:$0xff] }
 0x365   : > { %v3794_v3 = vpop.permute.xlu0 %3793  ;;  %v3734_v18 = vsel %vm17695_vm1, %v3725_v41, %v3733_v38  ;;  %5644 = vrot.lane.b32.xlu1 %v13906_v47, %s11217_s26  ;;  %vm17700_vm1 = vmmov %vm17699_vm0 }
 0x366   : > { %3939 = vmatprep.subr.bf16.mxu0 %v10226_v1  ;;  %v3798_v12 = vrot.slane %v3794_v3, 4  ;;  %v10227_v28 = vcombine.low %v3665_v49, %v3734_v18  ;;  %v10228_v32 = vcombine.high %v3665_v49, %v3734_v18  ;;  %v14018_v1 = vld [vmem:[%s17247_s1 + $0x68] sm:$0xff]  ;;  %v14025_v18 = vld [vmem:[%s17247_s1 + $0x70] sm:$0xff] }
 0x367   : > { %v3796_v31 = vpop.permute.xlu1 %3795  ;;  %3940 = vmatpush1.bf16.msra.mxu0 %v10225_v25  ;;  %5646 = vrot.lane.b32.xlu0 %v13916_v45, %s11217_s26 }
 0x368   : > { %v3800_v36 = vsel %vm252_vm8, %v3797_v48, %v3798_v12  ;;  %v3799_v62 = vrot.slane %v3796_v31, 4  ;;  %3980 = vmatprep.subr.bf16.mxu1 %v10228_v32  ;;  %v14033_v31 = vld [vmem:[%s17247_s1 + $0x78] sm:$0xff] }
 0x369   : > { %3981 = vmatpush1.bf16.msra.mxu1 %v10227_v28  ;;  %v2675_v54 = vpop.permute.xlu0 %2674  ;;  %v3801_v42 = vsel %vm17696_vm7, %v3792_v5, %v3800_v36  ;;  %5648 = vrot.lane.b32.xlu1 %v13925_v57, %s11217_s26  ;;  %vm17701_vm7 = vcmask 449536  }
 0x36a   : > { %v3802_v40 = vsel %vm252_vm8, %v3798_v12, %v3799_v62  ;;  %v10230_v2 = vcombine.high %v3801_v42, %v3801_v42  ;;  %v10229_v14 = vcombine.low %v3801_v42, %v3801_v42  ;;  %v2680_v24 = vrot.slane %v2675_v54, 4 }
 0x36b   : > { %v2677_v10 = vpop.permute.xlu1 %2676  ;;  %v3803_v59 = vsel %vm17697_vm6, %v3794_v3, %v3802_v40  ;;  %5711 = vrot.lane.b32.xlu0 %v13933_v55, %s11218_s8  ;;  %v14042_v40 = vld [vmem:[%s17247_s1 + $0xa0] sm:$0xff]  ;;  %vm17702_vm6 = vmmov %vm17701_vm7 }
 0x36c   : > { %10233 = vmatprep.subr.msk.bf16.mxu0 %vm252_vm8, %v10230_v2  ;;  %v3922_v6 = vsel %vm252_vm8, %v10229_v14, 0  ;;  %v10232_v30 = vcombine.high %v3803_v59, %v3803_v59  ;;  %v10231_v8 = vcombine.low %v3803_v59, %v3803_v59  ;;  %v2681_v51 = vrot.slane %v2677_v10, 4 }
 0x36d   : > { %3942 = vmatpush1.bf16.msra.mxu0 %v3922_v6  ;;  %v2679_v0 = vpop.permute.xlu0 %2678  ;;  %5713 = vrot.lane.b32.xlu1 %v13942_v29, %s11218_s8 }
 0x36e   : > { %10235 = vmatprep.subr.msk.bf16.mxu1 %vm252_vm8, %v10232_v30  ;;  %v3928_v50 = vsel %vm252_vm8, %v10231_v8, 0  ;;  %v2682_v63 = vrot.slane %v2679_v0, 4  ;;  %v2683_v46 = vsel %vm252_vm8, %v2680_v24, %v2681_v51  ;;  %v14052_v8 = vld [vmem:[%s17247_s1 + $0xa8] sm:$0xff] }
 0x36f   : > { %v2744_v19 = vpop.permute.xlu1 %2743  ;;  %3983 = vmatpush1.bf16.msra.mxu1 %v3928_v50  ;;  %5715 = vrot.lane.b32.xlu0 %v13952_v35, %s11218_s8  ;;  %v2684_v41 = vsel %vm254_vm15, %v2675_v54, %v2683_v46 }
 0x370   : > { %10234 = vmatmul.mubr.msk.bf16.vlgmr.msra.gmra.mrb[4].mxu0 %vm326_vm14, %v10212_v58  ;;  %v2749_v52 = vrot.slane %v2744_v19, 4  ;;  %v2685_v53 = vsel %vm252_vm8, %v2681_v51, %v2682_v63 }
 0x371   : > { %v2746_v13 = vpop.permute.xlu0 %2745  ;;  %5717 = vrot.lane.b32.xlu1 %v13964_v17, %s11218_s8  ;;  %4152 = vmatprep.mubr.bf16.mxu0 %v17698_v56  ;;  %v2686_v9 = vsel %vm254_vm15, %v2677_v10, %v2685_v53  ;;  %v14075_v53 = vld [vmem:[%s17247_s1 + $0xc0] sm:$0xff] }
 0x372   : > { %v2750_v60 = vrot.slane %v2746_v13, 4  ;;  %10236 = vmatmul.mubr.msk.bf16.vlgmr.msra.gmra.mrb[4].mxu1 %vm326_vm14, %v10212_v58 }
 0x373   : > { %v2748_v4 = vpop.permute.xlu1 %2747  ;;  %5780 = vrot.lane.b32.xlu0 %v13972_v20, %s11219_s19  ;;  %4193 = vmatprep.mubr.bf16.mxu1 %v17698_v56 }
 0x374   : > { %v2751_v7 = vrot.slane %v2748_v4, 4  ;;  %v2752_v23 = vsel %vm252_vm8, %v2749_v52, %v2750_v60 }
 0x375   : > { %v2813_v44 = vpop.permute.xlu0 %2812  ;;  %v2753_v33 = vsel %vm326_vm14, %v2744_v19, %v2752_v23  ;;  %5782 = vrot.lane.b32.xlu1 %v13982_v61, %s11219_s19  ;;  %v14061_v19 = vld [vmem:[%s17247_s1 + $0xb0] sm:$0xff] }
 0x376   : > { %v2754_v11 = vsel %vm252_vm8, %v2750_v60, %v2751_v7  ;;  %v10237_v43 = vcombine.low %v2684_v41, %v2753_v33  ;;  %v10238_v16 = vcombine.high %v2684_v41, %v2753_v33  ;;  %v2818_v38 = vrot.slane %v2813_v44, 4  ;;  %v14068_v60 = vld [vmem:[%s17247_s1 + $0xb8] sm:$0xff]  ;;  %v14083_v33 = vld [vmem:[%s17247_s1 + $0xc8] sm:$0xff] }
 0x377   : > { %v2815_v26 = vpop.permute.xlu1 %2814  ;;  %v2755_v22 = vsel %vm326_vm14, %v2746_v13, %v2754_v11  ;;  %5784 = vrot.lane.b32.xlu0 %v13992_v21, %s11219_s19 }
 0x378   : > { %4120 = vmatprep.subr.bf16.mxu0 %v10238_v16  ;;  %v10239_v34 = vcombine.low %v2686_v9, %v2755_v22  ;;  %v10240_v5 = vcombine.high %v2686_v9, %v2755_v22  ;;  %v2819_v25 = vrot.slane %v2815_v26, 4  ;;  %v14092_v9 = vld [vmem:[%s17247_s1 + $0xd0] sm:$0xff] }
 0x379   : > { %4121 = vmatpush1.bf16.msra.mxu0 %v10237_v43  ;;  %v2817_v37 = vpop.permute.xlu0 %2816  ;;  %5786 = vrot.lane.b32.xlu1 %v14002_v39, %s11219_s19 }
 0x37a   : > { %4161 = vmatprep.subr.bf16.mxu1 %v10240_v5  ;;  %v2820_v49 = vrot.slane %v2817_v37, 4  ;;  %v2821_v32 = vsel %vm252_vm8, %v2818_v38, %v2819_v25 }
 0x37b   : > { %v2882_v3 = vpop.permute.xlu1 %2881  ;;  %4162 = vmatpush1.bf16.msra.mxu1 %v10239_v34  ;;  %5849 = vrot.lane.b32.xlu0 %v14011_v15, %s11220_s30  ;;  %v2822_v14 = vsel %vm398_vm13, %v2813_v44, %v2821_v32 }
 0x37c   : > { %v2887_v12 = vrot.slane %v2882_v3, 4  ;;  %v2823_v62 = vsel %vm252_vm8, %v2819_v25, %v2820_v49 }
 0x37d   : > { %v2884_v48 = vpop.permute.xlu0 %2883  ;;  %5851 = vrot.lane.b32.xlu1 %v14018_v1, %s11220_s30  ;;  %v2824_v58 = vsel %vm398_vm13, %v2815_v26, %v2823_v62 }
 0x37e   : > { %v2888_v28 = vrot.slane %v2884_v48, 4 }
 0x37f   : > { %v2886_v36 = vpop.permute.xlu1 %2885  ;;  %5853 = vrot.lane.b32.xlu0 %v14025_v18, %s11220_s30 }
 0x380   : > { %v2889_v54 = vrot.slane %v2886_v36, 4  ;;  %v2890_v42 = vsel %vm252_vm8, %v2887_v12, %v2888_v28  ;;  %v14111_v36 = vld [vmem:[%s17247_s1 + $0xe0] sm:$0xff] }
 0x381   : > { %v2922_v2 = vpop.permute.xlu0 %2921  ;;  %v2891_v10 = vsel %vm470_vm12, %v2882_v3, %v2890_v42  ;;  %5855 = vrot.lane.b32.xlu1 %v14033_v31, %s11220_s30  ;;  %v14102_v3 = vld [vmem:[%s17247_s1 + $0xd8] sm:$0xff] }
 0x382   : > { %v2892_v59 = vsel %vm252_vm8, %v2888_v28, %v2889_v54  ;;  %v10241_v6 = vcombine.low %v2822_v14, %v2891_v10  ;;  %v10242_v30 = vcombine.high %v2822_v14, %v2891_v10  ;;  %v2927_v13 = vrot.slane %v2922_v2, 4 }
 0x383   : > { %v2924_v0 = vpop.permute.xlu1 %2923  ;;  %v2893_v24 = vsel %vm470_vm12, %v2884_v48, %v2892_v59  ;;  %5940 = vrot.lane.b32.xlu0 %v14042_v40, %s11221_s14  ;;  %v14125_v59 = vld [vmem:[%s17247_s1 + $0xf0] sm:$0xff] }
 0x384   : > { %4122 = vmatprep.subr.bf16.mxu0 %v10242_v30  ;;  %v10243_v51 = vcombine.low %v2824_v58, %v2893_v24  ;;  %v10244_v50 = vcombine.high %v2824_v58, %v2893_v24  ;;  %v2928_v52 = vrot.slane %v2924_v0, 4  ;;  %v14133_v24 = vld [vmem:[%s17247_s1 + $0xf8] sm:$0xff] }
 0x385   : > { %4123 = vmatpush1.bf16.msra.mxu0 %v10241_v6  ;;  %v2926_v63 = vpop.permute.xlu0 %2925  ;;  %5942 = vrot.lane.b32.xlu1 %v14052_v8, %s11221_s14 }
 0x386   : > { %4163 = vmatprep.subr.bf16.mxu1 %v10244_v50  ;;  %v2929_v4 = vrot.slane %v2926_v63, 4  ;;  %v2930_v41 = vsel %vm252_vm8, %v2927_v13, %v2928_v52 }
 0x387   : > { %v2991_v46 = vpop.permute.xlu1 %2990  ;;  %4164 = vmatpush1.bf16.msra.mxu1 %v10243_v51  ;;  %5944 = vrot.lane.b32.xlu0 %v14061_v19, %s11221_s14  ;;  %v2931_v34 = vsel %vm17699_vm0, %v2922_v2, %v2930_v41  ;;  %v14118_v2 = vld [vmem:[%s17247_s1 + $0xe8] sm:$0xff] }
 0x388   : > { %v2996_v23 = vrot.slane %v2991_v46, 4  ;;  %v2932_v43 = vsel %vm252_vm8, %v2928_v52, %v2929_v4  ;;  %v14142_v52 = vld [vmem:[%s17247_s1 + $0x100] sm:$0xff] }
 0x389   : > { %v2993_v7 = vpop.permute.xlu0 %2992  ;;  %5946 = vrot.lane.b32.xlu1 %v14068_v60, %s11221_s14  ;;  %v2933_v48 = vsel %vm17700_vm1, %v2924_v0, %v2932_v43  ;;  %v14152_v43 = vld [vmem:[%s17247_s1 + $0x108] sm:$0xff]  ;;  %vm17703_vm1 = vmmov %vm17699_vm0 }
 0x38a   : > { %v2997_v44 = vrot.slane %v2993_v7, 4 }
 0x38b   : > { %v2995_v11 = vpop.permute.xlu1 %2994  ;;  %6009 = vrot.lane.b32.xlu0 %v14075_v53, %s11222_s27 }
 0x38c   : > { %v2998_v16 = vrot.slane %v2995_v11, 4  ;;  %v2999_v26 = vsel %vm252_vm8, %v2996_v23, %v2997_v44 }
 0x38d   : > { %v3060_v22 = vpop.permute.xlu0 %3059  ;;  %v3000_v5 = vsel %vm428_vm11, %v2991_v46, %v2999_v26  ;;  %6011 = vrot.lane.b32.xlu1 %v14083_v33, %s11222_s27 }
 0x38e   : > { %v3001_v37 = vsel %vm252_vm8, %v2997_v44, %v2998_v16  ;;  %v10245_v38 = vcombine.low %v2931_v34, %v3000_v5  ;;  %v10246_v25 = vcombine.high %v2931_v34, %v3000_v5  ;;  %v3065_v54 = vrot.slane %v3060_v22, 4 }
 0x38f   : > { %v3062_v49 = vpop.permute.xlu1 %3061  ;;  %v3002_v12 = vsel %vm428_vm11, %v2993_v7, %v3001_v37  ;;  %6013 = vrot.lane.b32.xlu0 %v14092_v9, %s11222_s27 }
 0x390   : > { %4124 = vmatprep.subr.bf16.mxu0 %v10246_v25  ;;  %v10247_v28 = vcombine.low %v2933_v48, %v3002_v12  ;;  %v10248_v32 = vcombine.high %v2933_v48, %v3002_v12  ;;  %v3066_v42 = vrot.slane %v3062_v49, 4  ;;  %v14169_v12 = vld [vmem:[%s17247_s1 + $0x118] sm:$0xff] }
 0x391   : > { %4125 = vmatpush1.bf16.msra.mxu0 %v10245_v38  ;;  %v3064_v62 = vpop.permute.xlu0 %3063  ;;  %6015 = vrot.lane.b32.xlu1 %v14102_v3, %s11222_s27  ;;  %v14161_v38 = vld [vmem:[%s17247_s1 + $0x110] sm:$0xff] }
 0x392   : > { %4165 = vmatprep.subr.bf16.mxu1 %v10248_v32  ;;  %v3067_v10 = vrot.slane %v3064_v62, 4  ;;  %v3068_v58 = vsel %vm252_vm8, %v3065_v54, %v3066_v42 }
 0x393   : > { %v3129_v14 = vpop.permute.xlu1 %3128  ;;  %4166 = vmatpush1.bf16.msra.mxu1 %v10247_v28  ;;  %6078 = vrot.lane.b32.xlu0 %v14111_v36, %s11223_s11  ;;  %v3069_v4 = vsel %vm356_vm10, %v3060_v22, %v3068_v58 }
 0x394   : > { %v3134_v30 = vrot.slane %v3129_v14, 4  ;;  %v3070_v50 = vsel %vm252_vm8, %v3066_v42, %v3067_v10 }
 0x395   : > { %v3131_v6 = vpop.permute.xlu0 %3130  ;;  %6080 = vrot.lane.b32.xlu1 %v14118_v2, %s11223_s11  ;;  %v3071_v26 = vsel %vm356_vm10, %v3062_v49, %v3070_v50 }
 0x396   : > { %v3135_v0 = vrot.slane %v3131_v6, 4 }
 0x397   : > { %v3133_v51 = vpop.permute.xlu1 %3132  ;;  %6082 = vrot.lane.b32.xlu0 %v14125_v59, %s11223_s11 }
 0x398   : > { %v3136_v63 = vrot.slane %v3133_v51, 4  ;;  %v3137_v13 = vsel %vm252_vm8, %v3134_v30, %v3135_v0  ;;  %v10157_v51 = vld [vmem:[%s17246_s0 + $0xc] sm:$0xf] }
 0x399   : > { %v3198_v46 = vpop.permute.xlu0 %3197  ;;  %v3138_v7 = vsel %vm284_vm9, %v3129_v14, %v3137_v13  ;;  %6084 = vrot.lane.b32.xlu1 %v14133_v24, %s11223_s11 }
 0x39a   : > { %v3139_v23 = vsel %vm252_vm8, %v3135_v0, %v3136_v63  ;;  %v3203_v44 = vrot.slane %v3198_v46, 4  ;;  %v10249_v41 = vcombine.low %v3069_v4, %v3138_v7  ;;  %v10250_v11 = vcombine.high %v3069_v4, %v3138_v7 }
 0x39b   : > { %v3200_v16 = vpop.permute.xlu1 %3199  ;;  %v3140_v22 = vsel %vm284_vm9, %v3131_v6, %v3139_v23  ;;  %6147 = vrot.lane.b32.xlu0 %v14142_v52, %s11224_s25 }
 0x39c   : > { %v3204_v34 = vrot.slane %v3200_v16, 4  ;;  %4126 = vmatprep.subr.bf16.mxu0 %v10250_v11  ;;  %v10251_v5 = vcombine.low %v3071_v26, %v3140_v22  ;;  %v10252_v37 = vcombine.high %v3071_v26, %v3140_v22 }
 0x39d   : > { %4127 = vmatpush1.bf16.msra.mxu0 %v10249_v41  ;;  %v3202_v25 = vpop.permute.xlu0 %3201  ;;  %6149 = vrot.lane.b32.xlu1 %v14152_v43, %s11224_s25 }
 0x39e   : > { %v3206_v49 = vsel %vm252_vm8, %v3203_v44, %v3204_v34  ;;  %4167 = vmatprep.subr.bf16.mxu1 %v10252_v37  ;;  %v3205_v48 = vrot.slane %v3202_v25, 4 }
 0x39f   : > { %v4255_v28 = vpop.permute.xlu1 %4254  ;;  %4168 = vmatpush1.bf16.msra.mxu1 %v10251_v5  ;;  %v3207_v32 = vsel %vm17701_vm7, %v3198_v46, %v3206_v49  ;;  %6151 = vrot.lane.b32.xlu0 %v14161_v38, %s11224_s25  ;;  %vm17704_vm7 = vmmov %vm17702_vm6 }
 0x3a0   : > { %v3208_v62 = vsel %vm252_vm8, %v3204_v34, %v3205_v48  ;;  %v10254_v54 = vcombine.high %v3207_v32, %v3207_v32  ;;  %v10253_v42 = vcombine.low %v3207_v32, %v3207_v32  ;;  %v4260_v46 = vrot.slane %v4255_v28, 4 }
 0x3a1   : > { %v4257_v14 = vpop.permute.xlu0 %4256  ;;  %v3209_v10 = vsel %vm17702_vm6, %v3200_v16, %v3208_v62  ;;  %6153 = vrot.lane.b32.xlu1 %v14169_v12, %s11224_s25 }
 0x3a2   : > { %10257 = vmatprep.subr.msk.bf16.mxu0 %vm252_vm8, %v10254_v54  ;;  %v4109_v6 = vsel %vm252_vm8, %v10253_v42, 0  ;;  %v10256_v30 = vcombine.high %v3209_v10, %v3209_v10  ;;  %v10255_v0 = vcombine.low %v3209_v10, %v3209_v10  ;;  %v4261_v50 = vrot.slane %v4257_v14, 4 }
 0x3a3   : > { %v4259_v58 = vpop.permute.xlu1 %4258  ;;  %4129 = vmatpush1.bf16.msra.mxu0 %v4109_v6  ;;  %5030 = vrot.lane.b32.xlu0 %v13898_v27, %s11225_s6 }
 0x3a4   : > { %10259 = vmatprep.subr.msk.bf16.mxu1 %vm252_vm8, %v10256_v30  ;;  %v4115_v63 = vsel %vm252_vm8, %v10255_v0, 0  ;;  %v4262_v4 = vrot.slane %v4259_v58, 4  ;;  %v4263_v41 = vsel %vm252_vm8, %v4260_v46, %v4261_v50 }
 0x3a5   : > { %4170 = vmatpush1.bf16.msra.mxu1 %v4115_v63  ;;  %v4324_v13 = vpop.permute.xlu0 %4323  ;;  %5032 = vrot.lane.b32.xlu1 %v13906_v47, %s11225_s6  ;;  %v4264_v5 = vsel %vm254_vm15, %v4255_v28, %v4263_v41 }
 0x3a6   : > { %v4329_v7 = vrot.slane %v4324_v13, 4  ;;  %10258 = vmatmul.mubr.msk.bf16.vlgmr.msra.gmra.mrb[8].mxu0 %vm326_vm14, %v10157_v51  ;;  %v4265_v16 = vsel %vm252_vm8, %v4261_v50, %v4262_v4 }
 0x3a7   : > { %v4326_v23 = vpop.permute.xlu1 %4325  ;;  %5034 = vrot.lane.b32.xlu0 %v13916_v45, %s11225_s6  ;;  %4951 = vmatprep.mubr.bf16.mxu0 %v17698_v56  ;;  %v4266_v62 = vsel %vm254_vm15, %v4257_v14, %v4265_v16 }
 0x3a8   : > { %v4330_v44 = vrot.slane %v4326_v23, 4  ;;  %10260 = vmatmul.mubr.msk.bf16.vlgmr.msra.gmra.mrb[8].mxu1 %vm326_vm14, %v10157_v51 }
 0x3a9   : > { %v4328_v11 = vpop.permute.xlu0 %4327  ;;  %5036 = vrot.lane.b32.xlu1 %v13925_v57, %s11225_s6  ;;  %4992 = vmatprep.mubr.bf16.mxu1 %v17698_v56 }
 0x3aa   : > { %v4331_v26 = vrot.slane %v4328_v11, 4  ;;  %v4332_v22 = vsel %vm252_vm8, %v4329_v7, %v4330_v44 }
 0x3ab   : > { %v4393_v34 = vpop.permute.xlu1 %4392  ;;  %v4333_v37 = vsel %vm326_vm14, %v4324_v13, %v4332_v22  ;;  %5099 = vrot.lane.b32.xlu0 %v13933_v55, %s11226_s7 }
 0x3ac   : > { %v4334_v25 = vsel %vm252_vm8, %v4330_v44, %v4331_v26  ;;  %v10317_v49 = vcombine.low %v4264_v5, %v4333_v37  ;;  %v10318_v48 = vcombine.high %v4264_v5, %v4333_v37  ;;  %v4398_v14 = vrot.slane %v4393_v34, 4 }
 0x3ad   : > { %v4395_v32 = vpop.permute.xlu0 %4394  ;;  %v4335_v54 = vsel %vm326_vm14, %v4326_v23, %v4334_v25  ;;  %5101 = vrot.lane.b32.xlu1 %v13942_v29, %s11226_s7 }
 0x3ae   : > { %4919 = vmatprep.subr.bf16.mxu0 %v10318_v48  ;;  %v10319_v42 = vcombine.low %v4266_v62, %v4335_v54  ;;  %v10320_v28 = vcombine.high %v4266_v62, %v4335_v54  ;;  %v4399_v6 = vrot.slane %v4395_v32, 4 }
 0x3af   : > { %v4397_v10 = vpop.permute.xlu1 %4396  ;;  %4920 = vmatpush1.bf16.msra.mxu0 %v10317_v49  ;;  %5103 = vrot.lane.b32.xlu0 %v13952_v35, %s11226_s7 }
 0x3b0   : > { %4960 = vmatprep.subr.bf16.mxu1 %v10320_v28  ;;  %v4400_v0 = vrot.slane %v4397_v10, 4  ;;  %v4401_v63 = vsel %vm252_vm8, %v4398_v14, %v4399_v6 }
 0x3b1   : > { %4961 = vmatpush1.bf16.msra.mxu1 %v10319_v42  ;;  %v4462_v30 = vpop.permute.xlu0 %4461  ;;  %5105 = vrot.lane.b32.xlu1 %v13964_v17, %s11226_s7  ;;  %v4402_v44 = vsel %vm398_vm13, %v4393_v34, %v4401_v63 }
 0x3b2   : > { %v4467_v58 = vrot.slane %v4462_v30, 4  ;;  %v4403_v46 = vsel %vm252_vm8, %v4399_v6, %v4400_v0 }
 0x3b3   : > { %v4464_v51 = vpop.permute.xlu1 %4463  ;;  %5168 = vrot.lane.b32.xlu0 %v13972_v20, %s11227_s9  ;;  %v4404_v5 = vsel %vm398_vm13, %v4395_v32, %v4403_v46 }
 0x3b4   : > { %v4468_v50 = vrot.slane %v4464_v51, 4 }
 0x3b5   : > { %v4466_v13 = vpop.permute.xlu0 %4465  ;;  %5170 = vrot.lane.b32.xlu1 %v13982_v61, %s11227_s9 }
 0x3b6   : > { %v4469_v4 = vrot.slane %v4466_v13, 4  ;;  %v4470_v7 = vsel %vm252_vm8, %v4467_v58, %v4468_v50 }
 0x3b7   : > { %v4502_v23 = vpop.permute.xlu1 %4501  ;;  %v4471_v41 = vsel %vm470_vm12, %v4462_v30, %v4470_v7  ;;  %5172 = vrot.lane.b32.xlu0 %v13992_v21, %s11227_s9 }
 0x3b8   : > { %v4472_v11 = vsel %vm252_vm8, %v4468_v50, %v4469_v4  ;;  %v10321_v16 = vcombine.low %v4402_v44, %v4471_v41  ;;  %v10322_v26 = vcombine.high %v4402_v44, %v4471_v41  ;;  %v4507_v32 = vrot.slane %v4502_v23, 4 }
 0x3b9   : > { %v4504_v22 = vpop.permute.xlu0 %4503  ;;  %v4473_v37 = vsel %vm470_vm12, %v4464_v51, %v4472_v11  ;;  %5174 = vrot.lane.b32.xlu1 %v14002_v39, %s11227_s9 }
 0x3ba   : > { %4921 = vmatprep.subr.bf16.mxu0 %v10322_v26  ;;  %v10323_v25 = vcombine.low %v4404_v5, %v4473_v37  ;;  %v10324_v34 = vcombine.high %v4404_v5, %v4473_v37  ;;  %v4508_v48 = vrot.slane %v4504_v22, 4 }
 0x3bb   : > { %v4506_v49 = vpop.permute.xlu1 %4505  ;;  %4922 = vmatpush1.bf16.msra.mxu0 %v10321_v16  ;;  %5237 = vrot.lane.b32.xlu0 %v14011_v15, %s11228_s10 }
 0x3bc   : > { %4962 = vmatprep.subr.bf16.mxu1 %v10324_v34  ;;  %v4509_v54 = vrot.slane %v4506_v49, 4  ;;  %v4510_v6 = vsel %vm252_vm8, %v4507_v32, %v4508_v48 }
 0x3bd   : > { %4963 = vmatpush1.bf16.msra.mxu1 %v10323_v25  ;;  %v4571_v62 = vpop.permute.xlu0 %4570  ;;  %5239 = vrot.lane.b32.xlu1 %v14018_v1, %s11228_s10  ;;  %v4511_v50 = vsel %vm17699_vm0, %v4502_v23, %v4510_v6  ;;  %vm17767_vm0 = vcmask 973824  }
 0x3be   : > { %v4576_v42 = vrot.slane %v4571_v62, 4  ;;  %v4512_v14 = vsel %vm252_vm8, %v4508_v48, %v4509_v54 }
 0x3bf   : > { %v4573_v28 = vpop.permute.xlu1 %4572  ;;  %5241 = vrot.lane.b32.xlu0 %v14025_v18, %s11228_s10  ;;  %v4513_v44 = vsel %vm17703_vm1, %v4504_v22, %v4512_v14  ;;  %vm17768_vm1 = vcmask 982016  }
 0x3c0   : > { %v4577_v10 = vrot.slane %v4573_v28, 4 }
 0x3c1   : > { %v4575_v30 = vpop.permute.xlu0 %4574  ;;  %5243 = vrot.lane.b32.xlu1 %v14033_v31, %s11228_s10 }
 0x3c2   : > { %v4578_v0 = vrot.slane %v4575_v30, 4  ;;  %v4579_v58 = vsel %vm252_vm8, %v4576_v42, %v4577_v10 }
 0x3c3   : > { %v4640_v51 = vpop.permute.xlu1 %4639  ;;  %v4580_v63 = vsel %vm428_vm11, %v4571_v62, %v4579_v58  ;;  %5346 = vrot.lane.b32.xlu0 %v14042_v40, %s11229_s13 }
 0x3c4   : > { %v4581_v13 = vsel %vm252_vm8, %v4577_v10, %v4578_v0  ;;  %v10325_v46 = vcombine.low %v4511_v50, %v4580_v63  ;;  %v10326_v4 = vcombine.high %v4511_v50, %v4580_v63  ;;  %v4645_v22 = vrot.slane %v4640_v51, 4 }
 0x3c5   : > { %v4642_v7 = vpop.permute.xlu0 %4641  ;;  %v4582_v41 = vsel %vm428_vm11, %v4573_v28, %v4581_v13  ;;  %5348 = vrot.lane.b32.xlu1 %v14052_v8, %s11229_s13 }
 0x3c6   : > { %4923 = vmatprep.subr.bf16.mxu0 %v10326_v4  ;;  %v10327_v11 = vcombine.low %v4513_v44, %v4582_v41  ;;  %v10328_v23 = vcombine.high %v4513_v44, %v4582_v41  ;;  %v4646_v26 = vrot.slane %v4642_v7, 4 }
 0x3c7   : > { %v4644_v16 = vpop.permute.xlu1 %4643  ;;  %4924 = vmatpush1.bf16.msra.mxu0 %v10325_v46  ;;  %5350 = vrot.lane.b32.xlu0 %v14061_v19, %s11229_s13 }
 0x3c8   : > { %4964 = vmatprep.subr.bf16.mxu1 %v10328_v23  ;;  %v4647_v37 = vrot.slane %v4644_v16, 4  ;;  %v4648_v48 = vsel %vm252_vm8, %v4645_v22, %v4646_v26 }
 0x3c9   : > { %4965 = vmatpush1.bf16.msra.mxu1 %v10327_v11  ;;  %v4709_v5 = vpop.permute.xlu0 %4708  ;;  %5352 = vrot.lane.b32.xlu1 %v14068_v60, %s11229_s13  ;;  %v4649_v10 = vsel %vm356_vm10, %v4640_v51, %v4648_v48  ;;  %v10316_v48 = vld [vmem:[%s17246_s0 + $0x14] sm:$0xf] }
 0x3ca   : > { %v4714_v25 = vrot.slane %v4709_v5, 4  ;;  %v4650_v32 = vsel %vm252_vm8, %v4646_v26, %v4647_v37 }
 0x3cb   : > { %v4711_v34 = vpop.permute.xlu1 %4710  ;;  %5415 = vrot.lane.b32.xlu0 %v14075_v53, %s11230_s15  ;;  %v4651_v50 = vsel %vm356_vm10, %v4642_v7, %v4650_v32 }
 0x3cc   : > { %v4715_v49 = vrot.slane %v4711_v34, 4 }
 0x3cd   : > { %v4713_v62 = vpop.permute.xlu0 %4712  ;;  %5417 = vrot.lane.b32.xlu1 %v14083_v33, %s11230_s15 }
 0x3ce   : > { %v4716_v54 = vrot.slane %v4713_v62, 4  ;;  %v4717_v42 = vsel %vm252_vm8, %v4714_v25, %v4715_v49 }
 0x3cf   : > { %v4778_v28 = vpop.permute.xlu1 %4777  ;;  %v4718_v6 = vsel %vm284_vm9, %v4709_v5, %v4717_v42  ;;  %5419 = vrot.lane.b32.xlu0 %v14092_v9, %s11230_s15 }
 0x3d0   : > { %v4719_v30 = vsel %vm252_vm8, %v4715_v49, %v4716_v54  ;;  %v10329_v14 = vcombine.low %v4649_v10, %v4718_v6  ;;  %v10330_v0 = vcombine.high %v4649_v10, %v4718_v6  ;;  %v4783_v13 = vrot.slane %v4778_v28, 4 }
 0x3d1   : > { %v4780_v58 = vpop.permute.xlu0 %4779  ;;  %v4720_v63 = vsel %vm284_vm9, %v4711_v34, %v4719_v30  ;;  %5421 = vrot.lane.b32.xlu1 %v14102_v3, %s11230_s15 }
 0x3d2   : > { %4925 = vmatprep.subr.bf16.mxu0 %v10330_v0  ;;  %v4784_v51 = vrot.slane %v4780_v58, 4  ;;  %v10331_v46 = vcombine.low %v4651_v50, %v4720_v63  ;;  %v10332_v4 = vcombine.high %v4651_v50, %v4720_v63 }
 0x3d3   : > { %v4782_v44 = vpop.permute.xlu1 %4781  ;;  %4926 = vmatpush1.bf16.msra.mxu0 %v10329_v14  ;;  %5484 = vrot.lane.b32.xlu0 %v14111_v36, %s11231_s16 }
 0x3d4   : > { %v4786_v41 = vsel %vm252_vm8, %v4783_v13, %v4784_v51  ;;  %v4785_v11 = vrot.slane %v4782_v44, 4  ;;  %4966 = vmatprep.subr.bf16.mxu1 %v10332_v4 }
 0x3d5   : > { %4967 = vmatpush1.bf16.msra.mxu1 %v10331_v46  ;;  %v4787_v7 = vsel %vm17704_vm7, %v4778_v28, %v4786_v41  ;;  %5486 = vrot.lane.b32.xlu1 %v14118_v2, %s11231_s16  ;;  %v14275_v23 = vpop.permute.xlu0 %5642  ;;  %vm17781_vm7 = vmmov %vm17767_vm0 }
 0x3d6   : > { %v4788_v16 = vsel %vm252_vm8, %v4784_v51, %v4785_v11  ;;  %v10334_v26 = vcombine.high %v4787_v7, %v4787_v7  ;;  %v10333_v5 = vcombine.low %v4787_v7, %v4787_v7 }
 0x3d7   : > { %v4789_v22 = vsel %vm17702_vm6, %v4780_v58, %v4788_v16  ;;  %v14279_v37 = vpop.permute.xlu1 %5644  ;;  %5488 = vrot.lane.b32.xlu0 %v14125_v59, %s11231_s16 }
 0x3d8   : > { %10337 = vmatprep.subr.msk.bf16.mxu0 %vm252_vm8, %v10334_v26  ;;  %v4908_v25 = vsel %vm252_vm8, %v10333_v5, 0  ;;  %v10336_v34 = vcombine.high %v4789_v22, %v4789_v22  ;;  %v10335_v49 = vcombine.low %v4789_v22, %v4789_v22 }
 0x3d9   : > { %4928 = vmatpush1.bf16.msra.mxu0 %v4908_v25  ;;  %5490 = vrot.lane.b32.xlu1 %v14133_v24, %s11231_s16  ;;  %v14290_v62 = vpop.permute.xlu0 %5646 }
 0x3da   : > { %10339 = vmatprep.subr.msk.bf16.mxu1 %vm252_vm8, %v10336_v34  ;;  %v4914_v32 = vsel %vm252_vm8, %v10335_v49, 0 }
 0x3db   : > { %4969 = vmatpush1.bf16.msra.mxu1 %v4914_v32  ;;  %v14294_v54 = vpop.permute.xlu1 %5648  ;;  %5553 = vrot.lane.b32.xlu0 %v14142_v52, %s11232_s17 }
 0x3dc   : > { %10338 = vmatmul.mubr.msk.bf16.vlgmr.msra.gmra.mrb[12].mxu0 %vm326_vm14, %v10316_v48 }
 0x3dd   : > { %5555 = vrot.lane.b32.xlu1 %v14152_v43, %s11232_s17  ;;  %v14301_v42 = vpop.permute.xlu0 %5711  ;;  %6360 = vmatprep.mubr.bf16.mxu0 %v17698_v56 }
 0x3de   : > { %10340 = vmatmul.mubr.msk.bf16.vlgmr.msra.gmra.mrb[12].mxu1 %vm326_vm14, %v10316_v48 }
 0x3df   : > { %v14305_v28 = vpop.permute.xlu1 %5713  ;;  %5557 = vrot.lane.b32.xlu0 %v14161_v38, %s11232_s17  ;;  %6401 = vmatprep.mubr.bf16.mxu1 %v17698_v56 }
 0x3e1   : > { %5559 = vrot.lane.b32.xlu1 %v14169_v12, %s11232_s17  ;;  %v14312_v10 = vpop.permute.xlu0 %5715 }
 0x3e3   : > { %v14314_v6 = vpop.permute.xlu1 %5717  ;;  %6610 = vrot.lane.b32.xlu0 %v13898_v27, %s11225_s6 }
 0x3e5   : > { %6612 = vrot.lane.b32.xlu1 %v13906_v47, %s11225_s6  ;;  %v14320_v30 = vpop.permute.xlu0 %5780 }
 0x3e7   : > { %v14322_v14 = vpop.permute.xlu1 %5782  ;;  %6614 = vrot.lane.b32.xlu0 %v13916_v45, %s11225_s6 }
 0x3e9   : > { %6616 = vrot.lane.b32.xlu1 %v13925_v57, %s11225_s6  ;;  %v14328_v0 = vpop.permute.xlu0 %5784 }
 0x3eb   : > { %v14330_v58 = vpop.permute.xlu1 %5786  ;;  %6679 = vrot.lane.b32.xlu0 %v13933_v55, %s11226_s7 }
 0x3ed   : > { %6681 = vrot.lane.b32.xlu1 %v13942_v29, %s11226_s7  ;;  %v14336_v27 = vpop.permute.xlu0 %5849 }
 0x3ef   : > { %v14338_v47 = vpop.permute.xlu1 %5851  ;;  %6683 = vrot.lane.b32.xlu0 %v13952_v35, %s11226_s7 }
 0x3f1   : > { %6685 = vrot.lane.b32.xlu1 %v13964_v17, %s11226_s7  ;;  %v14344_v45 = vpop.permute.xlu0 %5853 }
 0x3f3   : > { %v14346_v57 = vpop.permute.xlu1 %5855  ;;  %6748 = vrot.lane.b32.xlu0 %v13972_v20, %s11227_s9 }
 0x3f5   : > { %6750 = vrot.lane.b32.xlu1 %v13982_v61, %s11227_s9  ;;  %v14352_v55 = vpop.permute.xlu0 %5940 }
 0x3f7   : > { %v14354_v29 = vpop.permute.xlu1 %5942  ;;  %6752 = vrot.lane.b32.xlu0 %v13992_v21, %s11227_s9 }
 0x3f9   : > { %6754 = vrot.lane.b32.xlu1 %v14002_v39, %s11227_s9  ;;  %v14360_v35 = vpop.permute.xlu0 %5944 }
 0x3fb   : > { %v14362_v17 = vpop.permute.xlu1 %5946  ;;  %6817 = vrot.lane.b32.xlu0 %v14011_v15, %s11228_s10 }
 0x3fd   : > { %6819 = vrot.lane.b32.xlu1 %v14018_v1, %s11228_s10  ;;  %v14368_v20 = vpop.permute.xlu0 %6009 }
 0x3ff   : > { %v14370_v61 = vpop.permute.xlu1 %6011  ;;  %6821 = vrot.lane.b32.xlu0 %v14025_v18, %s11228_s10 }
 0x401   : > { %6823 = vrot.lane.b32.xlu1 %v14033_v31, %s11228_s10  ;;  %v14376_v21 = vpop.permute.xlu0 %6013 }
 0x403   : > { %v14378_v39 = vpop.permute.xlu1 %6015  ;;  %6926 = vrot.lane.b32.xlu0 %v14042_v40, %s11229_s13 }
 0x405   : > { %6928 = vrot.lane.b32.xlu1 %v14052_v8, %s11229_s13  ;;  %v14384_v15 = vpop.permute.xlu0 %6078 }
 0x407   : > { %v14386_v1 = vpop.permute.xlu1 %6080  ;;  %6930 = vrot.lane.b32.xlu0 %v14061_v19, %s11229_s13 }
 0x409   : > { %6932 = vrot.lane.b32.xlu1 %v14068_v60, %s11229_s13  ;;  %v14392_v18 = vpop.permute.xlu0 %6082 }
 0x40b   : > { %v14394_v31 = vpop.permute.xlu1 %6084  ;;  %6995 = vrot.lane.b32.xlu0 %v14075_v53, %s11230_s15 }
 0x40d   : > { %6997 = vrot.lane.b32.xlu1 %v14083_v33, %s11230_s15  ;;  %v14400_v40 = vpop.permute.xlu0 %6147 }
 0x40e   : > { %17705 = vst [vmem:[#allocation30_spill] sm:$0xff] %v14400_v40  ;;  %v11206_v40 = vld [vmem:[%s11266_s18 + $0x10] sm:$0xff] }
 0x40f   : > { %v14402_v8 = vpop.permute.xlu1 %6149  ;;  %6999 = vrot.lane.b32.xlu0 %v14092_v9, %s11230_s15  ;;  %v14422_v9 = vld [vmem:[#allocation2 + $0x28] sm:$0xff] }
 0x410   : > { %17706 = vst [vmem:[#allocation32_spill] sm:$0xff] %v14402_v8  ;;  %17710 = vst [vmem:[#allocation39_spill] sm:$0xff] %v14422_v9 }
 0x411   : > { %7001 = vrot.lane.b32.xlu1 %v14102_v3, %s11230_s15  ;;  %v14408_v19 = vpop.permute.xlu0 %6151 }
 0x412   : > { %17707 = vst [vmem:[#allocation35_spill] sm:$0xff] %v14408_v19 }
 0x413   : > { %v14410_v60 = vpop.permute.xlu1 %6153  ;;  %7064 = vrot.lane.b32.xlu0 %v14111_v36, %s11231_s16  ;;  %v5960_v36 = vmul.f32 %v14362_v17, %v14422_v9 }
 0x414   : > { %17708 = vst [vmem:[#allocation34_spill] sm:$0xff] %v14410_v60 }
 0x415   : > { %7066 = vrot.lane.b32.xlu1 %v14118_v2, %s11231_s16  ;;  %v14416_v53 = vpop.permute.xlu0 %5030  ;;  %v6029_v2 = vmul.f32 %v14378_v39, %v14422_v9  ;;  %v11026_v63 = vpack.c.bf16 %v5960_v36, %v5960_v36 }
 0x417   : > { %v14418_v33 = vpop.permute.xlu1 %5032  ;;  %7068 = vrot.lane.b32.xlu0 %v14125_v59, %s11231_s16  ;;  %v11029_v51 = vpack.c.bf16 %v6029_v2, %v6029_v2 }
 0x418   : > { %17709 = vst [vmem:[#allocation36_spill] sm:$0xff] %v14418_v33 }
 0x419   : > { %7070 = vrot.lane.b32.xlu1 %v14133_v24, %s11231_s16  ;;  %v14426_v3 = vpop.permute.xlu0 %5034  ;;  %v6098_v24 = vmul.f32 %v14394_v31, %v14422_v9 }
 0x41a   : > { %17711 = vst [vmem:[#allocation38_spill] sm:$0xff] %v14426_v3 }
 0x41b   : > { %v14430_v50 = vpop.permute.xlu1 %5036  ;;  %7133 = vrot.lane.b32.xlu0 %v14142_v52, %s11232_s17  ;;  %v6167_v52 = vmul.f32 %v14410_v60, %v14422_v9 }
 0x41c   : > { %17712 = vst [vmem:[#allocation40_spill] sm:$0xff] %v14430_v50 }
 0x41d   : > { %7135 = vrot.lane.b32.xlu1 %v14152_v43, %s11232_s17  ;;  %v14438_v59 = vpop.permute.xlu0 %5099  ;;  %v11032_v43 = vpack.c.bf16 %v6098_v24, %v6098_v24  ;;  %v11035_v44 = vpack.c.bf16 %v6167_v52, %v6167_v52 }
 0x41f   : > { %v14442_v13 = vpop.permute.xlu1 %5101  ;;  %7137 = vrot.lane.b32.xlu0 %v14161_v38, %s11232_s17 }
 0x420   : > { %17713 = vst [vmem:[#allocation43_spill] sm:$0xff] %v14442_v13 }
 0x421   : > { %7139 = vrot.lane.b32.xlu1 %v14169_v12, %s11232_s17  ;;  %v14450_v46 = vpop.permute.xlu0 %5103 }
 0x422   : > { %17714 = vst [vmem:[#allocation42_spill] sm:$0xff] %v14450_v46 }
 0x423   : > { %v14452_v4 = vpop.permute.xlu1 %5105  ;;  %5983 = vrot.lane.b32.xlu0 %v11026_v63, %s11220_s30 }
 0x424   : > { %17715 = vst [vmem:[#allocation44_spill] sm:$0xff] %v14452_v4 }
 0x425   : > { %v14455_v41 = vpop.permute.xlu0 %5168  ;;  %6052 = vrot.lane.b32.xlu1 %v11029_v51, %s11219_s19 }
 0x426   : > { %17716 = vst [vmem:[#allocation47_spill] sm:$0xff] %v14455_v41 }
 0x427   : > { %v14458_v38 = vpop.permute.xlu1 %5170  ;;  %6121 = vrot.lane.b32.xlu0 %v11032_v43, %s11218_s8 }
 0x428   : > { %17717 = vst [vmem:[#allocation46_spill] sm:$0xff] %v14458_v38 }
 0x429   : > { %v14461_v11 = vpop.permute.xlu0 %5172  ;;  %6190 = vrot.lane.b32.xlu1 %v11035_v44, %s11217_s26 }
 0x42a   : > { %17718 = vst [vmem:[#allocation48_spill] sm:$0xff] %v14461_v11 }
 0x42b   : > { %v14464_v12 = vpop.permute.xlu1 %5174 }
 0x42c   : > { %17719 = vst [vmem:[#allocation49_spill] sm:$0xff] %v14464_v12 }
 0x42d   : > { %v14466_v7 = vpop.permute.xlu0 %5237 }
 0x42e   : > { %17720 = vst [vmem:[#allocation51_spill] sm:$0xff] %v14466_v7 }
 0x42f   : > { %v14468_v16 = vpop.permute.xlu1 %5239 }
 0x430   : > { %17721 = vst [vmem:[#allocation50_spill] sm:$0xff] %v14468_v16 }
 0x431   : > { %v14470_v26 = vpop.permute.xlu0 %5241 }
 0x432   : > { %17722 = vst [vmem:[#allocation52_spill] sm:$0xff] %v14470_v26 }
 0x433   : > { %v14472_v5 = vpop.permute.xlu1 %5243 }
 0x434   : > { %17723 = vst [vmem:[#allocation59_spill] sm:$0xff] %v14472_v5 }
 0x435   : > { %v14474_v22 = vpop.permute.xlu0 %5346 }
 0x436   : > { %17724 = vst [vmem:[#allocation55_spill] sm:$0xff] %v14474_v22 }
 0x437   : > { %v14476_v25 = vpop.permute.xlu1 %5348 }
 0x438   : > { %17725 = vst [vmem:[#allocation54_spill] sm:$0xff] %v14476_v25 }
 0x439   : > { %v14478_v34 = vpop.permute.xlu0 %5350 }
 0x43a   : > { %17726 = vst [vmem:[#allocation60_spill] sm:$0xff] %v14478_v34 }
 0x43b   : > { %v14480_v49 = vpop.permute.xlu1 %5352 }
 0x43c   : > { %17727 = vst [vmem:[#allocation63_spill] sm:$0xff] %v14480_v49 }
 0x43d   : > { %v14482_v48 = vpop.permute.xlu0 %5415 }
 0x43e   : > { %17728 = vst [vmem:[#allocation58_spill] sm:$0xff] %v14482_v48 }
 0x43f   : > { %v14484_v32 = vpop.permute.xlu1 %5417 }
 0x440   : > { %17729 = vst [vmem:[#allocation6_spill] sm:$0xff] %v14484_v32 }
 0x441   : > { %v14486_v36 = vpop.permute.xlu0 %5419 }
 0x442   : > { %17730 = vst [vmem:[#allocation57_spill] sm:$0xff] %v14486_v36 }
 0x443   : > { %v14488_v2 = vpop.permute.xlu1 %5421  ;;  %v3967_v63 = vpop.f32.mrb[4].mxu0 }
 0x444   : > { %17731 = vst [vmem:[#allocation7_spill] sm:$0xff] %v14488_v2  ;;  %v3969_v24 = vpop.f32.mrb[5].mxu0 }
 0x445   : > { %v14490_v51 = vpop.permute.xlu0 %5484  ;;  %v3971_v52 = vpop.f32.mrb[6].mxu0 }
 0x446   : > { %17732 = vst [vmem:[#allocation8_spill] sm:$0xff] %v14490_v51  ;;  %v3972_v43 = vpop.f32.mrb[7].mxu0  ;;  %v4008_v44 = vpop.f32.mrb[4].mxu1 }
 0x447   : > { %v14492_v56 = vpop.permute.xlu1 %5486  ;;  %v4010_v9 = vpop.f32.mrb[5].mxu1 }
 0x448   : > { %17733 = vst [vmem:[#allocation11_spill] sm:$0xff] %v14492_v56  ;;  %v4012_v34 = vpop.f32.mrb[6].mxu1 }
 0x449   : > { %v14494_v49 = vpop.permute.xlu0 %5488  ;;  %v4013_v48 = vpop.f32.mrb[7].mxu1 }
 0x44a   : > { %17734 = vst [vmem:[#allocation10_spill] sm:$0xff] %v14494_v49 }
 0x44b   : > { %v14496_v22 = vpop.permute.xlu1 %5490 }
 0x44c   : > { %17735 = vst [vmem:[#allocation9_spill] sm:$0xff] %v14496_v22 }
 0x44d   : > { %v14498_v25 = vpop.permute.xlu0 %5553 }
 0x44e   : > { %17736 = vst [vmem:[#allocation16_spill] sm:$0xff] %v14498_v25 }
 0x44f   : > { %v14500_v5 = vpop.permute.xlu1 %5555 }
 0x450   : > { %17737 = vst [vmem:[#allocation12_spill] sm:$0xff] %v14500_v5 }
 0x451   : > { %v14502_v26 = vpop.permute.xlu0 %5557 }
 0x452   : > { %17738 = vst [vmem:[#allocation13_spill] sm:$0xff] %v14502_v26 }
 0x453   : > { %v14504_v7 = vpop.permute.xlu1 %5559 }
 0x454   : > { %17739 = vst [vmem:[#allocation24_spill] sm:$0xff] %v14504_v7 }
 0x455   : > { %v14506_v52 = vpop.permute.xlu0 %6610 }
 0x456   : > { %17740 = vst [vmem:[#allocation20_spill] sm:$0xff] %v14506_v52 }
 0x457   : > { %v14508_v43 = vpop.permute.xlu1 %6612 }
 0x458   : > { %17741 = vst [vmem:[#allocation15_spill] sm:$0xff] %v14508_v43 }
 0x459   : > { %v14510_v51 = vpop.permute.xlu0 %6614 }
 0x45a   : > { %17742 = vst [vmem:[#allocation14_spill] sm:$0xff] %v14510_v51 }
 0x45b   : > { %v14512_v34 = vpop.permute.xlu1 %6616 }
 0x45c   : > { %17743 = vst [vmem:[#allocation19_spill] sm:$0xff] %v14512_v34 }
 0x45d   : > { %v14514_v16 = vpop.permute.xlu0 %6679 }
 0x45e   : > { %17744 = vst [vmem:[#allocation18_spill] sm:$0xff] %v14514_v16 }
 0x45f   : > { %v14516_v48 = vpop.permute.xlu1 %6681 }
 0x460   : > { %17745 = vst [vmem:[#allocation17_spill] sm:$0xff] %v14516_v48 }
 0x461   : > { %v14518_v12 = vpop.permute.xlu0 %6683 }
 0x462   : > { %17746 = vst [vmem:[#allocation5_spill] sm:$0xff] %v14518_v12 }
 0x463   : > { %v14520_v25 = vpop.permute.xlu1 %6685 }
 0x464   : > { %17747 = vst [vmem:[#allocation61_spill] sm:$0xff] %v14520_v25 }
 0x465   : > { %v14522_v11 = vpop.permute.xlu0 %6748 }
 0x466   : > { %17748 = vst [vmem:[#allocation23_spill] sm:$0xff] %v14522_v11 }
 0x467   : > { %v14524_v41 = vpop.permute.xlu1 %6750 }
 0x468   : > { %17749 = vst [vmem:[#allocation22_spill] sm:$0xff] %v14524_v41 }
 0x469   : > { %v14526_v38 = vpop.permute.xlu0 %6752 }
 0x46a   : > { %17750 = vst [vmem:[#allocation21_spill] sm:$0xff] %v14526_v38 }
 0x46b   : > { %v14528_v4 = vpop.permute.xlu1 %6754 }
 0x46c   : > { %17751 = vst [vmem:[#allocation31_spill] sm:$0xff] %v14528_v4 }
 0x46d   : > { %v14530_v3 = vpop.permute.xlu0 %6817 }
 0x46e   : > { %17752 = vst [vmem:[#allocation28_spill] sm:$0xff] %v14530_v3 }
 0x46f   : > { %v14532_v16 = vpop.permute.xlu1 %6819 }
 0x470   : > { %17753 = vst [vmem:[#allocation27_spill] sm:$0xff] %v14532_v16 }
 0x471   : > { %v14534_v5 = vpop.permute.xlu0 %6821 }
 0x472   : > { %17754 = vst [vmem:[#allocation26_spill] sm:$0xff] %v14534_v5  ;;  %v5719_v5 = vsel %vm17768_vm1, %v14301_v42, %v14305_v28 }
 0x473   : > { %v14536_v38 = vpop.permute.xlu1 %6823 }
 0x474   : > { %17755 = vst [vmem:[#allocation25_spill] sm:$0xff] %v14536_v38 }
 0x475   : > { %v14538_v4 = vpop.permute.xlu0 %6926 }
 0x476   : > { %17756 = vst [vmem:[#allocation29_spill] sm:$0xff] %v14538_v4  ;;  %v14556_v4 = vld [vmem:[#allocation2] sm:$0xff] }
 0x477   : > { %v14540_v3 = vpop.permute.xlu1 %6928  ;;  %17765 = vst [vmem:[#allocation62_spill] sm:$0xff] %v14556_v4  ;;  %v5727_v38 = vmul.f32 %v14301_v42, %v14556_v4  ;;  %v11205_v42 = vld [vmem:[%s11266_s18 + $0x8] sm:$0xff] }
 0x478   : > { %17757 = vst [vmem:[#allocation33_spill] sm:$0xff] %v14540_v3 }
 0x479   : > { %v4154_v46 = vpop.f32.mrb[8].mxu0 }
 0x47a   : > { %v4155_v50 = vadd.f32 %v4154_v46, %v3967_v63  ;;  %v4156_v34 = vpop.f32.mrb[9].mxu0  ;;  %v14542_v46 = vpop.permute.xlu0 %6930 }
 0x47b   : > { %v4157_v48 = vadd.f32 %v4156_v34, %v3969_v24  ;;  %v4195_v51 = vpop.f32.mrb[8].mxu1  ;;  %v4158_v12 = vpop.f32.mrb[10].mxu0  ;;  %17758 = vst [vmem:[#allocation37_spill] sm:$0xff] %v14542_v46 }
 0x47c   : > { %v4196_v52 = vadd.f32 %v4195_v51, %v4008_v44  ;;  %v4197_v25 = vpop.f32.mrb[9].mxu1  ;;  %v4159_v43 = vpop.f32.mrb[11].mxu0 }
 0x47d   : > { %v4198_v11 = vadd.f32 %v4197_v25, %v4010_v9  ;;  %v4199_v7 = vpop.f32.mrb[10].mxu1  ;;  %v14544_v63 = vpop.permute.xlu1 %6932 }
 0x47e   : > { %v4200_v41 = vpop.f32.mrb[11].mxu1  ;;  %17759 = vst [vmem:[#allocation41_spill] sm:$0xff] %v14544_v63  ;;  %v14546_v24 = vpop.permute.xlu0 %6995 }
 0x47f   : > { %17760 = vst [vmem:[#allocation45_spill] sm:$0xff] %v14546_v24  ;;  %v5658_v24 = vmul.f32 %v14275_v23, %v14556_v4 }
 0x481   : > { %v14548_v12 = vpop.permute.xlu1 %6997 }
 0x482   : > { %17761 = vst [vmem:[#allocation53_spill] sm:$0xff] %v14548_v12  ;;  %v14550_v51 = vpop.permute.xlu0 %6999 }
 0x483   : > { %17762 = vst [vmem:[#allocation56_spill] sm:$0xff] %v14550_v51 }
 0x485   : > { %v14552_v9 = vpop.permute.xlu1 %7001 }
 0x486   : > { %17763 = vst [vmem:[#allocation67_spill] sm:$0xff] %v14552_v9  ;;  %v7065_v41 = vpop.permute.xlu0 %7064  ;;  %v5650_v9 = vsel %vm17767_vm0, %v14275_v23, %v14279_v37  ;;  %v11204_v23 = vld [vmem:[%s11266_s18] sm:$0xff] }
 0x489   : > { %v7067_v7 = vpop.permute.xlu1 %7066 }
 0x48a   : > { %v7069_v25 = vpop.permute.xlu0 %7068 }
 0x48b   : > { %v7073_v36 = vsel %vm326_vm14, %v7067_v7, %v7069_v25 }
 0x48d   : > { %v14554_v44 = vpop.permute.xlu1 %7070 }
 0x48e   : > { %17764 = vst [vmem:[#allocation64_spill] sm:$0xff] %v14554_v44  ;;  %v7134_v43 = vpop.permute.xlu0 %7133 }
 0x491   : > { %v7136_v34 = vpop.permute.xlu1 %7135 }
 0x492   : > { %v7138_v63 = vpop.permute.xlu0 %7137 }
 0x495   : > { %v14560_v3 = vpop.permute.xlu1 %7139 }
 0x496   : > { %17766 = vst [vmem:[#allocation68_spill] sm:$0xff] %v14560_v3 }
 0x4af   : > { %v4953_v46 = vpop.f32.mrb[12].mxu0 }
 0x4b0   : > { %v5001_v12 = vadd.f32 %v4953_v46, %v4155_v50  ;;  %v4955_v51 = vpop.f32.mrb[13].mxu0  ;;  %v5788_v50 = vsel %vm17449_vm2, %v14320_v30, %v14322_v14  ;;  %v5857_v46 = vsel %vm1060_vm3, %v14336_v27, %v14338_v47 }
 0x4b1   : > { %v5002_v16 = vadd.f32 %v4955_v51, %v4157_v48  ;;  %v4994_v26 = vpop.f32.mrb[12].mxu1  ;;  %v4957_v22 = vpop.f32.mrb[14].mxu0 }
 0x4b2   : > { %v14577_v56 = vadd.f32 %v11204_v23, %v5001_v12  ;;  %v5003_v49 = vadd.f32 %v4994_v26, %v4196_v52  ;;  %v4996_v2 = vpop.f32.mrb[13].mxu1  ;;  %v4958_v32 = vpop.f32.mrb[15].mxu0  ;;  %v7072_v22 = vsel %vm326_vm14, %v7065_v41, %v7067_v7  ;;  %v7074_v26 = vsel %vm326_vm14, %v7069_v25, %v14554_v44  ;;  %v17816_v44 = vld [vmem:[#allocation31_spill] sm:$0xff] }
 0x4b3   : > { %v14580_v48 = vadd.f32 %v11205_v42, %v5002_v16  ;;  %v5004_v51 = vadd.f32 %v4996_v2, %v4198_v11  ;;  %v4998_v60 = vpop.f32.mrb[14].mxu1  ;;  %v7141_v32 = vsel %vm254_vm15, %v7134_v43, %v7136_v34  ;;  %v11207_v11 = vld [vmem:[%s11266_s18 + $0x18] sm:$0xff]  ;;  %v7143_v12 = vsel %vm254_vm15, %v7138_v63, %v14560_v3 }
 0x4b4   : > { %17769 = vst [vmem:[#allocation65_spill] sm:$0xff] %v14577_v56  ;;  %v14585_v19 = vmax.f32 %v14577_v56, 0.0  ;;  %v14588_v8 = vadd.f32 %v11206_v40, %v5003_v49  ;;  %v4999_v52 = vpop.f32.mrb[15].mxu1  ;;  %v7142_v60 = vsel %vm254_vm15, %v7136_v34, %v7138_v63 }
 0x4b5   : > { %17770 = vst [vmem:[#allocation69_spill] sm:$0xff] %v14580_v48  ;;  %v14594_v16 = vmax.f32 %v14580_v48, 0.0  ;;  %v14597_v2 = vadd.f32 %v11207_v11, %v5004_v51  ;;  %v5651_v11 = vsel %vm17781_vm7, %v14279_v37, %v14290_v62  ;;  %vm17782_vm7 = vmmov %vm17768_vm1  ;;  %v17799_v52 = vld [vmem:[#allocation13_spill] sm:$0xff] }
 0x4b6   : > { %17771 = vst [vmem:[#allocation66_spill] sm:$0xff] %v14588_v8  ;;  %v14603_v40 = vmax.f32 %v14588_v8, 0.0  ;;  %v14606_v49 = vmul.f32 %v7065_v41, %v14585_v19  ;;  %v14609_v7 = vmul.f32 %v7134_v43, %v14585_v19  ;;  %v5659_v25 = vmul.f32 %v5650_v9, %v14585_v19  ;;  %v17803_v8 = vld [vmem:[#allocation20_spill] sm:$0xff] }
 0x4b7   : > { %17772 = vst [vmem:[#allocation70_spill] sm:$0xff] %v14597_v2  ;;  %v14613_v23 = vmax.f32 %v14597_v2, 0.0  ;;  %v14616_v42 = vmul.f32 %v7072_v22, %v14594_v16  ;;  %v14619_v34 = vmul.f32 %v7141_v32, %v14594_v16  ;;  %v5728_v63 = vmul.f32 %v5719_v5, %v14585_v19  ;;  %v17797_v32 = vld [vmem:[#allocation11_spill] sm:$0xff]  ;;  %v17800_v2 = vld [vmem:[#allocation12_spill] sm:$0xff] }
 0x4b8   : > { %17773 = vst [vmem:[#allocation71_spill] sm:$0xff] %v14606_v49  ;;  %17774 = vst [vmem:[#allocation72_spill] sm:$0xff] %v14609_v7  ;;  %v14623_v51 = vmul.f32 %v7073_v36, %v14603_v40  ;;  %v14626_v41 = vmul.f32 %v7142_v60, %v14603_v40  ;;  %v11010_v43 = vpack.c.bf16 %v5659_v25, %v5658_v24  ;;  %v17809_v7 = vld [vmem:[#allocation17_spill] sm:$0xff] }
 0x4b9   : > { %17775 = vst [vmem:[#allocation73_spill] sm:$0xff] %v14616_v42  ;;  %17776 = vst [vmem:[#allocation74_spill] sm:$0xff] %v14619_v34  ;;  %v5797_v9 = vmul.f32 %v5788_v50, %v14585_v19  ;;  %v14632_v22 = vmul.f32 %v7074_v26, %v14613_v23  ;;  %v14637_v5 = vmul.f32 %v7143_v12, %v14613_v23  ;;  %v17796_v12 = vld [vmem:[#allocation10_spill] sm:$0xff]  ;;  %v17815_v42 = vld [vmem:[#allocation21_spill] sm:$0xff] }
 0x4ba   : > { %17777 = vst [vmem:[#allocation75_spill] sm:$0xff] %v14623_v51  ;;  %17778 = vst [vmem:[#allocation76_spill] sm:$0xff] %v14626_v41  ;;  %v5796_v36 = vmul.f32 %v14320_v30, %v14556_v4  ;;  %5681 = vrot.lane.b32.xlu0 %v11010_v43, %s11224_s25  ;;  %v11013_v24 = vpack.c.bf16 %v5728_v63, %v5727_v38  ;;  %v5866_v50 = vmul.f32 %v5857_v46, %v14585_v19  ;;  %v17810_v34 = vld [vmem:[#allocation18_spill] sm:$0xff]  ;;  %v17814_v51 = vld [vmem:[#allocation23_spill] sm:$0xff] }
 0x4bb   : > { %17779 = vst [vmem:[#allocation77_spill] sm:$0xff] %v14632_v22  ;;  %17780 = vst [vmem:[#allocation78_spill] sm:$0xff] %v14637_v5  ;;  %v5038_v26 = vsel %vm17702_vm6, %v14416_v53, %v14418_v33  ;;  %v5652_v30 = vsel %vm17767_vm0, %v14290_v62, %v14294_v54  ;;  %v5865_v38 = vmul.f32 %v14336_v27, %v14556_v4  ;;  %vm17783_vm6 = vcmask 64512   ;;  %v17807_v5 = vld [vmem:[#allocation19_spill] sm:$0xff] }
 0x4bc   : > { %5750 = vrot.lane.b32.xlu1 %v11013_v24, %s11223_s11  ;;  %v11016_v37 = vpack.c.bf16 %v5797_v9, %v5796_v36  ;;  %v5047_v46 = vmul.f32 %v5038_v26, %v14585_v19  ;;  %v5720_v25 = vsel %vm17768_vm1, %v14305_v28, %v14312_v10  ;;  %v5721_v63 = vsel %vm17782_vm7, %v14312_v10, %v14314_v6  ;;  %vm17784_vm0 = vmmov %vm17783_vm6 }
 0x4bd   : > { %v5789_v62 = vsel %vm17449_vm2, %v14322_v14, %v14328_v0  ;;  %v5107_v27 = vsel %vm284_vm9, %v14438_v59, %v14442_v13  ;;  %v5790_v43 = vsel %vm17449_vm2, %v14328_v0, %v14330_v58  ;;  %v5046_v9 = vmul.f32 %v14556_v4, %v14416_v53  ;;  %vm17785_vm1 = vmmov %vm17784_vm0 }
 0x4be   : > { %5819 = vrot.lane.b32.xlu0 %v11016_v37, %s11222_s27  ;;  %v11019_v28 = vpack.c.bf16 %v5866_v50, %v5865_v38  ;;  %v5116_v10 = vmul.f32 %v5107_v27, %v14585_v19  ;;  %v5858_v14 = vsel %vm1060_vm3, %v14338_v47, %v14344_v45  ;;  %v5859_v36 = vsel %vm1060_vm3, %v14344_v45, %v14346_v57  ;;  %v17787_v37 = vld [vmem:[#allocation30_spill] sm:$0xff]  ;;  %v17789_v27 = vld [vmem:[#allocation35_spill] sm:$0xff] }
 0x4bf   : > { %v5948_v0 = vsel %vm1102_vm4, %v14352_v55, %v14354_v29  ;;  %v5949_v53 = vsel %vm1102_vm4, %v14354_v29, %v14360_v35  ;;  %v5950_v24 = vsel %vm1102_vm4, %v14360_v35, %v14362_v17  ;;  %v5115_v50 = vmul.f32 %v14556_v4, %v14438_v59 }
 0x4c0   : > { %5888 = vrot.lane.b32.xlu1 %v11019_v28, %s11221_s14  ;;  %v10983_v47 = vpack.c.bf16 %v5047_v46, %v5046_v9  ;;  %v5662_v45 = vmul.f32 %v14294_v54, %v14613_v23  ;;  %v14702_v26 = vsel %vm1031_vm5, %v14368_v20, %v14370_v61  ;;  %v6018_v29 = vsel %vm1031_vm5, %v14370_v61, %v14376_v21  ;;  %v17791_v9 = vld [vmem:[#allocation34_spill] sm:$0xff] }
 0x4c1   : > { %v6019_v35 = vsel %vm1031_vm5, %v14376_v21, %v14378_v39  ;;  %v14713_v17 = vsel %vm17783_vm6, %v14384_v15, %v14386_v1  ;;  %v14718_v54 = vsel %vm17784_vm0, %v14386_v1, %v14392_v18  ;;  %v10986_v59 = vpack.c.bf16 %v5116_v10, %v5115_v50  ;;  %v17786_v39 = vld [vmem:[#allocation32_spill] sm:$0xff]  ;;  %v17794_v28 = vld [vmem:[#allocation6_spill] sm:$0xff] }
 0x4c2   : > { %5069 = vrot.lane.b32.xlu0 %v10983_v47, %s11232_s17  ;;  %v5660_v38 = vmul.f32 %v5651_v11, %v14594_v16  ;;  %v5661_v61 = vmul.f32 %v5652_v30, %v14603_v40  ;;  %v14726_v21 = vsel %vm17785_vm1, %v14392_v18, %v14394_v31  ;;  %vm17788_vm7 = vcmask 72704   ;;  %v17793_v30 = vld [vmem:[#allocation57_spill] sm:$0xff]  ;;  %v17795_v47 = vld [vmem:[#allocation7_spill] sm:$0xff] }
 0x4c3   : > { %v14731_v46 = vsel %vm17788_vm7, %v17787_v37, %v17786_v39  ;;  %vm17790_vm6 = vmmov %vm17788_vm7  ;;  %v5424_v18 = vsel %vm398_vm13, %v17794_v28, %v17793_v30  ;;  %v11012_v31 = vpack.c.bf16 %v5662_v45, %v5662_v45  ;;  %v5729_v10 = vmul.f32 %v5720_v25, %v14594_v16 }
 0x4c4   : > { %v14736_v1 = vsel %vm17790_vm6, %v17786_v39, %v17789_v27  ;;  %vm17792_vm0 = vmmov %vm17790_vm6  ;;  %5138 = vrot.lane.b32.xlu1 %v10986_v59, %s11231_s16  ;;  %v5730_v50 = vmul.f32 %v5721_v63, %v14603_v40  ;;  %v5425_v39 = vsel %vm398_vm13, %v17793_v30, %v17795_v47  ;;  %v5562_v45 = vsel %vm254_vm15, %v17800_v2, %v17799_v52  ;;  %v17801_v59 = vld [vmem:[#allocation24_spill] sm:$0xff]  ;;  %v17802_v63 = vld [vmem:[#allocation15_spill] sm:$0xff] }
 0x4c5   : > { %v14741_v11 = vsel %vm17792_vm0, %v17789_v27, %v17791_v9  ;;  %v5493_v27 = vsel %vm326_vm14, %v17797_v32, %v17796_v12  ;;  %v17798_v9 = vld [vmem:[#allocation9_spill] sm:$0xff]  ;;  %v5563_v25 = vsel %vm254_vm15, %v17799_v52, %v17801_v59  ;;  %vm17804_vm1 = vcmask 449536  }
 0x4c6   : > { %v5494_v60 = vsel %vm326_vm14, %v17796_v12, %v17798_v9  ;;  %v14767_v30 = vsel %vm17804_vm1, %v17803_v8, %v17802_v63  ;;  %5685 = vrot.lane.b32.xlu0 %v11012_v31, %s11224_s25  ;;  %v11011_v48 = vpack.c.bf16 %v5661_v61, %v5660_v38  ;;  %v5731_v56 = vmul.f32 %v14314_v6, %v14613_v23  ;;  %v17805_v12 = vld [vmem:[#allocation14_spill] sm:$0xff]  ;;  %vm17806_vm7 = vmmov %vm17804_vm1  ;;  %v17811_v31 = vld [vmem:[#allocation5_spill] sm:$0xff] }
 0x4c7   : > { %v14775_v41 = vsel %vm17806_vm7, %v17802_v63, %v17805_v12  ;;  %vm17808_vm6 = vmmov %vm17804_vm1  ;;  %v14785_v3 = vsel %vm284_vm9, %v17810_v34, %v17809_v7  ;;  %v14790_v38 = vsel %vm284_vm9, %v17809_v7, %v17811_v31  ;;  %v17812_v6 = vld [vmem:[#allocation61_spill] sm:$0xff]  ;;  %v17813_v63 = vld [vmem:[#allocation22_spill] sm:$0xff]  ;;  %v11014_v22 = vpack.c.bf16 %v5730_v50, %v5729_v10 }
 0x4c8   : > { %v14780_v52 = vsel %vm17808_vm6, %v17805_v12, %v17807_v5  ;;  %v14795_v61 = vsel %vm284_vm9, %v17811_v31, %v17812_v6  ;;  %v14800_v12 = vsel %vm356_vm10, %v17814_v51, %v17813_v63  ;;  %5683 = vrot.lane.b32.xlu1 %v11011_v48, %s11224_s25  ;;  %v5800_v49 = vmul.f32 %v14330_v58, %v14613_v23  ;;  %v17817_v6 = vld [vmem:[#allocation27_spill] sm:$0xff]  ;;  %v17818_v5 = vld [vmem:[#allocation28_spill] sm:$0xff]  ;;  %v17819_v48 = vld [vmem:[#allocation26_spill] sm:$0xff] }
 0x4c9   : > { %v14808_v7 = vsel %vm356_vm10, %v17813_v63, %v17815_v42  ;;  %v14813_v31 = vsel %vm356_vm10, %v17815_v42, %v17816_v44  ;;  %v14818_v59 = vsel %vm428_vm11, %v17818_v5, %v17817_v6  ;;  %v14823_v10 = vsel %vm428_vm11, %v17817_v6, %v17819_v48  ;;  %v17820_v58 = vld [vmem:[#allocation25_spill] sm:$0xff]  ;;  %vm17832_vm0 = vmmov %vm17804_vm1 }
 0x4ca   : > { %v14828_v50 = vsel %vm428_vm11, %v17819_v48, %v17820_v58  ;;  %5752 = vrot.lane.b32.xlu0 %v11014_v22, %s11223_s11  ;;  %v11015_v63 = vpack.c.bf16 %v5731_v56, %v5731_v56  ;;  %v5798_v42 = vmul.f32 %v5789_v62, %v14594_v16  ;;  %v5799_v44 = vmul.f32 %v5790_v43, %v14603_v40  ;;  %v17821_v9 = vld [vmem:[#allocation33_spill] sm:$0xff]  ;;  %vm17833_vm1 = vmmov %vm17832_vm0 }
 0x4cb   : > { %v17822_v2 = vld [vmem:[#allocation29_spill] sm:$0xff]  ;;  %v5867_v48 = vmul.f32 %v5858_v14, %v14594_v16  ;;  %v5868_v58 = vmul.f32 %v5859_v36, %v14603_v40  ;;  %v11018_v56 = vpack.c.bf16 %v5800_v49, %v5800_v49  ;;  %v5869_v22 = vmul.f32 %v14346_v57, %v14613_v23 }
 0x4cc   : > { %v14836_v47 = vsel %vm470_vm12, %v17822_v2, %v17821_v9  ;;  %v17823_v32 = vld [vmem:[#allocation37_spill] sm:$0xff]  ;;  %5754 = vrot.lane.b32.xlu1 %v11015_v63, %s11223_s11  ;;  %v5956_v62 = vmul.f32 %v14352_v55, %v14585_v19  ;;  %v5957_v43 = vmul.f32 %v5948_v0, %v14594_v16  ;;  %v5958_v28 = vmul.f32 %v5949_v53, %v14603_v40  ;;  %v17827_v55 = vld [vmem:[#allocation56_spill] sm:$0xff] }
 0x4cd   : > { %v14841_v6 = vsel %vm470_vm12, %v17821_v9, %v17823_v32  ;;  %v5959_v9 = vmul.f32 %v5950_v24, %v14613_v23  ;;  %v6027_v4 = vmul.f32 %v6018_v29, %v14603_v40  ;;  %v6028_v14 = vmul.f32 %v6019_v35, %v14613_v23  ;;  %v17824_v36 = vld [vmem:[#allocation41_spill] sm:$0xff] }
 0x4ce   : > { %v14858_v49 = vsel %vm470_vm12, %v17823_v32, %v17824_v36  ;;  %v17825_v63 = vld [vmem:[#allocation53_spill] sm:$0xff]  ;;  %5823 = vrot.lane.b32.xlu0 %v11018_v56, %s11222_s27  ;;  %v11017_v53 = vpack.c.bf16 %v5799_v44, %v5798_v42  ;;  %v6025_v24 = vmul.f32 %v14368_v20, %v14585_v19  ;;  %v6026_v32 = vmul.f32 %v14702_v26, %v14594_v16  ;;  %v17828_v36 = vld [vmem:[#allocation67_spill] sm:$0xff] }
 0x4cf   : > { %v17826_v57 = vld [vmem:[#allocation45_spill] sm:$0xff]  ;;  %v14868_v0 = vsel %vm398_vm13, %v17825_v63, %v17827_v55  ;;  %v14876_v29 = vmul.f32 %v5424_v18, %v14594_v16  ;;  %v14879_v35 = vmul.f32 %v5425_v39, %v14603_v40  ;;  %v11020_v56 = vpack.c.bf16 %v5868_v58, %v5867_v48 }
 0x4d0   : > { %v14863_v13 = vsel %vm398_vm13, %v17826_v57, %v17825_v63  ;;  %v7005_v63 = vsel %vm398_vm13, %v17827_v55, %v17828_v36  ;;  %5821 = vrot.lane.b32.xlu1 %v11017_v53, %s11222_s27  ;;  %v11021_v44 = vpack.c.bf16 %v5869_v22, %v5869_v22  ;;  %v11024_v42 = vpack.c.bf16 %v5957_v43, %v5956_v62 }
 0x4d1   : > { %v11025_v33 = vpack.c.bf16 %v5959_v9, %v5958_v28  ;;  %v11028_v20 = vpack.c.bf16 %v6028_v14, %v6027_v4  ;;  %v6094_v26 = vmul.f32 %v14384_v15, %v14585_v19  ;;  %v11002_v18 = vpack.c.bf16 %v14879_v35, %v14876_v29 }
 0x4d2   : > { %5890 = vrot.lane.b32.xlu0 %v11020_v56, %s11221_s14  ;;  %v6095_v39 = vmul.f32 %v14713_v17, %v14594_v16  ;;  %v6096_v55 = vmul.f32 %v14718_v54, %v14603_v40  ;;  %v14895_v58 = vmul.f32 %v5493_v27, %v14594_v16  ;;  %v14898_v28 = vmul.f32 %v5494_v60, %v14603_v40 }
 0x4d3   : > { %v11027_v4 = vpack.c.bf16 %v6026_v32, %v6025_v24  ;;  %v6097_v15 = vmul.f32 %v14726_v21, %v14613_v23  ;;  %v14903_v48 = vmul.f32 %v5562_v45, %v14594_v16  ;;  %v14906_v22 = vmul.f32 %v5563_v25, %v14603_v40 }
 0x4d4   : > { %5892 = vrot.lane.b32.xlu1 %v11021_v44, %s11221_s14  ;;  %v6165_v17 = vmul.f32 %v14736_v1, %v14603_v40  ;;  %v11005_v54 = vpack.c.bf16 %v14898_v28, %v14895_v58  ;;  %v14915_v60 = vmul.f32 %v17803_v8, %v14585_v19  ;;  %v14919_v21 = vmul.f32 %v14767_v30, %v14594_v16 }
 0x4d5   : > { %v6166_v27 = vmul.f32 %v14741_v11, %v14613_v23  ;;  %v11008_v45 = vpack.c.bf16 %v14906_v22, %v14903_v48  ;;  %v14927_v1 = vmul.f32 %v14775_v41, %v14603_v40  ;;  %v14931_v25 = vmul.f32 %v14780_v52, %v14613_v23  ;;  %v17862_v22 = vld [vmem:[#allocation31_spill] sm:$0xff] }
 0x4d6   : > { %5979 = vrot.lane.b32.xlu0 %v11024_v42, %s11220_s30  ;;  %v11030_v8 = vpack.c.bf16 %v6095_v39, %v6094_v26  ;;  %v11036_v30 = vpack.c.bf16 %v14919_v21, %v14915_v60  ;;  %v14938_v11 = vmul.f32 %v17810_v34, %v14585_v19  ;;  %v14942_v62 = vmul.f32 %v14785_v3, %v14594_v16  ;;  %v15211_v60 = vpop.permute.xlu0 %5983 }
 0x4d7   : > { %v11037_v41 = vpack.c.bf16 %v14931_v25, %v14927_v1  ;;  %v14948_v52 = vmul.f32 %v14790_v38, %v14603_v40  ;;  %v14952_v43 = vmul.f32 %v14795_v61, %v14613_v23  ;;  %v14956_v9 = vmul.f32 %v17814_v51, %v14585_v19  ;;  %v15217_v1 = vpop.permute.xlu1 %6052 }
 0x4d8   : > { %5981 = vrot.lane.b32.xlu1 %v11025_v33, %s11220_s30  ;;  %v11039_v3 = vpack.c.bf16 %v14942_v62, %v14938_v11  ;;  %v14963_v34 = vmul.f32 %v14800_v12, %v14594_v16  ;;  %v14967_v38 = vmul.f32 %v14808_v7, %v14603_v40  ;;  %v14971_v61 = vmul.f32 %v14813_v31, %v14613_v23  ;;  %v17843_v31 = vld [vmem:[#allocation51_spill] sm:$0xff] }
 0x4d9   : > { %v11040_v51 = vpack.c.bf16 %v14952_v43, %v14948_v52  ;;  %v14977_v33 = vmul.f32 %v17818_v5, %v14585_v19  ;;  %v14981_v14 = vmul.f32 %v14818_v59, %v14594_v16  ;;  %v14985_v12 = vmul.f32 %v14823_v10, %v14603_v40 }
 0x4da   : > { %6050 = vrot.lane.b32.xlu0 %v11028_v20, %s11219_s19  ;;  %v14994_v5 = vmul.f32 %v14828_v50, %v14613_v23  ;;  %v14998_v59 = vpack.c.bf16 %v14594_v16, %v14585_v19  ;;  %v15004_v53 = vpack.c.bf16 %v14613_v23, %v14603_v40  ;;  %v15008_v24 = vmul.f32 %v17822_v2, %v14585_v19  ;;  %v15225_v62 = vpop.permute.xlu0 %6121 }
 0x4db   : > { %v15012_v32 = vmul.f32 %v14836_v47, %v14594_v16  ;;  %v15019_v56 = vmul.f32 %v14841_v6, %v14603_v40  ;;  %v15023_v44 = vmul.f32 %v14858_v49, %v14613_v23  ;;  %v15027_v2 = vmul.f32 %v17826_v57, %v14585_v19  ;;  %v17836_v47 = vld [vmem:[#allocation44_spill] sm:$0xff] }
 0x4dc   : > { %6048 = vrot.lane.b32.xlu1 %v11027_v4, %s11219_s19  ;;  %v15033_v42 = vmul.f32 %v14863_v13, %v14594_v16  ;;  %v15037_v20 = vmul.f32 %v14868_v0, %v14603_v40  ;;  %v15040_v6 = vmul.f32 %v7005_v63, %v14613_v23  ;;  %v11031_v49 = vpack.c.bf16 %v6097_v15, %v6096_v55  ;;  %v17829_v55 = vld [vmem:[#allocation40_spill] sm:$0xff]  ;;  %v17830_v15 = vld [vmem:[#allocation38_spill] sm:$0xff] }
 0x4dd   : > { %v6163_v57 = vmul.f32 %v17787_v37, %v14585_v19  ;;  %v6164_v26 = vmul.f32 %v14731_v46, %v14594_v16  ;;  %v11034_v63 = vpack.c.bf16 %v6166_v27, %v6165_v17  ;;  %v5050_v4 = vmul.f32 %v17829_v55, %v14613_v23  ;;  %v17831_v37 = vld [vmem:[#allocation36_spill] sm:$0xff]  ;;  %v17835_v17 = vld [vmem:[#allocation43_spill] sm:$0xff] }
 0x4de   : > { %6117 = vrot.lane.b32.xlu0 %v11030_v8, %s11218_s8  ;;  %v5039_v8 = vsel %vm17832_vm0, %v17831_v37, %v17830_v15  ;;  %v5040_v46 = vsel %vm17833_vm1, %v17830_v15, %v17829_v55  ;;  %v17863_v21 = vpack.c.bf16 %v14963_v34, %v14956_v9  ;;  %v17864_v25 = vpack.c.bf16 %v14971_v61, %v14967_v38  ;;  %v6877_v34 = vld [vmem:[#allocation2 + $0x28] sm:$0xff] }
 0x4df   : > { %v11033_v39 = vpack.c.bf16 %v6164_v26, %v6163_v57  ;;  %v5048_v13 = vmul.f32 %v5039_v8, %v14594_v16  ;;  %v5049_v0 = vmul.f32 %v5040_v46, %v14603_v40  ;;  %v10985_v37 = vpack.c.bf16 %v5050_v4, %v5050_v4  ;;  %v17837_v57 = vld [vmem:[#allocation46_spill] sm:$0xff]  ;;  %v17838_v26 = vld [vmem:[#allocation47_spill] sm:$0xff] }
 0x4e0   : > { %6119 = vrot.lane.b32.xlu1 %v11031_v49, %s11218_s8  ;;  %v17834_v49 = vld [vmem:[#allocation42_spill] sm:$0xff]  ;;  %v5176_v15 = vsel %vm356_vm10, %v17838_v26, %v17837_v57  ;;  %v5119_v46 = vmul.f32 %v17836_v47, %v14613_v23  ;;  %v17866_v52 = vpack.c.bf16 %v14981_v14, %v14977_v33  ;;  %v17867_v9 = vpack.c.bf16 %v14994_v5, %v14985_v12  ;;  %v17868_v33 = vld [vmem:[#allocation41_spill] sm:$0xff] }
 0x4e1   : > { %v5108_v27 = vsel %vm284_vm9, %v17835_v17, %v17834_v49  ;;  %v5109_v50 = vsel %vm284_vm9, %v17834_v49, %v17836_v47  ;;  %v10984_v8 = vpack.c.bf16 %v5049_v0, %v5048_v13  ;;  %v17839_v17 = vld [vmem:[#allocation48_spill] sm:$0xff]  ;;  %vm17874_vm7 = vcmask 72704  }
 0x4e2   : > { %6188 = vrot.lane.b32.xlu0 %v11034_v63, %s11217_s26  ;;  %v5117_v55 = vmul.f32 %v5108_v27, %v14594_v16  ;;  %v5118_v63 = vmul.f32 %v5109_v50, %v14603_v40  ;;  %v5177_v49 = vsel %vm356_vm10, %v17837_v57, %v17839_v17  ;;  %v17841_v50 = vld [vmem:[#allocation62_spill] sm:$0xff]  ;;  %v10988_v13 = vpack.c.bf16 %v5119_v46, %v5119_v46  ;;  %vm17876_vm0 = vmmov %vm17874_vm7 }
 0x4e3   : > { %v5184_v27 = vmul.f32 %v17841_v50, %v17838_v26  ;;  %v5186_v47 = vmul.f32 %v5177_v49, %v14594_v16  ;;  %v17842_v57 = vld [vmem:[#allocation50_spill] sm:$0xff]  ;;  %vm17875_vm6 = vcmask 64512  }
 0x4e4   : > { %6186 = vrot.lane.b32.xlu1 %v11033_v39, %s11217_s26  ;;  %v17840_v39 = vld [vmem:[#allocation49_spill] sm:$0xff]  ;;  %v10987_v10 = vpack.c.bf16 %v5118_v63, %v5117_v55  ;;  %v5245_v7 = vsel %vm428_vm11, %v17843_v31, %v17842_v57  ;;  %v17844_v55 = vld [vmem:[#allocation52_spill] sm:$0xff]  ;;  %vm17877_vm1 = vmmov %vm17875_vm6 }
 0x4e5   : > { %v5178_v4 = vsel %vm356_vm10, %v17839_v17, %v17840_v39  ;;  %v5188_v26 = vmul.f32 %v17840_v39, %v14613_v23  ;;  %v5246_v63 = vsel %vm428_vm11, %v17842_v57, %v17844_v55  ;;  %v5254_v49 = vmul.f32 %v5245_v7, %v14585_v19  ;;  %v5293_v57 = vld [vmem:[#allocation2] sm:$0xff]  ;;  %v17846_v7 = vld [vmem:[#allocation54_spill] sm:$0xff] }
 0x4e6   : > { %5073 = vrot.lane.b32.xlu0 %v10985_v37, %s11232_s17  ;;  %v5185_v37 = vmul.f32 %v5176_v15, %v14585_v19  ;;  %v5187_v0 = vmul.f32 %v5178_v4, %v14603_v40  ;;  %v17845_v15 = vld [vmem:[#allocation59_spill] sm:$0xff]  ;;  %v5255_v39 = vmul.f32 %v5246_v63, %v14594_v16 }
 0x4e7   : > { %v10991_v4 = vpack.c.bf16 %v5188_v26, %v5188_v26  ;;  %v10995_v26 = vpack.c.bf16 %v14585_v19, %v5293_v57 }
 0x4e8   : > { %5071 = vrot.lane.b32.xlu1 %v10984_v8, %s11232_s17  ;;  %v10989_v17 = vpack.c.bf16 %v5185_v37, %v5184_v27  ;;  %v5253_v8 = vmul.f32 %v17841_v50, %v17843_v31  ;;  %v10990_v46 = vpack.c.bf16 %v5187_v0, %v5186_v47  ;;  %v17847_v0 = vld [vmem:[#allocation55_spill] sm:$0xff] }
 0x4ea   : > { %5140 = vrot.lane.b32.xlu0 %v10987_v10, %s11231_s16  ;;  %v5247_v10 = vsel %vm428_vm11, %v17844_v55, %v17845_v15  ;;  %v10992_v37 = vpack.c.bf16 %v5254_v49, %v5253_v8  ;;  %v17848_v55 = vld [vmem:[#allocation60_spill] sm:$0xff]  ;;  %v5362_v8 = vmul.f32 %v17841_v50, %v17847_v0 }
 0x4eb   : > { %v5256_v27 = vmul.f32 %v5247_v10, %v14603_v40  ;;  %v5355_v63 = vsel %vm470_vm12, %v17846_v7, %v17848_v55 }
 0x4ec   : > { %5142 = vrot.lane.b32.xlu1 %v10988_v13, %s11231_s16  ;;  %v5257_v13 = vmul.f32 %v17845_v15, %v14613_v23  ;;  %v17849_v15 = vld [vmem:[#allocation63_spill] sm:$0xff] }
 0x4ed   : > { %v10993_v31 = vpack.c.bf16 %v5256_v27, %v5255_v39  ;;  %v5356_v10 = vsel %vm470_vm12, %v17848_v55, %v17849_v15  ;;  %v5364_v39 = vmul.f32 %v5355_v63, %v14594_v16 }
 0x4ee   : > { %5207 = vrot.lane.b32.xlu0 %v10989_v17, %s11230_s15  ;;  %v10994_v47 = vpack.c.bf16 %v5257_v13, %v5257_v13  ;;  %v5354_v17 = vsel %vm470_vm12, %v17847_v0, %v17846_v7  ;;  %v5365_v27 = vmul.f32 %v5356_v10, %v14603_v40  ;;  %v17851_v13 = vld [vmem:[#allocation58_spill] sm:$0xff] }
 0x4ef   : > { %v5363_v49 = vmul.f32 %v5354_v17, %v14585_v19  ;;  %v5431_v7 = vmul.f32 %v17841_v50, %v17851_v13 }
 0x4f0   : > { %5209 = vrot.lane.b32.xlu1 %v10990_v46, %s11230_s15  ;;  %v10996_v46 = vpack.c.bf16 %v14603_v40, %v14594_v16  ;;  %v10999_v0 = vpack.c.bf16 %v5365_v27, %v5364_v39  ;;  %v17852_v40 = vld [vmem:[#allocation11_spill] sm:$0xff]  ;;  %v17856_v39 = vld [vmem:[#allocation16_spill] sm:$0xff] }
 0x4f1   : > { %v10998_v57 = vpack.c.bf16 %v5363_v49, %v5362_v8 }
 0x4f2   : > { %5211 = vrot.lane.b32.xlu0 %v10991_v4, %s11230_s15  ;;  %v10997_v4 = vpack.c.bf16 %v14613_v23, %v14613_v23 }
 0x4f4   : > { %5276 = vrot.lane.b32.xlu1 %v10992_v37, %s11229_s13  ;;  %v17850_v37 = vld [vmem:[#allocation6_spill] sm:$0xff] }
 0x4f6   : > { %5278 = vrot.lane.b32.xlu0 %v10993_v31, %s11229_s13  ;;  %v5423_v31 = vsel %vm398_vm13, %v17851_v13, %v17850_v37  ;;  %v17857_v13 = vld [vmem:[#allocation9_spill] sm:$0xff] }
 0x4f7   : > { %v5432_v16 = vmul.f32 %v5423_v31, %v14585_v19  ;;  %v5504_v31 = vmul.f32 %v17857_v13, %v14613_v23 }
 0x4f8   : > { %5280 = vrot.lane.b32.xlu1 %v10994_v47, %s11229_s13  ;;  %v5366_v47 = vmul.f32 %v17849_v15, %v14613_v23  ;;  %v17854_v15 = vld [vmem:[#allocation7_spill] sm:$0xff] }
 0x4f9   : > { %v11001_v63 = vpack.c.bf16 %v5432_v16, %v5431_v7  ;;  %v5435_v10 = vmul.f32 %v17854_v15, %v14613_v23  ;;  %v11006_v29 = vpack.c.bf16 %v5504_v31, %v5504_v31 }
 0x4fa   : > { %5316 = vrot.lane.b32.xlu0 %v10995_v26, %s11234_s20  ;;  %v11000_v17 = vpack.c.bf16 %v5366_v47, %v5366_v47  ;;  %v17853_v26 = vld [vmem:[#allocation8_spill] sm:$0xff] }
 0x4fb   : > { %v5492_v55 = vsel %vm326_vm14, %v17853_v26, %v17852_v40  ;;  %v5500_v8 = vmul.f32 %v17841_v50, %v17853_v26  ;;  %v11003_v49 = vpack.c.bf16 %v5435_v10, %v5435_v10  ;;  %v17869_v40 = vpack.c.bf16 %v15012_v32, %v15008_v24 }
 0x4fc   : > { %5318 = vrot.lane.b32.xlu1 %v10996_v46, %s11234_s20  ;;  %v5501_v46 = vmul.f32 %v5492_v55, %v14585_v19  ;;  %v17870_v55 = vpack.c.bf16 %v15023_v44, %v15019_v56  ;;  %v17871_v24 = vpack.c.bf16 %v15033_v42, %v15027_v2  ;;  %v17873_v2 = vld [vmem:[#allocation64_spill] sm:$0xff] }
 0x4fe   : > { %5320 = vrot.lane.b32.xlu0 %v10997_v4, %s11234_s20  ;;  %v17855_v4 = vld [vmem:[#allocation12_spill] sm:$0xff]  ;;  %v11004_v37 = vpack.c.bf16 %v5501_v46, %v5500_v8 }
 0x4ff   : > { %v5561_v27 = vsel %vm254_vm15, %v17856_v39, %v17855_v4 }
 0x500   : > { %5385 = vrot.lane.b32.xlu1 %v10998_v57, %s11228_s10  ;;  %v5569_v57 = vmul.f32 %v17841_v50, %v17856_v39  ;;  %v5570_v47 = vmul.f32 %v5561_v27, %v14585_v19  ;;  %v17859_v50 = vld [vmem:[#allocation39_spill] sm:$0xff] }
 0x501   : > { %v6946_v14 = vmul.f32 %v17868_v33, %v17859_v50  ;;  %v7015_v15 = vmul.f32 %v17828_v36, %v17859_v50  ;;  %v17872_v36 = vpack.c.bf16 %v15040_v6, %v15037_v20  ;;  %v7084_v42 = vmul.f32 %v17873_v2, %v17859_v50 }
 0x502   : > { %5387 = vrot.lane.b32.xlu0 %v10999_v0, %s11228_s10  ;;  %v11007_v35 = vpack.c.bf16 %v5570_v47, %v5569_v57  ;;  %v17860_v0 = vld [vmem:[#allocation19_spill] sm:$0xff] }
 0x503   : > { %v6630_v16 = vmul.f32 %v17860_v0, %v17859_v50  ;;  %v11053_v26 = vpack.c.bf16 %v6946_v14, %v6946_v14  ;;  %v11056_v44 = vpack.c.bf16 %v7015_v15, %v7015_v15 }
 0x504   : > { %5389 = vrot.lane.b32.xlu1 %v11000_v17, %s11228_s10 }
 0x505   : > { %v11038_v58 = vpack.c.bf16 %v6630_v16, %v6630_v16  ;;  %v17878_v16 = vld [vmem:[#allocation73_spill] sm:$0xff] }
 0x506   : > { %5454 = vrot.lane.b32.xlu0 %v11001_v63, %s11227_s9 }
 0x508   : > { %5456 = vrot.lane.b32.xlu1 %v11002_v18, %s11227_s9  ;;  %v17858_v18 = vld [vmem:[#allocation24_spill] sm:$0xff] }
 0x509   : > { %v5573_v7 = vmul.f32 %v17858_v18, %v14613_v23  ;;  %v17861_v23 = vld [vmem:[#allocation61_spill] sm:$0xff] }
 0x50a   : > { %5458 = vrot.lane.b32.xlu0 %v11003_v49, %s11227_s9  ;;  %v6699_v28 = vmul.f32 %v17861_v23, %v17859_v50 }
 0x50b   : > { %v11009_v19 = vpack.c.bf16 %v5573_v7, %v5573_v7 }
 0x50c   : > { %5523 = vrot.lane.b32.xlu1 %v11004_v37, %s11226_s7  ;;  %v11041_v48 = vpack.c.bf16 %v6699_v28, %v6699_v28 }
 0x50e   : > { %5525 = vrot.lane.b32.xlu0 %v11005_v54, %s11226_s7  ;;  %v6768_v54 = vmul.f32 %v17862_v22, %v17859_v50 }
 0x510   : > { %5527 = vrot.lane.b32.xlu1 %v11006_v29, %s11226_s7 }
 0x512   : > { %5592 = vrot.lane.b32.xlu0 %v11007_v35, %s11225_s6 }
 0x514   : > { %5594 = vrot.lane.b32.xlu1 %v11008_v45, %s11225_s6  ;;  %v11044_v45 = vpack.c.bf16 %v6768_v54, %v6768_v54 }
 0x516   : > { %5596 = vrot.lane.b32.xlu0 %v11009_v19, %s11225_s6 }
 0x518   : > { %6649 = vrot.lane.b32.xlu1 %v11036_v30, %s11232_s17  ;;  %v17865_v30 = vld [vmem:[#allocation25_spill] sm:$0xff] }
 0x519   : > { %v6837_v11 = vmul.f32 %v17865_v30, %v17859_v50 }
 0x51a   : > { %6651 = vrot.lane.b32.xlu0 %v11037_v41, %s11232_s17  ;;  %v15228_v41 = vpop.permute.xlu1 %6190 }
 0x51b   : > { %v11047_v43 = vpack.c.bf16 %v6837_v11, %v6837_v11 }
 0x51c   : > { %6653 = vrot.lane.b32.xlu1 %v11038_v58, %s11232_s17  ;;  %v17879_v58 = vld [vmem:[#allocation71_spill] sm:$0xff] }
 0x51d   : > { %v17880_v23 = vpack.c.bf16 %v17878_v16, %v17879_v58  ;;  %v6056_v16 = vrot.slane %v15217_v1, 4 }
 0x51e   : > { %6718 = vrot.lane.b32.xlu0 %v11039_v3, %s11231_s16 }
 0x520   : > { %6720 = vrot.lane.b32.xlu1 %v11040_v51, %s11231_s16  ;;  %v11050_v51 = vpack.c.bf16 %v6877_v34, %v6877_v34 }
 0x522   : > { %6722 = vrot.lane.b32.xlu0 %v11041_v48, %s11231_s16 }
 0x524   : > { %6787 = vrot.lane.b32.xlu1 %v17863_v21, %s11230_s15  ;;  %v11059_v21 = vpack.c.bf16 %v7084_v42, %v7084_v42 }
 0x526   : > { %6789 = vrot.lane.b32.xlu0 %v17864_v25, %s11230_s15  ;;  %v17882_v25 = vld [vmem:[#allocation75_spill] sm:$0xff] }
 0x528   : > { %6791 = vrot.lane.b32.xlu1 %v11044_v45, %s11230_s15  ;;  %v17881_v45 = vld [vmem:[#allocation77_spill] sm:$0xff] }
 0x529   : > { %v17883_v30 = vpack.c.bf16 %v17881_v45, %v17882_v25 }
 0x52a   : > { %6856 = vrot.lane.b32.xlu0 %v17866_v52, %s11229_s13 }
 0x52c   : > { %6858 = vrot.lane.b32.xlu1 %v17867_v9, %s11229_s13  ;;  %v5682_v3 = vpop.permute.xlu0 %5681 }
 0x52d   : > { %v5687_v8 = vrot.slane %v5682_v3, 4 }
 0x52e   : > { %v5751_v38 = vpop.permute.xlu1 %5750  ;;  %6860 = vrot.lane.b32.xlu0 %v11047_v43, %s11229_s13 }
 0x52f   : > { %v5756_v4 = vrot.slane %v5751_v38, 4 }
 0x530   : > { %6896 = vrot.lane.b32.xlu1 %v14998_v59, %s11234_s20  ;;  %v15241_v61 = vpop.permute.xlu0 %5819 }
 0x531   : > { %v5825_v6 = vrot.slane %v15241_v61, 4 }
 0x532   : > { %v15243_v17 = vpop.permute.xlu1 %5888  ;;  %6898 = vrot.lane.b32.xlu0 %v15004_v53, %s11234_s20 }
 0x533   : > { %v5894_v52 = vrot.slane %v15243_v17, 4 }
 0x534   : > { %6900 = vrot.lane.b32.xlu1 %v11050_v51, %s11234_s20  ;;  %v15250_v12 = vpop.permute.xlu0 %5069 }
 0x536   : > { %v15252_v5 = vpop.permute.xlu1 %5138  ;;  %6965 = vrot.lane.b32.xlu0 %v17869_v40, %s11228_s10  ;;  %v17885_v40 = vld [vmem:[#allocation74_spill] sm:$0xff] }
 0x538   : > { %6967 = vrot.lane.b32.xlu1 %v17870_v55, %s11228_s10  ;;  %v5686_v63 = vpop.permute.xlu0 %5685 }
 0x539   : > { %v5689_v49 = vrot.slane %v5686_v63, 4 }
 0x53a   : > { %v5684_v10 = vpop.permute.xlu1 %5683  ;;  %6969 = vrot.lane.b32.xlu0 %v11053_v26, %s11228_s10  ;;  %v17886_v26 = vld [vmem:[#allocation72_spill] sm:$0xff] }
 0x53b   : > { %v5688_v46 = vrot.slane %v5684_v10, 4  ;;  %v17887_v55 = vpack.c.bf16 %v17885_v40, %v17886_v26 }
 0x53c   : > { %7034 = vrot.lane.b32.xlu1 %v17871_v24, %s11227_s9  ;;  %v5753_v32 = vpop.permute.xlu0 %5752 }
 0x53d   : > { %v5757_v39 = vrot.slane %v5753_v32, 4  ;;  %v5690_v56 = vsel %vm252_vm8, %v5687_v8, %v5688_v46  ;;  %v5692_v37 = vsel %vm252_vm8, %v5688_v46, %v5689_v49 }
 0x53e   : > { %v5755_v27 = vpop.permute.xlu1 %5754  ;;  %7036 = vrot.lane.b32.xlu0 %v17872_v36, %s11227_s9  ;;  %v5691_v47 = vsel %vm17874_vm7, %v5682_v3, %v5690_v56  ;;  %v5693_v7 = vsel %vm17876_vm0, %v5684_v10, %v5692_v37  ;;  %v17884_v3 = vld [vmem:[#allocation68_spill] sm:$0xff]  ;;  %v17888_v56 = vld [vmem:[#allocation78_spill] sm:$0xff]  ;;  %vm17891_vm7 = vcmask 982016   ;;  %vm17893_vm0 = vcmask 973824  }
 0x53f   : > { %v5758_v13 = vrot.slane %v5755_v27, 4  ;;  %v5759_v31 = vsel %vm252_vm8, %v5756_v4, %v5757_v39  ;;  %v7153_v34 = vmul.f32 %v17884_v3, %v17859_v50 }
 0x540   : > { %7038 = vrot.lane.b32.xlu1 %v11056_v44, %s11227_s9  ;;  %v5824_v57 = vpop.permute.xlu0 %5823  ;;  %v5760_v29 = vsel %vm17875_vm6, %v5751_v38, %v5759_v31  ;;  %v17889_v44 = vld [vmem:[#allocation76_spill] sm:$0xff]  ;;  %vm17892_vm6 = vmmov %vm17891_vm7 }
 0x541   : > { %v5761_v35 = vsel %vm252_vm8, %v5757_v39, %v5758_v13  ;;  %v10452_v18 = vcombine.low %v5691_v47, %v5760_v29  ;;  %v10453_v20 = vcombine.high %v5691_v47, %v5760_v29  ;;  %v5827_v22 = vrot.slane %v5824_v57, 4  ;;  %v15319_v13 = vld [vmem:[%s17247_s1] sm:$0xff] }
 0x542   : > { %v5762_v19 = vsel %vm17877_vm1, %v5753_v32, %v5761_v35  ;;  %v5822_v0 = vpop.permute.xlu1 %5821  ;;  %7103 = vrot.lane.b32.xlu0 %v17880_v23, %s11226_s7  ;;  %v11062_v24 = vpack.c.bf16 %v7153_v34, %v7153_v34  ;;  %v17890_v27 = vpack.c.bf16 %v17888_v56, %v17889_v44  ;;  %v15343_v23 = vld [vmem:[%s17247_s1 + $0x10] sm:$0xff]  ;;  %vm17894_vm1 = vmmov %vm17893_vm0 }
 0x543   : > { %v10454_v28 = vcombine.low %v5693_v7, %v5762_v19  ;;  %v5826_v48 = vrot.slane %v5822_v0, 4  ;;  %6328 = vmatprep.subr.bf16.mxu0 %v10453_v20  ;;  %v10455_v54 = vcombine.high %v5693_v7, %v5762_v19 }
 0x544   : > { %7105 = vrot.lane.b32.xlu1 %v17883_v30, %s11226_s7  ;;  %6329 = vmatpush1.bf16.msra.mxu0 %v10452_v18  ;;  %v5891_v11 = vpop.permute.xlu0 %5890  ;;  %v15363_v30 = vld [vmem:[%s17247_s1 + $0x20] sm:$0xff] }
 0x545   : > { %6369 = vmatprep.subr.bf16.mxu1 %v10455_v54  ;;  %v5895_v43 = vrot.slane %v5891_v11, 4  ;;  %v5828_v9 = vsel %vm252_vm8, %v5825_v6, %v5826_v48  ;;  %v5830_v51 = vsel %vm252_vm8, %v5826_v48, %v5827_v22 }
 0x546   : > { %v5893_v38 = vpop.permute.xlu1 %5892  ;;  %6370 = vmatpush1.bf16.msra.mxu1 %v10454_v28  ;;  %7107 = vrot.lane.b32.xlu0 %v11059_v21, %s11226_s7  ;;  %v5829_v15 = vsel %vm1031_vm5, %v15241_v61, %v5828_v9  ;;  %v5831_v32 = vsel %vm1031_vm5, %v5822_v0, %v5830_v51  ;;  %v5987_v61 = vrot.slane %v15211_v60, 4  ;;  %v15327_v60 = vld [vmem:[%s17247_s1 + $0x8] sm:$0xff]  ;;  %v15348_v28 = vld [vmem:[%s17247_s1 + $0x18] sm:$0xff]  ;;  %v6194_v21 = vrot.slane %v15228_v41, 4 }
 0x547   : > { %v5896_v33 = vrot.slane %v5893_v38, 4  ;;  %v5897_v14 = vsel %vm252_vm8, %v5894_v52, %v5895_v43 }
 0x548   : > { %7172 = vrot.lane.b32.xlu1 %v17887_v55, %s11225_s6  ;;  %v5980_v63 = vpop.permute.xlu0 %5979  ;;  %v5898_v50 = vsel %vm1102_vm4, %v15243_v17, %v5897_v14 }
 0x549   : > { %v5899_v10 = vsel %vm252_vm8, %v5895_v43, %v5896_v33  ;;  %v5985_v8 = vrot.slane %v5980_v63, 4  ;;  %v10456_v46 = vcombine.low %v5829_v15, %v5898_v50  ;;  %v10457_v49 = vcombine.high %v5829_v15, %v5898_v50 }
 0x54a   : > { %v5900_v4 = vsel %vm1102_vm4, %v5891_v11, %v5899_v10  ;;  %v5982_v39 = vpop.permute.xlu1 %5981  ;;  %7174 = vrot.lane.b32.xlu0 %v17890_v27, %s11225_s6  ;;  %v15368_v11 = vld [vmem:[%s17247_s1 + $0x28] sm:$0xff]  ;;  %v15384_v10 = vld [vmem:[%s17247_s1 + $0x30] sm:$0xff] }
 0x54b   : > { %v10458_v36 = vcombine.low %v5831_v32, %v5900_v4  ;;  %v5986_v17 = vrot.slane %v5982_v39, 4  ;;  %6330 = vmatprep.subr.bf16.mxu0 %v10457_v49  ;;  %v10459_v37 = vcombine.high %v5831_v32, %v5900_v4 }
 0x54c   : > { %7176 = vrot.lane.b32.xlu1 %v11062_v24, %s11225_s6  ;;  %6331 = vmatpush1.bf16.msra.mxu0 %v10456_v46  ;;  %v6051_v31 = vpop.permute.xlu0 %6050  ;;  %v15391_v24 = vld [vmem:[%s17247_s1 + $0x38] sm:$0xff] }
 0x54d   : > { %v5990_v2 = vsel %vm252_vm8, %v5986_v17, %v5987_v61  ;;  %v5988_v42 = vsel %vm252_vm8, %v5985_v8, %v5986_v17  ;;  %6371 = vmatprep.subr.bf16.mxu1 %v10459_v37  ;;  %v6055_v6 = vrot.slane %v6051_v31, 4  ;;  %v5075_v8 = vrot.slane %v15250_v12, 4 }
 0x54e   : > { %v5991_v57 = vsel %vm1060_vm3, %v5982_v39, %v5990_v2  ;;  %v5989_v47 = vsel %vm1060_vm3, %v5980_v63, %v5988_v42  ;;  %v6049_v29 = vpop.permute.xlu1 %6048  ;;  %6372 = vmatpush1.bf16.msra.mxu1 %v10458_v36  ;;  %8033 = vrot.lane.b32.xlu0 %v15319_v13, %s11217_s26  ;;  %v5144_v61 = vrot.slane %v15252_v5, 4  ;;  %v15411_v42 = vld [vmem:[%s17247_s1 + $0x48] sm:$0xff] }
 0x54f   : > { %v10462_v35 = vcombine.low %v15004_v53, %v5991_v57  ;;  %v10460_v18 = vcombine.low %v14998_v59, %v5989_v47  ;;  %v6054_v20 = vrot.slane %v6049_v29, 4  ;;  %v10461_v7 = vcombine.high %v14998_v59, %v5989_v47 }
 0x550   : > { %v10463_v19 = vcombine.high %v15004_v53, %v5991_v57  ;;  %v6118_v0 = vpop.permute.xlu0 %6117  ;;  %8035 = vrot.lane.b32.xlu1 %v15327_v60, %s11217_s26  ;;  %v6125_v53 = vrot.slane %v15225_v62, 4  ;;  %v6059_v48 = vsel %vm252_vm8, %v6055_v6, %v6056_v16  ;;  %v15430_v16 = vld [vmem:[%s17247_s1 + $0x50] sm:$0xff] }
 0x551   : > { %v6123_v58 = vrot.slane %v6118_v0, 4  ;;  %6332 = vmatprep.subr.bf16.mxu0 %v10461_v7  ;;  %v6057_v1 = vsel %vm252_vm8, %v6054_v20, %v6055_v6  ;;  %v6060_v52 = vsel %vm17449_vm2, %v6051_v31, %v6059_v48  ;;  %v15406_v31 = vld [vmem:[%s17247_s1 + $0x40] sm:$0xff] }
 0x552   : > { %6373 = vmatprep.subr.bf16.mxu1 %v10463_v19  ;;  %v6120_v59 = vpop.permute.xlu1 %6119  ;;  %6333 = vmatpush1.bf16.msra.mxu0 %v10460_v18  ;;  %v6058_v41 = vsel %vm17449_vm2, %v6049_v29, %v6057_v1 }
 0x553   : > { %v6124_v22 = vrot.slane %v6120_v59, 4  ;;  %6374 = vmatpush1.bf16.msra.mxu1 %v10462_v35  ;;  %8037 = vrot.lane.b32.xlu0 %v15343_v23, %s11217_s26  ;;  %v10451_v35 = vld [vmem:[%s17246_s0 + $0x1c] sm:$0xf] }
 0x554   : > { %v6189_v54 = vpop.permute.xlu0 %6188  ;;  %8039 = vrot.lane.b32.xlu1 %v15348_v28, %s11217_s26 }
 0x555   : > { %v6128_v45 = vsel %vm252_vm8, %v6124_v22, %v6125_v53  ;;  %v6126_v62 = vsel %vm252_vm8, %v6123_v58, %v6124_v22  ;;  %v6193_v25 = vrot.slane %v6189_v54, 4  ;;  %v17895_v22 = vmov 0  }
 0x556   : > { %v6129_v43 = vsel %vm17891_vm7, %v6120_v59, %v6128_v45  ;;  %v6127_v9 = vsel %vm17892_vm6, %v6118_v0, %v6126_v62  ;;  %v6187_v3 = vpop.permute.xlu1 %6186  ;;  %v15439_v59 = vld [vmem:[%s17247_s1 + $0x58] sm:$0xff]  ;;  %v15449_v45 = vld [vmem:[%s17247_s1 + $0x60] sm:$0xff]  ;;  %vm17896_vm7 = vcmask 523264  }
 0x557   : > { %v10466_v34 = vcombine.low %v6060_v52, %v6129_v43  ;;  %v10464_v38 = vcombine.low %v6058_v41, %v6127_v9  ;;  %v6192_v51 = vrot.slane %v6187_v3, 4  ;;  %v6197_v33 = vsel %vm252_vm8, %v6193_v25, %v6194_v21  ;;  %8102 = vrot.lane.b32.xlu0 %v15363_v30, %s11218_s8  ;;  %vm17897_vm6 = vmmov %vm17896_vm7 }
 0x558   : > { %v6198_v14 = vsel %vm17893_vm0, %v6189_v54, %v6197_v33  ;;  %v10465_v40 = vcombine.high %v6058_v41, %v6127_v9  ;;  %v10467_v26 = vcombine.high %v6060_v52, %v6129_v43  ;;  %v5074_v55 = vpop.permute.xlu0 %5073  ;;  %8104 = vrot.lane.b32.xlu1 %v15368_v11, %s11218_s8  ;;  %vm17898_vm0 = vcmask 449536  }
 0x559   : > { %v6195_v63 = vsel %vm252_vm8, %v6192_v51, %v6193_v25  ;;  %v10470_v15 = vcombine.low %v6198_v14, %v6198_v14  ;;  %v10471_v50 = vcombine.high %v6198_v14, %v6198_v14  ;;  %v5077_v4 = vrot.slane %v5074_v55, 4  ;;  %v15454_v25 = vld [vmem:[%s17247_s1 + $0x68] sm:$0xff]  ;;  %v15470_v51 = vld [vmem:[%s17247_s1 + $0x78] sm:$0xff] }
 0x55a   : > { %6334 = vmatprep.subr.bf16.mxu0 %v10465_v40  ;;  %6375 = vmatprep.subr.bf16.mxu1 %v10467_v26  ;;  %v5072_v46 = vpop.permute.xlu1 %5071  ;;  %v6196_v49 = vsel %vm17894_vm1, %v6187_v3, %v6195_v63  ;;  %vm17899_vm1 = vmmov %vm17898_vm0 }
 0x55b   : > { %v5076_v32 = vrot.slane %v5072_v46, 4  ;;  %6335 = vmatpush1.bf16.msra.mxu0 %v10464_v38  ;;  %6376 = vmatpush1.bf16.msra.mxu1 %v10466_v34  ;;  %v10469_v39 = vcombine.high %v6196_v49, %v6196_v49  ;;  %v10468_v56 = vcombine.low %v6196_v49, %v6196_v49  ;;  %v6323_v44 = vsel %vm252_vm8, %v10470_v15, 0  ;;  %v15465_v34 = vld [vmem:[%s17247_s1 + $0x70] sm:$0xff] }
 0x55c   : > { %10474 = vmatprep.subr.msk.bf16.mxu1 %vm252_vm8, %v10471_v50  ;;  %v5141_v27 = vpop.permute.xlu0 %5140  ;;  %8106 = vrot.lane.b32.xlu0 %v15384_v10, %s11218_s8 }
 0x55d   : > { %10472 = vmatprep.subr.msk.bf16.mxu0 %vm252_vm8, %v10469_v39  ;;  %v6317_v36 = vsel %vm252_vm8, %v10468_v56, 0  ;;  %v5145_v17 = vrot.slane %v5141_v27, 4  ;;  %v5078_v37 = vsel %vm252_vm8, %v5075_v8, %v5076_v32  ;;  %8108 = vrot.lane.b32.xlu1 %v15391_v24, %s11218_s8  ;;  %v5080_v57 = vsel %vm252_vm8, %v5076_v32, %v5077_v4  ;;  %v15491_v39 = vld [vmem:[%s17247_s1 + $0xa8] sm:$0xff] }
 0x55e   : > { %v5143_v2 = vpop.permute.xlu1 %5142  ;;  %v5079_v20 = vsel %vm254_vm15, %v15250_v12, %v5078_v37  ;;  %v5081_v12 = vsel %vm254_vm15, %v5072_v46, %v5080_v57  ;;  %v15484_v46 = vld [vmem:[%s17247_s1 + $0xa0] sm:$0xff] }
 0x55f   : > { %v5146_v47 = vrot.slane %v5143_v2, 4  ;;  %6337 = vmatpush1.bf16.msra.mxu0 %v6317_v36  ;;  %6378 = vmatpush1.bf16.msra.mxu1 %v6323_v44  ;;  %v5147_v29 = vsel %vm252_vm8, %v5144_v61, %v5145_v17  ;;  %v15505_v2 = vld [vmem:[%s17247_s1 + $0xb8] sm:$0xff] }
 0x560   : > { %v5208_v18 = vpop.permute.xlu0 %5207  ;;  %v5148_v6 = vsel %vm326_vm14, %v15252_v5, %v5147_v29  ;;  %8171 = vrot.lane.b32.xlu0 %v15406_v31, %s11219_s19 }
 0x561   : > { %v5149_v7 = vsel %vm252_vm8, %v5145_v17, %v5146_v47  ;;  %v10476_v19 = vcombine.low %v5079_v20, %v5148_v6  ;;  %v10477_v0 = vcombine.high %v5079_v20, %v5148_v6  ;;  %8173 = vrot.lane.b32.xlu1 %v15411_v42, %s11219_s19  ;;  %v5213_v21 = vrot.slane %v5208_v18, 4  ;;  %v15500_v17 = vld [vmem:[%s17247_s1 + $0xb0] sm:$0xff]  ;;  %v15515_v20 = vld [vmem:[%s17247_s1 + $0xc0] sm:$0xff] }
 0x562   : > { %v5150_v58 = vsel %vm326_vm14, %v5141_v27, %v5149_v7  ;;  %v5210_v5 = vpop.permute.xlu1 %5209  ;;  %10473 = vmatmul.mubr.msk.bf16.vlgmr.msra.gmra.mrb[16].mxu0 %vm326_vm14, %v10451_v35  ;;  %10475 = vmatmul.mubr.msk.bf16.vlgmr.msra.gmra.mrb[16].mxu1 %vm326_vm14, %v10451_v35  ;;  %v15520_v7 = vld [vmem:[%s17247_s1 + $0xc8] sm:$0xff] }
 0x563   : > { %v10478_v53 = vcombine.low %v5081_v12, %v5150_v58  ;;  %6515 = vmatprep.subr.bf16.mxu0 %v10477_v0  ;;  %v10479_v48 = vcombine.high %v5081_v12, %v5150_v58  ;;  %6547 = vmatprep.mubr.bf16.mxu0 %v17895_v22  ;;  %v5214_v54 = vrot.slane %v5210_v5, 4 }
 0x564   : > { %6516 = vmatpush1.bf16.msra.mxu0 %v10476_v19  ;;  %v5212_v1 = vpop.permute.xlu0 %5211  ;;  %8175 = vrot.lane.b32.xlu0 %v15430_v16, %s11219_s19 }
 0x565   : > { %6556 = vmatprep.subr.bf16.mxu1 %v10479_v48  ;;  %8177 = vrot.lane.b32.xlu1 %v15439_v59, %s11219_s19  ;;  %v5215_v52 = vrot.slane %v5212_v1, 4  ;;  %v5216_v41 = vsel %vm252_vm8, %v5213_v21, %v5214_v54  ;;  %v15534_v21 = vld [vmem:[%s17247_s1 + $0xd0] sm:$0xff] }
 0x566   : > { %v5277_v62 = vpop.permute.xlu1 %5276  ;;  %6557 = vmatpush1.bf16.msra.mxu1 %v10478_v53  ;;  %6588 = vmatprep.mubr.bf16.mxu1 %v17895_v22  ;;  %v5217_v26 = vsel %vm398_vm13, %v5208_v18, %v5216_v41  ;;  %v15541_v41 = vld [vmem:[%s17247_s1 + $0xd8] sm:$0xff] }
 0x567   : > { %v5282_v9 = vrot.slane %v5277_v62, 4  ;;  %v5218_v33 = vsel %vm252_vm8, %v5214_v54, %v5215_v52 }
 0x568   : > { %v5279_v43 = vpop.permute.xlu0 %5278  ;;  %8240 = vrot.lane.b32.xlu0 %v15449_v45, %s11220_s30  ;;  %v5219_v49 = vsel %vm398_vm13, %v5210_v5, %v5218_v33 }
 0x569   : > { %v5283_v3 = vrot.slane %v5279_v43, 4  ;;  %8242 = vrot.lane.b32.xlu1 %v15454_v25, %s11220_s30 }
 0x56a   : > { %v5281_v38 = vpop.permute.xlu1 %5280 }
 0x56b   : > { %v5284_v14 = vrot.slane %v5281_v38, 4  ;;  %v5285_v40 = vsel %vm252_vm8, %v5282_v9, %v5283_v3 }
 0x56c   : > { %v5317_v55 = vpop.permute.xlu0 %5316  ;;  %v5286_v63 = vsel %vm470_vm12, %v5277_v62, %v5285_v40  ;;  %8244 = vrot.lane.b32.xlu0 %v15465_v34, %s11220_s30  ;;  %v15550_v40 = vld [vmem:[%s17247_s1 + $0xe0] sm:$0xff] }
 0x56d   : > { %v5287_v15 = vsel %vm252_vm8, %v5283_v3, %v5284_v14  ;;  %v10480_v50 = vcombine.low %v5217_v26, %v5286_v63  ;;  %v10481_v8 = vcombine.high %v5217_v26, %v5286_v63  ;;  %8246 = vrot.lane.b32.xlu1 %v15470_v51, %s11220_s30  ;;  %v5322_v36 = vrot.slane %v5317_v55, 4 }
 0x56e   : > { %v5288_v32 = vsel %vm470_vm12, %v5279_v43, %v5287_v15  ;;  %v5319_v4 = vpop.permute.xlu1 %5318 }
 0x56f   : > { %v10482_v56 = vcombine.low %v5219_v49, %v5288_v32  ;;  %6517 = vmatprep.subr.bf16.mxu0 %v10481_v8  ;;  %v10483_v44 = vcombine.high %v5219_v49, %v5288_v32  ;;  %v5323_v61 = vrot.slane %v5319_v4, 4  ;;  %v15565_v32 = vld [vmem:[%s17247_s1 + $0xf0] sm:$0xff] }
 0x570   : > { %6518 = vmatpush1.bf16.msra.mxu0 %v10480_v50  ;;  %v5321_v27 = vpop.permute.xlu0 %5320  ;;  %8331 = vrot.lane.b32.xlu0 %v15484_v46, %s11221_s14 }
 0x571   : > { %6558 = vmatprep.subr.bf16.mxu1 %v10483_v44  ;;  %8333 = vrot.lane.b32.xlu1 %v15491_v39, %s11221_s14  ;;  %v5324_v57 = vrot.slane %v5321_v27, 4  ;;  %v5325_v29 = vsel %vm252_vm8, %v5322_v36, %v5323_v61 }
 0x572   : > { %v5386_v37 = vpop.permute.xlu1 %5385  ;;  %6559 = vmatpush1.bf16.msra.mxu1 %v10482_v56  ;;  %v5326_v58 = vsel %vm17896_vm7, %v5317_v55, %v5325_v29  ;;  %v15555_v55 = vld [vmem:[%s17247_s1 + $0xe8] sm:$0xff]  ;;  %v15570_v56 = vld [vmem:[%s17247_s1 + $0xf8] sm:$0xff]  ;;  %vm17900_vm7 = vmmov %vm17897_vm6 }
 0x573   : > { %v5391_v35 = vrot.slane %v5386_v37, 4  ;;  %v5327_v19 = vsel %vm252_vm8, %v5323_v61, %v5324_v57 }
 0x574   : > { %v5388_v47 = vpop.permute.xlu0 %5387  ;;  %8335 = vrot.lane.b32.xlu0 %v15500_v17, %s11221_s14  ;;  %v5328_v62 = vsel %vm17897_vm6, %v5319_v4, %v5327_v19 }
 0x575   : > { %v5392_v18 = vrot.slane %v5388_v47, 4  ;;  %8337 = vrot.lane.b32.xlu1 %v15505_v2, %s11221_s14 }
 0x576   : > { %v5390_v6 = vpop.permute.xlu1 %5389 }
 0x577   : > { %v5393_v0 = vrot.slane %v5390_v6, 4  ;;  %v5394_v12 = vsel %vm252_vm8, %v5391_v35, %v5392_v18  ;;  %v15584_v6 = vld [vmem:[%s17247_s1 + $0x100] sm:$0xff] }
 0x578   : > { %v5455_v5 = vpop.permute.xlu0 %5454  ;;  %v5395_v53 = vsel %vm428_vm11, %v5386_v37, %v5394_v12  ;;  %8400 = vrot.lane.b32.xlu0 %v15515_v20, %s11222_s27 }
 0x579   : > { %v5396_v48 = vsel %vm252_vm8, %v5392_v18, %v5393_v0  ;;  %v10484_v1 = vcombine.low %v5326_v58, %v5395_v53  ;;  %v10485_v54 = vcombine.high %v5326_v58, %v5395_v53  ;;  %8402 = vrot.lane.b32.xlu1 %v15520_v7, %s11222_s27  ;;  %v5460_v14 = vrot.slane %v5455_v5, 4  ;;  %v15591_v58 = vld [vmem:[%s17247_s1 + $0x108] sm:$0xff] }
 0x57a   : > { %v5397_v52 = vsel %vm428_vm11, %v5388_v47, %v5396_v48  ;;  %v5457_v43 = vpop.permute.xlu1 %5456 }
 0x57b   : > { %v10486_v9 = vcombine.low %v5328_v62, %v5397_v52  ;;  %6519 = vmatprep.subr.bf16.mxu0 %v10485_v54  ;;  %v10487_v3 = vcombine.high %v5328_v62, %v5397_v52  ;;  %v5461_v33 = vrot.slane %v5457_v43, 4  ;;  %v15601_v52 = vld [vmem:[%s17247_s1 + $0x110] sm:$0xff] }
 0x57c   : > { %6520 = vmatpush1.bf16.msra.mxu0 %v10484_v1  ;;  %v5459_v38 = vpop.permute.xlu0 %5458  ;;  %8404 = vrot.lane.b32.xlu0 %v15534_v21, %s11222_s27 }
 0x57d   : > { %6560 = vmatprep.subr.bf16.mxu1 %v10487_v3  ;;  %8406 = vrot.lane.b32.xlu1 %v15541_v41, %s11222_s27  ;;  %v5462_v63 = vrot.slane %v5459_v38, 4  ;;  %v5463_v50 = vsel %vm252_vm8, %v5460_v14, %v5461_v33  ;;  %v15607_v3 = vld [vmem:[%s17247_s1 + $0x118] sm:$0xff] }
 0x57e   : > { %v5524_v26 = vpop.permute.xlu1 %5523  ;;  %6561 = vmatpush1.bf16.msra.mxu1 %v10486_v9  ;;  %v5464_v36 = vsel %vm356_vm10, %v5455_v5, %v5463_v50 }
 0x57f   : > { %v5529_v8 = vrot.slane %v5524_v26, 4  ;;  %v5465_v44 = vsel %vm252_vm8, %v5461_v33, %v5462_v63 }
 0x580   : > { %v5526_v15 = vpop.permute.xlu0 %5525  ;;  %8469 = vrot.lane.b32.xlu0 %v15550_v40, %s11223_s11  ;;  %v5466_v19 = vsel %vm356_vm10, %v5457_v43, %v5465_v44 }
 0x581   : > { %v5530_v49 = vrot.slane %v5526_v15, 4  ;;  %8471 = vrot.lane.b32.xlu1 %v15555_v55, %s11223_s11 }
 0x582   : > { %v5528_v4 = vpop.permute.xlu1 %5527 }
 0x583   : > { %v5531_v27 = vrot.slane %v5528_v4, 4  ;;  %v5532_v61 = vsel %vm252_vm8, %v5529_v8, %v5530_v49  ;;  %v10396_v4 = vld [vmem:[%s17246_s0 + $0x18] sm:$0xf] }
 0x584   : > { %v5593_v37 = vpop.permute.xlu0 %5592  ;;  %v5533_v57 = vsel %vm284_vm9, %v5524_v26, %v5532_v61  ;;  %8473 = vrot.lane.b32.xlu0 %v15565_v32, %s11223_s11 }
 0x585   : > { %v5534_v47 = vsel %vm252_vm8, %v5530_v49, %v5531_v27  ;;  %v5598_v29 = vrot.slane %v5593_v37, 4  ;;  %v10488_v35 = vcombine.low %v5464_v36, %v5533_v57  ;;  %v10489_v18 = vcombine.high %v5464_v36, %v5533_v57  ;;  %8475 = vrot.lane.b32.xlu1 %v15570_v56, %s11223_s11 }
 0x586   : > { %v5535_v0 = vsel %vm284_vm9, %v5526_v15, %v5534_v47  ;;  %v5595_v12 = vpop.permute.xlu1 %5594 }
 0x587   : > { %v10490_v5 = vcombine.low %v5466_v19, %v5535_v0  ;;  %v5599_v53 = vrot.slane %v5595_v12, 4  ;;  %6521 = vmatprep.subr.bf16.mxu0 %v10489_v18  ;;  %v10491_v48 = vcombine.high %v5466_v19, %v5535_v0 }
 0x588   : > { %6522 = vmatpush1.bf16.msra.mxu0 %v10488_v35  ;;  %v5597_v1 = vpop.permute.xlu0 %5596  ;;  %8538 = vrot.lane.b32.xlu0 %v15584_v6, %s11224_s25 }
 0x589   : > { %v5601_v54 = vsel %vm252_vm8, %v5598_v29, %v5599_v53  ;;  %6562 = vmatprep.subr.bf16.mxu1 %v10491_v48  ;;  %v5600_v62 = vrot.slane %v5597_v1, 4  ;;  %8540 = vrot.lane.b32.xlu1 %v15591_v58, %s11224_s25 }
 0x58a   : > { %v5602_v43 = vsel %vm17898_vm0, %v5593_v37, %v5601_v54  ;;  %v6650_v9 = vpop.permute.xlu1 %6649  ;;  %6563 = vmatpush1.bf16.msra.mxu1 %v10490_v5 }
 0x58b   : > { %v10492_v38 = vcombine.low %v5602_v43, %v5602_v43  ;;  %v10493_v33 = vcombine.high %v5602_v43, %v5602_v43  ;;  %v5603_v14 = vsel %vm252_vm8, %v5599_v53, %v5600_v62  ;;  %v6655_v36 = vrot.slane %v6650_v9, 4 }
 0x58c   : > { %v6652_v26 = vpop.permute.xlu0 %6651  ;;  %v5604_v63 = vsel %vm17899_vm1, %v5595_v12, %v5603_v14  ;;  %8542 = vrot.lane.b32.xlu0 %v15601_v52, %s11224_s25  ;;  %vm17901_vm1 = vmmov %vm17898_vm0 }
 0x58d   : > { %10496 = vmatprep.subr.msk.bf16.mxu0 %vm252_vm8, %v10493_v33  ;;  %v6504_v15 = vsel %vm252_vm8, %v10492_v38, 0  ;;  %v10495_v50 = vcombine.high %v5604_v63, %v5604_v63  ;;  %v10494_v8 = vcombine.low %v5604_v63, %v5604_v63  ;;  %8544 = vrot.lane.b32.xlu1 %v15607_v3, %s11224_s25  ;;  %v6656_v44 = vrot.slane %v6652_v26, 4 }
 0x58e   : > { %v6654_v49 = vpop.permute.xlu1 %6653  ;;  %6524 = vmatpush1.bf16.msra.mxu0 %v6504_v15 }
 0x58f   : > { %10498 = vmatprep.subr.msk.bf16.mxu1 %vm252_vm8, %v10495_v50  ;;  %v6510_v27 = vsel %vm252_vm8, %v10494_v8, 0  ;;  %v6657_v37 = vrot.slane %v6654_v49, 4  ;;  %v6658_v35 = vsel %vm252_vm8, %v6655_v36, %v6656_v44 }
 0x590   : > { %6565 = vmatpush1.bf16.msra.mxu1 %v6510_v27  ;;  %v6719_v61 = vpop.permute.xlu0 %6718  ;;  %7421 = vrot.lane.b32.xlu0 %v15319_v13, %s11225_s6  ;;  %v6659_v5 = vsel %vm254_vm15, %v6650_v9, %v6658_v35 }
 0x591   : > { %v6724_v57 = vrot.slane %v6719_v61, 4  ;;  %10497 = vmatmul.mubr.msk.bf16.vlgmr.msra.gmra.mrb[16].mxu0 %vm326_vm14, %v10396_v4  ;;  %7423 = vrot.lane.b32.xlu1 %v15327_v60, %s11225_s6  ;;  %v6660_v19 = vsel %vm252_vm8, %v6656_v44, %v6657_v37 }
 0x592   : > { %v6721_v47 = vpop.permute.xlu1 %6720  ;;  %7346 = vmatprep.mubr.bf16.mxu0 %v17895_v22  ;;  %v6661_v43 = vsel %vm254_vm15, %v6652_v26, %v6660_v19 }
 0x593   : > { %v6725_v29 = vrot.slane %v6721_v47, 4  ;;  %10499 = vmatmul.mubr.msk.bf16.vlgmr.msra.gmra.mrb[16].mxu1 %vm326_vm14, %v10396_v4 }
 0x594   : > { %v6723_v18 = vpop.permute.xlu0 %6722  ;;  %7425 = vrot.lane.b32.xlu0 %v15343_v23, %s11225_s6  ;;  %7387 = vmatprep.mubr.bf16.mxu1 %v17895_v22 }
 0x595   : > { %v6727_v0 = vsel %vm252_vm8, %v6724_v57, %v6725_v29  ;;  %v6726_v12 = vrot.slane %v6723_v18, 4  ;;  %7427 = vrot.lane.b32.xlu1 %v15348_v28, %s11225_s6 }
 0x596   : > { %v6728_v53 = vsel %vm326_vm14, %v6719_v61, %v6727_v0  ;;  %v6788_v48 = vpop.permute.xlu1 %6787 }
 0x597   : > { %v10556_v1 = vcombine.low %v6659_v5, %v6728_v53  ;;  %v6729_v54 = vsel %vm252_vm8, %v6725_v29, %v6726_v12  ;;  %v10557_v62 = vcombine.high %v6659_v5, %v6728_v53  ;;  %v6793_v26 = vrot.slane %v6788_v48, 4 }
 0x598   : > { %v6790_v38 = vpop.permute.xlu0 %6789  ;;  %v6730_v33 = vsel %vm326_vm14, %v6721_v47, %v6729_v54  ;;  %7490 = vrot.lane.b32.xlu0 %v15363_v30, %s11226_s7 }
 0x599   : > { %7314 = vmatprep.subr.bf16.mxu0 %v10557_v62  ;;  %v10558_v14 = vcombine.low %v6661_v43, %v6730_v33  ;;  %v10559_v63 = vcombine.high %v6661_v43, %v6730_v33  ;;  %7492 = vrot.lane.b32.xlu1 %v15368_v11, %s11226_s7  ;;  %v6794_v15 = vrot.slane %v6790_v38, 4 }
 0x59a   : > { %v6792_v9 = vpop.permute.xlu1 %6791  ;;  %7315 = vmatpush1.bf16.msra.mxu0 %v10556_v1 }
 0x59b   : > { %7355 = vmatprep.subr.bf16.mxu1 %v10559_v63  ;;  %v6795_v8 = vrot.slane %v6792_v9, 4  ;;  %v6796_v27 = vsel %vm252_vm8, %v6793_v26, %v6794_v15 }
 0x59c   : > { %7356 = vmatpush1.bf16.msra.mxu1 %v10558_v14  ;;  %v6857_v50 = vpop.permute.xlu0 %6856  ;;  %7494 = vrot.lane.b32.xlu0 %v15384_v10, %s11226_s7  ;;  %v6797_v47 = vsel %vm398_vm13, %v6788_v48, %v6796_v27 }
 0x59d   : > { %v6862_v49 = vrot.slane %v6857_v50, 4  ;;  %7496 = vrot.lane.b32.xlu1 %v15391_v24, %s11226_s7  ;;  %v6798_v36 = vsel %vm252_vm8, %v6794_v15, %v6795_v8 }
 0x59e   : > { %v6859_v4 = vpop.permute.xlu1 %6858  ;;  %v6799_v12 = vsel %vm398_vm13, %v6790_v38, %v6798_v36 }
 0x59f   : > { %v6863_v44 = vrot.slane %v6859_v4, 4 }
 0x5a0   : > { %v6861_v61 = vpop.permute.xlu0 %6860  ;;  %7559 = vrot.lane.b32.xlu0 %v15406_v31, %s11227_s9 }
 0x5a1   : > { %v6865_v37 = vsel %vm252_vm8, %v6862_v49, %v6863_v44  ;;  %v6864_v57 = vrot.slane %v6861_v61, 4  ;;  %7561 = vrot.lane.b32.xlu1 %v15411_v42, %s11227_s9 }
 0x5a2   : > { %v6866_v29 = vsel %vm470_vm12, %v6857_v50, %v6865_v37  ;;  %v6897_v35 = vpop.permute.xlu1 %6896 }
 0x5a3   : > { %v10560_v18 = vcombine.low %v6797_v47, %v6866_v29  ;;  %v6867_v19 = vsel %vm252_vm8, %v6863_v44, %v6864_v57  ;;  %v10561_v0 = vcombine.high %v6797_v47, %v6866_v29  ;;  %v6902_v38 = vrot.slane %v6897_v35, 4 }
 0x5a4   : > { %v6899_v5 = vpop.permute.xlu0 %6898  ;;  %v6868_v53 = vsel %vm470_vm12, %v6859_v4, %v6867_v19  ;;  %7563 = vrot.lane.b32.xlu0 %v15430_v16, %s11227_s9 }
 0x5a5   : > { %7316 = vmatprep.subr.bf16.mxu0 %v10561_v0  ;;  %v10562_v1 = vcombine.low %v6799_v12, %v6868_v53  ;;  %v10563_v54 = vcombine.high %v6799_v12, %v6868_v53  ;;  %7565 = vrot.lane.b32.xlu1 %v15439_v59, %s11227_s9  ;;  %v6903_v62 = vrot.slane %v6899_v5, 4 }
 0x5a6   : > { %v6901_v48 = vpop.permute.xlu1 %6900  ;;  %7317 = vmatpush1.bf16.msra.mxu0 %v10560_v18 }
 0x5a7   : > { %7357 = vmatprep.subr.bf16.mxu1 %v10563_v54  ;;  %v6904_v33 = vrot.slane %v6901_v48, 4  ;;  %v6905_v15 = vsel %vm252_vm8, %v6902_v38, %v6903_v62 }
 0x5a8   : > { %7358 = vmatpush1.bf16.msra.mxu1 %v10562_v1  ;;  %v6966_v43 = vpop.permute.xlu0 %6965  ;;  %7628 = vrot.lane.b32.xlu0 %v15449_v45, %s11228_s10  ;;  %v6906_v4 = vsel %vm17900_vm7, %v6897_v35, %v6905_v15  ;;  %vm17947_vm7 = vcmask 973824  }
 0x5a9   : > { %v6971_v14 = vrot.slane %v6966_v43, 4  ;;  %7630 = vrot.lane.b32.xlu1 %v15454_v25, %s11228_s10  ;;  %v6907_v26 = vsel %vm252_vm8, %v6903_v62, %v6904_v33 }
 0x5aa   : > { %v6968_v63 = vpop.permute.xlu1 %6967  ;;  %v6908_v57 = vsel %vm17897_vm6, %v6899_v5, %v6907_v26  ;;  %vm17948_vm6 = vmmov %vm17947_vm7 }
 0x5ab   : > { %v6972_v9 = vrot.slane %v6968_v63, 4 }
 0x5ac   : > { %v6970_v50 = vpop.permute.xlu0 %6969  ;;  %7632 = vrot.lane.b32.xlu0 %v15465_v34, %s11228_s10 }
 0x5ad   : > { %v6974_v8 = vsel %vm252_vm8, %v6971_v14, %v6972_v9  ;;  %v6973_v49 = vrot.slane %v6970_v50, 4  ;;  %7634 = vrot.lane.b32.xlu1 %v15470_v51, %s11228_s10 }
 0x5ae   : > { %v6975_v44 = vsel %vm428_vm11, %v6966_v43, %v6974_v8  ;;  %v7035_v27 = vpop.permute.xlu1 %7034 }
 0x5af   : > { %v10564_v61 = vcombine.low %v6906_v4, %v6975_v44  ;;  %v6976_v36 = vsel %vm252_vm8, %v6972_v9, %v6973_v49  ;;  %v10565_v37 = vcombine.high %v6906_v4, %v6975_v44  ;;  %v7040_v5 = vrot.slane %v7035_v27, 4 }
 0x5b0   : > { %v7037_v47 = vpop.permute.xlu0 %7036  ;;  %v6977_v29 = vsel %vm428_vm11, %v6968_v63, %v6976_v36  ;;  %7737 = vrot.lane.b32.xlu0 %v15484_v46, %s11229_s13 }
 0x5b1   : > { %7318 = vmatprep.subr.bf16.mxu0 %v10565_v37  ;;  %v10566_v18 = vcombine.low %v6908_v57, %v6977_v29  ;;  %v10567_v19 = vcombine.high %v6908_v57, %v6977_v29  ;;  %7739 = vrot.lane.b32.xlu1 %v15491_v39, %s11229_s13  ;;  %v7041_v0 = vrot.slane %v7037_v47, 4 }
 0x5b2   : > { %v7039_v35 = vpop.permute.xlu1 %7038  ;;  %7319 = vmatpush1.bf16.msra.mxu0 %v10564_v61 }
 0x5b3   : > { %7359 = vmatprep.subr.bf16.mxu1 %v10567_v19  ;;  %v7042_v53 = vrot.slane %v7039_v35, 4  ;;  %v7043_v62 = vsel %vm252_vm8, %v7040_v5, %v7041_v0 }
 0x5b4   : > { %7360 = vmatpush1.bf16.msra.mxu1 %v10566_v18  ;;  %v7104_v12 = vpop.permute.xlu0 %7103  ;;  %7741 = vrot.lane.b32.xlu0 %v15500_v17, %s11229_s13  ;;  %v7044_v63 = vsel %vm356_vm10, %v7035_v27, %v7043_v62  ;;  %v10555_v62 = vld [vmem:[%s17246_s0 + $0x20] sm:$0xf] }
 0x5b5   : > { %v7109_v1 = vrot.slane %v7104_v12, 4  ;;  %7743 = vrot.lane.b32.xlu1 %v15505_v2, %s11229_s13  ;;  %v7045_v38 = vsel %vm252_vm8, %v7041_v0, %v7042_v53 }
 0x5b6   : > { %v7106_v54 = vpop.permute.xlu1 %7105  ;;  %v7046_v49 = vsel %vm356_vm10, %v7037_v47, %v7045_v38 }
 0x5b7   : > { %v7110_v48 = vrot.slane %v7106_v54, 4 }
 0x5b8   : > { %v7108_v43 = vpop.permute.xlu0 %7107  ;;  %7806 = vrot.lane.b32.xlu0 %v15515_v20, %s11230_s15 }
 0x5b9   : > { %v7112_v33 = vsel %vm252_vm8, %v7109_v1, %v7110_v48  ;;  %v7111_v14 = vrot.slane %v7108_v43, 4  ;;  %7808 = vrot.lane.b32.xlu1 %v15520_v7, %s11230_s15 }
 0x5ba   : > { %v7113_v9 = vsel %vm284_vm9, %v7104_v12, %v7112_v33  ;;  %v7173_v15 = vpop.permute.xlu1 %7172 }
 0x5bb   : > { %v10568_v50 = vcombine.low %v7044_v63, %v7113_v9  ;;  %v7114_v26 = vsel %vm252_vm8, %v7110_v48, %v7111_v14  ;;  %v10569_v8 = vcombine.high %v7044_v63, %v7113_v9  ;;  %v7178_v61 = vrot.slane %v7173_v15, 4 }
 0x5bc   : > { %v7175_v4 = vpop.permute.xlu0 %7174  ;;  %v7115_v44 = vsel %vm284_vm9, %v7106_v54, %v7114_v26  ;;  %7810 = vrot.lane.b32.xlu0 %v15534_v21, %s11230_s15 }
 0x5bd   : > { %7320 = vmatprep.subr.bf16.mxu0 %v10569_v8  ;;  %v7179_v36 = vrot.slane %v7175_v4, 4  ;;  %v10570_v37 = vcombine.low %v7046_v49, %v7115_v44  ;;  %v10571_v27 = vcombine.high %v7046_v49, %v7115_v44  ;;  %7812 = vrot.lane.b32.xlu1 %v15541_v41, %s11230_s15 }
 0x5be   : > { %v7177_v57 = vpop.permute.xlu1 %7176  ;;  %7321 = vmatpush1.bf16.msra.mxu0 %v10568_v50 }
 0x5bf   : > { %v7180_v29 = vrot.slane %v7177_v57, 4  ;;  %v7181_v18 = vsel %vm252_vm8, %v7178_v61, %v7179_v36  ;;  %7361 = vmatprep.subr.bf16.mxu1 %v10571_v27 }
 0x5c0   : > { %7362 = vmatpush1.bf16.msra.mxu1 %v10570_v37  ;;  %v7182_v47 = vsel %vm17898_vm0, %v7173_v15, %v7181_v18  ;;  %7875 = vrot.lane.b32.xlu0 %v15550_v40, %s11231_s16  ;;  %v15710_v19 = vpop.permute.xlu0 %8033  ;;  %vm17949_vm0 = vmmov %vm17948_vm6 }
 0x5c1   : > { %v7183_v35 = vsel %vm252_vm8, %v7179_v36, %v7180_v29  ;;  %v10573_v0 = vcombine.high %v7182_v47, %v7182_v47  ;;  %v10572_v12 = vcombine.low %v7182_v47, %v7182_v47  ;;  %7877 = vrot.lane.b32.xlu1 %v15555_v55, %s11231_s16 }
 0x5c2   : > { %v7184_v5 = vsel %vm17901_vm1, %v7175_v4, %v7183_v35  ;;  %v15716_v53 = vpop.permute.xlu1 %8035  ;;  %vm17950_vm1 = vcmask 982016  }
 0x5c3   : > { %v10574_v1 = vcombine.low %v7184_v5, %v7184_v5  ;;  %v10575_v54 = vcombine.high %v7184_v5, %v7184_v5  ;;  %10576 = vmatprep.subr.msk.bf16.mxu0 %vm252_vm8, %v10573_v0  ;;  %v7303_v48 = vsel %vm252_vm8, %v10572_v12, 0 }
 0x5c4   : > { %7323 = vmatpush1.bf16.msra.mxu0 %v7303_v48  ;;  %7879 = vrot.lane.b32.xlu0 %v15565_v32, %s11231_s16 }
 0x5c5   : > { %10578 = vmatprep.subr.msk.bf16.mxu1 %vm252_vm8, %v10575_v54  ;;  %v7309_v43 = vsel %vm252_vm8, %v10574_v1, 0  ;;  %7881 = vrot.lane.b32.xlu1 %v15570_v56, %s11231_s16  ;;  %v15729_v38 = vpop.permute.xlu0 %8037 }
 0x5c6   : > { %7364 = vmatpush1.bf16.msra.mxu1 %v7309_v43  ;;  %v15731_v33 = vpop.permute.xlu1 %8039 }
 0x5c7   : > { %17902 = vst [vmem:[#allocation32_spill] sm:$0xff] %v15731_v33  ;;  %10577 = vmatmul.mubr.msk.bf16.vlgmr.msra.gmra.mrb[16].mxu0 %vm326_vm14, %v10555_v62 }
 0x5c8   : > { %7944 = vrot.lane.b32.xlu0 %v15584_v6, %s11232_s17  ;;  %8751 = vmatprep.mubr.bf16.mxu0 %v17895_v22 }
 0x5c9   : > { %10579 = vmatmul.mubr.msk.bf16.vlgmr.msra.gmra.mrb[16].mxu1 %vm326_vm14, %v10555_v62  ;;  %7946 = vrot.lane.b32.xlu1 %v15591_v58, %s11232_s17  ;;  %v15740_v14 = vpop.permute.xlu0 %8102 }
 0x5ca   : > { %v15742_v63 = vpop.permute.xlu1 %8104  ;;  %8792 = vmatprep.mubr.bf16.mxu1 %v17895_v22 }
 0x5cc   : > { %7948 = vrot.lane.b32.xlu0 %v15601_v52, %s11232_s17 }
 0x5cd   : > { %7950 = vrot.lane.b32.xlu1 %v15607_v3, %s11232_s17 }
 0x5ce   : > { %v15749_v9 = vpop.permute.xlu0 %8106 }
 0x5cf   : > { %v15751_v15 = vpop.permute.xlu1 %8108 }
 0x5d0   : > { %17903 = vst [vmem:[#allocation30_spill] sm:$0xff] %v15751_v15  ;;  %9001 = vrot.lane.b32.xlu0 %v15319_v13, %s11225_s6 }
 0x5d1   : > { %9003 = vrot.lane.b32.xlu1 %v15327_v60, %s11225_s6 }
 0x5d2   : > { %v15757_v50 = vpop.permute.xlu0 %8171 }
 0x5d3   : > { %v15759_v26 = vpop.permute.xlu1 %8173 }
 0x5d4   : > { %9005 = vrot.lane.b32.xlu0 %v15343_v23, %s11225_s6 }
 0x5d5   : > { %9007 = vrot.lane.b32.xlu1 %v15348_v28, %s11225_s6 }
 0x5d6   : > { %v15765_v8 = vpop.permute.xlu0 %8175 }
 0x5d7   : > { %v15767_v49 = vpop.permute.xlu1 %8177 }
 0x5d8   : > { %17904 = vst [vmem:[#allocation35_spill] sm:$0xff] %v15767_v49  ;;  %9070 = vrot.lane.b32.xlu0 %v15363_v30, %s11226_s7 }
 0x5d9   : > { %9072 = vrot.lane.b32.xlu1 %v15368_v11, %s11226_s7 }
 0x5da   : > { %v15773_v13 = vpop.permute.xlu0 %8240 }
 0x5db   : > { %v15775_v60 = vpop.permute.xlu1 %8242 }
 0x5dc   : > { %9074 = vrot.lane.b32.xlu0 %v15384_v10, %s11226_s7 }
 0x5dd   : > { %9076 = vrot.lane.b32.xlu1 %v15391_v24, %s11226_s7 }
 0x5de   : > { %v15781_v23 = vpop.permute.xlu0 %8244 }
 0x5df   : > { %v15783_v28 = vpop.permute.xlu1 %8246 }
 0x5e0   : > { %17905 = vst [vmem:[#allocation34_spill] sm:$0xff] %v15783_v28  ;;  %9139 = vrot.lane.b32.xlu0 %v15406_v31, %s11227_s9 }
 0x5e1   : > { %9141 = vrot.lane.b32.xlu1 %v15411_v42, %s11227_s9 }
 0x5e2   : > { %v15789_v30 = vpop.permute.xlu0 %8331 }
 0x5e3   : > { %v15791_v11 = vpop.permute.xlu1 %8333 }
 0x5e4   : > { %9143 = vrot.lane.b32.xlu0 %v15430_v16, %s11227_s9 }
 0x5e5   : > { %9145 = vrot.lane.b32.xlu1 %v15439_v59, %s11227_s9 }
 0x5e6   : > { %v15797_v10 = vpop.permute.xlu0 %8335 }
 0x5e7   : > { %v15799_v24 = vpop.permute.xlu1 %8337 }
 0x5e8   : > { %9208 = vrot.lane.b32.xlu0 %v15449_v45, %s11228_s10 }
 0x5e9   : > { %9210 = vrot.lane.b32.xlu1 %v15454_v25, %s11228_s10 }
 0x5ea   : > { %v15805_v31 = vpop.permute.xlu0 %8400 }
 0x5eb   : > { %v15807_v42 = vpop.permute.xlu1 %8402 }
 0x5ec   : > { %9212 = vrot.lane.b32.xlu0 %v15465_v34, %s11228_s10 }
 0x5ed   : > { %9214 = vrot.lane.b32.xlu1 %v15470_v51, %s11228_s10 }
 0x5ee   : > { %v15813_v16 = vpop.permute.xlu0 %8404 }
 0x5ef   : > { %v15815_v59 = vpop.permute.xlu1 %8406 }
 0x5f0   : > { %9317 = vrot.lane.b32.xlu0 %v15484_v46, %s11229_s13 }
 0x5f1   : > { %9319 = vrot.lane.b32.xlu1 %v15491_v39, %s11229_s13 }
 0x5f2   : > { %v15821_v45 = vpop.permute.xlu0 %8469 }
 0x5f3   : > { %v15823_v25 = vpop.permute.xlu1 %8471 }
 0x5f4   : > { %9321 = vrot.lane.b32.xlu0 %v15500_v17, %s11229_s13 }
 0x5f5   : > { %9323 = vrot.lane.b32.xlu1 %v15505_v2, %s11229_s13 }
 0x5f6   : > { %v15829_v34 = vpop.permute.xlu0 %8473 }
 0x5f7   : > { %v15831_v51 = vpop.permute.xlu1 %8475 }
 0x5f8   : > { %9386 = vrot.lane.b32.xlu0 %v15515_v20, %s11230_s15 }
 0x5f9   : > { %9388 = vrot.lane.b32.xlu1 %v15520_v7, %s11230_s15 }
 0x5fa   : > { %v15837_v46 = vpop.permute.xlu0 %8538 }
 0x5fb   : > { %v15839_v39 = vpop.permute.xlu1 %8540 }
 0x5fc   : > { %9390 = vrot.lane.b32.xlu0 %v15534_v21, %s11230_s15  ;;  %v15859_v21 = vld [vmem:[#allocation2 + $0x28] sm:$0xff] }
 0x5fd   : > { %9392 = vrot.lane.b32.xlu1 %v15541_v41, %s11230_s15  ;;  %17906 = vst [vmem:[#allocation57_spill] sm:$0xff] %v15859_v21  ;;  %v8489_v61 = vmul.f32 %v15831_v51, %v15859_v21 }
 0x5fe   : > { %v15845_v17 = vpop.permute.xlu0 %8542 }
 0x5ff   : > { %v15847_v2 = vpop.permute.xlu1 %8544  ;;  %v11112_v27 = vpack.c.bf16 %v8489_v61, %v8489_v61 }
 0x600   : > { %9455 = vrot.lane.b32.xlu0 %v15550_v40, %s11231_s16  ;;  %v8351_v40 = vmul.f32 %v15799_v24, %v15859_v21 }
 0x601   : > { %9457 = vrot.lane.b32.xlu1 %v15555_v55, %s11231_s16  ;;  %v8420_v55 = vmul.f32 %v15815_v59, %v15859_v21 }
 0x602   : > { %v15853_v20 = vpop.permute.xlu0 %7421 }
 0x603   : > { %v15855_v7 = vpop.permute.xlu1 %7423  ;;  %v11109_v36 = vpack.c.bf16 %v8420_v55, %v8420_v55 }
 0x604   : > { %9459 = vrot.lane.b32.xlu0 %v15565_v32, %s11231_s16 }
 0x605   : > { %9461 = vrot.lane.b32.xlu1 %v15570_v56, %s11231_s16  ;;  %v11106_v56 = vpack.c.bf16 %v8351_v40, %v8351_v40 }
 0x606   : > { %v15863_v41 = vpop.permute.xlu0 %7425 }
 0x607   : > { %v15865_v4 = vpop.permute.xlu1 %7427 }
 0x608   : > { %17907 = vst [vmem:[#allocation10_spill] sm:$0xff] %v15865_v4  ;;  %9524 = vrot.lane.b32.xlu0 %v15584_v6, %s11232_s17  ;;  %v8558_v6 = vmul.f32 %v15847_v2, %v15859_v21 }
 0x609   : > { %9526 = vrot.lane.b32.xlu1 %v15591_v58, %s11232_s17 }
 0x60a   : > { %v15875_v32 = vpop.permute.xlu0 %7490  ;;  %v11115_v57 = vpack.c.bf16 %v8558_v6, %v8558_v6 }
 0x60b   : > { %v15877_v44 = vpop.permute.xlu1 %7492 }
 0x60c   : > { %9528 = vrot.lane.b32.xlu0 %v15601_v52, %s11232_s17 }
 0x60d   : > { %9530 = vrot.lane.b32.xlu1 %v15607_v3, %s11232_s17 }
 0x60e   : > { %v15887_v37 = vpop.permute.xlu0 %7494 }
 0x60f   : > { %v15889_v58 = vpop.permute.xlu1 %7496 }
 0x610   : > { %17908 = vst [vmem:[#allocation13_spill] sm:$0xff] %v15889_v58  ;;  %8374 = vrot.lane.b32.xlu0 %v11106_v56, %s11220_s30 }
 0x611   : > { %8443 = vrot.lane.b32.xlu1 %v11109_v36, %s11219_s19 }
 0x612   : > { %v15893_v29 = vpop.permute.xlu0 %7559 }
 0x613   : > { %v15895_v52 = vpop.permute.xlu1 %7561 }
 0x614   : > { %8512 = vrot.lane.b32.xlu0 %v11112_v27, %s11218_s8 }
 0x615   : > { %8581 = vrot.lane.b32.xlu1 %v11115_v57, %s11217_s26 }
 0x616   : > { %v15899_v18 = vpop.permute.xlu0 %7563 }
 0x617   : > { %v15901_v3 = vpop.permute.xlu1 %7565 }
 0x618   : > { %17909 = vst [vmem:[#allocation15_spill] sm:$0xff] %v15901_v3 }
 0x61a   : > { %v15903_v47 = vpop.permute.xlu0 %7628 }
 0x61b   : > { %v15905_v35 = vpop.permute.xlu1 %7630 }
 0x61e   : > { %v15907_v0 = vpop.permute.xlu0 %7632 }
 0x61f   : > { %v15909_v12 = vpop.permute.xlu1 %7634 }
 0x620   : > { %17910 = vst [vmem:[#allocation20_spill] sm:$0xff] %v15909_v12 }
 0x622   : > { %v15911_v5 = vpop.permute.xlu0 %7737 }
 0x623   : > { %v15913_v1 = vpop.permute.xlu1 %7739 }
 0x626   : > { %v15915_v54 = vpop.permute.xlu0 %7741 }
 0x627   : > { %v15917_v48 = vpop.permute.xlu1 %7743 }
 0x628   : > { %17911 = vst [vmem:[#allocation14_spill] sm:$0xff] %v15917_v48 }
 0x62a   : > { %v15919_v62 = vpop.permute.xlu0 %7806 }
 0x62b   : > { %17912 = vst [vmem:[#allocation17_spill] sm:$0xff] %v15919_v62  ;;  %v15921_v43 = vpop.permute.xlu1 %7808 }
 0x62c   : > { %17913 = vst [vmem:[#allocation18_spill] sm:$0xff] %v15921_v43 }
 0x62e   : > { %v15923_v40 = vpop.permute.xlu0 %7810 }
 0x62f   : > { %17914 = vst [vmem:[#allocation5_spill] sm:$0xff] %v15923_v40  ;;  %v15925_v55 = vpop.permute.xlu1 %7812 }
 0x630   : > { %17915 = vst [vmem:[#allocation22_spill] sm:$0xff] %v15925_v55 }
 0x632   : > { %v15927_v56 = vpop.permute.xlu0 %7875 }
 0x633   : > { %17916 = vst [vmem:[#allocation23_spill] sm:$0xff] %v15927_v56  ;;  %v15929_v61 = vpop.permute.xlu1 %7877 }
 0x634   : > { %17917 = vst [vmem:[#allocation21_spill] sm:$0xff] %v15929_v61 }
 0x636   : > { %v15931_v36 = vpop.permute.xlu0 %7879 }
 0x637   : > { %17918 = vst [vmem:[#allocation27_spill] sm:$0xff] %v15931_v36  ;;  %v15933_v6 = vpop.permute.xlu1 %7881 }
 0x638   : > { %17919 = vst [vmem:[#allocation28_spill] sm:$0xff] %v15933_v6 }
 0x63a   : > { %v15935_v27 = vpop.permute.xlu0 %7944 }
 0x63b   : > { %17920 = vst [vmem:[#allocation26_spill] sm:$0xff] %v15935_v27  ;;  %v15937_v57 = vpop.permute.xlu1 %7946 }
 0x63c   : > { %17921 = vst [vmem:[#allocation33_spill] sm:$0xff] %v15937_v57 }
 0x63e   : > { %v15939_v22 = vpop.permute.xlu0 %7948 }
 0x63f   : > { %17922 = vst [vmem:[#allocation29_spill] sm:$0xff] %v15939_v22  ;;  %v15941_v62 = vpop.permute.xlu1 %7950 }
 0x640   : > { %17923 = vst [vmem:[#allocation37_spill] sm:$0xff] %v15941_v62 }
 0x642   : > { %v15943_v43 = vpop.permute.xlu0 %9001 }
 0x643   : > { %17924 = vst [vmem:[#allocation53_spill] sm:$0xff] %v15943_v43  ;;  %v15945_v40 = vpop.permute.xlu1 %9003 }
 0x644   : > { %17925 = vst [vmem:[#allocation45_spill] sm:$0xff] %v15945_v40 }
 0x646   : > { %v15947_v55 = vpop.permute.xlu0 %9005 }
 0x647   : > { %17926 = vst [vmem:[#allocation56_spill] sm:$0xff] %v15947_v55  ;;  %v15949_v56 = vpop.permute.xlu1 %9007 }
 0x648   : > { %17927 = vst [vmem:[#allocation67_spill] sm:$0xff] %v15949_v56  ;;  %v9021_v36 = vmul.f32 %v15949_v56, %v15859_v21 }
 0x64a   : > { %v11118_v6 = vpack.c.bf16 %v9021_v36, %v9021_v36  ;;  %v15953_v61 = vpop.permute.xlu0 %9070 }
 0x64b   : > { %17928 = vst [vmem:[#allocation40_spill] sm:$0xff] %v15953_v61  ;;  %v15955_v27 = vpop.permute.xlu1 %9072 }
 0x64c   : > { %17929 = vst [vmem:[#allocation38_spill] sm:$0xff] %v15955_v27  ;;  %9044 = vrot.lane.b32.xlu1 %v11118_v6, %s11232_s17 }
 0x64e   : > { %v15962_v40 = vpop.permute.xlu0 %9074 }
 0x64f   : > { %v15958_v22 = vpop.permute.xlu1 %9076 }
 0x650   : > { %17930 = vst [vmem:[#allocation36_spill] sm:$0xff] %v15958_v22  ;;  %v9090_v43 = vmul.f32 %v15958_v22, %v15859_v21 }
 0x652   : > { %v11121_v55 = vpack.c.bf16 %v9090_v43, %v9090_v43  ;;  %v15965_v62 = vpop.permute.xlu0 %9139 }
 0x653   : > { %17931 = vst [vmem:[#allocation42_spill] sm:$0xff] %v15965_v62  ;;  %v15967_v56 = vpop.permute.xlu1 %9141 }
 0x654   : > { %9113 = vrot.lane.b32.xlu0 %v11121_v55, %s11231_s16  ;;  %17932 = vst [vmem:[#allocation43_spill] sm:$0xff] %v15967_v56 }
 0x656   : > { %v15969_v36 = vpop.permute.xlu0 %9143 }
 0x657   : > { %17933 = vst [vmem:[#allocation44_spill] sm:$0xff] %v15969_v36  ;;  %v15971_v61 = vpop.permute.xlu1 %9145 }
 0x658   : > { %17934 = vst [vmem:[#allocation46_spill] sm:$0xff] %v15971_v61 }
 0x65a   : > { %v15973_v27 = vpop.permute.xlu0 %9208 }
 0x65b   : > { %17935 = vst [vmem:[#allocation47_spill] sm:$0xff] %v15973_v27  ;;  %v15975_v6 = vpop.permute.xlu1 %9210 }
 0x65c   : > { %17936 = vst [vmem:[#allocation48_spill] sm:$0xff] %v15975_v6 }
 0x65e   : > { %v15977_v57 = vpop.permute.xlu0 %9212 }
 0x65f   : > { %17937 = vst [vmem:[#allocation49_spill] sm:$0xff] %v15977_v57  ;;  %v15979_v21 = vpop.permute.xlu1 %9214 }
 0x660   : > { %17938 = vst [vmem:[#allocation62_spill] sm:$0xff] %v15979_v21  ;;  %v16001_v21 = vld [vmem:[#allocation2] sm:$0xff] }
 0x662   : > { %v15981_v22 = vpop.permute.xlu0 %9317 }
 0x663   : > { %17939 = vst [vmem:[#allocation50_spill] sm:$0xff] %v15981_v22  ;;  %v15983_v43 = vpop.permute.xlu1 %9319  ;;  %v16005_v22 = vmul.f32 %v15710_v19, %v16001_v21 }
 0x666   : > { %v15985_v55 = vpop.permute.xlu0 %9321 }
 0x667   : > { %v15987_v62 = vpop.permute.xlu1 %9323 }
 0x668   : > { %17940 = vst [vmem:[#allocation51_spill] sm:$0xff] %v15987_v62 }
 0x66a   : > { %v15989_v56 = vpop.permute.xlu0 %9386 }
 0x66b   : > { %17941 = vst [vmem:[#allocation52_spill] sm:$0xff] %v15989_v56  ;;  %v15991_v36 = vpop.permute.xlu1 %9388  ;;  %v16010_v56 = vsel %vm17947_vm7, %v15710_v19, %v15716_v53  ;;  %vm17951_vm7 = vmmov %vm17950_vm1 }
 0x66c   : > { %17942 = vst [vmem:[#allocation59_spill] sm:$0xff] %v15991_v36  ;;  %v16029_v36 = vsel %vm17950_vm1, %v15740_v14, %v15742_v63  ;;  %v16034_v19 = vsel %vm17951_vm7, %v15742_v63, %v15749_v9  ;;  %v16055_v63 = vsel %vm17449_vm2, %v15759_v26, %v15765_v8 }
 0x66d   : > { %17952 = vst [vmem:[#allocation6_spill] sm:$0xff] %v16034_v19  ;;  %17954 = vst [vmem:[#allocation58_spill] sm:$0xff] %v16055_v63  ;;  %v16081_v63 = vsel %vm1060_vm3, %v15781_v23, %v15783_v28  ;;  %v16106_v28 = vsel %vm1031_vm5, %v15807_v42, %v15813_v16 }
 0x66e   : > { %v15993_v61 = vpop.permute.xlu0 %9390 }
 0x66f   : > { %17943 = vst [vmem:[#allocation54_spill] sm:$0xff] %v15993_v61  ;;  %v15995_v27 = vpop.permute.xlu1 %9392  ;;  %v16015_v61 = vsel %vm17948_vm6, %v15716_v53, %v15729_v38  ;;  %vm17953_vm6 = vmmov %vm17950_vm1 }
 0x670   : > { %17944 = vst [vmem:[#allocation55_spill] sm:$0xff] %v15995_v27  ;;  %v16024_v27 = vmul.f32 %v15740_v14, %v16001_v21  ;;  %v16050_v14 = vsel %vm17449_vm2, %v15757_v50, %v15759_v26  ;;  %v16076_v26 = vsel %vm1060_vm3, %v15775_v60, %v15781_v23  ;;  %v16101_v23 = vsel %vm1031_vm5, %v15805_v31, %v15807_v42 }
 0x672   : > { %v15997_v6 = vpop.permute.xlu0 %9455 }
 0x673   : > { %17945 = vst [vmem:[#allocation60_spill] sm:$0xff] %v15997_v6  ;;  %v15999_v57 = vpop.permute.xlu1 %9457  ;;  %v16020_v6 = vsel %vm17949_vm0, %v15729_v38, %v15731_v33  ;;  %v16041_v38 = vsel %vm17953_vm6, %v15749_v9, %v15751_v15  ;;  %v16045_v33 = vmul.f32 %v15757_v50, %v16001_v21  ;;  %v16062_v9 = vsel %vm17449_vm2, %v15765_v8, %v15767_v49 }
 0x674   : > { %17946 = vst [vmem:[#allocation63_spill] sm:$0xff] %v15999_v57  ;;  %v16066_v15 = vmul.f32 %v15773_v13, %v16001_v21  ;;  %v16071_v50 = vsel %vm1060_vm3, %v15773_v13, %v15775_v60  ;;  %v16086_v8 = vsel %vm1102_vm4, %v15789_v30, %v15791_v11  ;;  %v16091_v13 = vsel %vm1102_vm4, %v15791_v11, %v15797_v10 }
 0x675   : > { %v16096_v60 = vsel %vm1102_vm4, %v15797_v10, %v15799_v24  ;;  %v16111_v11 = vsel %vm1031_vm5, %v15813_v16, %v15815_v59  ;;  %vm17956_vm0 = vcmask 64512   ;;  %vm17959_vm6 = vcmask 72704  }
 0x676   : > { %v16036_v53 = vpop.permute.xlu0 %9459  ;;  %v16116_v10 = vsel %vm17956_vm0, %v15821_v45, %v15823_v25  ;;  %vm17957_vm1 = vmmov %vm17956_vm0  ;;  %v16131_v16 = vsel %vm17959_vm6, %v15837_v46, %v15839_v39  ;;  %v16145_v49 = vmul.f32 %v16001_v21, %v15853_v20 }
 0x677   : > { %v16057_v19 = vpop.permute.xlu1 %9461  ;;  %v16121_v24 = vsel %vm17957_vm1, %v15823_v25, %v15829_v34  ;;  %vm17958_vm7 = vmmov %vm17956_vm0  ;;  %vm17964_vm1 = vcmask 449536  }
 0x678   : > { %17955 = vst [vmem:[#allocation11_spill] sm:$0xff] %v16057_v19  ;;  %v16126_v42 = vsel %vm17958_vm7, %v15829_v34, %v15831_v51  ;;  %vm17960_vm2 = vmmov %vm17959_vm6  ;;  %v16150_v34 = vsel %vm17964_vm1, %v15853_v20, %v15855_v7  ;;  %v16169_v20 = vsel %vm284_vm9, %v15875_v32, %v15877_v44 }
 0x679   : > { %v16136_v59 = vsel %vm17960_vm2, %v15839_v39, %v15845_v17  ;;  %vm17962_vm0 = vmmov %vm17960_vm2 }
 0x67a   : > { %17961 = vst [vmem:[#allocation8_spill] sm:$0xff] %v16136_v59  ;;  %v16141_v25 = vsel %vm17962_vm0, %v15845_v17, %v15847_v2  ;;  %vm17965_vm7 = vmmov %vm17964_vm1  ;;  %v9525_v39 = vpop.permute.xlu0 %9524  ;;  %v16164_v2 = vmul.f32 %v16001_v21, %v15875_v32  ;;  %v16188_v32 = vsel %vm356_vm10, %v15893_v29, %v15895_v52  ;;  %v18008_v59 = vld [vmem:[#allocation56_spill] sm:$0xff] }
 0x67b   : > { %17963 = vst [vmem:[#allocation7_spill] sm:$0xff] %v16141_v25  ;;  %v16155_v51 = vsel %vm17965_vm7, %v15855_v7, %v15863_v41  ;;  %vm17967_vm2 = vmmov %vm17964_vm1  ;;  %v16174_v7 = vsel %vm284_vm9, %v15877_v44, %v15887_v37  ;;  %v16193_v44 = vsel %vm356_vm10, %v15895_v52, %v15899_v18  ;;  %v16217_v52 = vsel %vm428_vm11, %v15907_v0, %v15909_v12 }
 0x67c   : > { %17966 = vst [vmem:[#allocation12_spill] sm:$0xff] %v16155_v51  ;;  %v16160_v17 = vsel %vm17967_vm2, %v15863_v41, %v15865_v4  ;;  %17969 = vst [vmem:[#allocation9_spill] sm:$0xff] %v16174_v7  ;;  %v9527_v51 = vpop.permute.xlu1 %9526  ;;  %v16179_v41 = vsel %vm284_vm9, %v15887_v37, %v15889_v58  ;;  %v16183_v4 = vmul.f32 %v16001_v21, %v15893_v29  ;;  %vm18138_vm7 = vcmask 523264  }
 0x67d   : > { %17968 = vst [vmem:[#allocation16_spill] sm:$0xff] %v16160_v17  ;;  %17970 = vst [vmem:[#allocation24_spill] sm:$0xff] %v16179_v41  ;;  %v16198_v7 = vsel %vm356_vm10, %v15899_v18, %v15901_v3  ;;  %v16202_v37 = vmul.f32 %v16001_v21, %v15903_v47  ;;  %v16207_v58 = vsel %vm428_vm11, %v15903_v47, %v15905_v35 }
 0x67e   : > { %17971 = vst [vmem:[#allocation39_spill] sm:$0xff] %v16183_v4  ;;  %17972 = vst [vmem:[#allocation19_spill] sm:$0xff] %v16193_v44  ;;  %v16212_v29 = vsel %vm428_vm11, %v15905_v35, %v15907_v0  ;;  %v16221_v18 = vmul.f32 %v16001_v21, %v15911_v5  ;;  %v16226_v3 = vsel %vm470_vm12, %v15911_v5, %v15913_v1  ;;  %v17979_v0 = vld [vmem:[#allocation17_spill] sm:$0xff] }
 0x67f   : > { %17973 = vst [vmem:[#allocation61_spill] sm:$0xff] %v16198_v7  ;;  %17974 = vst [vmem:[#allocation31_spill] sm:$0xff] %v16212_v29  ;;  %v16231_v47 = vsel %vm470_vm12, %v15913_v1, %v15915_v54  ;;  %v16236_v35 = vsel %vm470_vm12, %v15915_v54, %v15917_v48  ;;  %v16240_v12 = vmul.f32 %v16001_v21, %v17979_v0  ;;  %v17982_v5 = vld [vmem:[#allocation5_spill] sm:$0xff]  ;;  %v17984_v1 = vld [vmem:[#allocation22_spill] sm:$0xff] }
 0x680   : > { %17975 = vst [vmem:[#allocation25_spill] sm:$0xff] %v16217_v52  ;;  %17976 = vst [vmem:[#allocation41_spill] sm:$0xff] %v16221_v18  ;;  %v17981_v52 = vld [vmem:[#allocation18_spill] sm:$0xff]  ;;  %v17986_v54 = vld [vmem:[#allocation23_spill] sm:$0xff]  ;;  %v16290_v41 = vpop.permute.xlu1 %9530  ;;  %v9532_v17 = vsel %vm254_vm15, %v9525_v39, %v9527_v51  ;;  %v9464_v4 = vsel %vm326_vm14, %v15999_v57, %v16036_v53 }
 0x681   : > { %17977 = vst [vmem:[#allocation64_spill] sm:$0xff] %v16231_v47  ;;  %17978 = vst [vmem:[#allocation73_spill] sm:$0xff] %v16236_v35  ;;  %v16245_v29 = vsel %vm398_vm13, %v17979_v0, %v17981_v52  ;;  %v16250_v7 = vsel %vm398_vm13, %v17981_v52, %v17982_v5  ;;  %v16255_v47 = vsel %vm398_vm13, %v17982_v5, %v17984_v1  ;;  %v17988_v35 = vld [vmem:[#allocation21_spill] sm:$0xff]  ;;  %v17990_v0 = vld [vmem:[#allocation27_spill] sm:$0xff]  ;;  %v9529_v52 = vpop.permute.xlu0 %9528 }
 0x682   : > { %17980 = vst [vmem:[#allocation71_spill] sm:$0xff] %v16240_v12  ;;  %17983 = vst [vmem:[#allocation77_spill] sm:$0xff] %v16250_v7  ;;  %v16259_v48 = vmul.f32 %v16001_v21, %v17986_v54  ;;  %v16264_v12 = vsel %vm326_vm14, %v17986_v54, %v17988_v35  ;;  %v16269_v44 = vsel %vm326_vm14, %v17988_v35, %v17990_v0  ;;  %v17992_v7 = vld [vmem:[#allocation28_spill] sm:$0xff]  ;;  %v17994_v1 = vld [vmem:[#allocation26_spill] sm:$0xff] }
 0x683   : > { %17985 = vst [vmem:[#allocation75_spill] sm:$0xff] %v16255_v47  ;;  %17989 = vst [vmem:[#allocation74_spill] sm:$0xff] %v16264_v12  ;;  %v16274_v5 = vsel %vm326_vm14, %v17990_v0, %v17992_v7  ;;  %v16278_v47 = vmul.f32 %v16001_v21, %v17994_v1  ;;  %v17998_v18 = vld [vmem:[#allocation29_spill] sm:$0xff]  ;;  %v9534_v25 = vsel %vm254_vm15, %v9529_v52, %v16290_v41 }
 0x684   : > { %17987 = vst [vmem:[#allocation68_spill] sm:$0xff] %v16259_v48  ;;  %17991 = vst [vmem:[#allocation72_spill] sm:$0xff] %v16269_v44  ;;  %v17996_v48 = vld [vmem:[#allocation33_spill] sm:$0xff] }
 0x685   : > { %17993 = vst [vmem:[#allocation78_spill] sm:$0xff] %v16274_v5  ;;  %17995 = vst [vmem:[#allocation76_spill] sm:$0xff] %v16278_v47  ;;  %v16283_v54 = vsel %vm254_vm15, %v17994_v1, %v17996_v48  ;;  %v16288_v35 = vsel %vm254_vm15, %v17996_v48, %v17998_v18  ;;  %v18001_v12 = vld [vmem:[#allocation37_spill] sm:$0xff] }
 0x686   : > { %17997 = vst [vmem:[#allocation17_spill] sm:$0xff] %v16283_v54  ;;  %17999 = vst [vmem:[#allocation18_spill] sm:$0xff] %v16288_v35  ;;  %v16295_v0 = vsel %vm254_vm15, %v17998_v18, %v18001_v12  ;;  %v18003_v7 = vld [vmem:[#allocation45_spill] sm:$0xff]  ;;  %v9465_v18 = vsel %vm326_vm14, %v16036_v53, %v16057_v19  ;;  %v18010_v53 = vld [vmem:[#allocation67_spill] sm:$0xff] }
 0x687   : > { %18000 = vst [vmem:[#allocation5_spill] sm:$0xff] %v16290_v41  ;;  %18002 = vst [vmem:[#allocation23_spill] sm:$0xff] %v16295_v0  ;;  %v18004_v5 = vld [vmem:[#allocation53_spill] sm:$0xff] }
 0x688   : > { %vm18005_vm6 = vmmov %vm17964_vm1 }
 0x689   : > { %v16300_v47 = vsel %vm18005_vm6, %v18004_v5, %v18003_v7  ;;  %v9533_v5 = vsel %vm254_vm15, %v9527_v51, %v9529_v52  ;;  %vm18009_vm0 = vmmov %vm17964_vm1  ;;  %vm18152_vm6 = vcmask 72704  }
 0x68a   : > { %18006 = vst [vmem:[#allocation21_spill] sm:$0xff] %v16300_v47  ;;  %vm18011_vm1 = vmmov %vm18009_vm0 }
 0x68b   : > { %v16332_v51 = vsel %vm18011_vm1, %v18008_v59, %v18010_v53  ;;  %v18015_v53 = vld [vmem:[#allocation38_spill] sm:$0xff]  ;;  %vm18139_vm2 = vmmov %vm18138_vm7 }
 0x68c   : > { %vm18154_vm1 = vmmov %vm18152_vm6 }
 0x69a   : > { %v7348_v44 = vpop.f32.mrb[16].mxu0 }
 0x69b   : > { %v16302_v1 = vmax.f32 %v7348_v44, 0.0  ;;  %v7350_v54 = vpop.f32.mrb[17].mxu0 }
 0x69c   : > { %v7389_v48 = vpop.f32.mrb[16].mxu1  ;;  %v16305_v35 = vmax.f32 %v7350_v54, 0.0  ;;  %v7352_v12 = vpop.f32.mrb[18].mxu0 }
 0x69d   : > { %7404 = vst [vmem:[#allocation2 + $0x8] sm:$0xff] %v16302_v1  ;;  %v16315_v44 = vmax.f32 %v7389_v48, 0.0  ;;  %v7391_v47 = vpop.f32.mrb[17].mxu1  ;;  %v7353_v0 = vpop.f32.mrb[19].mxu0  ;;  %v16318_v54 = vmul.f32 %v9525_v39, %v16302_v1  ;;  %v11075_v57 = vpack.c.bf16 %v16302_v1, %v16001_v21  ;;  %v16327_v12 = vsel %vm18009_vm0, %v18003_v7, %v18008_v59 }
 0x69e   : > { %7405 = vst [vmem:[#allocation2 + $0x10] sm:$0xff] %v16305_v35  ;;  %v16335_v39 = vmax.f32 %v7391_v47, 0.0  ;;  %v7393_v0 = vpop.f32.mrb[18].mxu1  ;;  %v16338_v52 = vmul.f32 %v9532_v17, %v16305_v35  ;;  %v8119_v47 = vmul.f32 %v16029_v36, %v16302_v1  ;;  %v18016_v17 = vld [vmem:[#allocation40_spill] sm:$0xff]  ;;  %v16369_v36 = vsel %vm284_vm9, %v18015_v53, %v15962_v40 }
 0x69f   : > { %18007 = vst [vmem:[#allocation27_spill] sm:$0xff] %v16318_v54  ;;  %7406 = vst [vmem:[#allocation2 + $0x18] sm:$0xff] %v16315_v44  ;;  %v16342_v21 = vmul.f32 %v9464_v4, %v16315_v44  ;;  %v7394_v7 = vpop.f32.mrb[19].mxu1  ;;  %v16345_v48 = vmul.f32 %v9533_v5, %v16315_v44  ;;  %7707 = vrot.lane.b32.xlu0 %v11075_v57, %s11234_s20  ;;  %v11076_v59 = vpack.c.bf16 %v16315_v44, %v16305_v35  ;;  %v18022_v54 = vld [vmem:[#allocation42_spill] sm:$0xff]  ;;  %vm18153_vm0 = vcmask 64512  }
 0x6a0   : > { %18012 = vst [vmem:[#allocation26_spill] sm:$0xff] %v16338_v52  ;;  %v16355_v0 = vsel %vm284_vm9, %v18016_v17, %v18015_v53  ;;  %7407 = vst [vmem:[#allocation2 + $0x20] sm:$0xff] %v16335_v39  ;;  %v16359_v4 = vmul.f32 %v9465_v18, %v16335_v39  ;;  %v16364_v57 = vmul.f32 %v9534_v25, %v16335_v39  ;;  %v18020_v7 = vld [vmem:[#allocation36_spill] sm:$0xff]  ;;  %v18021_v25 = vld [vmem:[#allocation43_spill] sm:$0xff] }
 0x6a1   : > { %18013 = vst [vmem:[#allocation33_spill] sm:$0xff] %v16342_v21  ;;  %18014 = vst [vmem:[#allocation29_spill] sm:$0xff] %v16345_v48  ;;  %v16374_v41 = vsel %vm284_vm9, %v15962_v40, %v18020_v7  ;;  %7709 = vrot.lane.b32.xlu1 %v11076_v59, %s11234_s20  ;;  %v11077_v18 = vpack.c.bf16 %v16335_v39, %v16335_v39  ;;  %v8050_v5 = vmul.f32 %v16010_v56, %v16302_v1  ;;  %v18023_v7 = vld [vmem:[#allocation44_spill] sm:$0xff]  ;;  %v18024_v56 = vld [vmem:[#allocation46_spill] sm:$0xff] }
 0x6a2   : > { %18017 = vst [vmem:[#allocation45_spill] sm:$0xff] %v16355_v0  ;;  %18018 = vst [vmem:[#allocation56_spill] sm:$0xff] %v16359_v4  ;;  %v16384_v52 = vsel %vm356_vm10, %v18022_v54, %v18021_v25  ;;  %v8257_v59 = vmul.f32 %v16071_v50, %v16302_v1  ;;  %v16395_v19 = vsel %vm356_vm10, %v18021_v25, %v18023_v7  ;;  %v18025_v48 = vld [vmem:[#allocation48_spill] sm:$0xff]  ;;  %v18027_v21 = vld [vmem:[#allocation49_spill] sm:$0xff] }
 0x6a3   : > { %18019 = vst [vmem:[#allocation67_spill] sm:$0xff] %v16364_v57  ;;  %v16400_v0 = vsel %vm356_vm10, %v18023_v7, %v18024_v56  ;;  %7711 = vrot.lane.b32.xlu0 %v11077_v18, %s11234_s20  ;;  %v11093_v53 = vpack.c.bf16 %v8119_v47, %v16024_v27  ;;  %v8188_v40 = vmul.f32 %v16050_v14, %v16302_v1  ;;  %v18026_v57 = vld [vmem:[#allocation47_spill] sm:$0xff]  ;;  %v18028_v4 = vld [vmem:[#allocation62_spill] sm:$0xff] }
 0x6a4   : > { %v16409_v50 = vsel %vm428_vm11, %v18026_v57, %v18025_v48  ;;  %v16414_v25 = vsel %vm428_vm11, %v18025_v48, %v18027_v21  ;;  %v16419_v7 = vsel %vm428_vm11, %v18027_v21, %v18028_v4  ;;  %v7507_v27 = vmul.f32 %v16169_v20, %v16302_v1  ;;  %v18029_v14 = vld [vmem:[#allocation50_spill] sm:$0xff] }
 0x6a5   : > { %v16426_v47 = vsel %vm470_vm12, %v18029_v14, %v15983_v43  ;;  %8141 = vrot.lane.b32.xlu1 %v11093_v53, %s11223_s11  ;;  %v11090_v18 = vpack.c.bf16 %v8050_v5, %v16005_v22  ;;  %v7438_v48 = vmul.f32 %v16150_v34, %v16302_v1  ;;  %v16434_v56 = vmul.f32 %v16015_v61, %v16305_v35  ;;  %v18056_v4 = vld [vmem:[#allocation54_spill] sm:$0xff] }
 0x6a6   : > { %v16439_v20 = vsel %vm470_vm12, %v15983_v43, %v15985_v55  ;;  %v16444_v21 = vsel %vm470_vm12, %v15985_v55, %v15987_v62  ;;  %v11099_v53 = vpack.c.bf16 %v8257_v59, %v16066_v15  ;;  %v16449_v22 = vmul.f32 %v16020_v6, %v16315_v44  ;;  %v18030_v43 = vld [vmem:[#allocation6_spill] sm:$0xff]  ;;  %v18055_v62 = vld [vmem:[#allocation52_spill] sm:$0xff] }
 0x6a7   : > { %8072 = vrot.lane.b32.xlu0 %v11090_v18, %s11224_s25  ;;  %v11096_v61 = vpack.c.bf16 %v8188_v40, %v16045_v33  ;;  %v7645_v34 = vmul.f32 %v16207_v58, %v16302_v1  ;;  %v16457_v5 = vmul.f32 %v18030_v43, %v16305_v35  ;;  %v16461_v55 = vmul.f32 %v16041_v38, %v16315_v44  ;;  %v18031_v59 = vld [vmem:[#allocation58_spill] sm:$0xff] }
 0x6a8   : > { %v11066_v15 = vpack.c.bf16 %v7507_v27, %v16164_v2  ;;  %v16468_v18 = vmul.f32 %v18031_v59, %v16305_v35  ;;  %v16472_v33 = vmul.f32 %v16062_v9, %v16315_v44  ;;  %v11063_v58 = vpack.c.bf16 %v7438_v48, %v16145_v49 }
 0x6a9   : > { %8279 = vrot.lane.b32.xlu1 %v11099_v53, %s11221_s14  ;;  %v7576_v38 = vmul.f32 %v16188_v32, %v16302_v1  ;;  %v7754_v2 = vmul.f32 %v16226_v3, %v16302_v1  ;;  %v16486_v9 = vmul.f32 %v16076_v26, %v16305_v35  ;;  %v16490_v53 = vmul.f32 %v16081_v63, %v16315_v44 }
 0x6aa   : > { %v16494_v49 = vmul.f32 %v16091_v13, %v16315_v44  ;;  %v11072_v3 = vpack.c.bf16 %v7645_v34, %v16202_v37  ;;  %v7823_v32 = vmul.f32 %v16245_v29, %v16302_v1  ;;  %v16502_v48 = vmul.f32 %v16096_v60, %v16335_v39 }
 0x6ab   : > { %8210 = vrot.lane.b32.xlu0 %v11096_v61, %s11222_s27  ;;  %v16506_v26 = vmul.f32 %v15789_v30, %v16302_v1  ;;  %v16512_v13 = vmul.f32 %v16086_v8, %v16305_v35  ;;  %v16516_v37 = vmul.f32 %v15805_v31, %v16302_v1  ;;  %v16520_v29 = vmul.f32 %v16101_v23, %v16305_v35 }
 0x6ac   : > { %v16527_v60 = vmul.f32 %v16106_v28, %v16315_v44  ;;  %v16531_v8 = vmul.f32 %v16111_v11, %v16335_v39  ;;  %v16535_v31 = vmul.f32 %v16121_v24, %v16315_v44  ;;  %v16543_v34 = vmul.f32 %v16126_v42, %v16335_v39 }
 0x6ad   : > { %7529 = vrot.lane.b32.xlu1 %v11066_v15, %s11231_s16  ;;  %v16547_v28 = vmul.f32 %v15821_v45, %v16302_v1  ;;  %v16554_v24 = vmul.f32 %v16116_v10, %v16305_v35  ;;  %v16558_v43 = vmul.f32 %v15837_v46, %v16302_v1  ;;  %v16562_v42 = vmul.f32 %v16131_v16, %v16305_v35  ;;  %v18035_v15 = vld [vmem:[#allocation8_spill] sm:$0xff]  ;;  %v18041_v46 = vld [vmem:[#allocation39_spill] sm:$0xff]  ;;  %v18049_v45 = vld [vmem:[#allocation41_spill] sm:$0xff] }
 0x6ae   : > { %v16568_v59 = vmul.f32 %v18035_v15, %v16315_v44  ;;  %v18039_v10 = vld [vmem:[#allocation12_spill] sm:$0xff]  ;;  %v11069_v16 = vpack.c.bf16 %v7576_v38, %v18041_v46  ;;  %v11078_v23 = vpack.c.bf16 %v7754_v2, %v18049_v45  ;;  %v18057_v45 = vld [vmem:[#allocation17_spill] sm:$0xff] }
 0x6af   : > { %18032 = vst [vmem:[#allocation38_spill] sm:$0xff] %v16547_v28  ;;  %7460 = vrot.lane.b32.xlu0 %v11063_v58, %s11232_s17  ;;  %18033 = vst [vmem:[#allocation40_spill] sm:$0xff] %v16558_v43  ;;  %v18037_v58 = vld [vmem:[#allocation7_spill] sm:$0xff]  ;;  %v16576_v61 = vmul.f32 %v18039_v10, %v16305_v35  ;;  %v18042_v15 = vld [vmem:[#allocation16_spill] sm:$0xff] }
 0x6b0   : > { %18034 = vst [vmem:[#allocation36_spill] sm:$0xff] %v16562_v42  ;;  %18036 = vst [vmem:[#allocation43_spill] sm:$0xff] %v16568_v59  ;;  %v16572_v11 = vmul.f32 %v18037_v58, %v16335_v39  ;;  %v16586_v30 = vmul.f32 %v18042_v15, %v16315_v44  ;;  %v18044_v58 = vld [vmem:[#allocation74_spill] sm:$0xff]  ;;  %v18047_v38 = vld [vmem:[#allocation24_spill] sm:$0xff] }
 0x6b1   : > { %18040 = vst [vmem:[#allocation44_spill] sm:$0xff] %v16576_v61  ;;  %7667 = vrot.lane.b32.xlu1 %v11072_v3, %s11229_s13  ;;  %v7892_v63 = vmul.f32 %v18044_v58, %v16302_v1  ;;  %v18045_v3 = vld [vmem:[#allocation9_spill] sm:$0xff]  ;;  %v16598_v46 = vmul.f32 %v18047_v38, %v16315_v44  ;;  %v18050_v58 = vld [vmem:[#allocation19_spill] sm:$0xff]  ;;  %v18073_v42 = vld [vmem:[#allocation76_spill] sm:$0xff] }
 0x6b2   : > { %18038 = vst [vmem:[#allocation42_spill] sm:$0xff] %v16572_v11  ;;  %18043 = vst [vmem:[#allocation48_spill] sm:$0xff] %v16586_v30  ;;  %v16594_v27 = vmul.f32 %v18045_v3, %v16305_v35  ;;  %v16606_v40 = vmul.f32 %v18050_v58, %v16305_v35  ;;  %v18052_v10 = vld [vmem:[#allocation61_spill] sm:$0xff]  ;;  %v18054_v3 = vld [vmem:[#allocation59_spill] sm:$0xff] }
 0x6b3   : > { %18048 = vst [vmem:[#allocation49_spill] sm:$0xff] %v16598_v46  ;;  %7598 = vrot.lane.b32.xlu0 %v11069_v16, %s11230_s15  ;;  %v16610_v6 = vmul.f32 %v18052_v10, %v16315_v44  ;;  %v16615_v38 = vsel %vm398_vm13, %v18055_v62, %v18054_v3  ;;  %v16620_v2 = vsel %vm398_vm13, %v18054_v3, %v18056_v4  ;;  %v18058_v10 = vld [vmem:[#allocation71_spill] sm:$0xff]  ;;  %v18060_v3 = vld [vmem:[#allocation25_spill] sm:$0xff]  ;;  %v18062_v58 = vld [vmem:[#allocation30_spill] sm:$0xff] }
 0x6b4   : > { %18046 = vst [vmem:[#allocation47_spill] sm:$0xff] %v16594_v27  ;;  %18051 = vst [vmem:[#allocation50_spill] sm:$0xff] %v16606_v40  ;;  %v7961_v16 = vmul.f32 %v18057_v45, %v16302_v1  ;;  %v11081_v15 = vpack.c.bf16 %v7823_v32, %v18058_v10  ;;  %v18059_v30 = vld [vmem:[#allocation31_spill] sm:$0xff]  ;;  %v16636_v11 = vmul.f32 %v18060_v3, %v16315_v44  ;;  %v18061_v45 = vld [vmem:[#allocation32_spill] sm:$0xff] }
 0x6b5   : > { %18053 = vst [vmem:[#allocation6_spill] sm:$0xff] %v16610_v6  ;;  %7776 = vrot.lane.b32.xlu1 %v11078_v23, %s11228_s10  ;;  %v16632_v59 = vmul.f32 %v18059_v30, %v16305_v35  ;;  %v8053_v43 = vmul.f32 %v18061_v45, %v16335_v39  ;;  %v8122_v27 = vmul.f32 %v18062_v58, %v16335_v39  ;;  %v18063_v23 = vld [vmem:[#allocation64_spill] sm:$0xff]  ;;  %v18065_v10 = vld [vmem:[#allocation73_spill] sm:$0xff]  ;;  %v18070_v58 = vld [vmem:[#allocation75_spill] sm:$0xff] }
 0x6b6   : > { %v16644_v32 = vmul.f32 %v18063_v23, %v16305_v35  ;;  %v16648_v61 = vmul.f32 %v18065_v10, %v16315_v44  ;;  %v18067_v30 = vld [vmem:[#allocation68_spill] sm:$0xff]  ;;  %v18068_v45 = vld [vmem:[#allocation77_spill] sm:$0xff]  ;;  %v16660_v46 = vmul.f32 %v18070_v58, %v16315_v44  ;;  %v18072_v23 = vld [vmem:[#allocation55_spill] sm:$0xff]  ;;  %v11087_v28 = vpack.c.bf16 %v7961_v16, %v18073_v42 }
 0x6b7   : > { %7845 = vrot.lane.b32.xlu0 %v11081_v15, %s11227_s9  ;;  %v11084_v40 = vpack.c.bf16 %v7892_v63, %v18067_v30  ;;  %v16656_v6 = vmul.f32 %v18068_v45, %v16305_v35  ;;  %v9396_v10 = vsel %vm398_vm13, %v18056_v4, %v18072_v23  ;;  %v18074_v15 = vld [vmem:[#allocation72_spill] sm:$0xff]  ;;  %v18075_v58 = vld [vmem:[#allocation78_spill] sm:$0xff]  ;;  %v18077_v42 = vld [vmem:[#allocation23_spill] sm:$0xff] }
 0x6b8   : > { %18064 = vst [vmem:[#allocation58_spill] sm:$0xff] %v16644_v32  ;;  %18066 = vst [vmem:[#allocation8_spill] sm:$0xff] %v16648_v61  ;;  %v16670_v30 = vmul.f32 %v18074_v15, %v16305_v35  ;;  %v16677_v3 = vmul.f32 %v18075_v58, %v16315_v44  ;;  %v18076_v4 = vld [vmem:[#allocation18_spill] sm:$0xff]  ;;  %v16685_v16 = vmul.f32 %v18077_v42, %v16315_v44  ;;  %v18078_v63 = vld [vmem:[#allocation63_spill] sm:$0xff] }
 0x6b9   : > { %18069 = vst [vmem:[#allocation7_spill] sm:$0xff] %v16656_v6  ;;  %18071 = vst [vmem:[#allocation12_spill] sm:$0xff] %v16660_v46  ;;  %7914 = vrot.lane.b32.xlu1 %v11084_v40, %s11226_s7  ;;  %v16681_v23 = vmul.f32 %v18076_v4, %v16305_v35  ;;  %v18079_v15 = vld [vmem:[#allocation60_spill] sm:$0xff]  ;;  %v11092_v40 = vpack.c.bf16 %v8053_v43, %v8053_v43  ;;  %v11095_v61 = vpack.c.bf16 %v8122_v27, %v8122_v27  ;;  %v18080_v45 = vld [vmem:[#allocation53_spill] sm:$0xff] }
 0x6ba   : > { %v9463_v32 = vsel %vm326_vm14, %v18079_v15, %v18078_v63  ;;  %v16692_v6 = vmul.f32 %v18080_v45, %v16302_v1  ;;  %v18081_v42 = vld [vmem:[#allocation21_spill] sm:$0xff]  ;;  %v16705_v43 = vmul.f32 %v16327_v12, %v16315_v44  ;;  %v18082_v27 = vld [vmem:[#allocation35_spill] sm:$0xff]  ;;  %v16715_v45 = vmul.f32 %v16369_v36, %v16315_v44 }
 0x6bb   : > { %7983 = vrot.lane.b32.xlu0 %v11087_v28, %s11225_s6  ;;  %v16701_v46 = vmul.f32 %v18081_v42, %v16305_v35  ;;  %v8191_v63 = vmul.f32 %v18082_v27, %v16335_v39  ;;  %v16711_v28 = vmul.f32 %v16332_v51, %v16335_v39  ;;  %v16719_v4 = vmul.f32 %v16374_v41, %v16335_v39  ;;  %v18084_v27 = vld [vmem:[#allocation45_spill] sm:$0xff] }
 0x6bc   : > { %v18083_v12 = vpack.c.bf16 %v16449_v22, %v16434_v56  ;;  %v16729_v51 = vmul.f32 %v18016_v17, %v16302_v1  ;;  %v16733_v36 = vmul.f32 %v18084_v27, %v16305_v35  ;;  %v16737_v41 = vmul.f32 %v18022_v54, %v16302_v1 }
 0x6bd   : > { %v11116_v42 = vpack.c.bf16 %v16701_v46, %v16692_v6  ;;  %v16745_v22 = vmul.f32 %v16384_v52, %v16305_v35  ;;  %v16749_v17 = vmul.f32 %v16395_v19, %v16315_v44  ;;  %v16758_v58 = vmul.f32 %v16400_v0, %v16335_v39 }
 0x6be   : > { %8074 = vrot.lane.b32.xlu1 %v18083_v12, %s11224_s25  ;;  %v18085_v12 = vld [vmem:[#allocation34_spill] sm:$0xff]  ;;  %v16762_v52 = vmul.f32 %v18026_v57, %v16302_v1  ;;  %v16776_v27 = vmul.f32 %v16419_v7, %v16335_v39  ;;  %v16783_v57 = vpack.c.bf16 %v16305_v35, %v16302_v1  ;;  %v16799_v0 = vmul.f32 %v16426_v47, %v16305_v35 }
 0x6bf   : > { %8076 = vrot.lane.b32.xlu0 %v11092_v40, %s11224_s25  ;;  %v8260_v54 = vmul.f32 %v18085_v12, %v16335_v39  ;;  %v16768_v40 = vmul.f32 %v16409_v50, %v16305_v35  ;;  %v16772_v12 = vmul.f32 %v16414_v25, %v16315_v44  ;;  %v16787_v50 = vpack.c.bf16 %v16335_v39, %v16315_v44 }
 0x6c0   : > { %v16791_v25 = vmul.f32 %v18029_v14, %v16302_v1  ;;  %v16803_v19 = vmul.f32 %v16439_v20, %v16315_v44  ;;  %v18086_v56 = vpack.c.bf16 %v16461_v55, %v16457_v5  ;;  %v16811_v14 = vmul.f32 %v16444_v21, %v16335_v39 }
 0x6c1   : > { %v11125_v7 = vpack.c.bf16 %v16768_v40, %v16762_v52  ;;  %v16819_v47 = vmul.f32 %v16615_v38, %v16305_v35  ;;  %v16823_v20 = vmul.f32 %v16620_v2, %v16315_v44  ;;  %v16828_v55 = vmul.f32 %v9396_v10, %v16335_v39 }
 0x6c2   : > { %8145 = vrot.lane.b32.xlu1 %v11095_v61, %s11223_s11  ;;  %v16815_v61 = vmul.f32 %v18055_v62, %v16302_v1  ;;  %v11131_v5 = vpack.c.bf16 %v16799_v0, %v16791_v25  ;;  %v16832_v21 = vmul.f32 %v18079_v15, %v16302_v1  ;;  %v16835_v62 = vmul.f32 %v9463_v32, %v16305_v35 }
 0x6c3   : > { %8143 = vrot.lane.b32.xlu0 %v18086_v56, %s11223_s11  ;;  %v18087_v38 = vpack.c.bf16 %v16472_v33, %v16468_v18  ;;  %v11098_v44 = vpack.c.bf16 %v8191_v63, %v8191_v63  ;;  %v11132_v2 = vpack.c.bf16 %v16811_v14, %v16803_v19  ;;  %v11135_v56 = vpack.c.bf16 %v16828_v55, %v16823_v20 }
 0x6c4   : > { %v11134_v10 = vpack.c.bf16 %v16819_v47, %v16815_v61  ;;  %v11137_v1 = vpack.c.bf16 %v16835_v62, %v16832_v21  ;;  %v11101_v35 = vpack.c.bf16 %v8260_v54, %v8260_v54  ;;  %v18088_v18 = vpack.c.bf16 %v16490_v53, %v16486_v9  ;;  %v18142_v47 = vld [vmem:[#allocation56_spill] sm:$0xff] }
 0x6c5   : > { %v18089_v33 = vpack.c.bf16 %v16502_v48, %v16494_v49  ;;  %v18090_v32 = vpack.c.bf16 %v16512_v13, %v16506_v26  ;;  %v18091_v15 = vpack.c.bf16 %v16520_v29, %v16516_v37  ;;  %v18092_v9 = vpack.c.bf16 %v16531_v8, %v16527_v60  ;;  %v18094_v49 = vld [vmem:[#allocation38_spill] sm:$0xff]  ;;  %v18096_v26 = vld [vmem:[#allocation36_spill] sm:$0xff]  ;;  %v18101_v8 = vld [vmem:[#allocation43_spill] sm:$0xff] }
 0x6c6   : > { %8212 = vrot.lane.b32.xlu1 %v18087_v38, %s11222_s27  ;;  %v18093_v53 = vpack.c.bf16 %v16543_v34, %v16535_v31  ;;  %v18095_v48 = vpack.c.bf16 %v16554_v24, %v18094_v49  ;;  %v18097_v13 = vld [vmem:[#allocation40_spill] sm:$0xff]  ;;  %v18099_v29 = vld [vmem:[#allocation10_spill] sm:$0xff]  ;;  %v18103_v31 = vld [vmem:[#allocation13_spill] sm:$0xff]  ;;  %v18132_v6 = vpack.c.bf16 %v16733_v36, %v16729_v51  ;;  %v18133_v46 = vpack.c.bf16 %v16745_v22, %v16737_v41 }
 0x6c7   : > { %8214 = vrot.lane.b32.xlu0 %v11098_v44, %s11222_s27  ;;  %v18098_v37 = vpack.c.bf16 %v18096_v26, %v18097_v13  ;;  %v7441_v63 = vmul.f32 %v18099_v29, %v16335_v39  ;;  %v18100_v60 = vld [vmem:[#allocation42_spill] sm:$0xff]  ;;  %v7510_v34 = vmul.f32 %v18103_v31, %v16335_v39  ;;  %v18104_v38 = vld [vmem:[#allocation48_spill] sm:$0xff] }
 0x6c8   : > { %v18102_v54 = vpack.c.bf16 %v18100_v60, %v18101_v8  ;;  %v18105_v24 = vld [vmem:[#allocation44_spill] sm:$0xff]  ;;  %v18112_v26 = vld [vmem:[#allocation6_spill] sm:$0xff] }
 0x6c9   : > { %v18106_v44 = vpack.c.bf16 %v18104_v38, %v18105_v24  ;;  %v18111_v49 = vld [vmem:[#allocation20_spill] sm:$0xff]  ;;  %v18113_v13 = vld [vmem:[#allocation50_spill] sm:$0xff] }
 0x6ca   : > { %8283 = vrot.lane.b32.xlu1 %v11101_v35, %s11221_s14  ;;  %v11065_v35 = vpack.c.bf16 %v7441_v63, %v7441_v63  ;;  %v18115_v60 = vld [vmem:[#allocation14_spill] sm:$0xff]  ;;  %v18118_v24 = vld [vmem:[#allocation8_spill] sm:$0xff] }
 0x6cb   : > { %8281 = vrot.lane.b32.xlu0 %v18088_v18, %s11221_s14  ;;  %v11068_v18 = vpack.c.bf16 %v7510_v34, %v7510_v34  ;;  %v7757_v8 = vmul.f32 %v18115_v60, %v16335_v39  ;;  %v18117_v34 = vld [vmem:[#allocation22_spill] sm:$0xff]  ;;  %v9268_v22 = vld [vmem:[#allocation2 + $0x28] sm:$0xff] }
 0x6cc   : > { %v7826_v38 = vmul.f32 %v18117_v34, %v16335_v39  ;;  %v11130_v60 = vpack.c.bf16 %v9268_v22, %v9268_v22 }
 0x6cd   : > { %v11080_v31 = vpack.c.bf16 %v7757_v8, %v7757_v8  ;;  %v18137_v8 = vld [vmem:[#allocation51_spill] sm:$0xff] }
 0x6ce   : > { %8372 = vrot.lane.b32.xlu1 %v18089_v33, %s11220_s30  ;;  %v18107_v33 = vld [vmem:[#allocation15_spill] sm:$0xff] }
 0x6cf   : > { %8370 = vrot.lane.b32.xlu0 %v18090_v32, %s11220_s30  ;;  %v7579_v32 = vmul.f32 %v18107_v33, %v16335_v39 }
 0x6d1   : > { %v11071_v29 = vpack.c.bf16 %v7579_v32, %v7579_v32  ;;  %v18122_v32 = vld [vmem:[#allocation12_spill] sm:$0xff] }
 0x6d2   : > { %8439 = vrot.lane.b32.xlu1 %v18091_v15, %s11219_s19  ;;  %v18108_v15 = vld [vmem:[#allocation49_spill] sm:$0xff] }
 0x6d3   : > { %8441 = vrot.lane.b32.xlu0 %v18092_v9, %s11219_s19  ;;  %v18109_v9 = vld [vmem:[#allocation47_spill] sm:$0xff] }
 0x6d6   : > { %8510 = vrot.lane.b32.xlu1 %v18093_v53, %s11218_s8  ;;  %v18110_v53 = vpack.c.bf16 %v18108_v15, %v18109_v9  ;;  %v18123_v15 = vld [vmem:[#allocation7_spill] sm:$0xff] }
 0x6d7   : > { %8508 = vrot.lane.b32.xlu0 %v18095_v48, %s11218_s8  ;;  %v7648_v48 = vmul.f32 %v18111_v49, %v16335_v39  ;;  %v18124_v9 = vpack.c.bf16 %v18122_v32, %v18123_v15 }
 0x6d9   : > { %v11074_v63 = vpack.c.bf16 %v7648_v48, %v7648_v48  ;;  %v18126_v48 = vpack.c.bf16 %v16677_v3, %v16670_v30  ;;  %v18129_v3 = vpack.c.bf16 %v16719_v4, %v16715_v45  ;;  %v18131_v30 = vld [vmem:[#allocation46_spill] sm:$0xff]  ;;  %v18134_v45 = vpack.c.bf16 %v16758_v58, %v16749_v17 }
 0x6da   : > { %8577 = vrot.lane.b32.xlu1 %v18098_v37, %s11217_s26  ;;  %v18114_v37 = vpack.c.bf16 %v18112_v26, %v18113_v13  ;;  %v18127_v26 = vpack.c.bf16 %v16685_v16, %v16681_v23  ;;  %v18130_v23 = vld [vmem:[#allocation57_spill] sm:$0xff]  ;;  %v18136_v58 = vpack.c.bf16 %v16776_v27, %v16772_v12 }
 0x6db   : > { %8579 = vrot.lane.b32.xlu0 %v18102_v54, %s11217_s26  ;;  %v18116_v54 = vpack.c.bf16 %v16636_v11, %v16632_v59  ;;  %v11083_v11 = vpack.c.bf16 %v7826_v38, %v7826_v38  ;;  %v9159_v16 = vmul.f32 %v18131_v30, %v18130_v23  ;;  %v9337_v27 = vmul.f32 %v18137_v8, %v18130_v23 }
 0x6de   : > { %7462 = vrot.lane.b32.xlu1 %v18106_v44, %s11232_s17  ;;  %v18119_v44 = vld [vmem:[#allocation58_spill] sm:$0xff] }
 0x6df   : > { %7464 = vrot.lane.b32.xlu0 %v11065_v35, %s11232_s17  ;;  %v18120_v35 = vpack.c.bf16 %v18118_v24, %v18119_v44  ;;  %v11133_v44 = vpack.c.bf16 %v9337_v27, %v9337_v27 }
 0x6e2   : > { %7533 = vrot.lane.b32.xlu1 %v11068_v18, %s11231_s16  ;;  %v18121_v18 = vld [vmem:[#allocation28_spill] sm:$0xff] }
 0x6e3   : > { %7531 = vrot.lane.b32.xlu0 %v18110_v53, %s11231_s16  ;;  %v7895_v33 = vmul.f32 %v18121_v18, %v16335_v39  ;;  %v18125_v53 = vld [vmem:[#allocation37_spill] sm:$0xff] }
 0x6e4   : > { %v7964_v49 = vmul.f32 %v18125_v53, %v16335_v39  ;;  %v18128_v39 = vpack.c.bf16 %v16711_v28, %v16705_v43  ;;  %v11124_v43 = vpack.c.bf16 %v9159_v16, %v9159_v16  ;;  %v16967_v28 = vpop.permute.xlu1 %8443  ;;  %v18146_v53 = vld [vmem:[#allocation26_spill] sm:$0xff] }
 0x6e5   : > { %v11086_v59 = vpack.c.bf16 %v7895_v33, %v7895_v33  ;;  %v18140_v33 = vld [vmem:[#allocation55_spill] sm:$0xff] }
 0x6e6   : > { %7600 = vrot.lane.b32.xlu1 %v18114_v37, %s11230_s15  ;;  %v11089_v13 = vpack.c.bf16 %v7964_v49, %v7964_v49  ;;  %v16957_v37 = vpop.permute.xlu0 %8374  ;;  %v9406_v32 = vmul.f32 %v18140_v33, %v18130_v23  ;;  %v18147_v49 = vld [vmem:[#allocation27_spill] sm:$0xff] }
 0x6e7   : > { %7602 = vrot.lane.b32.xlu0 %v11071_v29, %s11230_s15  ;;  %v18148_v21 = vpack.c.bf16 %v18146_v53, %v18147_v49 }
 0x6e8   : > { %v16978_v51 = vpop.permute.xlu1 %8581  ;;  %v11136_v19 = vpack.c.bf16 %v9406_v32, %v9406_v32 }
 0x6ea   : > { %7671 = vrot.lane.b32.xlu1 %v11074_v63, %s11229_s13  ;;  %v16969_v4 = vpop.permute.xlu0 %8512 }
 0x6eb   : > { %7669 = vrot.lane.b32.xlu0 %v18116_v54, %s11229_s13 }
 0x6ec   : > { %v16990_v17 = vpop.permute.xlu1 %9044 }
 0x6ee   : > { %7780 = vrot.lane.b32.xlu1 %v11080_v31, %s11228_s10  ;;  %v16984_v36 = vpop.permute.xlu0 %9113 }
 0x6ef   : > { %7778 = vrot.lane.b32.xlu0 %v18120_v35, %s11228_s10 }
 0x6f2   : > { %7847 = vrot.lane.b32.xlu1 %v18124_v9, %s11227_s9 }
 0x6f3   : > { %7849 = vrot.lane.b32.xlu0 %v11083_v11, %s11227_s9 }
 0x6f6   : > { %7918 = vrot.lane.b32.xlu1 %v11086_v59, %s11226_s7 }
 0x6f7   : > { %7916 = vrot.lane.b32.xlu0 %v18126_v48, %s11226_s7 }
 0x6fa   : > { %7985 = vrot.lane.b32.xlu1 %v18127_v26, %s11225_s6  ;;  %v18149_v26 = vld [vmem:[#allocation67_spill] sm:$0xff] }
 0x6fb   : > { %7987 = vrot.lane.b32.xlu0 %v11089_v13, %s11225_s6  ;;  %v18150_v13 = vld [vmem:[#allocation29_spill] sm:$0xff] }
 0x6fe   : > { %9040 = vrot.lane.b32.xlu1 %v11116_v42, %s11232_s17  ;;  %v18135_v42 = vld [vmem:[#allocation62_spill] sm:$0xff] }
 0x6ff   : > { %9042 = vrot.lane.b32.xlu0 %v18128_v39, %s11232_s17  ;;  %v9228_v29 = vmul.f32 %v18135_v42, %v18130_v23  ;;  %v18151_v39 = vpack.c.bf16 %v18149_v26, %v18150_v13 }
 0x701   : > { %v11127_v41 = vpack.c.bf16 %v9228_v29, %v9228_v29 }
 0x702   : > { %9111 = vrot.lane.b32.xlu1 %v18129_v3, %s11231_s16 }
 0x703   : > { %9109 = vrot.lane.b32.xlu0 %v18132_v6, %s11231_s16 }
 0x706   : > { %9178 = vrot.lane.b32.xlu1 %v18133_v46, %s11230_s15 }
 0x707   : > { %9180 = vrot.lane.b32.xlu0 %v18134_v45, %s11230_s15 }
 0x70a   : > { %9182 = vrot.lane.b32.xlu1 %v11124_v43, %s11230_s15 }
 0x70b   : > { %9247 = vrot.lane.b32.xlu0 %v11125_v7, %s11229_s13 }
 0x70e   : > { %9249 = vrot.lane.b32.xlu1 %v18136_v58, %s11229_s13 }
 0x70f   : > { %9251 = vrot.lane.b32.xlu0 %v11127_v41, %s11229_s13 }
 0x711   : > { %v7708_v63 = vpop.permute.xlu0 %7707 }
 0x712   : > { %9287 = vrot.lane.b32.xlu1 %v16783_v57, %s11234_s20  ;;  %v7713_v52 = vrot.slane %v7708_v63, 4 }
 0x713   : > { %v7710_v40 = vpop.permute.xlu1 %7709  ;;  %9289 = vrot.lane.b32.xlu0 %v16787_v50, %s11234_s20 }
 0x714   : > { %v7714_v7 = vrot.slane %v7710_v40, 4 }
 0x715   : > { %v7712_v12 = vpop.permute.xlu0 %7711 }
 0x716   : > { %9291 = vrot.lane.b32.xlu1 %v11130_v60, %s11234_s20  ;;  %v7716_v54 = vsel %vm252_vm8, %v7713_v52, %v7714_v7  ;;  %v7715_v31 = vrot.slane %v7712_v12, 4 }
 0x717   : > { %v8142_v34 = vpop.permute.xlu1 %8141  ;;  %9356 = vrot.lane.b32.xlu0 %v11131_v5, %s11228_s10  ;;  %v17006_v38 = vsel %vm18138_vm7, %v7708_v63, %v7716_v54  ;;  %v18141_v5 = vld [vmem:[#allocation11_spill] sm:$0xff]  ;;  %vm18155_vm7 = vmmov %vm18153_vm0 }
 0x718   : > { %v7718_v24 = vsel %vm252_vm8, %v7714_v7, %v7715_v31  ;;  %v8147_v45 = vrot.slane %v8142_v34, 4 }
 0x719   : > { %v8073_v35 = vpop.permute.xlu0 %8072  ;;  %v17014_v18 = vsel %vm18139_vm2, %v7710_v40, %v7718_v24 }
 0x71a   : > { %9358 = vrot.lane.b32.xlu1 %v11132_v2, %s11228_s10  ;;  %v9475_v2 = vmul.f32 %v18141_v5, %v18130_v23  ;;  %v8078_v43 = vrot.slane %v8073_v35, 4 }
 0x71b   : > { %v17018_v0 = vpop.permute.xlu1 %8279  ;;  %9360 = vrot.lane.b32.xlu0 %v11133_v44, %s11228_s10 }
 0x71c   : > { %v11139_v61 = vpack.c.bf16 %v9475_v2, %v9475_v2  ;;  %v8285_v2 = vrot.slane %v17018_v0, 4 }
 0x71d   : > { %v17025_v25 = vpop.permute.xlu0 %8210 }
 0x71e   : > { %9425 = vrot.lane.b32.xlu1 %v11134_v10, %s11227_s9  ;;  %v18143_v10 = vld [vmem:[#allocation33_spill] sm:$0xff]  ;;  %v8216_v5 = vrot.slane %v17025_v25, 4 }
 0x71f   : > { %v17027_v14 = vpop.permute.xlu1 %7529  ;;  %9427 = vrot.lane.b32.xlu0 %v11135_v56, %s11227_s9  ;;  %v18144_v20 = vpack.c.bf16 %v18142_v47, %v18143_v10  ;;  %v18145_v56 = vld [vmem:[#allocation5_spill] sm:$0xff] }
 0x720   : > { %v9544_v11 = vmul.f32 %v18145_v56, %v18130_v23  ;;  %v8378_v56 = vrot.slane %v16957_v37, 4 }
 0x721   : > { %v17036_v15 = vpop.permute.xlu0 %7460 }
 0x722   : > { %9429 = vrot.lane.b32.xlu1 %v11136_v19, %s11227_s9 }
 0x723   : > { %v17038_v9 = vpop.permute.xlu1 %7667  ;;  %9494 = vrot.lane.b32.xlu0 %v11137_v1, %s11226_s7  ;;  %v11142_v1 = vpack.c.bf16 %v9544_v11, %v9544_v11 }
 0x725   : > { %v17048_v55 = vpop.permute.xlu0 %7598 }
 0x726   : > { %9496 = vrot.lane.b32.xlu1 %v18144_v20, %s11226_s7 }
 0x727   : > { %v17052_v59 = vpop.permute.xlu1 %7776  ;;  %9498 = vrot.lane.b32.xlu0 %v11139_v61, %s11226_s7 }
 0x729   : > { %v17059_v62 = vpop.permute.xlu0 %7845 }
 0x72a   : > { %9563 = vrot.lane.b32.xlu1 %v18148_v21, %s11225_s6 }
 0x72b   : > { %v17061_v48 = vpop.permute.xlu1 %7914  ;;  %9565 = vrot.lane.b32.xlu0 %v18151_v39, %s11225_s6 }
 0x72d   : > { %v17068_v3 = vpop.permute.xlu0 %7983 }
 0x72e   : > { %9567 = vrot.lane.b32.xlu1 %v11142_v1, %s11225_s6 }
 0x730   : > { %v8075_v23 = vpop.permute.xlu1 %8074 }
 0x731   : > { %v8077_v30 = vpop.permute.xlu0 %8076  ;;  %v8079_v16 = vrot.slane %v8075_v23, 4 }
 0x732   : > { %v8080_v6 = vrot.slane %v8077_v30, 4 }
 0x733   : > { %v8081_v29 = vsel %vm252_vm8, %v8078_v43, %v8079_v16 }
 0x734   : > { %v8146_v46 = vpop.permute.xlu1 %8145  ;;  %v8083_v41 = vsel %vm252_vm8, %v8079_v16, %v8080_v6  ;;  %v8082_v27 = vsel %vm18154_vm1, %v8073_v35, %v8081_v29  ;;  %vm18163_vm1 = vcmask 449536  }
 0x735   : > { %v8144_v42 = vpop.permute.xlu0 %8143  ;;  %v8149_v58 = vrot.slane %v8146_v46, 4  ;;  %v8084_v40 = vsel %vm18152_vm6, %v8075_v23, %v8083_v41  ;;  %v8447_v41 = vrot.slane %v16967_v28, 4  ;;  %vm18160_vm6 = vcmask 973824  }
 0x736   : > { %v8148_v22 = vrot.slane %v8144_v42, 4 }
 0x738   : > { %v8213_v63 = vpop.permute.xlu1 %8212  ;;  %v8150_v60 = vsel %vm252_vm8, %v8147_v45, %v8148_v22  ;;  %v8152_v52 = vsel %vm252_vm8, %v8148_v22, %v8149_v58 }
 0x739   : > { %v8153_v7 = vsel %vm18153_vm0, %v8144_v42, %v8152_v52  ;;  %v8215_v8 = vpop.permute.xlu0 %8214  ;;  %v8151_v12 = vsel %vm18155_vm7, %v8142_v34, %v8150_v60  ;;  %v8217_v24 = vrot.slane %v8213_v63, 4  ;;  %vm18161_vm0 = vmmov %vm18160_vm6 }
 0x73a   : > { %v10693_v54 = vcombine.low %v8084_v40, %v8153_v7  ;;  %v10694_v31 = vcombine.high %v8084_v40, %v8153_v7  ;;  %v8218_v44 = vrot.slane %v8215_v8, 4  ;;  %v10691_v32 = vcombine.low %v8082_v27, %v8151_v12  ;;  %vm18164_vm7 = vmmov %vm18163_vm1 }
 0x73b   : > { %v10692_v19 = vcombine.high %v8082_v27, %v8151_v12  ;;  %v8219_v47 = vsel %vm252_vm8, %v8216_v5, %v8217_v24  ;;  %v8516_v40 = vrot.slane %v16969_v4, 4 }
 0x73c   : > { %v8284_v33 = vpop.permute.xlu1 %8283  ;;  %8760 = vmatprep.subr.bf16.mxu1 %v10694_v31  ;;  %v8221_v35 = vsel %vm252_vm8, %v8217_v24, %v8218_v44  ;;  %v8220_v13 = vsel %vm1031_vm5, %v17025_v25, %v8219_v47 }
 0x73d   : > { %8719 = vmatprep.subr.bf16.mxu0 %v10692_v19  ;;  %8761 = vmatpush1.bf16.msra.mxu1 %v10693_v54  ;;  %v8282_v61 = vpop.permute.xlu0 %8281  ;;  %v8287_v34 = vrot.slane %v8284_v33, 4  ;;  %v8222_v21 = vsel %vm1031_vm5, %v8213_v63, %v8221_v35 }
 0x73e   : > { %8720 = vmatpush1.bf16.msra.mxu0 %v10691_v32  ;;  %v8286_v10 = vrot.slane %v8282_v61, 4  ;;  %v8585_v32 = vrot.slane %v16978_v51, 4 }
 0x740   : > { %v8373_v20 = vpop.permute.xlu1 %8372  ;;  %v8288_v11 = vsel %vm252_vm8, %v8285_v2, %v8286_v10  ;;  %v8290_v53 = vsel %vm252_vm8, %v8286_v10, %v8287_v34 }
 0x741   : > { %v8377_v49 = vrot.slane %v8373_v20, 4  ;;  %v8291_v1 = vsel %vm1102_vm4, %v8282_v61, %v8290_v53  ;;  %v8371_v26 = vpop.permute.xlu0 %8370  ;;  %v8289_v39 = vsel %vm1102_vm4, %v17018_v0, %v8288_v11  ;;  %vm18157_vm4 = vcmask 982016  }
 0x742   : > { %v10697_v23 = vcombine.low %v8222_v21, %v8291_v1  ;;  %v10698_v30 = vcombine.high %v8222_v21, %v8291_v1  ;;  %v8376_v16 = vrot.slane %v8371_v26, 4  ;;  %v10695_v43 = vcombine.low %v8220_v13, %v8289_v39  ;;  %vm18159_vm2 = vmmov %vm18157_vm4 }
 0x743   : > { %v8381_v37 = vsel %vm252_vm8, %v8377_v49, %v8378_v56  ;;  %v10696_v45 = vcombine.high %v8220_v13, %v8289_v39 }
 0x744   : > { %v8382_v6 = vsel %vm1060_vm3, %v8373_v20, %v8381_v37  ;;  %v8440_v46 = vpop.permute.xlu1 %8439  ;;  %v8379_v29 = vsel %vm252_vm8, %v8376_v16, %v8377_v49  ;;  %8762 = vmatprep.subr.bf16.mxu1 %v10698_v30  ;;  %v7466_v37 = vrot.slane %v17036_v15, 4 }
 0x745   : > { %v10702_v42 = vcombine.high %v16787_v50, %v8382_v6  ;;  %v8380_v25 = vsel %vm1060_vm3, %v8371_v26, %v8379_v29  ;;  %8721 = vmatprep.subr.bf16.mxu0 %v10696_v45  ;;  %8763 = vmatpush1.bf16.msra.mxu1 %v10697_v23  ;;  %v8442_v0 = vpop.permute.xlu0 %8441  ;;  %v10701_v60 = vcombine.low %v16787_v50, %v8382_v6  ;;  %v8445_v7 = vrot.slane %v8440_v46, 4 }
 0x746   : > { %v10699_v58 = vcombine.low %v16783_v57, %v8380_v25  ;;  %v10700_v22 = vcombine.high %v16783_v57, %v8380_v25  ;;  %8722 = vmatpush1.bf16.msra.mxu0 %v10695_v43  ;;  %v8446_v63 = vrot.slane %v8442_v0, 4  ;;  %vm18156_vm3 = vcmask 990208  }
 0x747   : > { %8764 = vmatprep.subr.bf16.mxu1 %v10702_v42  ;;  %vm18158_vm5 = vmmov %vm18156_vm3  ;;  %v7535_v43 = vrot.slane %v17027_v14, 4 }
 0x748   : > { %v8511_v52 = vpop.permute.xlu1 %8510  ;;  %v8450_v8 = vsel %vm252_vm8, %v8446_v63, %v8447_v41  ;;  %8723 = vmatprep.subr.bf16.mxu0 %v10700_v22  ;;  %v8448_v57 = vsel %vm252_vm8, %v8445_v7, %v8446_v63  ;;  %v18162_v7 = vmov 0  }
 0x749   : > { %v8515_v27 = vrot.slane %v8511_v52, 4  ;;  %v8451_v12 = vsel %vm18156_vm3, %v8442_v0, %v8450_v8  ;;  %8765 = vmatpush1.bf16.msra.mxu1 %v10701_v60  ;;  %v8509_v28 = vpop.permute.xlu0 %8508  ;;  %v8449_v19 = vsel %vm18158_vm5, %v8440_v46, %v8448_v57  ;;  %v10690_v46 = vld [vmem:[%s17246_s0 + $0x28] sm:$0xf] }
 0x74a   : > { %8724 = vmatpush1.bf16.msra.mxu0 %v10699_v58  ;;  %v8514_v31 = vrot.slane %v8509_v28, 4 }
 0x74b   : > { %v8519_v54 = vsel %vm252_vm8, %v8515_v27, %v8516_v40 }
 0x74c   : > { %v8520_v50 = vsel %vm18157_vm4, %v8511_v52, %v8519_v54  ;;  %v8578_v24 = vpop.permute.xlu1 %8577  ;;  %v8517_v33 = vsel %vm252_vm8, %v8514_v31, %v8515_v27  ;;  %v7604_v54 = vrot.slane %v17048_v55, 4 }
 0x74d   : > { %v10705_v44 = vcombine.low %v8451_v12, %v8520_v50  ;;  %v10706_v4 = vcombine.high %v8451_v12, %v8520_v50  ;;  %v8518_v5 = vsel %vm18159_vm2, %v8509_v28, %v8517_v33  ;;  %v8580_v2 = vpop.permute.xlu0 %8579  ;;  %v8583_v35 = vrot.slane %v8578_v24, 4 }
 0x74e   : > { %v10703_v61 = vcombine.low %v8449_v19, %v8518_v5  ;;  %v10704_v47 = vcombine.high %v8449_v19, %v8518_v5  ;;  %v8584_v34 = vrot.slane %v8580_v2, 4  ;;  %v7782_v19 = vrot.slane %v17052_v59, 4 }
 0x74f   : > { %8766 = vmatprep.subr.bf16.mxu1 %v10706_v4 }
 0x750   : > { %v7463_v10 = vpop.permute.xlu1 %7462  ;;  %8767 = vmatpush1.bf16.msra.mxu1 %v10705_v44  ;;  %v8586_v20 = vsel %vm252_vm8, %v8583_v35, %v8584_v34  ;;  %v8588_v56 = vsel %vm252_vm8, %v8584_v34, %v8585_v32  ;;  %8725 = vmatprep.subr.bf16.mxu0 %v10704_v47  ;;  %v7673_v44 = vrot.slane %v17038_v9, 4 }
 0x751   : > { %v8589_v11 = vsel %vm18160_vm6, %v8580_v2, %v8588_v56  ;;  %8726 = vmatpush1.bf16.msra.mxu0 %v10703_v61  ;;  %v7465_v51 = vpop.permute.xlu0 %7464  ;;  %v8587_v53 = vsel %vm18161_vm0, %v8578_v24, %v8586_v20  ;;  %v7467_v26 = vrot.slane %v7463_v10, 4 }
 0x752   : > { %v10709_v49 = vcombine.low %v8589_v11, %v8589_v11  ;;  %v10710_v21 = vcombine.high %v8589_v11, %v8589_v11  ;;  %v7468_v1 = vrot.slane %v7465_v51, 4  ;;  %v10708_v39 = vcombine.high %v8587_v53, %v8587_v53 }
 0x753   : > { %v10707_v23 = vcombine.low %v8587_v53, %v8587_v53  ;;  %v7469_v25 = vsel %vm252_vm8, %v7466_v37, %v7467_v26 }
 0x754   : > { %v7534_v13 = vpop.permute.xlu1 %7533  ;;  %10713 = vmatprep.subr.msk.bf16.mxu1 %vm252_vm8, %v10710_v21  ;;  %v8714_v30 = vsel %vm252_vm8, %v10709_v49, 0  ;;  %10711 = vmatprep.subr.msk.bf16.mxu0 %vm252_vm8, %v10708_v39  ;;  %v7471_v45 = vsel %vm252_vm8, %v7467_v26, %v7468_v1  ;;  %v7470_v28 = vsel %vm254_vm15, %v17036_v15, %v7469_v25 }
 0x755   : > { %v8708_v16 = vsel %vm252_vm8, %v10707_v23, 0  ;;  %8769 = vmatpush1.bf16.msra.mxu1 %v8714_v30  ;;  %v7532_v6 = vpop.permute.xlu0 %7531  ;;  %v7537_v42 = vrot.slane %v7534_v13, 4  ;;  %v7472_v22 = vsel %vm254_vm15, %v7463_v10, %v7471_v45  ;;  %v7920_v45 = vrot.slane %v17061_v48, 4 }
 0x756   : > { %8728 = vmatpush1.bf16.msra.mxu0 %v8708_v16  ;;  %v7536_v29 = vrot.slane %v7532_v6, 4 }
 0x758   : > { %v7601_v0 = vpop.permute.xlu1 %7600  ;;  %v7538_v41 = vsel %vm252_vm8, %v7535_v43, %v7536_v29  ;;  %v7540_v58 = vsel %vm252_vm8, %v7536_v29, %v7537_v42  ;;  %10714 = vmatmul.mubr.msk.bf16.vlgmr.msra.gmra.mrb[20].mxu1 %vm326_vm14, %v10690_v46  ;;  %v7851_v43 = vrot.slane %v17059_v62, 4 }
 0x759   : > { %v7541_v63 = vsel %vm326_vm14, %v7532_v6, %v7540_v58  ;;  %v7605_v60 = vrot.slane %v7601_v0, 4  ;;  %v7603_v52 = vpop.permute.xlu0 %7602  ;;  %v7539_v40 = vsel %vm326_vm14, %v17027_v14, %v7538_v41  ;;  %10712 = vmatmul.mubr.msk.bf16.vlgmr.msra.gmra.mrb[20].mxu0 %vm326_vm14, %v10690_v46  ;;  %8979 = vmatprep.mubr.bf16.mxu1 %v18162_v7  ;;  %v7989_v41 = vrot.slane %v17068_v3, 4 }
 0x75a   : > { %v10717_v8 = vcombine.low %v7472_v22, %v7541_v63  ;;  %v10718_v27 = vcombine.high %v7472_v22, %v7541_v63  ;;  %v7606_v12 = vrot.slane %v7603_v52, 4  ;;  %8938 = vmatprep.mubr.bf16.mxu0 %v18162_v7  ;;  %v10715_v31 = vcombine.low %v7470_v28, %v7539_v40 }
 0x75b   : > { %v10716_v50 = vcombine.high %v7470_v28, %v7539_v40  ;;  %v7607_v14 = vsel %vm252_vm8, %v7604_v54, %v7605_v60 }
 0x75c   : > { %v7672_v57 = vpop.permute.xlu1 %7671  ;;  %8947 = vmatprep.subr.bf16.mxu1 %v10718_v27  ;;  %v7609_v4 = vsel %vm252_vm8, %v7605_v60, %v7606_v12  ;;  %v7608_v61 = vsel %vm398_vm13, %v17048_v55, %v7607_v14 }
 0x75d   : > { %8906 = vmatprep.subr.bf16.mxu0 %v10716_v50  ;;  %8948 = vmatpush1.bf16.msra.mxu1 %v10717_v8  ;;  %v7670_v24 = vpop.permute.xlu0 %7669  ;;  %v7675_v33 = vrot.slane %v7672_v57, 4  ;;  %v7610_v47 = vsel %vm398_vm13, %v7601_v0, %v7609_v4 }
 0x75e   : > { %8907 = vmatpush1.bf16.msra.mxu0 %v10715_v31  ;;  %v7674_v15 = vrot.slane %v7670_v24, 4 }
 0x760   : > { %v7781_v32 = vpop.permute.xlu1 %7780  ;;  %v7676_v5 = vsel %vm252_vm8, %v7673_v44, %v7674_v15  ;;  %v7678_v2 = vsel %vm252_vm8, %v7674_v15, %v7675_v33  ;;  %v9048_v33 = vrot.slane %v16990_v17, 4 }
 0x761   : > { %v7679_v35 = vsel %vm470_vm12, %v7670_v24, %v7678_v2  ;;  %v7784_v34 = vrot.slane %v7781_v32, 4  ;;  %v7779_v10 = vpop.permute.xlu0 %7778  ;;  %v7677_v20 = vsel %vm470_vm12, %v17038_v9, %v7676_v5  ;;  %v9117_v5 = vrot.slane %v16984_v36, 4  ;;  %v10635_v36 = vld [vmem:[%s17246_s0 + $0x24] sm:$0xf] }
 0x762   : > { %v10721_v56 = vcombine.low %v7610_v47, %v7679_v35  ;;  %v10722_v11 = vcombine.high %v7610_v47, %v7679_v35  ;;  %v7783_v51 = vrot.slane %v7779_v10, 4  ;;  %v10719_v53 = vcombine.low %v7608_v61, %v7677_v20 }
 0x763   : > { %v10720_v21 = vcombine.high %v7608_v61, %v7677_v20 }
 0x764   : > { %v7848_v49 = vpop.permute.xlu1 %7847  ;;  %v7785_v1 = vsel %vm252_vm8, %v7782_v19, %v7783_v51  ;;  %v7787_v26 = vsel %vm252_vm8, %v7783_v51, %v7784_v34  ;;  %8949 = vmatprep.subr.bf16.mxu1 %v10722_v11 }
 0x765   : > { %v7788_v55 = vsel %vm428_vm11, %v7779_v10, %v7787_v26  ;;  %8908 = vmatprep.subr.bf16.mxu0 %v10720_v21  ;;  %8950 = vmatpush1.bf16.msra.mxu1 %v10721_v56  ;;  %v7850_v13 = vpop.permute.xlu0 %7849  ;;  %v7786_v39 = vsel %vm428_vm11, %v17052_v59, %v7785_v1  ;;  %v7852_v30 = vrot.slane %v7848_v49, 4 }
 0x766   : > { %v10725_v9 = vcombine.low %v17014_v18, %v7788_v55  ;;  %v10726_v23 = vcombine.high %v17014_v18, %v7788_v55  ;;  %8909 = vmatpush1.bf16.msra.mxu0 %v10719_v53  ;;  %v7853_v37 = vrot.slane %v7850_v13, 4  ;;  %v10723_v6 = vcombine.low %v17006_v38, %v7786_v39 }
 0x767   : > { %v10724_v46 = vcombine.high %v17006_v38, %v7786_v39  ;;  %v7854_v42 = vsel %vm252_vm8, %v7851_v43, %v7852_v30 }
 0x768   : > { %v7919_v16 = vpop.permute.xlu1 %7918  ;;  %8951 = vmatprep.subr.bf16.mxu1 %v10726_v23  ;;  %v7856_v18 = vsel %vm252_vm8, %v7852_v30, %v7853_v37  ;;  %v7855_v40 = vsel %vm356_vm10, %v17059_v62, %v7854_v42 }
 0x769   : > { %8910 = vmatprep.subr.bf16.mxu0 %v10724_v46  ;;  %8952 = vmatpush1.bf16.msra.mxu1 %v10725_v9  ;;  %v7917_v59 = vpop.permute.xlu0 %7916  ;;  %v7922_v29 = vrot.slane %v7919_v16, 4  ;;  %v7857_v63 = vsel %vm356_vm10, %v7848_v49, %v7856_v18 }
 0x76a   : > { %8911 = vmatpush1.bf16.msra.mxu0 %v10723_v6  ;;  %v7921_v25 = vrot.slane %v7917_v59, 4 }
 0x76c   : > { %v7986_v0 = vpop.permute.xlu1 %7985  ;;  %v7923_v38 = vsel %vm252_vm8, %v7920_v45, %v7921_v25  ;;  %v7925_v58 = vsel %vm252_vm8, %v7921_v25, %v7922_v29 }
 0x76d   : > { %v7990_v22 = vrot.slane %v7986_v0, 4  ;;  %v7926_v60 = vsel %vm284_vm9, %v7917_v59, %v7925_v58  ;;  %v7988_v52 = vpop.permute.xlu0 %7987  ;;  %v7924_v8 = vsel %vm284_vm9, %v17061_v48, %v7923_v38 }
 0x76e   : > { %v10729_v27 = vcombine.low %v7857_v63, %v7926_v60  ;;  %v10730_v12 = vcombine.high %v7857_v63, %v7926_v60  ;;  %v7991_v54 = vrot.slane %v7988_v52, 4  ;;  %v10727_v31 = vcombine.low %v7855_v40, %v7924_v8 }
 0x76f   : > { %v7992_v28 = vsel %vm252_vm8, %v7989_v41, %v7990_v22  ;;  %v10728_v50 = vcombine.high %v7855_v40, %v7924_v8 }
 0x770   : > { %v9041_v57 = vpop.permute.xlu1 %9040  ;;  %v7993_v14 = vsel %vm18163_vm1, %v17068_v3, %v7992_v28  ;;  %v7994_v24 = vsel %vm252_vm8, %v7990_v22, %v7991_v54  ;;  %8953 = vmatprep.subr.bf16.mxu1 %v10730_v12 }
 0x771   : > { %v10732_v44 = vcombine.high %v7993_v14, %v7993_v14  ;;  %v7995_v62 = vsel %vm18164_vm7, %v7986_v0, %v7994_v24  ;;  %8912 = vmatprep.subr.bf16.mxu0 %v10728_v50  ;;  %8954 = vmatpush1.bf16.msra.mxu1 %v10729_v27  ;;  %v9043_v48 = vpop.permute.xlu0 %9042  ;;  %v10731_v4 = vcombine.low %v7993_v14, %v7993_v14  ;;  %v9046_v3 = vrot.slane %v9041_v57, 4 }
 0x772   : > { %8913 = vmatpush1.bf16.msra.mxu0 %v10727_v31  ;;  %v9047_v15 = vrot.slane %v9043_v48, 4  ;;  %v10734_v32 = vcombine.high %v7995_v62, %v7995_v62  ;;  %v10733_v19 = vcombine.low %v7995_v62, %v7995_v62 }
 0x773   : > { %10735 = vmatprep.subr.msk.bf16.mxu0 %vm252_vm8, %v10732_v44  ;;  %v8895_v17 = vsel %vm252_vm8, %v10731_v4, 0 }
 0x774   : > { %v9112_v2 = vpop.permute.xlu1 %9111  ;;  %v9051_v61 = vsel %vm252_vm8, %v9047_v15, %v9048_v33  ;;  %10737 = vmatprep.subr.msk.bf16.mxu1 %vm252_vm8, %v10734_v32  ;;  %v8901_v35 = vsel %vm252_vm8, %v10733_v19, 0  ;;  %v9049_v56 = vsel %vm252_vm8, %v9046_v3, %v9047_v15 }
 0x775   : > { %v9116_v47 = vrot.slane %v9112_v2, 4  ;;  %v9052_v34 = vsel %vm254_vm15, %v9043_v48, %v9051_v61  ;;  %8956 = vmatpush1.bf16.msra.mxu1 %v8901_v35  ;;  %v9110_v10 = vpop.permute.xlu0 %9109  ;;  %v9050_v26 = vsel %vm254_vm15, %v9041_v57, %v9049_v56 }
 0x776   : > { %8915 = vmatpush1.bf16.msra.mxu0 %v8895_v17  ;;  %v9115_v11 = vrot.slane %v9110_v10, 4 }
 0x777   : > { %v9120_v20 = vsel %vm252_vm8, %v9116_v47, %v9117_v5 }
 0x778   : > { %v9121_v51 = vsel %vm326_vm14, %v9112_v2, %v9120_v20  ;;  %v9179_v53 = vpop.permute.xlu1 %9178  ;;  %v9118_v1 = vsel %vm252_vm8, %v9115_v11, %v9116_v47  ;;  %10738 = vmatmul.mubr.msk.bf16.vlgmr.msra.gmra.mrb[24].mxu1 %vm326_vm14, %v10635_v36 }
 0x779   : > { %v10797_v49 = vcombine.low %v9052_v34, %v9121_v51  ;;  %v10798_v21 = vcombine.high %v9052_v34, %v9121_v51  ;;  %v9119_v55 = vsel %vm326_vm14, %v9110_v10, %v9118_v1  ;;  %v9181_v13 = vpop.permute.xlu0 %9180  ;;  %10736 = vmatmul.mubr.msk.bf16.vlgmr.msra.gmra.mrb[24].mxu0 %vm326_vm14, %v10635_v36  ;;  %9778 = vmatprep.mubr.bf16.mxu1 %v18162_v7  ;;  %v9184_v16 = vrot.slane %v9179_v53, 4 }
 0x77a   : > { %v10795_v39 = vcombine.low %v9050_v26, %v9119_v55  ;;  %v10796_v9 = vcombine.high %v9050_v26, %v9119_v55  ;;  %9737 = vmatprep.mubr.bf16.mxu0 %v18162_v7  ;;  %v9185_v30 = vrot.slane %v9181_v13, 4 }
 0x77b   : > { %9746 = vmatprep.subr.bf16.mxu1 %v10798_v21 }
 0x77c   : > { %v9183_v23 = vpop.permute.xlu1 %9182  ;;  %9747 = vmatpush1.bf16.msra.mxu1 %v10797_v49  ;;  %9705 = vmatprep.subr.bf16.mxu0 %v10796_v9  ;;  %v9187_v45 = vsel %vm252_vm8, %v9184_v16, %v9185_v30 }
 0x77d   : > { %9706 = vmatpush1.bf16.msra.mxu0 %v10795_v39  ;;  %v9248_v37 = vpop.permute.xlu0 %9247  ;;  %v9186_v6 = vrot.slane %v9183_v23, 4  ;;  %v9188_v0 = vsel %vm398_vm13, %v9179_v53, %v9187_v45 }
 0x77e   : > { %v9253_v46 = vrot.slane %v9248_v37, 4 }
 0x77f   : > { %v9189_v18 = vsel %vm252_vm8, %v9185_v30, %v9186_v6 }
 0x780   : > { %v9250_v43 = vpop.permute.xlu1 %9249  ;;  %v9190_v60 = vsel %vm398_vm13, %v9181_v13, %v9189_v18 }
 0x781   : > { %v9254_v59 = vrot.slane %v9250_v43, 4  ;;  %v9252_v42 = vpop.permute.xlu0 %9251 }
 0x782   : > { %v9255_v25 = vrot.slane %v9252_v42, 4 }
 0x783   : > { %v9256_v29 = vsel %vm252_vm8, %v9253_v46, %v9254_v59 }
 0x784   : > { %v9288_v7 = vpop.permute.xlu1 %9287  ;;  %v9257_v41 = vsel %vm470_vm12, %v9248_v37, %v9256_v29  ;;  %v9258_v38 = vsel %vm252_vm8, %v9254_v59, %v9255_v25 }
 0x785   : > { %v10799_v58 = vcombine.low %v9188_v0, %v9257_v41  ;;  %v10800_v22 = vcombine.high %v9188_v0, %v9257_v41  ;;  %v9290_v63 = vpop.permute.xlu0 %9289  ;;  %v9259_v52 = vsel %vm470_vm12, %v9250_v43, %v9258_v38  ;;  %v9293_v54 = vrot.slane %v9288_v7, 4 }
 0x786   : > { %v10801_v40 = vcombine.low %v9190_v60, %v9259_v52  ;;  %v10802_v8 = vcombine.high %v9190_v60, %v9259_v52  ;;  %v9294_v12 = vrot.slane %v9290_v63, 4  ;;  %vm18165_vm12 = vcmask 523264   ;;  %v10794_v52 = vld [vmem:[%s17246_s0 + $0x2c] sm:$0xf] }
 0x787   : > { %9707 = vmatprep.subr.bf16.mxu0 %v10800_v22  ;;  %vm18166_vm13 = vmmov %vm18165_vm12 }
 0x788   : > { %v9292_v27 = vpop.permute.xlu1 %9291  ;;  %9708 = vmatpush1.bf16.msra.mxu0 %v10799_v58  ;;  %9748 = vmatprep.subr.bf16.mxu1 %v10802_v8  ;;  %v9296_v14 = vsel %vm252_vm8, %v9293_v54, %v9294_v12 }
 0x789   : > { %9749 = vmatpush1.bf16.msra.mxu1 %v10801_v40  ;;  %v9357_v28 = vpop.permute.xlu0 %9356  ;;  %v9295_v57 = vrot.slane %v9292_v27, 4  ;;  %v9297_v15 = vsel %vm18165_vm12, %v9288_v7, %v9296_v14 }
 0x78a   : > { %v9362_v31 = vrot.slane %v9357_v28, 4 }
 0x78b   : > { %v9298_v62 = vsel %vm252_vm8, %v9294_v12, %v9295_v57 }
 0x78c   : > { %v9359_v50 = vpop.permute.xlu1 %9358  ;;  %v9299_v61 = vsel %vm18166_vm13, %v9290_v63, %v9298_v62 }
 0x78d   : > { %v9363_v24 = vrot.slane %v9359_v50, 4  ;;  %v9361_v44 = vpop.permute.xlu0 %9360 }
 0x78e   : > { %v9364_v4 = vrot.slane %v9361_v44, 4 }
 0x78f   : > { %v9365_v48 = vsel %vm252_vm8, %v9362_v31, %v9363_v24 }
 0x790   : > { %v9426_v33 = vpop.permute.xlu1 %9425  ;;  %v9366_v32 = vsel %vm428_vm11, %v9357_v28, %v9365_v48  ;;  %v9367_v19 = vsel %vm252_vm8, %v9363_v24, %v9364_v4 }
 0x791   : > { %v10803_v5 = vcombine.low %v9297_v15, %v9366_v32  ;;  %v10804_v2 = vcombine.high %v9297_v15, %v9366_v32  ;;  %v9428_v3 = vpop.permute.xlu0 %9427  ;;  %v9368_v47 = vsel %vm428_vm11, %v9359_v50, %v9367_v19  ;;  %v9431_v20 = vrot.slane %v9426_v33, 4  ;;  %vm18167_vm11 = vmmov %vm18163_vm1 }
 0x792   : > { %v10805_v35 = vcombine.low %v9299_v61, %v9368_v47  ;;  %v10806_v34 = vcombine.high %v9299_v61, %v9368_v47  ;;  %v9432_v10 = vrot.slane %v9428_v3, 4 }
 0x793   : > { %9709 = vmatprep.subr.bf16.mxu0 %v10804_v2 }
 0x794   : > { %v9430_v17 = vpop.permute.xlu1 %9429  ;;  %9710 = vmatpush1.bf16.msra.mxu0 %v10803_v5  ;;  %9750 = vmatprep.subr.bf16.mxu1 %v10806_v34  ;;  %v9434_v53 = vsel %vm252_vm8, %v9431_v20, %v9432_v10 }
 0x795   : > { %9751 = vmatpush1.bf16.msra.mxu1 %v10805_v35  ;;  %v9495_v36 = vpop.permute.xlu0 %9494  ;;  %v9433_v56 = vrot.slane %v9430_v17, 4  ;;  %v9435_v39 = vsel %vm356_vm10, %v9426_v33, %v9434_v53 }
 0x796   : > { %v9500_v11 = vrot.slane %v9495_v36, 4 }
 0x797   : > { %v9436_v1 = vsel %vm252_vm8, %v9432_v10, %v9433_v56  ;;  %v18169_v10 = vld [vmem:[#allocation65_spill] sm:$0xff] }
 0x798   : > { %v9497_v51 = vpop.permute.xlu1 %9496  ;;  %v9437_v6 = vsel %vm356_vm10, %v9428_v3, %v9436_v1  ;;  %vm18168_vm10 = vmmov %vm18163_vm1  ;;  %v18171_v1 = vld [vmem:[#allocation66_spill] sm:$0xff] }
 0x799   : > { %v9501_v49 = vrot.slane %v9497_v51, 4  ;;  %v9499_v21 = vpop.permute.xlu0 %9498 }
 0x79a   : > { %v9502_v55 = vrot.slane %v9499_v21, 4 }
 0x79b   : > { %v9503_v26 = vsel %vm252_vm8, %v9500_v11, %v9501_v49 }
 0x79c   : > { %v9564_v13 = vpop.permute.xlu1 %9563  ;;  %v9504_v9 = vsel %vm284_vm9, %v9495_v36, %v9503_v26  ;;  %v9505_v23 = vsel %vm252_vm8, %v9501_v49, %v9502_v55 }
 0x79d   : > { %v10807_v30 = vcombine.low %v9435_v39, %v9504_v9  ;;  %v10808_v37 = vcombine.high %v9435_v39, %v9504_v9  ;;  %v9566_v16 = vpop.permute.xlu0 %9565  ;;  %v9506_v46 = vsel %vm284_vm9, %v9497_v51, %v9505_v23  ;;  %v9569_v43 = vrot.slane %v9564_v13, 4  ;;  %v18170_v51 = vld [vmem:[#allocation69_spill] sm:$0xff] }
 0x79e   : > { %v9570_v45 = vrot.slane %v9566_v16, 4  ;;  %v10809_v59 = vcombine.low %v9437_v6, %v9506_v46  ;;  %v10810_v42 = vcombine.high %v9437_v6, %v9506_v46 }
 0x79f   : > { %9711 = vmatprep.subr.bf16.mxu0 %v10808_v37 }
 0x7a0   : > { %v9568_v18 = vpop.permute.xlu1 %9567  ;;  %9712 = vmatpush1.bf16.msra.mxu0 %v10807_v30  ;;  %v9572_v29 = vsel %vm252_vm8, %v9569_v43, %v9570_v45  ;;  %9752 = vmatprep.subr.bf16.mxu1 %v10810_v42 }
 0x7a1   : > { %v9571_v25 = vrot.slane %v9568_v18, 4  ;;  %v9573_v7 = vsel %vm18167_vm11, %v9564_v13, %v9572_v29  ;;  %9753 = vmatpush1.bf16.msra.mxu1 %v10809_v59  ;;  %v18172_v13 = vld [vmem:[#allocation70_spill] sm:$0xff] }
 0x7a2   : > { %v10812_v41 = vcombine.high %v9573_v7, %v9573_v7  ;;  %v10811_v38 = vcombine.low %v9573_v7, %v9573_v7 }
 0x7a3   : > { %v9574_v0 = vsel %vm252_vm8, %v9570_v45, %v9571_v25 }
 0x7a4   : > { %v9575_v58 = vsel %vm18168_vm10, %v9566_v16, %v9574_v0  ;;  %10815 = vmatprep.subr.msk.bf16.mxu0 %vm252_vm8, %v10812_v41  ;;  %v9694_v22 = vsel %vm252_vm8, %v10811_v38, 0 }
 0x7a5   : > { %v10814_v63 = vcombine.high %v9575_v58, %v9575_v58  ;;  %v10813_v60 = vcombine.low %v9575_v58, %v9575_v58  ;;  %9714 = vmatpush1.bf16.msra.mxu0 %v9694_v22 }
 0x7a7   : > { %10817 = vmatprep.subr.msk.bf16.mxu1 %vm252_vm8, %v10814_v63  ;;  %v9700_v40 = vsel %vm252_vm8, %v10813_v60, 0 }
 0x7a8   : > { %9755 = vmatpush1.bf16.msra.mxu1 %v9700_v40  ;;  %10816 = vmatmul.mubr.msk.bf16.vlgmr.msra.gmra.mrb[28].mxu0 %vm326_vm14, %v10794_v52 }
 0x7ab   : > { %10818 = vmatmul.mubr.msk.bf16.vlgmr.msra.gmra.mrb[28].mxu1 %vm326_vm14, %v10794_v52 }
 0x82b   : > { %v8794_v8 = vpop.f32.mrb[20].mxu1 }
 0x82c   : > { %v8753_v27 = vpop.f32.mrb[20].mxu0  ;;  %v8796_v12 = vpop.f32.mrb[21].mxu1 }
 0x82d   : > { %v8755_v28 = vpop.f32.mrb[21].mxu0  ;;  %v8798_v54 = vpop.f32.mrb[22].mxu1 }
 0x82e   : > { %v8757_v57 = vpop.f32.mrb[22].mxu0  ;;  %v8799_v31 = vpop.f32.mrb[23].mxu1 }
 0x82f   : > { %v8758_v50 = vpop.f32.mrb[23].mxu0 }
 0x84b   : > { %v8981_v14 = vpop.f32.mrb[24].mxu1 }
 0x84c   : > { %v8940_v24 = vpop.f32.mrb[24].mxu0  ;;  %v8982_v44 = vadd.f32 %v8981_v14, %v8794_v8  ;;  %v8983_v62 = vpop.f32.mrb[25].mxu1 }
 0x84d   : > { %v8941_v48 = vadd.f32 %v8940_v24, %v8753_v27  ;;  %v8942_v4 = vpop.f32.mrb[25].mxu0  ;;  %v8984_v33 = vadd.f32 %v8983_v62, %v8796_v12  ;;  %v8985_v15 = vpop.f32.mrb[26].mxu1 }
 0x84e   : > { %v8943_v32 = vadd.f32 %v8942_v4, %v8755_v28  ;;  %v8944_v19 = vpop.f32.mrb[26].mxu0  ;;  %v8986_v5 = vpop.f32.mrb[27].mxu1 }
 0x84f   : > { %v8945_v2 = vpop.f32.mrb[27].mxu0 }
 0x87b   : > { %v9739_v3 = vpop.f32.mrb[28].mxu0 }
 0x87c   : > { %v9787_v61 = vadd.f32 %v9739_v3, %v8941_v48  ;;  %v9741_v47 = vpop.f32.mrb[29].mxu0 }
 0x87d   : > { %v9788_v35 = vadd.f32 %v9741_v47, %v8943_v32  ;;  %v9743_v17 = vpop.f32.mrb[30].mxu0 }
 0x87e   : > { %v9780_v34 = vpop.f32.mrb[28].mxu1  ;;  %v9791_v36 = vadd.f32 %v9787_v61, %v18169_v10  ;;  %v9744_v11 = vpop.f32.mrb[31].mxu0 }
 0x87f   : > { %v9789_v20 = vadd.f32 %v9780_v34, %v8982_v44  ;;  %v9782_v56 = vpop.f32.mrb[29].mxu1  ;;  %v9792_v53 = vadd.f32 %v9788_v35, %v18170_v51 }
 0x880   : > { %v9790_v49 = vadd.f32 %v9782_v56, %v8984_v33  ;;  %v9784_v21 = vpop.f32.mrb[30].mxu1  ;;  %9795 = vst [vmem:[%s11271_s21] sm:$0xff] %v9791_v36 }
 0x881   : > { %v9793_v26 = vadd.f32 %v9789_v20, %v18171_v1  ;;  %v9785_v55 = vpop.f32.mrb[31].mxu1  ;;  %9796 = vst [vmem:[%s11271_s21 + $0x8] sm:$0xff] %v9792_v53 }
 0x882   : > { %v9794_v39 = vadd.f32 %v9790_v49, %v18172_v13 }
 0x883   : > { %9797 = vst [vmem:[%s11271_s21 + $0x10] sm:$0xff] %v9793_v26 }
 0x884   : > { %9798 = vst [vmem:[%s11271_s21 + $0x18] sm:$0xff] %v9794_v39 }
 0x885 PF: > { %s13_s12 = sadd.s32 1, %s11214_s12  }
 0x886   : > { %p10_p5 = scmp.ge.s32.totalorder %s13_s12, 4  }
 0x888   :  { %12 = sbr.rel (!%p10_p5) target bundleno = 1 (0x1), region = 84 }

</bundles_post_ra>
